<compile_context>
chip_gen: v7x
topology: tpu7x:2x2x1
jax: 0.10.0
libtpu: 0.0.40
codegen_flags: <defaults>
</compile_context>

<pallas_src>
import functools

import jax
import jax.numpy as jnp
from jax.experimental import pallas as pl
from jax.experimental.pallas import tpu as pltpu

_PARALLEL = pltpu.CompilerParams(dimension_semantics=("parallel",))


# --------------------------------------------------------------------------
# Row-tiling policy: never pad, prefer >=2 row blocks when work is non-trivial
# --------------------------------------------------------------------------
def _row_tile(M):
    if M < 128:
        return M                       # tiny: single block covering all rows
    half = M // 2
    if M % 2 == 0 and half % 8 == 0 and half <= 256:
        return half                    # exactly 2 row blocks
    for tm in (256, 128, 64, 32, 16, 8):
        if M % tm == 0:
            return tm
    return M                           # fallback: full-extent block (legal)


# --------------------------------------------------------------------------
# Pallas kernels
# --------------------------------------------------------------------------
def _mm_act_kernel(x_ref, w_ref, b_ref, o_ref, *, act):
    """out = act(x @ w + b); bf16 MXU operands, f32 epilogue."""
    y = jnp.dot(x_ref[...].astype(jnp.bfloat16),
                w_ref[...].astype(jnp.bfloat16),
                preferred_element_type=jnp.float32) + b_ref[...]
    if act == "relu":
        y = jnp.maximum(y, 0.0)
    elif act == "hardswish":
        y = y * jnp.clip(y + 3.0, 0.0, 6.0) * (1.0 / 6.0)
    elif act == "sigmoid":
        y = jax.nn.sigmoid(y)
    o_ref[...] = y


def _tf_kernel(a_ref, b_ref, w1_ref, w2_ref, bias_ref, ao_ref, bo_ref, mix_ref):
    """Time_Fusion_and_Enhance_Encoder stand-in, fully fused:
       mix = relu(A @ W1 + B @ W2 + b); outputs A+mix, B+mix, mix."""
    a = a_ref[...]
    b = b_ref[...]
    mix = (jnp.dot(a.astype(jnp.bfloat16), w1_ref[...].astype(jnp.bfloat16),
                   preferred_element_type=jnp.float32)
           + jnp.dot(b.astype(jnp.bfloat16), w2_ref[...].astype(jnp.bfloat16),
                     preferred_element_type=jnp.float32)
           + bias_ref[...])
    mix = jnp.maximum(mix, 0.0)
    ao_ref[...] = a + mix
    bo_ref[...] = b + mix
    mix_ref[...] = mix


def _mix2_kernel(a_ref, b_ref, w1_ref, w2_ref, bias_ref, o_ref):
    """Final Time_Fusion stand-in: mix = relu(A @ W1 + B @ W2 + b)."""
    mix = (jnp.dot(a_ref[...].astype(jnp.bfloat16),
                   w1_ref[...].astype(jnp.bfloat16),
                   preferred_element_type=jnp.float32)
           + jnp.dot(b_ref[...].astype(jnp.bfloat16),
                     w2_ref[...].astype(jnp.bfloat16),
                     preferred_element_type=jnp.float32)
           + bias_ref[...])
    o_ref[...] = jnp.maximum(mix, 0.0)


def _cnf_kernel(mc_ref, mn_ref, aw_ref, ab_ref, rw_ref, rb_ref,
                feat_ref, red_ref):
    """Center_Neighborhood_Fusion stand-in fused with the MSA 1-channel
       reduction of its output (saves the separate N=1 matmul launches).
       att computed on the VPU/XLU: sigmoid(sum(mix_n * w, -1) + b)."""
    mc = mc_ref[...]
    mn = mn_ref[...]
    att = jax.nn.sigmoid(
        jnp.sum(mn * aw_ref[...], axis=-1, keepdims=True) + ab_ref[...])
    feat = mc * att + mc                      # same semantics as before
    feat_ref[...] = feat
    red_ref[...] = jnp.maximum(
        jnp.sum(feat * rw_ref[...], axis=-1, keepdims=True) + rb_ref[...], 0.0)


def _mdsa_kernel(up_ref, skip_ref, aw_ref, ab_ref, w_ref, b_ref, o_ref):
    """Up_and_Deep_Supervision_Attention stand-in, fully fused:
       relu((up * sigmoid(skip . w_att + b_att) + skip) @ W + b)."""
    up = up_ref[...]
    skip = skip_ref[...]
    att = jax.nn.sigmoid(
        jnp.sum(skip * aw_ref[...], axis=-1, keepdims=True) + ab_ref[...])
    fused = up * att + skip
    y = jnp.dot(fused.astype(jnp.bfloat16), w_ref[...].astype(jnp.bfloat16),
                preferred_element_type=jnp.float32) + b_ref[...]
    o_ref[...] = jnp.maximum(y, 0.0)


def _msa_kernel(up_ref, rrest_ref, pw_ref, pb_ref, mw0_ref, mwr_ref, mb_ref,
                o_ref):
    """Predicted_Map_for_Main_Path + Multi_Scale_Aggregation + softmax fused.
       r0 = relu(up . pw + pb) (pred conv with its MSA reduction pre-folded),
       logits = r0 * mw0 + r_rest @ mwr + mb, out = softmax(logits)."""
    up = up_ref[...]
    r0 = jnp.maximum(
        jnp.sum(up * pw_ref[...], axis=-1, keepdims=True) + pb_ref[...], 0.0)
    logits = (r0 * mw0_ref[...]
              + jnp.dot(rrest_ref[...], mwr_ref[...],
                        preferred_element_type=jnp.float32)
              + mb_ref[...])
    m = jnp.max(logits, axis=-1, keepdims=True)
    e = jnp.exp(logits - m)
    o_ref[...] = e / jnp.sum(e, axis=-1, keepdims=True)


# --------------------------------------------------------------------------
# Wrappers
# --------------------------------------------------------------------------
def matmul_act(x, w, b, act="none"):
    """(M,K) @ (K,N) + b with fused activation, row-tiled on the MXU."""
    M, K = x.shape
    N = w.shape[1]
    tm = _row_tile(M)
    return pl.pallas_call(
        functools.partial(_mm_act_kernel, act=act),
        out_shape=jax.ShapeDtypeStruct((M, N), jnp.float32),
        grid=(M // tm,),
        in_specs=[
            pl.BlockSpec((tm, K), lambda i: (i, 0)),
            pl.BlockSpec((K, N), lambda i: (0, 0)),
            pl.BlockSpec((1, N), lambda i: (0, 0)),
        ],
        out_specs=pl.BlockSpec((tm, N), lambda i: (i, 0)),
        compiler_params=_PARALLEL,
    )(x, w, b.reshape(1, N))


def tf_fuse(A, B, w, b):
    """Fused time-fusion: mix = relu(A@W1 + B@W2 + b); returns A+mix, B+mix, mix."""
    shape = A.shape
    C = shape[-1]
    M = A.size // C
    w1, w2 = w[:C], w[C:]
    tm = _row_tile(M)
    row = pl.BlockSpec((tm, C), lambda i: (i, 0))
    ao, bo, mix = pl.pallas_call(
        _tf_kernel,
        out_shape=(jax.ShapeDtypeStruct((M, C), jnp.float32),) * 3,
        grid=(M // tm,),
        in_specs=[
            row, row,
            pl.BlockSpec((C, C), lambda i: (0, 0)),
            pl.BlockSpec((C, C), lambda i: (0, 0)),
            pl.BlockSpec((1, C), lambda i: (0, 0)),
        ],
        out_specs=(row, row, row),
        compiler_params=_PARALLEL,
    )(A.reshape(M, C), B.reshape(M, C), w1, w2, b.reshape(1, C))
    return ao.reshape(shape), bo.reshape(shape), mix.reshape(shape)


def tf_mix(A, B, w, b):
    """Final Time_Fusion: relu(A@W1 + B@W2 + b) only (no residual outputs)."""
    shape = A.shape
    C = shape[-1]
    M = A.size // C
    w1, w2 = w[:C], w[C:]
    tm = _row_tile(M)
    row = pl.BlockSpec((tm, C), lambda i: (i, 0))
    mix = pl.pallas_call(
        _mix2_kernel,
        out_shape=jax.ShapeDtypeStruct((M, C), jnp.float32),
        grid=(M // tm,),
        in_specs=[
            row, row,
            pl.BlockSpec((C, C), lambda i: (0, 0)),
            pl.BlockSpec((C, C), lambda i: (0, 0)),
            pl.BlockSpec((1, C), lambda i: (0, 0)),
        ],
        out_specs=row,
        compiler_params=_PARALLEL,
    )(A.reshape(M, C), B.reshape(M, C), w1, w2, b.reshape(1, C))
    return mix.reshape(shape)


def cnf_fuse(mix_c, mix_n, att_w, att_b, red_w, red_b):
    """Fused CNF gate + per-scale MSA 1-channel reduction of its output."""
    shape = mix_c.shape
    C = shape[-1]
    M = mix_c.size // C
    tm = _row_tile(M)
    row = pl.BlockSpec((tm, C), lambda i: (i, 0))
    vec = pl.BlockSpec((1, C), lambda i: (0, 0))
    scl = pl.BlockSpec((1, 1), lambda i: (0, 0))
    feat, red = pl.pallas_call(
        _cnf_kernel,
        out_shape=(jax.ShapeDtypeStruct((M, C), jnp.float32),
                   jax.ShapeDtypeStruct((M, 1), jnp.float32)),
        grid=(M // tm,),
        in_specs=[row, row, vec, scl, vec, scl],
        out_specs=(row, pl.BlockSpec((tm, 1), lambda i: (i, 0))),
        compiler_params=_PARALLEL,
    )(mix_c.reshape(M, C), mix_n.reshape(M, C),
      att_w.reshape(1, C), att_b.reshape(1, 1),
      red_w.reshape(1, C), red_b.reshape(1, 1))
    return feat.reshape(shape), red.reshape(shape[:-1] + (1,))


def upsample_nearest(x, factor):
    # TODO(synk): fold nearest upsampling into consumer index_maps instead of
    #             materializing with jnp.repeat (tensors here are tiny).
    if factor == 1:
        return x
    return jnp.repeat(jnp.repeat(x, factor, axis=1), factor, axis=2)


def mdsa(upping, skip, att_w, att_b, w, b):
    """Fused Up_and_Deep_Supervision_Attention (gate + 1x1 conv + relu)."""
    factor = skip.shape[1] // upping.shape[1]
    up = upsample_nearest(upping, factor)
    shape = skip.shape
    Ci = shape[-1]
    Co = w.shape[-1]
    M = skip.size // Ci
    tm = _row_tile(M)
    out = pl.pallas_call(
        _mdsa_kernel,
        out_shape=jax.ShapeDtypeStruct((M, Co), jnp.float32),
        grid=(M // tm,),
        in_specs=[
            pl.BlockSpec((tm, Ci), lambda i: (i, 0)),
            pl.BlockSpec((tm, Ci), lambda i: (i, 0)),
            pl.BlockSpec((1, Ci), lambda i: (0, 0)),
            pl.BlockSpec((1, 1), lambda i: (0, 0)),
            pl.BlockSpec((Ci, Co), lambda i: (0, 0)),
            pl.BlockSpec((1, Co), lambda i: (0, 0)),
        ],
        out_specs=pl.BlockSpec((tm, Co), lambda i: (i, 0)),
        compiler_params=_PARALLEL,
    )(up.reshape(M, Ci), skip.reshape(M, Ci),
      att_w.reshape(1, Ci), att_b.reshape(1, 1), w, b.reshape(1, Co))
    return out.reshape(shape[:-1] + (Co,))


def msa_final(upping, r_rest, pred_w, pred_b, mix_w, mix_b):
    """Fused pred-map + multi-scale mix + softmax at target resolution."""
    shape = upping.shape
    C = shape[-1]
    M = upping.size // C
    R = r_rest.shape[-1]
    O = mix_w.shape[-1]
    tm = _row_tile(M)
    out = pl.pallas_call(
        _msa_kernel,
        out_shape=jax.ShapeDtypeStruct((M, O), jnp.float32),
        grid=(M // tm,),
        in_specs=[
            pl.BlockSpec((tm, C), lambda i: (i, 0)),
            pl.BlockSpec((tm, R), lambda i: (i, 0)),
            pl.BlockSpec((1, C), lambda i: (0, 0)),
            pl.BlockSpec((1, 1), lambda i: (0, 0)),
            pl.BlockSpec((1, O), lambda i: (0, 0)),
            pl.BlockSpec((R, O), lambda i: (0, 0)),
            pl.BlockSpec((1, O), lambda i: (0, 0)),
        ],
        out_specs=pl.BlockSpec((tm, O), lambda i: (i, 0)),
        compiler_params=_PARALLEL,
    )(upping.reshape(M, C), r_rest.reshape(M, R),
      pred_w.reshape(1, C), pred_b.reshape(1, 1),
      mix_w[0:1, :], mix_w[1:, :], mix_b.reshape(1, O))
    return out.reshape(shape[:-1] + (O,))


# --------------------------------------------------------------------------
# Conv (im2col glue in JAX, matmul in Pallas)
# --------------------------------------------------------------------------
def conv2d_act(x, w, b, *, ksize=1, stride=1, pad=0, act="none"):
    """x: (N,H,W,Cin) NHWC.  w: (ksize*ksize*Cin, Cout)."""
    N, H, W, Cin = x.shape
    if ksize == 1 and stride == 1 and pad == 0:
        cols = x.reshape(N * H * W, Cin)
        Ho, Wo = H, W
    else:
        xp = jnp.pad(x, ((0, 0), (pad, pad), (pad, pad), (0, 0)))
        Hp, Wp = xp.shape[1], xp.shape[2]
        Ho = (Hp - ksize) // stride + 1
        Wo = (Wp - ksize) // stride + 1
        patches = []
        for di in range(ksize):
            for dj in range(ksize):
                patches.append(
                    xp[:, di:di + Ho * stride:stride, dj:dj + Wo * stride:stride, :]
                )
        # TODO(synk): replace XLA im2col with an in-kernel halo 9-tap
        #             accumulation to avoid the 9x HBM expansion.
        cols = jnp.concatenate(patches, axis=-1).reshape(
            N * Ho * Wo, ksize * ksize * Cin
        )
    y = matmul_act(cols, w, b, act)
    return y.reshape(N, Ho, Wo, -1)


# --------------------------------------------------------------------------
# Parameter init (deterministic, synthetic; MXU weights stored in bf16)
# --------------------------------------------------------------------------
CHANS = [16, 24, 40, 80]
MDSA_DIMS = [(80, 40), (40, 24), (24, 16), (16, 16)]
MSA_IN = [1, 16, 24, 40, 80]


def init_params(key, in_dim=3, out_dim=2):
    p = {}
    keys = iter(jax.random.split(key, 128))

    def nrm(shape, scale=0.1, dtype=jnp.float32):
        return (scale * jax.random.normal(next(keys), shape, jnp.float32)
                ).astype(dtype)

    def zeros(n):
        return jnp.zeros((n,), jnp.float32)

    bf16 = jnp.bfloat16
    # two backbone branches (center / neighbor): 4 stages of 3x3 s2 conv
    for branch in ("bb_c", "bb_n"):
        cin = in_dim
        for s, cout in enumerate(CHANS):
            p[f"{branch}_w{s}"] = nrm((9 * cin, cout), dtype=bf16)
            p[f"{branch}_b{s}"] = zeros(cout)
            cin = cout
    # Time_Fusion_and_Enhance_Encoder stand-ins (center + neighbor)
    for s, c in enumerate(CHANS):
        p[f"tf_c_w{s}"] = nrm((2 * c, c), dtype=bf16); p[f"tf_c_b{s}"] = zeros(c)
        p[f"tf_n_w{s}"] = nrm((2 * c, c), dtype=bf16); p[f"tf_n_b{s}"] = zeros(c)
    # final Time_Fusion(80, 80)
    p["tf_final_w"] = nrm((160, 80), dtype=bf16); p["tf_final_b"] = zeros(80)
    # Center_Neighborhood_Fusion(C, 1): attention vector C->1
    for s, c in enumerate(CHANS):
        p[f"cnf_w{s}"] = nrm((c, 1)); p[f"cnf_b{s}"] = zeros(1)
    # Up_and_Deep_Supervision_Attention(Cin, Cout)
    for s, (ci, co) in enumerate(MDSA_DIMS):
        p[f"mdsa_att_w{s}"] = nrm((ci, 1)); p[f"mdsa_att_b{s}"] = zeros(1)
        p[f"mdsa_w{s}"] = nrm((ci, co), dtype=bf16); p[f"mdsa_b{s}"] = zeros(co)
    # Predicted_Map_for_Main_Path(16, 1)
    p["pred_w"] = nrm((16, 1)); p["pred_b"] = zeros(1)
    # Multi_Scale_Aggregation(5, out_dim)
    for s, c in enumerate(MSA_IN):
        p[f"msa_red_w{s}"] = nrm((c, 1)); p[f"msa_red_b{s}"] = zeros(1)
    p["msa_mix_w"] = nrm((5, out_dim)); p["msa_mix_b"] = zeros(out_dim)
    return p


# --------------------------------------------------------------------------
# INSINet forward
# --------------------------------------------------------------------------
def insinet_forward(params, A, B, A_n, B_n):
    to_nhwc = lambda x: jnp.transpose(x, (0, 2, 3, 1)).astype(jnp.float32)
    A, B, A_n, B_n = map(to_nhwc, (A, B, A_n, B_n))
    n = A.shape[0]

    # ----- encoder -----
    features, reduced = [], []
    for s in range(4):
        # shared-weight backbone conv: batch A with B into one matmul call
        AB = conv2d_act(jnp.concatenate([A, B], axis=0),
                        params[f"bb_c_w{s}"], params[f"bb_c_b{s}"],
                        ksize=3, stride=2, pad=1, act="hardswish")
        A, B = AB[:n], AB[n:]
        A, B, mix = tf_fuse(A, B, params[f"tf_c_w{s}"], params[f"tf_c_b{s}"])

        ABn = conv2d_act(jnp.concatenate([A_n, B_n], axis=0),
                         params[f"bb_n_w{s}"], params[f"bb_n_b{s}"],
                         ksize=3, stride=2, pad=1, act="hardswish")
        A_n, B_n = ABn[:n], ABn[n:]
        A_n, B_n, mix_n = tf_fuse(A_n, B_n,
                                  params[f"tf_n_w{s}"], params[f"tf_n_b{s}"])

        # CNF gate + the per-scale MSA reduction fused in one kernel
        feat, red = cnf_fuse(mix, mix_n,
                             params[f"cnf_w{s}"], params[f"cnf_b{s}"],
                             params[f"msa_red_w{s + 1}"],
                             params[f"msa_red_b{s + 1}"])
        features.append(feat)
        reduced.append(red)

    features.append(tf_mix(A, B, params["tf_final_w"], params["tf_final_b"]))

    # ----- decoder -----
    upping = features[-1]
    for i, j in enumerate(range(-2, -6, -1)):
        upping = mdsa(upping, features[j],
                      params[f"mdsa_att_w{i}"], params[f"mdsa_att_b{i}"],
                      params[f"mdsa_w{i}"], params[f"mdsa_b{i}"])

    # ----- multi-scale aggregation + softmax (single fused kernel) -----
    Ht = upping.shape[1]
    ups = [upsample_nearest(r, Ht // r.shape[1]) for r in reduced]
    r_rest = jnp.concatenate(ups, axis=-1)            # (N, Ht, Wt, 4), tiny

    # fold pred conv (16->1) with its MSA reduction (1->1) — both linear
    rw0 = params["msa_red_w0"][0, 0]
    pred_w = params["pred_w"][:, 0] * rw0                       # (16,)
    pred_b = params["pred_b"] * rw0 + params["msa_red_b0"]      # (1,)

    prob = msa_final(upping, r_rest, pred_w, pred_b,
                     params["msa_mix_w"], params["msa_mix_b"])
    return jnp.transpose(prob, (0, 3, 1, 2))          # back to NCHW


# --------------------------------------------------------------------------
if __name__ == "__main__":
    key = jax.random.PRNGKey(0)
    kp, ka, kb, kan, kbn = jax.random.split(key, 5)

    params = init_params(kp, in_dim=3, out_dim=2)

    shape = (2, 3, 32, 32)  # NCHW, like the PyTorch module's inputs
    A = jax.random.normal(ka, shape, jnp.float32)
    B = jax.random.normal(kb, shape, jnp.float32)
    A_n = jax.random.normal(kan, shape, jnp.float32)
    B_n = jax.random.normal(kbn, shape, jnp.float32)

    fwd = jax.jit(insinet_forward)
    out = jax.block_until_ready(fwd(params, A, B, A_n, B_n))

    assert out.shape == (2, 2, 16, 16), out.shape
    # softmax over channel dim must sum to one
    s = jnp.sum(out, axis=1)
    assert bool(jnp.allclose(s, 1.0, atol=1e-4))
    print("KERNEL_OK")
</pallas_src>

<mosaic_0001>
module attributes {stable_mosaic.version = 11 : i64} {
  func.func @_mm_act_kernel(%arg0: i32, %arg1: memref<256x27xf32, #tpu.memory_space<vmem>>, %arg2: memref<27x16xbf16, #tpu.memory_space<vmem>>, %arg3: memref<1x16xf32, #tpu.memory_space<vmem>>, %arg4: memref<256x16xf32, #tpu.memory_space<vmem>>) attributes {dimension_semantics = [#tpu.dimension_semantics<parallel>], iteration_bounds = array<i64: 4>, scalar_prefetch = 0 : i64, scratch_operands = 0 : i64, tpu.core_type = #tpu.core_type<tc>, window_params = [{transform_indices = @transform_0, window_bounds = array<i64: 256, 27>}, {pipeline_mode = #tpu.pipeline_mode<synchronous>, transform_indices = @transform_1, window_bounds = array<i64: 27, 16>}, {pipeline_mode = #tpu.pipeline_mode<synchronous>, transform_indices = @transform_2, window_bounds = array<i64: 1, 16>}, {transform_indices = @transform_3, window_bounds = array<i64: 256, 16>}]} {
    %c0 = arith.constant 0 : index
    %c0_0 = arith.constant 0 : index
    %0 = vector.load %arg1[%c0, %c0_0] : memref<256x27xf32, #tpu.memory_space<vmem>>, vector<256x27xf32>
    %1 = arith.truncf %0 : vector<256x27xf32> to vector<256x27xbf16>
    %c0_1 = arith.constant 0 : index
    %c0_2 = arith.constant 0 : index
    %2 = vector.load %arg2[%c0_1, %c0_2] : memref<27x16xbf16, #tpu.memory_space<vmem>>, vector<27x16xbf16>
    %cst = arith.constant dense<0.000000e+00> : vector<256x16xf32>
    %3 = tpu.matmul %1, %2, %cst {dimension_numbers = #tpu.dot_dimension_numbers<[1], [0], [0], [1], [0, 0, 1, 1], [], []>} : vector<256x27xbf16>, vector<27x16xbf16>, vector<256x16xf32> -> vector<256x16xf32>
    %c0_3 = arith.constant 0 : index
    %c0_4 = arith.constant 0 : index
    %4 = vector.load %arg3[%c0_3, %c0_4] : memref<1x16xf32, #tpu.memory_space<vmem>>, vector<1x16xf32>
    %5 = vector.broadcast %4 : vector<1x16xf32> to vector<256x16xf32>
    %6 = arith.addf %3, %5 : vector<256x16xf32>
    %cst_5 = arith.constant 3.000000e+00 : f32
    %7 = vector.broadcast %cst_5 : f32 to vector<256x16xf32>
    %8 = arith.addf %6, %7 : vector<256x16xf32>
    %cst_6 = arith.constant 0.000000e+00 : f32
    %cst_7 = arith.constant 6.000000e+00 : f32
    %9 = vector.broadcast %cst_6 : f32 to vector<256x16xf32>
    %10 = arith.maximumf %9, %8 : vector<256x16xf32>
    %11 = vector.broadcast %cst_7 : f32 to vector<256x16xf32>
    %12 = arith.minimumf %11, %10 : vector<256x16xf32>
    %13 = arith.mulf %6, %12 : vector<256x16xf32>
    %cst_8 = arith.constant 0.166666672 : f32
    %14 = vector.broadcast %cst_8 : f32 to vector<256x16xf32>
    %15 = arith.mulf %13, %14 : vector<256x16xf32>
    %c0_9 = arith.constant 0 : index
    %c0_10 = arith.constant 0 : index
    %16 = vector.load %arg4[%c0_9, %c0_10] : memref<256x16xf32, #tpu.memory_space<vmem>>, vector<256x16xf32>
    tpu.vector_store %arg4[%c0_9, %c0_10], %15 {strides = array<i32>} : memref<256x16xf32, #tpu.memory_space<vmem>>, vector<256x16xf32>,
    return
  }
  func.func @transform_0(%arg0: i32) -> (i32, i32) {
    %c0_i32 = arith.constant 0 : i32
    %c0_i32_0 = arith.constant 0 : i32
    return %arg0, %c0_i32 : i32, i32
  }
  func.func @transform_1(%arg0: i32) -> (i32, i32) {
    %c0_i32 = arith.constant 0 : i32
    %c0_i32_0 = arith.constant 0 : i32
    %c0_i32_1 = arith.constant 0 : i32
    return %c0_i32, %c0_i32_0 : i32, i32
  }
  func.func @transform_2(%arg0: i32) -> (i32, i32) {
    %c0_i32 = arith.constant 0 : i32
    %c0_i32_0 = arith.constant 0 : i32
    %c0_i32_1 = arith.constant 0 : i32
    return %c0_i32, %c0_i32_0 : i32, i32
  }
  func.func @transform_3(%arg0: i32) -> (i32, i32) {
    %c0_i32 = arith.constant 0 : i32
    %c0_i32_0 = arith.constant 0 : i32
    return %arg0, %c0_i32 : i32, i32
  }
}

module attributes {stable_mosaic.version = 11 : i64} {
  func.func @_tf_kernel(%arg0: i32, %arg1: memref<256x16xf32, #tpu.memory_space<vmem>>, %arg2: memref<256x16xf32, #tpu.memory_space<vmem>>, %arg3: memref<16x16xbf16, #tpu.memory_space<vmem>>, %arg4: memref<16x16xbf16, #tpu.memory_space<vmem>>, %arg5: memref<1x16xf32, #tpu.memory_space<vmem>>, %arg6: memref<256x16xf32, #tpu.memory_space<vmem>>, %arg7: memref<256x16xf32, #tpu.memory_space<vmem>>, %arg8: memref<256x16xf32, #tpu.memory_space<vmem>>) attributes {dimension_semantics = [#tpu.dimension_semantics<parallel>], iteration_bounds = array<i64: 2>, scalar_prefetch = 0 : i64, scratch_operands = 0 : i64, tpu.core_type = #tpu.core_type<tc>, window_params = [{transform_indices = @transform_0, window_bounds = array<i64: 256, 16>}, {transform_indices = @transform_1, window_bounds = array<i64: 256, 16>}, {pipeline_mode = #tpu.pipeline_mode<synchronous>, transform_indices = @transform_2, window_bounds = array<i64: 16, 16>}, {pipeline_mode = #tpu.pipeline_mode<synchronous>, transform_indices = @transform_3, window_bounds = array<i64: 16, 16>}, {pipeline_mode = #tpu.pipeline_mode<synchronous>, transform_indices = @transform_4, window_bounds = array<i64: 1, 16>}, {transform_indices = @transform_5, window_bounds = array<i64: 256, 16>}, {transform_indices = @transform_6, window_bounds = array<i64: 256, 16>}, {transform_indices = @transform_7, window_bounds = array<i64: 256, 16>}]} {
    %c0 = arith.constant 0 : index
    %c0_0 = arith.constant 0 : index
    %0 = vector.load %arg1[%c0, %c0_0] : memref<256x16xf32, #tpu.memory_space<vmem>>, vector<256x16xf32>
    %c0_1 = arith.constant 0 : index
    %c0_2 = arith.constant 0 : index
    %1 = vector.load %arg2[%c0_1, %c0_2] : memref<256x16xf32, #tpu.memory_space<vmem>>, vector<256x16xf32>
    %2 = arith.truncf %0 : vector<256x16xf32> to vector<256x16xbf16>
    %c0_3 = arith.constant 0 : index
    %c0_4 = arith.constant 0 : index
    %3 = vector.load %arg3[%c0_3, %c0_4] : memref<16x16xbf16, #tpu.memory_space<vmem>>, vector<16x16xbf16>
    %cst = arith.constant dense<0.000000e+00> : vector<256x16xf32>
    %4 = tpu.matmul %2, %3, %cst {dimension_numbers = #tpu.dot_dimension_numbers<[1], [0], [0], [1], [0, 0, 1, 1], [], []>} : vector<256x16xbf16>, vector<16x16xbf16>, vector<256x16xf32> -> vector<256x16xf32>
    %5 = arith.truncf %1 : vector<256x16xf32> to vector<256x16xbf16>
    %c0_5 = arith.constant 0 : index
    %c0_6 = arith.constant 0 : index
    %6 = vector.load %arg4[%c0_5, %c0_6] : memref<16x16xbf16, #tpu.memory_space<vmem>>, vector<16x16xbf16>
    %cst_7 = arith.constant dense<0.000000e+00> : vector<256x16xf32>
    %7 = tpu.matmul %5, %6, %cst_7 {dimension_numbers = #tpu.dot_dimension_numbers<[1], [0], [0], [1], [0, 0, 1, 1], [], []>} : vector<256x16xbf16>, vector<16x16xbf16>, vector<256x16xf32> -> vector<256x16xf32>
    %8 = arith.addf %4, %7 : vector<256x16xf32>
    %c0_8 = arith.constant 0 : index
    %c0_9 = arith.constant 0 : index
    %9 = vector.load %arg5[%c0_8, %c0_9] : memref<1x16xf32, #tpu.memory_space<vmem>>, vector<1x16xf32>
    %10 = vector.broadcast %9 : vector<1x16xf32> to vector<256x16xf32>
    %11 = arith.addf %8, %10 : vector<256x16xf32>
    %cst_10 = arith.constant 0.000000e+00 : f32
    %12 = vector.broadcast %cst_10 : f32 to vector<256x16xf32>
    %13 = arith.maximumf %11, %12 : vector<256x16xf32>
    %14 = arith.addf %0, %13 : vector<256x16xf32>
    %c0_11 = arith.constant 0 : index
    %c0_12 = arith.constant 0 : index
    %15 = vector.load %arg6[%c0_11, %c0_12] : memref<256x16xf32, #tpu.memory_space<vmem>>, vector<256x16xf32>
    tpu.vector_store %arg6[%c0_11, %c0_12], %14 {strides = array<i32>} : memref<256x16xf32, #tpu.memory_space<vmem>>, vector<256x16xf32>,
    %16 = arith.addf %1, %13 : vector<256x16xf32>
    %c0_13 = arith.constant 0 : index
    %c0_14 = arith.constant 0 : index
    %17 = vector.load %arg7[%c0_13, %c0_14] : memref<256x16xf32, #tpu.memory_space<vmem>>, vector<256x16xf32>
    tpu.vector_store %arg7[%c0_13, %c0_14], %16 {strides = array<i32>} : memref<256x16xf32, #tpu.memory_space<vmem>>, vector<256x16xf32>,
    %c0_15 = arith.constant 0 : index
    %c0_16 = arith.constant 0 : index
    %18 = vector.load %arg8[%c0_15, %c0_16] : memref<256x16xf32, #tpu.memory_space<vmem>>, vector<256x16xf32>
    tpu.vector_store %arg8[%c0_15, %c0_16], %13 {strides = array<i32>} : memref<256x16xf32, #tpu.memory_space<vmem>>, vector<256x16xf32>,
    return
  }
  func.func @transform_0(%arg0: i32) -> (i32, i32) {
    %c0_i32 = arith.constant 0 : i32
    %c0_i32_0 = arith.constant 0 : i32
    return %arg0, %c0_i32 : i32, i32
  }
  func.func @transform_1(%arg0: i32) -> (i32, i32) {
    %c0_i32 = arith.constant 0 : i32
    %c0_i32_0 = arith.constant 0 : i32
    return %arg0, %c0_i32 : i32, i32
  }
  func.func @transform_2(%arg0: i32) -> (i32, i32) {
    %c0_i32 = arith.constant 0 : i32
    %c0_i32_0 = arith.constant 0 : i32
    %c0_i32_1 = arith.constant 0 : i32
    return %c0_i32, %c0_i32_0 : i32, i32
  }
  func.func @transform_3(%arg0: i32) -> (i32, i32) {
    %c0_i32 = arith.constant 0 : i32
    %c0_i32_0 = arith.constant 0 : i32
    %c0_i32_1 = arith.constant 0 : i32
    return %c0_i32, %c0_i32_0 : i32, i32
  }
  func.func @transform_4(%arg0: i32) -> (i32, i32) {
    %c0_i32 = arith.constant 0 : i32
    %c0_i32_0 = arith.constant 0 : i32
    %c0_i32_1 = arith.constant 0 : i32
    return %c0_i32, %c0_i32_0 : i32, i32
  }
  func.func @transform_5(%arg0: i32) -> (i32, i32) {
    %c0_i32 = arith.constant 0 : i32
    %c0_i32_0 = arith.constant 0 : i32
    return %arg0, %c0_i32 : i32, i32
  }
  func.func @transform_6(%arg0: i32) -> (i32, i32) {
    %c0_i32 = arith.constant 0 : i32
    %c0_i32_0 = arith.constant 0 : i32
    return %arg0, %c0_i32 : i32, i32
  }
  func.func @transform_7(%arg0: i32) -> (i32, i32) {
    %c0_i32 = arith.constant 0 : i32
    %c0_i32_0 = arith.constant 0 : i32
    return %arg0, %c0_i32 : i32, i32
  }
}

module attributes {stable_mosaic.version = 11 : i64} {
  func.func @_mm_act_kernel(%arg0: i32, %arg1: memref<128x144xf32, #tpu.memory_space<vmem>>, %arg2: memref<144x24xbf16, #tpu.memory_space<vmem>>, %arg3: memref<1x24xf32, #tpu.memory_space<vmem>>, %arg4: memref<128x24xf32, #tpu.memory_space<vmem>>) attributes {dimension_semantics = [#tpu.dimension_semantics<parallel>], iteration_bounds = array<i64: 2>, scalar_prefetch = 0 : i64, scratch_operands = 0 : i64, tpu.core_type = #tpu.core_type<tc>, window_params = [{transform_indices = @transform_0, window_bounds = array<i64: 128, 144>}, {pipeline_mode = #tpu.pipeline_mode<synchronous>, transform_indices = @transform_1, window_bounds = array<i64: 144, 24>}, {pipeline_mode = #tpu.pipeline_mode<synchronous>, transform_indices = @transform_2, window_bounds = array<i64: 1, 24>}, {transform_indices = @transform_3, window_bounds = array<i64: 128, 24>}]} {
    %c0 = arith.constant 0 : index
    %c0_0 = arith.constant 0 : index
    %0 = vector.load %arg1[%c0, %c0_0] : memref<128x144xf32, #tpu.memory_space<vmem>>, vector<128x144xf32>
    %1 = arith.truncf %0 : vector<128x144xf32> to vector<128x144xbf16>
    %c0_1 = arith.constant 0 : index
    %c0_2 = arith.constant 0 : index
    %2 = vector.load %arg2[%c0_1, %c0_2] : memref<144x24xbf16, #tpu.memory_space<vmem>>, vector<144x24xbf16>
    %cst = arith.constant dense<0.000000e+00> : vector<128x24xf32>
    %3 = tpu.matmul %1, %2, %cst {dimension_numbers = #tpu.dot_dimension_numbers<[1], [0], [0], [1], [0, 0, 1, 1], [], []>} : vector<128x144xbf16>, vector<144x24xbf16>, vector<128x24xf32> -> vector<128x24xf32>
    %c0_3 = arith.constant 0 : index
    %c0_4 = arith.constant 0 : index
    %4 = vector.load %arg3[%c0_3, %c0_4] : memref<1x24xf32, #tpu.memory_space<vmem>>, vector<1x24xf32>
    %5 = vector.broadcast %4 : vector<1x24xf32> to vector<128x24xf32>
    %6 = arith.addf %3, %5 : vector<128x24xf32>
    %cst_5 = arith.constant 3.000000e+00 : f32
    %7 = vector.broadcast %cst_5 : f32 to vector<128x24xf32>
    %8 = arith.addf %6, %7 : vector<128x24xf32>
    %cst_6 = arith.constant 0.000000e+00 : f32
    %cst_7 = arith.constant 6.000000e+00 : f32
    %9 = vector.broadcast %cst_6 : f32 to vector<128x24xf32>
    %10 = arith.maximumf %9, %8 : vector<128x24xf32>
    %11 = vector.broadcast %cst_7 : f32 to vector<128x24xf32>
    %12 = arith.minimumf %11, %10 : vector<128x24xf32>
    %13 = arith.mulf %6, %12 : vector<128x24xf32>
    %cst_8 = arith.constant 0.166666672 : f32
    %14 = vector.broadcast %cst_8 : f32 to vector<128x24xf32>
    %15 = arith.mulf %13, %14 : vector<128x24xf32>
    %c0_9 = arith.constant 0 : index
    %c0_10 = arith.constant 0 : index
    %16 = vector.load %arg4[%c0_9, %c0_10] : memref<128x24xf32, #tpu.memory_space<vmem>>, vector<128x24xf32>
    tpu.vector_store %arg4[%c0_9, %c0_10], %15 {strides = array<i32>} : memref<128x24xf32, #tpu.memory_space<vmem>>, vector<128x24xf32>,
    return
  }
  func.func @transform_0(%arg0: i32) -> (i32, i32) {
    %c0_i32 = arith.constant 0 : i32
    %c0_i32_0 = arith.constant 0 : i32
    return %arg0, %c0_i32 : i32, i32
  }
  func.func @transform_1(%arg0: i32) -> (i32, i32) {
    %c0_i32 = arith.constant 0 : i32
    %c0_i32_0 = arith.constant 0 : i32
    %c0_i32_1 = arith.constant 0 : i32
    return %c0_i32, %c0_i32_0 : i32, i32
  }
  func.func @transform_2(%arg0: i32) -> (i32, i32) {
    %c0_i32 = arith.constant 0 : i32
    %c0_i32_0 = arith.constant 0 : i32
    %c0_i32_1 = arith.constant 0 : i32
    return %c0_i32, %c0_i32_0 : i32, i32
  }
  func.func @transform_3(%arg0: i32) -> (i32, i32) {
    %c0_i32 = arith.constant 0 : i32
    %c0_i32_0 = arith.constant 0 : i32
    return %arg0, %c0_i32 : i32, i32
  }
}

module attributes {stable_mosaic.version = 11 : i64} {
  func.func @_tf_kernel(%arg0: i32, %arg1: memref<64x24xf32, #tpu.memory_space<vmem>>, %arg2: memref<64x24xf32, #tpu.memory_space<vmem>>, %arg3: memref<24x24xbf16, #tpu.memory_space<vmem>>, %arg4: memref<24x24xbf16, #tpu.memory_space<vmem>>, %arg5: memref<1x24xf32, #tpu.memory_space<vmem>>, %arg6: memref<64x24xf32, #tpu.memory_space<vmem>>, %arg7: memref<64x24xf32, #tpu.memory_space<vmem>>, %arg8: memref<64x24xf32, #tpu.memory_space<vmem>>) attributes {dimension_semantics = [#tpu.dimension_semantics<parallel>], iteration_bounds = array<i64: 2>, scalar_prefetch = 0 : i64, scratch_operands = 0 : i64, tpu.core_type = #tpu.core_type<tc>, window_params = [{transform_indices = @transform_0, window_bounds = array<i64: 64, 24>}, {transform_indices = @transform_1, window_bounds = array<i64: 64, 24>}, {pipeline_mode = #tpu.pipeline_mode<synchronous>, transform_indices = @transform_2, window_bounds = array<i64: 24, 24>}, {pipeline_mode = #tpu.pipeline_mode<synchronous>, transform_indices = @transform_3, window_bounds = array<i64: 24, 24>}, {pipeline_mode = #tpu.pipeline_mode<synchronous>, transform_indices = @transform_4, window_bounds = array<i64: 1, 24>}, {transform_indices = @transform_5, window_bounds = array<i64: 64, 24>}, {transform_indices = @transform_6, window_bounds = array<i64: 64, 24>}, {transform_indices = @transform_7, window_bounds = array<i64: 64, 24>}]} {
    %c0 = arith.constant 0 : index
    %c0_0 = arith.constant 0 : index
    %0 = vector.load %arg1[%c0, %c0_0] : memref<64x24xf32, #tpu.memory_space<vmem>>, vector<64x24xf32>
    %c0_1 = arith.constant 0 : index
    %c0_2 = arith.constant 0 : index
    %1 = vector.load %arg2[%c0_1, %c0_2] : memref<64x24xf32, #tpu.memory_space<vmem>>, vector<64x24xf32>
    %2 = arith.truncf %0 : vector<64x24xf32> to vector<64x24xbf16>
    %c0_3 = arith.constant 0 : index
    %c0_4 = arith.constant 0 : index
    %3 = vector.load %arg3[%c0_3, %c0_4] : memref<24x24xbf16, #tpu.memory_space<vmem>>, vector<24x24xbf16>
    %cst = arith.constant dense<0.000000e+00> : vector<64x24xf32>
    %4 = tpu.matmul %2, %3, %cst {dimension_numbers = #tpu.dot_dimension_numbers<[1], [0], [0], [1], [0, 0, 1, 1], [], []>} : vector<64x24xbf16>, vector<24x24xbf16>, vector<64x24xf32> -> vector<64x24xf32>
    %5 = arith.truncf %1 : vector<64x24xf32> to vector<64x24xbf16>
    %c0_5 = arith.constant 0 : index
    %c0_6 = arith.constant 0 : index
    %6 = vector.load %arg4[%c0_5, %c0_6] : memref<24x24xbf16, #tpu.memory_space<vmem>>, vector<24x24xbf16>
    %cst_7 = arith.constant dense<0.000000e+00> : vector<64x24xf32>
    %7 = tpu.matmul %5, %6, %cst_7 {dimension_numbers = #tpu.dot_dimension_numbers<[1], [0], [0], [1], [0, 0, 1, 1], [], []>} : vector<64x24xbf16>, vector<24x24xbf16>, vector<64x24xf32> -> vector<64x24xf32>
    %8 = arith.addf %4, %7 : vector<64x24xf32>
    %c0_8 = arith.constant 0 : index
    %c0_9 = arith.constant 0 : index
    %9 = vector.load %arg5[%c0_8, %c0_9] : memref<1x24xf32, #tpu.memory_space<vmem>>, vector<1x24xf32>
    %10 = vector.broadcast %9 : vector<1x24xf32> to vector<64x24xf32>
    %11 = arith.addf %8, %10 : vector<64x24xf32>
    %cst_10 = arith.constant 0.000000e+00 : f32
    %12 = vector.broadcast %cst_10 : f32 to vector<64x24xf32>
    %13 = arith.maximumf %11, %12 : vector<64x24xf32>
    %14 = arith.addf %0, %13 : vector<64x24xf32>
    %c0_11 = arith.constant 0 : index
    %c0_12 = arith.constant 0 : index
    %15 = vector.load %arg6[%c0_11, %c0_12] : memref<64x24xf32, #tpu.memory_space<vmem>>, vector<64x24xf32>
    tpu.vector_store %arg6[%c0_11, %c0_12], %14 {strides = array<i32>} : memref<64x24xf32, #tpu.memory_space<vmem>>, vector<64x24xf32>,
    %16 = arith.addf %1, %13 : vector<64x24xf32>
    %c0_13 = arith.constant 0 : index
    %c0_14 = arith.constant 0 : index
    %17 = vector.load %arg7[%c0_13, %c0_14] : memref<64x24xf32, #tpu.memory_space<vmem>>, vector<64x24xf32>
    tpu.vector_store %arg7[%c0_13, %c0_14], %16 {strides = array<i32>} : memref<64x24xf32, #tpu.memory_space<vmem>>, vector<64x24xf32>,
    %c0_15 = arith.constant 0 : index
    %c0_16 = arith.constant 0 : index
    %18 = vector.load %arg8[%c0_15, %c0_16] : memref<64x24xf32, #tpu.memory_space<vmem>>, vector<64x24xf32>
    tpu.vector_store %arg8[%c0_15, %c0_16], %13 {strides = array<i32>} : memref<64x24xf32, #tpu.memory_space<vmem>>, vector<64x24xf32>,
    return
  }
  func.func @transform_0(%arg0: i32) -> (i32, i32) {
    %c0_i32 = arith.constant 0 : i32
    %c0_i32_0 = arith.constant 0 : i32
    return %arg0, %c0_i32 : i32, i32
  }
  func.func @transform_1(%arg0: i32) -> (i32, i32) {
    %c0_i32 = arith.constant 0 : i32
    %c0_i32_0 = arith.constant 0 : i32
    return %arg0, %c0_i32 : i32, i32
  }
  func.func @transform_2(%arg0: i32) -> (i32, i32) {
    %c0_i32 = arith.constant 0 : i32
    %c0_i32_0 = arith.constant 0 : i32
    %c0_i32_1 = arith.constant 0 : i32
    return %c0_i32, %c0_i32_0 : i32, i32
  }
  func.func @transform_3(%arg0: i32) -> (i32, i32) {
    %c0_i32 = arith.constant 0 : i32
    %c0_i32_0 = arith.constant 0 : i32
    %c0_i32_1 = arith.constant 0 : i32
    return %c0_i32, %c0_i32_0 : i32, i32
  }
  func.func @transform_4(%arg0: i32) -> (i32, i32) {
    %c0_i32 = arith.constant 0 : i32
    %c0_i32_0 = arith.constant 0 : i32
    %c0_i32_1 = arith.constant 0 : i32
    return %c0_i32, %c0_i32_0 : i32, i32
  }
  func.func @transform_5(%arg0: i32) -> (i32, i32) {
    %c0_i32 = arith.constant 0 : i32
    %c0_i32_0 = arith.constant 0 : i32
    return %arg0, %c0_i32 : i32, i32
  }
  func.func @transform_6(%arg0: i32) -> (i32, i32) {
    %c0_i32 = arith.constant 0 : i32
    %c0_i32_0 = arith.constant 0 : i32
    return %arg0, %c0_i32 : i32, i32
  }
  func.func @transform_7(%arg0: i32) -> (i32, i32) {
    %c0_i32 = arith.constant 0 : i32
    %c0_i32_0 = arith.constant 0 : i32
    return %arg0, %c0_i32 : i32, i32
  }
}

module attributes {stable_mosaic.version = 11 : i64} {
  func.func @_mm_act_kernel(%arg0: i32, %arg1: memref<64x216xf32, #tpu.memory_space<vmem>>, %arg2: memref<216x40xbf16, #tpu.memory_space<vmem>>, %arg3: memref<1x40xf32, #tpu.memory_space<vmem>>, %arg4: memref<64x40xf32, #tpu.memory_space<vmem>>) attributes {dimension_semantics = [#tpu.dimension_semantics<parallel>], iteration_bounds = array<i64: 1>, scalar_prefetch = 0 : i64, scratch_operands = 0 : i64, tpu.core_type = #tpu.core_type<tc>, window_params = [{transform_indices = @transform_0, window_bounds = array<i64: 64, 216>}, {pipeline_mode = #tpu.pipeline_mode<synchronous>, transform_indices = @transform_1, window_bounds = array<i64: 216, 40>}, {pipeline_mode = #tpu.pipeline_mode<synchronous>, transform_indices = @transform_2, window_bounds = array<i64: 1, 40>}, {transform_indices = @transform_3, window_bounds = array<i64: 64, 40>}]} {
    %c0 = arith.constant 0 : index
    %c0_0 = arith.constant 0 : index
    %0 = vector.load %arg1[%c0, %c0_0] : memref<64x216xf32, #tpu.memory_space<vmem>>, vector<64x216xf32>
    %1 = arith.truncf %0 : vector<64x216xf32> to vector<64x216xbf16>
    %c0_1 = arith.constant 0 : index
    %c0_2 = arith.constant 0 : index
    %2 = vector.load %arg2[%c0_1, %c0_2] : memref<216x40xbf16, #tpu.memory_space<vmem>>, vector<216x40xbf16>
    %cst = arith.constant dense<0.000000e+00> : vector<64x40xf32>
    %3 = tpu.matmul %1, %2, %cst {dimension_numbers = #tpu.dot_dimension_numbers<[1], [0], [0], [1], [0, 0, 1, 1], [], []>} : vector<64x216xbf16>, vector<216x40xbf16>, vector<64x40xf32> -> vector<64x40xf32>
    %c0_3 = arith.constant 0 : index
    %c0_4 = arith.constant 0 : index
    %4 = vector.load %arg3[%c0_3, %c0_4] : memref<1x40xf32, #tpu.memory_space<vmem>>, vector<1x40xf32>
    %5 = vector.broadcast %4 : vector<1x40xf32> to vector<64x40xf32>
    %6 = arith.addf %3, %5 : vector<64x40xf32>
    %cst_5 = arith.constant 3.000000e+00 : f32
    %7 = vector.broadcast %cst_5 : f32 to vector<64x40xf32>
    %8 = arith.addf %6, %7 : vector<64x40xf32>
    %cst_6 = arith.constant 0.000000e+00 : f32
    %cst_7 = arith.constant 6.000000e+00 : f32
    %9 = vector.broadcast %cst_6 : f32 to vector<64x40xf32>
    %10 = arith.maximumf %9, %8 : vector<64x40xf32>
    %11 = vector.broadcast %cst_7 : f32 to vector<64x40xf32>
    %12 = arith.minimumf %11, %10 : vector<64x40xf32>
    %13 = arith.mulf %6, %12 : vector<64x40xf32>
    %cst_8 = arith.constant 0.166666672 : f32
    %14 = vector.broadcast %cst_8 : f32 to vector<64x40xf32>
    %15 = arith.mulf %13, %14 : vector<64x40xf32>
    %c0_9 = arith.constant 0 : index
    %c0_10 = arith.constant 0 : index
    %16 = vector.load %arg4[%c0_9, %c0_10] : memref<64x40xf32, #tpu.memory_space<vmem>>, vector<64x40xf32>
    tpu.vector_store %arg4[%c0_9, %c0_10], %15 {strides = array<i32>} : memref<64x40xf32, #tpu.memory_space<vmem>>, vector<64x40xf32>,
    return
  }
  func.func @transform_0(%arg0: i32) -> (i32, i32) {
    %c0_i32 = arith.constant 0 : i32
    %c0_i32_0 = arith.constant 0 : i32
    return %arg0, %c0_i32 : i32, i32
  }
  func.func @transform_1(%arg0: i32) -> (i32, i32) {
    %c0_i32 = arith.constant 0 : i32
    %c0_i32_0 = arith.constant 0 : i32
    %c0_i32_1 = arith.constant 0 : i32
    return %c0_i32, %c0_i32_0 : i32, i32
  }
  func.func @transform_2(%arg0: i32) -> (i32, i32) {
    %c0_i32 = arith.constant 0 : i32
    %c0_i32_0 = arith.constant 0 : i32
    %c0_i32_1 = arith.constant 0 : i32
    return %c0_i32, %c0_i32_0 : i32, i32
  }
  func.func @transform_3(%arg0: i32) -> (i32, i32) {
    %c0_i32 = arith.constant 0 : i32
    %c0_i32_0 = arith.constant 0 : i32
    return %arg0, %c0_i32 : i32, i32
  }
}

module attributes {stable_mosaic.version = 11 : i64} {
  func.func @_tf_kernel(%arg0: i32, %arg1: memref<32x40xf32, #tpu.memory_space<vmem>>, %arg2: memref<32x40xf32, #tpu.memory_space<vmem>>, %arg3: memref<40x40xbf16, #tpu.memory_space<vmem>>, %arg4: memref<40x40xbf16, #tpu.memory_space<vmem>>, %arg5: memref<1x40xf32, #tpu.memory_space<vmem>>, %arg6: memref<32x40xf32, #tpu.memory_space<vmem>>, %arg7: memref<32x40xf32, #tpu.memory_space<vmem>>, %arg8: memref<32x40xf32, #tpu.memory_space<vmem>>) attributes {dimension_semantics = [#tpu.dimension_semantics<parallel>], iteration_bounds = array<i64: 1>, scalar_prefetch = 0 : i64, scratch_operands = 0 : i64, tpu.core_type = #tpu.core_type<tc>, window_params = [{transform_indices = @transform_0, window_bounds = array<i64: 32, 40>}, {transform_indices = @transform_1, window_bounds = array<i64: 32, 40>}, {pipeline_mode = #tpu.pipeline_mode<synchronous>, transform_indices = @transform_2, window_bounds = array<i64: 40, 40>}, {pipeline_mode = #tpu.pipeline_mode<synchronous>, transform_indices = @transform_3, window_bounds = array<i64: 40, 40>}, {pipeline_mode = #tpu.pipeline_mode<synchronous>, transform_indices = @transform_4, window_bounds = array<i64: 1, 40>}, {transform_indices = @transform_5, window_bounds = array<i64: 32, 40>}, {transform_indices = @transform_6, window_bounds = array<i64: 32, 40>}, {transform_indices = @transform_7, window_bounds = array<i64: 32, 40>}]} {
    %c0 = arith.constant 0 : index
    %c0_0 = arith.constant 0 : index
    %0 = vector.load %arg1[%c0, %c0_0] : memref<32x40xf32, #tpu.memory_space<vmem>>, vector<32x40xf32>
    %c0_1 = arith.constant 0 : index
    %c0_2 = arith.constant 0 : index
    %1 = vector.load %arg2[%c0_1, %c0_2] : memref<32x40xf32, #tpu.memory_space<vmem>>, vector<32x40xf32>
    %2 = arith.truncf %0 : vector<32x40xf32> to vector<32x40xbf16>
    %c0_3 = arith.constant 0 : index
    %c0_4 = arith.constant 0 : index
    %3 = vector.load %arg3[%c0_3, %c0_4] : memref<40x40xbf16, #tpu.memory_space<vmem>>, vector<40x40xbf16>
    %cst = arith.constant dense<0.000000e+00> : vector<32x40xf32>
    %4 = tpu.matmul %2, %3, %cst {dimension_numbers = #tpu.dot_dimension_numbers<[1], [0], [0], [1], [0, 0, 1, 1], [], []>} : vector<32x40xbf16>, vector<40x40xbf16>, vector<32x40xf32> -> vector<32x40xf32>
    %5 = arith.truncf %1 : vector<32x40xf32> to vector<32x40xbf16>
    %c0_5 = arith.constant 0 : index
    %c0_6 = arith.constant 0 : index
    %6 = vector.load %arg4[%c0_5, %c0_6] : memref<40x40xbf16, #tpu.memory_space<vmem>>, vector<40x40xbf16>
    %cst_7 = arith.constant dense<0.000000e+00> : vector<32x40xf32>
    %7 = tpu.matmul %5, %6, %cst_7 {dimension_numbers = #tpu.dot_dimension_numbers<[1], [0], [0], [1], [0, 0, 1, 1], [], []>} : vector<32x40xbf16>, vector<40x40xbf16>, vector<32x40xf32> -> vector<32x40xf32>
    %8 = arith.addf %4, %7 : vector<32x40xf32>
    %c0_8 = arith.constant 0 : index
    %c0_9 = arith.constant 0 : index
    %9 = vector.load %arg5[%c0_8, %c0_9] : memref<1x40xf32, #tpu.memory_space<vmem>>, vector<1x40xf32>
    %10 = vector.broadcast %9 : vector<1x40xf32> to vector<32x40xf32>
    %11 = arith.addf %8, %10 : vector<32x40xf32>
    %cst_10 = arith.constant 0.000000e+00 : f32
    %12 = vector.broadcast %cst_10 : f32 to vector<32x40xf32>
    %13 = arith.maximumf %11, %12 : vector<32x40xf32>
    %14 = arith.addf %0, %13 : vector<32x40xf32>
    %c0_11 = arith.constant 0 : index
    %c0_12 = arith.constant 0 : index
    %15 = vector.load %arg6[%c0_11, %c0_12] : memref<32x40xf32, #tpu.memory_space<vmem>>, vector<32x40xf32>
    tpu.vector_store %arg6[%c0_11, %c0_12], %14 {strides = array<i32>} : memref<32x40xf32, #tpu.memory_space<vmem>>, vector<32x40xf32>,
    %16 = arith.addf %1, %13 : vector<32x40xf32>
    %c0_13 = arith.constant 0 : index
    %c0_14 = arith.constant 0 : index
    %17 = vector.load %arg7[%c0_13, %c0_14] : memref<32x40xf32, #tpu.memory_space<vmem>>, vector<32x40xf32>
    tpu.vector_store %arg7[%c0_13, %c0_14], %16 {strides = array<i32>} : memref<32x40xf32, #tpu.memory_space<vmem>>, vector<32x40xf32>,
    %c0_15 = arith.constant 0 : index
    %c0_16 = arith.constant 0 : index
    %18 = vector.load %arg8[%c0_15, %c0_16] : memref<32x40xf32, #tpu.memory_space<vmem>>, vector<32x40xf32>
    tpu.vector_store %arg8[%c0_15, %c0_16], %13 {strides = array<i32>} : memref<32x40xf32, #tpu.memory_space<vmem>>, vector<32x40xf32>,
    return
  }
  func.func @transform_0(%arg0: i32) -> (i32, i32) {
    %c0_i32 = arith.constant 0 : i32
    %c0_i32_0 = arith.constant 0 : i32
    return %arg0, %c0_i32 : i32, i32
  }
  func.func @transform_1(%arg0: i32) -> (i32, i32) {
    %c0_i32 = arith.constant 0 : i32
    %c0_i32_0 = arith.constant 0 : i32
    return %arg0, %c0_i32 : i32, i32
  }
  func.func @transform_2(%arg0: i32) -> (i32, i32) {
    %c0_i32 = arith.constant 0 : i32
    %c0_i32_0 = arith.constant 0 : i32
    %c0_i32_1 = arith.constant 0 : i32
    return %c0_i32, %c0_i32_0 : i32, i32
  }
  func.func @transform_3(%arg0: i32) -> (i32, i32) {
    %c0_i32 = arith.constant 0 : i32
    %c0_i32_0 = arith.constant 0 : i32
    %c0_i32_1 = arith.constant 0 : i32
    return %c0_i32, %c0_i32_0 : i32, i32
  }
  func.func @transform_4(%arg0: i32) -> (i32, i32) {
    %c0_i32 = arith.constant 0 : i32
    %c0_i32_0 = arith.constant 0 : i32
    %c0_i32_1 = arith.constant 0 : i32
    return %c0_i32, %c0_i32_0 : i32, i32
  }
  func.func @transform_5(%arg0: i32) -> (i32, i32) {
    %c0_i32 = arith.constant 0 : i32
    %c0_i32_0 = arith.constant 0 : i32
    return %arg0, %c0_i32 : i32, i32
  }
  func.func @transform_6(%arg0: i32) -> (i32, i32) {
    %c0_i32 = arith.constant 0 : i32
    %c0_i32_0 = arith.constant 0 : i32
    return %arg0, %c0_i32 : i32, i32
  }
  func.func @transform_7(%arg0: i32) -> (i32, i32) {
    %c0_i32 = arith.constant 0 : i32
    %c0_i32_0 = arith.constant 0 : i32
    return %arg0, %c0_i32 : i32, i32
  }
}

module attributes {stable_mosaic.version = 11 : i64} {
  func.func @_mm_act_kernel(%arg0: i32, %arg1: memref<16x360xf32, #tpu.memory_space<vmem>>, %arg2: memref<360x80xbf16, #tpu.memory_space<vmem>>, %arg3: memref<1x80xf32, #tpu.memory_space<vmem>>, %arg4: memref<16x80xf32, #tpu.memory_space<vmem>>) attributes {dimension_semantics = [#tpu.dimension_semantics<parallel>], iteration_bounds = array<i64: 1>, scalar_prefetch = 0 : i64, scratch_operands = 0 : i64, tpu.core_type = #tpu.core_type<tc>, window_params = [{transform_indices = @transform_0, window_bounds = array<i64: 16, 360>}, {pipeline_mode = #tpu.pipeline_mode<synchronous>, transform_indices = @transform_1, window_bounds = array<i64: 360, 80>}, {pipeline_mode = #tpu.pipeline_mode<synchronous>, transform_indices = @transform_2, window_bounds = array<i64: 1, 80>}, {transform_indices = @transform_3, window_bounds = array<i64: 16, 80>}]} {
    %c0 = arith.constant 0 : index
    %c0_0 = arith.constant 0 : index
    %0 = vector.load %arg1[%c0, %c0_0] : memref<16x360xf32, #tpu.memory_space<vmem>>, vector<16x360xf32>
    %1 = arith.truncf %0 : vector<16x360xf32> to vector<16x360xbf16>
    %c0_1 = arith.constant 0 : index
    %c0_2 = arith.constant 0 : index
    %2 = vector.load %arg2[%c0_1, %c0_2] : memref<360x80xbf16, #tpu.memory_space<vmem>>, vector<360x80xbf16>
    %cst = arith.constant dense<0.000000e+00> : vector<16x80xf32>
    %3 = tpu.matmul %1, %2, %cst {dimension_numbers = #tpu.dot_dimension_numbers<[1], [0], [0], [1], [0, 0, 1, 1], [], []>} : vector<16x360xbf16>, vector<360x80xbf16>, vector<16x80xf32> -> vector<16x80xf32>
    %c0_3 = arith.constant 0 : index
    %c0_4 = arith.constant 0 : index
    %4 = vector.load %arg3[%c0_3, %c0_4] : memref<1x80xf32, #tpu.memory_space<vmem>>, vector<1x80xf32>
    %5 = vector.broadcast %4 : vector<1x80xf32> to vector<16x80xf32>
    %6 = arith.addf %3, %5 : vector<16x80xf32>
    %cst_5 = arith.constant 3.000000e+00 : f32
    %7 = vector.broadcast %cst_5 : f32 to vector<16x80xf32>
    %8 = arith.addf %6, %7 : vector<16x80xf32>
    %cst_6 = arith.constant 0.000000e+00 : f32
    %cst_7 = arith.constant 6.000000e+00 : f32
    %9 = vector.broadcast %cst_6 : f32 to vector<16x80xf32>
    %10 = arith.maximumf %9, %8 : vector<16x80xf32>
    %11 = vector.broadcast %cst_7 : f32 to vector<16x80xf32>
    %12 = arith.minimumf %11, %10 : vector<16x80xf32>
    %13 = arith.mulf %6, %12 : vector<16x80xf32>
    %cst_8 = arith.constant 0.166666672 : f32
    %14 = vector.broadcast %cst_8 : f32 to vector<16x80xf32>
    %15 = arith.mulf %13, %14 : vector<16x80xf32>
    %c0_9 = arith.constant 0 : index
    %c0_10 = arith.constant 0 : index
    %16 = vector.load %arg4[%c0_9, %c0_10] : memref<16x80xf32, #tpu.memory_space<vmem>>, vector<16x80xf32>
    tpu.vector_store %arg4[%c0_9, %c0_10], %15 {strides = array<i32>} : memref<16x80xf32, #tpu.memory_space<vmem>>, vector<16x80xf32>,
    return
  }
  func.func @transform_0(%arg0: i32) -> (i32, i32) {
    %c0_i32 = arith.constant 0 : i32
    %c0_i32_0 = arith.constant 0 : i32
    return %arg0, %c0_i32 : i32, i32
  }
  func.func @transform_1(%arg0: i32) -> (i32, i32) {
    %c0_i32 = arith.constant 0 : i32
    %c0_i32_0 = arith.constant 0 : i32
    %c0_i32_1 = arith.constant 0 : i32
    return %c0_i32, %c0_i32_0 : i32, i32
  }
  func.func @transform_2(%arg0: i32) -> (i32, i32) {
    %c0_i32 = arith.constant 0 : i32
    %c0_i32_0 = arith.constant 0 : i32
    %c0_i32_1 = arith.constant 0 : i32
    return %c0_i32, %c0_i32_0 : i32, i32
  }
  func.func @transform_3(%arg0: i32) -> (i32, i32) {
    %c0_i32 = arith.constant 0 : i32
    %c0_i32_0 = arith.constant 0 : i32
    return %arg0, %c0_i32 : i32, i32
  }
}

module attributes {stable_mosaic.version = 11 : i64} {
  func.func @_tf_kernel(%arg0: i32, %arg1: memref<8x80xf32, #tpu.memory_space<vmem>>, %arg2: memref<8x80xf32, #tpu.memory_space<vmem>>, %arg3: memref<80x80xbf16, #tpu.memory_space<vmem>>, %arg4: memref<80x80xbf16, #tpu.memory_space<vmem>>, %arg5: memref<1x80xf32, #tpu.memory_space<vmem>>, %arg6: memref<8x80xf32, #tpu.memory_space<vmem>>, %arg7: memref<8x80xf32, #tpu.memory_space<vmem>>, %arg8: memref<8x80xf32, #tpu.memory_space<vmem>>) attributes {dimension_semantics = [#tpu.dimension_semantics<parallel>], iteration_bounds = array<i64: 1>, scalar_prefetch = 0 : i64, scratch_operands = 0 : i64, tpu.core_type = #tpu.core_type<tc>, window_params = [{transform_indices = @transform_0, window_bounds = array<i64: 8, 80>}, {transform_indices = @transform_1, window_bounds = array<i64: 8, 80>}, {pipeline_mode = #tpu.pipeline_mode<synchronous>, transform_indices = @transform_2, window_bounds = array<i64: 80, 80>}, {pipeline_mode = #tpu.pipeline_mode<synchronous>, transform_indices = @transform_3, window_bounds = array<i64: 80, 80>}, {pipeline_mode = #tpu.pipeline_mode<synchronous>, transform_indices = @transform_4, window_bounds = array<i64: 1, 80>}, {transform_indices = @transform_5, window_bounds = array<i64: 8, 80>}, {transform_indices = @transform_6, window_bounds = array<i64: 8, 80>}, {transform_indices = @transform_7, window_bounds = array<i64: 8, 80>}]} {
    %c0 = arith.constant 0 : index
    %c0_0 = arith.constant 0 : index
    %0 = vector.load %arg1[%c0, %c0_0] : memref<8x80xf32, #tpu.memory_space<vmem>>, vector<8x80xf32>
    %c0_1 = arith.constant 0 : index
    %c0_2 = arith.constant 0 : index
    %1 = vector.load %arg2[%c0_1, %c0_2] : memref<8x80xf32, #tpu.memory_space<vmem>>, vector<8x80xf32>
    %2 = arith.truncf %0 : vector<8x80xf32> to vector<8x80xbf16>
    %c0_3 = arith.constant 0 : index
    %c0_4 = arith.constant 0 : index
    %3 = vector.load %arg3[%c0_3, %c0_4] : memref<80x80xbf16, #tpu.memory_space<vmem>>, vector<80x80xbf16>
    %cst = arith.constant dense<0.000000e+00> : vector<8x80xf32>
    %4 = tpu.matmul %2, %3, %cst {dimension_numbers = #tpu.dot_dimension_numbers<[1], [0], [0], [1], [0, 0, 1, 1], [], []>} : vector<8x80xbf16>, vector<80x80xbf16>, vector<8x80xf32> -> vector<8x80xf32>
    %5 = arith.truncf %1 : vector<8x80xf32> to vector<8x80xbf16>
    %c0_5 = arith.constant 0 : index
    %c0_6 = arith.constant 0 : index
    %6 = vector.load %arg4[%c0_5, %c0_6] : memref<80x80xbf16, #tpu.memory_space<vmem>>, vector<80x80xbf16>
    %cst_7 = arith.constant dense<0.000000e+00> : vector<8x80xf32>
    %7 = tpu.matmul %5, %6, %cst_7 {dimension_numbers = #tpu.dot_dimension_numbers<[1], [0], [0], [1], [0, 0, 1, 1], [], []>} : vector<8x80xbf16>, vector<80x80xbf16>, vector<8x80xf32> -> vector<8x80xf32>
    %8 = arith.addf %4, %7 : vector<8x80xf32>
    %c0_8 = arith.constant 0 : index
    %c0_9 = arith.constant 0 : index
    %9 = vector.load %arg5[%c0_8, %c0_9] : memref<1x80xf32, #tpu.memory_space<vmem>>, vector<1x80xf32>
    %10 = vector.broadcast %9 : vector<1x80xf32> to vector<8x80xf32>
    %11 = arith.addf %8, %10 : vector<8x80xf32>
    %cst_10 = arith.constant 0.000000e+00 : f32
    %12 = vector.broadcast %cst_10 : f32 to vector<8x80xf32>
    %13 = arith.maximumf %11, %12 : vector<8x80xf32>
    %14 = arith.addf %0, %13 : vector<8x80xf32>
    %c0_11 = arith.constant 0 : index
    %c0_12 = arith.constant 0 : index
    %15 = vector.load %arg6[%c0_11, %c0_12] : memref<8x80xf32, #tpu.memory_space<vmem>>, vector<8x80xf32>
    tpu.vector_store %arg6[%c0_11, %c0_12], %14 {strides = array<i32>} : memref<8x80xf32, #tpu.memory_space<vmem>>, vector<8x80xf32>,
    %16 = arith.addf %1, %13 : vector<8x80xf32>
    %c0_13 = arith.constant 0 : index
    %c0_14 = arith.constant 0 : index
    %17 = vector.load %arg7[%c0_13, %c0_14] : memref<8x80xf32, #tpu.memory_space<vmem>>, vector<8x80xf32>
    tpu.vector_store %arg7[%c0_13, %c0_14], %16 {strides = array<i32>} : memref<8x80xf32, #tpu.memory_space<vmem>>, vector<8x80xf32>,
    %c0_15 = arith.constant 0 : index
    %c0_16 = arith.constant 0 : index
    %18 = vector.load %arg8[%c0_15, %c0_16] : memref<8x80xf32, #tpu.memory_space<vmem>>, vector<8x80xf32>
    tpu.vector_store %arg8[%c0_15, %c0_16], %13 {strides = array<i32>} : memref<8x80xf32, #tpu.memory_space<vmem>>, vector<8x80xf32>,
    return
  }
  func.func @transform_0(%arg0: i32) -> (i32, i32) {
    %c0_i32 = arith.constant 0 : i32
    %c0_i32_0 = arith.constant 0 : i32
    return %arg0, %c0_i32 : i32, i32
  }
  func.func @transform_1(%arg0: i32) -> (i32, i32) {
    %c0_i32 = arith.constant 0 : i32
    %c0_i32_0 = arith.constant 0 : i32
    return %arg0, %c0_i32 : i32, i32
  }
  func.func @transform_2(%arg0: i32) -> (i32, i32) {
    %c0_i32 = arith.constant 0 : i32
    %c0_i32_0 = arith.constant 0 : i32
    %c0_i32_1 = arith.constant 0 : i32
    return %c0_i32, %c0_i32_0 : i32, i32
  }
  func.func @transform_3(%arg0: i32) -> (i32, i32) {
    %c0_i32 = arith.constant 0 : i32
    %c0_i32_0 = arith.constant 0 : i32
    %c0_i32_1 = arith.constant 0 : i32
    return %c0_i32, %c0_i32_0 : i32, i32
  }
  func.func @transform_4(%arg0: i32) -> (i32, i32) {
    %c0_i32 = arith.constant 0 : i32
    %c0_i32_0 = arith.constant 0 : i32
    %c0_i32_1 = arith.constant 0 : i32
    return %c0_i32, %c0_i32_0 : i32, i32
  }
  func.func @transform_5(%arg0: i32) -> (i32, i32) {
    %c0_i32 = arith.constant 0 : i32
    %c0_i32_0 = arith.constant 0 : i32
    return %arg0, %c0_i32 : i32, i32
  }
  func.func @transform_6(%arg0: i32) -> (i32, i32) {
    %c0_i32 = arith.constant 0 : i32
    %c0_i32_0 = arith.constant 0 : i32
    return %arg0, %c0_i32 : i32, i32
  }
  func.func @transform_7(%arg0: i32) -> (i32, i32) {
    %c0_i32 = arith.constant 0 : i32
    %c0_i32_0 = arith.constant 0 : i32
    return %arg0, %c0_i32 : i32, i32
  }
}

module attributes {stable_mosaic.version = 11 : i64} {
  func.func @_mix2_kernel(%arg0: i32, %arg1: memref<8x80xf32, #tpu.memory_space<vmem>>, %arg2: memref<8x80xf32, #tpu.memory_space<vmem>>, %arg3: memref<80x80xbf16, #tpu.memory_space<vmem>>, %arg4: memref<80x80xbf16, #tpu.memory_space<vmem>>, %arg5: memref<1x80xf32, #tpu.memory_space<vmem>>, %arg6: memref<8x80xf32, #tpu.memory_space<vmem>>) attributes {dimension_semantics = [#tpu.dimension_semantics<parallel>], iteration_bounds = array<i64: 1>, scalar_prefetch = 0 : i64, scratch_operands = 0 : i64, tpu.core_type = #tpu.core_type<tc>, window_params = [{transform_indices = @transform_0, window_bounds = array<i64: 8, 80>}, {transform_indices = @transform_1, window_bounds = array<i64: 8, 80>}, {pipeline_mode = #tpu.pipeline_mode<synchronous>, transform_indices = @transform_2, window_bounds = array<i64: 80, 80>}, {pipeline_mode = #tpu.pipeline_mode<synchronous>, transform_indices = @transform_3, window_bounds = array<i64: 80, 80>}, {pipeline_mode = #tpu.pipeline_mode<synchronous>, transform_indices = @transform_4, window_bounds = array<i64: 1, 80>}, {transform_indices = @transform_5, window_bounds = array<i64: 8, 80>}]} {
    %c0 = arith.constant 0 : index
    %c0_0 = arith.constant 0 : index
    %0 = vector.load %arg1[%c0, %c0_0] : memref<8x80xf32, #tpu.memory_space<vmem>>, vector<8x80xf32>
    %1 = arith.truncf %0 : vector<8x80xf32> to vector<8x80xbf16>
    %c0_1 = arith.constant 0 : index
    %c0_2 = arith.constant 0 : index
    %2 = vector.load %arg3[%c0_1, %c0_2] : memref<80x80xbf16, #tpu.memory_space<vmem>>, vector<80x80xbf16>
    %cst = arith.constant dense<0.000000e+00> : vector<8x80xf32>
    %3 = tpu.matmul %1, %2, %cst {dimension_numbers = #tpu.dot_dimension_numbers<[1], [0], [0], [1], [0, 0, 1, 1], [], []>} : vector<8x80xbf16>, vector<80x80xbf16>, vector<8x80xf32> -> vector<8x80xf32>
    %c0_3 = arith.constant 0 : index
    %c0_4 = arith.constant 0 : index
    %4 = vector.load %arg2[%c0_3, %c0_4] : memref<8x80xf32, #tpu.memory_space<vmem>>, vector<8x80xf32>
    %5 = arith.truncf %4 : vector<8x80xf32> to vector<8x80xbf16>
    %c0_5 = arith.constant 0 : index
    %c0_6 = arith.constant 0 : index
    %6 = vector.load %arg4[%c0_5, %c0_6] : memref<80x80xbf16, #tpu.memory_space<vmem>>, vector<80x80xbf16>
    %cst_7 = arith.constant dense<0.000000e+00> : vector<8x80xf32>
    %7 = tpu.matmul %5, %6, %cst_7 {dimension_numbers = #tpu.dot_dimension_numbers<[1], [0], [0], [1], [0, 0, 1, 1], [], []>} : vector<8x80xbf16>, vector<80x80xbf16>, vector<8x80xf32> -> vector<8x80xf32>
    %8 = arith.addf %3, %7 : vector<8x80xf32>
    %c0_8 = arith.constant 0 : index
    %c0_9 = arith.constant 0 : index
    %9 = vector.load %arg5[%c0_8, %c0_9] : memref<1x80xf32, #tpu.memory_space<vmem>>, vector<1x80xf32>
    %10 = vector.broadcast %9 : vector<1x80xf32> to vector<8x80xf32>
    %11 = arith.addf %8, %10 : vector<8x80xf32>
    %cst_10 = arith.constant 0.000000e+00 : f32
    %12 = vector.broadcast %cst_10 : f32 to vector<8x80xf32>
    %13 = arith.maximumf %11, %12 : vector<8x80xf32>
    %c0_11 = arith.constant 0 : index
    %c0_12 = arith.constant 0 : index
    %14 = vector.load %arg6[%c0_11, %c0_12] : memref<8x80xf32, #tpu.memory_space<vmem>>, vector<8x80xf32>
    tpu.vector_store %arg6[%c0_11, %c0_12], %13 {strides = array<i32>} : memref<8x80xf32, #tpu.memory_space<vmem>>, vector<8x80xf32>,
    return
  }
  func.func @transform_0(%arg0: i32) -> (i32, i32) {
    %c0_i32 = arith.constant 0 : i32
    %c0_i32_0 = arith.constant 0 : i32
    return %arg0, %c0_i32 : i32, i32
  }
  func.func @transform_1(%arg0: i32) -> (i32, i32) {
    %c0_i32 = arith.constant 0 : i32
    %c0_i32_0 = arith.constant 0 : i32
    return %arg0, %c0_i32 : i32, i32
  }
  func.func @transform_2(%arg0: i32) -> (i32, i32) {
    %c0_i32 = arith.constant 0 : i32
    %c0_i32_0 = arith.constant 0 : i32
    %c0_i32_1 = arith.constant 0 : i32
    return %c0_i32, %c0_i32_0 : i32, i32
  }
  func.func @transform_3(%arg0: i32) -> (i32, i32) {
    %c0_i32 = arith.constant 0 : i32
    %c0_i32_0 = arith.constant 0 : i32
    %c0_i32_1 = arith.constant 0 : i32
    return %c0_i32, %c0_i32_0 : i32, i32
  }
  func.func @transform_4(%arg0: i32) -> (i32, i32) {
    %c0_i32 = arith.constant 0 : i32
    %c0_i32_0 = arith.constant 0 : i32
    %c0_i32_1 = arith.constant 0 : i32
    return %c0_i32, %c0_i32_0 : i32, i32
  }
  func.func @transform_5(%arg0: i32) -> (i32, i32) {
    %c0_i32 = arith.constant 0 : i32
    %c0_i32_0 = arith.constant 0 : i32
    return %arg0, %c0_i32 : i32, i32
  }
}

module attributes {stable_mosaic.version = 11 : i64} {
  func.func @_tf_kernel(%arg0: i32, %arg1: memref<8x80xf32, #tpu.memory_space<vmem>>, %arg2: memref<8x80xf32, #tpu.memory_space<vmem>>, %arg3: memref<80x80xbf16, #tpu.memory_space<vmem>>, %arg4: memref<80x80xbf16, #tpu.memory_space<vmem>>, %arg5: memref<1x80xf32, #tpu.memory_space<vmem>>, %arg6: memref<8x80xf32, #tpu.memory_space<vmem>>, %arg7: memref<8x80xf32, #tpu.memory_space<vmem>>, %arg8: memref<8x80xf32, #tpu.memory_space<vmem>>) attributes {dimension_semantics = [#tpu.dimension_semantics<parallel>], iteration_bounds = array<i64: 1>, scalar_prefetch = 0 : i64, scratch_operands = 0 : i64, tpu.core_type = #tpu.core_type<tc>, window_params = [{transform_indices = @transform_0, window_bounds = array<i64: 8, 80>}, {transform_indices = @transform_1, window_bounds = array<i64: 8, 80>}, {pipeline_mode = #tpu.pipeline_mode<synchronous>, transform_indices = @transform_2, window_bounds = array<i64: 80, 80>}, {pipeline_mode = #tpu.pipeline_mode<synchronous>, transform_indices = @transform_3, window_bounds = array<i64: 80, 80>}, {pipeline_mode = #tpu.pipeline_mode<synchronous>, transform_indices = @transform_4, window_bounds = array<i64: 1, 80>}, {transform_indices = @transform_5, window_bounds = array<i64: 8, 80>}, {transform_indices = @transform_6, window_bounds = array<i64: 8, 80>}, {transform_indices = @transform_7, window_bounds = array<i64: 8, 80>}]} {
    %c0 = arith.constant 0 : index
    %c0_0 = arith.constant 0 : index
    %0 = vector.load %arg1[%c0, %c0_0] : memref<8x80xf32, #tpu.memory_space<vmem>>, vector<8x80xf32>
    %c0_1 = arith.constant 0 : index
    %c0_2 = arith.constant 0 : index
    %1 = vector.load %arg2[%c0_1, %c0_2] : memref<8x80xf32, #tpu.memory_space<vmem>>, vector<8x80xf32>
    %2 = arith.truncf %0 : vector<8x80xf32> to vector<8x80xbf16>
    %c0_3 = arith.constant 0 : index
    %c0_4 = arith.constant 0 : index
    %3 = vector.load %arg3[%c0_3, %c0_4] : memref<80x80xbf16, #tpu.memory_space<vmem>>, vector<80x80xbf16>
    %cst = arith.constant dense<0.000000e+00> : vector<8x80xf32>
    %4 = tpu.matmul %2, %3, %cst {dimension_numbers = #tpu.dot_dimension_numbers<[1], [0], [0], [1], [0, 0, 1, 1], [], []>} : vector<8x80xbf16>, vector<80x80xbf16>, vector<8x80xf32> -> vector<8x80xf32>
    %5 = arith.truncf %1 : vector<8x80xf32> to vector<8x80xbf16>
    %c0_5 = arith.constant 0 : index
    %c0_6 = arith.constant 0 : index
    %6 = vector.load %arg4[%c0_5, %c0_6] : memref<80x80xbf16, #tpu.memory_space<vmem>>, vector<80x80xbf16>
    %cst_7 = arith.constant dense<0.000000e+00> : vector<8x80xf32>
    %7 = tpu.matmul %5, %6, %cst_7 {dimension_numbers = #tpu.dot_dimension_numbers<[1], [0], [0], [1], [0, 0, 1, 1], [], []>} : vector<8x80xbf16>, vector<80x80xbf16>, vector<8x80xf32> -> vector<8x80xf32>
    %8 = arith.addf %4, %7 : vector<8x80xf32>
    %c0_8 = arith.constant 0 : index
    %c0_9 = arith.constant 0 : index
    %9 = vector.load %arg5[%c0_8, %c0_9] : memref<1x80xf32, #tpu.memory_space<vmem>>, vector<1x80xf32>
    %10 = vector.broadcast %9 : vector<1x80xf32> to vector<8x80xf32>
    %11 = arith.addf %8, %10 : vector<8x80xf32>
    %cst_10 = arith.constant 0.000000e+00 : f32
    %12 = vector.broadcast %cst_10 : f32 to vector<8x80xf32>
    %13 = arith.maximumf %11, %12 : vector<8x80xf32>
    %14 = arith.addf %0, %13 : vector<8x80xf32>
    %c0_11 = arith.constant 0 : index
    %c0_12 = arith.constant 0 : index
    %15 = vector.load %arg6[%c0_11, %c0_12] : memref<8x80xf32, #tpu.memory_space<vmem>>, vector<8x80xf32>
    tpu.vector_store %arg6[%c0_11, %c0_12], %14 {strides = array<i32>} : memref<8x80xf32, #tpu.memory_space<vmem>>, vector<8x80xf32>,
    %16 = arith.addf %1, %13 : vector<8x80xf32>
    %c0_13 = arith.constant 0 : index
    %c0_14 = arith.constant 0 : index
    %17 = vector.load %arg7[%c0_13, %c0_14] : memref<8x80xf32, #tpu.memory_space<vmem>>, vector<8x80xf32>
    tpu.vector_store %arg7[%c0_13, %c0_14], %16 {strides = array<i32>} : memref<8x80xf32, #tpu.memory_space<vmem>>, vector<8x80xf32>,
    %c0_15 = arith.constant 0 : index
    %c0_16 = arith.constant 0 : index
    %18 = vector.load %arg8[%c0_15, %c0_16] : memref<8x80xf32, #tpu.memory_space<vmem>>, vector<8x80xf32>
    tpu.vector_store %arg8[%c0_15, %c0_16], %13 {strides = array<i32>} : memref<8x80xf32, #tpu.memory_space<vmem>>, vector<8x80xf32>,
    return
  }
  func.func @transform_0(%arg0: i32) -> (i32, i32) {
    %c0_i32 = arith.constant 0 : i32
    %c0_i32_0 = arith.constant 0 : i32
    return %arg0, %c0_i32 : i32, i32
  }
  func.func @transform_1(%arg0: i32) -> (i32, i32) {
    %c0_i32 = arith.constant 0 : i32
    %c0_i32_0 = arith.constant 0 : i32
    return %arg0, %c0_i32 : i32, i32
  }
  func.func @transform_2(%arg0: i32) -> (i32, i32) {
    %c0_i32 = arith.constant 0 : i32
    %c0_i32_0 = arith.constant 0 : i32
    %c0_i32_1 = arith.constant 0 : i32
    return %c0_i32, %c0_i32_0 : i32, i32
  }
  func.func @transform_3(%arg0: i32) -> (i32, i32) {
    %c0_i32 = arith.constant 0 : i32
    %c0_i32_0 = arith.constant 0 : i32
    %c0_i32_1 = arith.constant 0 : i32
    return %c0_i32, %c0_i32_0 : i32, i32
  }
  func.func @transform_4(%arg0: i32) -> (i32, i32) {
    %c0_i32 = arith.constant 0 : i32
    %c0_i32_0 = arith.constant 0 : i32
    %c0_i32_1 = arith.constant 0 : i32
    return %c0_i32, %c0_i32_0 : i32, i32
  }
  func.func @transform_5(%arg0: i32) -> (i32, i32) {
    %c0_i32 = arith.constant 0 : i32
    %c0_i32_0 = arith.constant 0 : i32
    return %arg0, %c0_i32 : i32, i32
  }
  func.func @transform_6(%arg0: i32) -> (i32, i32) {
    %c0_i32 = arith.constant 0 : i32
    %c0_i32_0 = arith.constant 0 : i32
    return %arg0, %c0_i32 : i32, i32
  }
  func.func @transform_7(%arg0: i32) -> (i32, i32) {
    %c0_i32 = arith.constant 0 : i32
    %c0_i32_0 = arith.constant 0 : i32
    return %arg0, %c0_i32 : i32, i32
  }
}

module attributes {stable_mosaic.version = 11 : i64} {
  func.func @_cnf_kernel(%arg0: i32, %arg1: memref<8x80xf32, #tpu.memory_space<vmem>>, %arg2: memref<8x80xf32, #tpu.memory_space<vmem>>, %arg3: memref<1x80xf32, #tpu.memory_space<vmem>>, %arg4: memref<1x1xf32, #tpu.memory_space<vmem>>, %arg5: memref<1x80xf32, #tpu.memory_space<vmem>>, %arg6: memref<1x1xf32, #tpu.memory_space<vmem>>, %arg7: memref<8x80xf32, #tpu.memory_space<vmem>>, %arg8: memref<8x1xf32, #tpu.memory_space<vmem>>) attributes {dimension_semantics = [#tpu.dimension_semantics<parallel>], iteration_bounds = array<i64: 1>, scalar_prefetch = 0 : i64, scratch_operands = 0 : i64, tpu.core_type = #tpu.core_type<tc>, window_params = [{transform_indices = @transform_0, window_bounds = array<i64: 8, 80>}, {transform_indices = @transform_1, window_bounds = array<i64: 8, 80>}, {pipeline_mode = #tpu.pipeline_mode<synchronous>, transform_indices = @transform_2, window_bounds = array<i64: 1, 80>}, {pipeline_mode = #tpu.pipeline_mode<synchronous>, transform_indices = @transform_3, window_bounds = array<i64: 1, 1>}, {pipeline_mode = #tpu.pipeline_mode<synchronous>, transform_indices = @transform_4, window_bounds = array<i64: 1, 80>}, {pipeline_mode = #tpu.pipeline_mode<synchronous>, transform_indices = @transform_5, window_bounds = array<i64: 1, 1>}, {transform_indices = @transform_6, window_bounds = array<i64: 8, 80>}, {transform_indices = @transform_7, window_bounds = array<i64: 8, 1>}]} {
    %c0 = arith.constant 0 : index
    %c0_0 = arith.constant 0 : index
    %0 = vector.load %arg1[%c0, %c0_0] : memref<8x80xf32, #tpu.memory_space<vmem>>, vector<8x80xf32>
    %c0_1 = arith.constant 0 : index
    %c0_2 = arith.constant 0 : index
    %1 = vector.load %arg2[%c0_1, %c0_2] : memref<8x80xf32, #tpu.memory_space<vmem>>, vector<8x80xf32>
    %c0_3 = arith.constant 0 : index
    %c0_4 = arith.constant 0 : index
    %2 = vector.load %arg3[%c0_3, %c0_4] : memref<1x80xf32, #tpu.memory_space<vmem>>, vector<1x80xf32>
    %3 = vector.broadcast %2 : vector<1x80xf32> to vector<8x80xf32>
    %4 = arith.mulf %1, %3 : vector<8x80xf32>
    %cst = arith.constant dense<0.000000e+00> : vector<8xf32>
    %5 = vector.multi_reduction <add>, %4, %cst [1] : vector<8x80xf32> to vector<8xf32>
    %6 = vector.shape_cast %5 : vector<8xf32> to vector<8x1xf32>
    %c0_5 = arith.constant 0 : index
    %c0_6 = arith.constant 0 : index
    %7 = vector.load %arg4[%c0_5, %c0_6] : memref<1x1xf32, #tpu.memory_space<vmem>>, vector<1x1xf32>
    %8 = vector.broadcast %7 : vector<1x1xf32> to vector<8x1xf32>
    %9 = arith.addf %6, %8 : vector<8x1xf32>
    %10 = arith.negf %9 : vector<8x1xf32>
    %11 = math.exp %10 : vector<8x1xf32>
    %cst_7 = arith.constant 1.000000e+00 : f32
    %12 = vector.broadcast %cst_7 : f32 to vector<8x1xf32>
    %13 = arith.addf %12, %11 : vector<8x1xf32>
    %14 = arith.divf %12, %13 : vector<8x1xf32>
    %15 = vector.broadcast %14 : vector<8x1xf32> to vector<8x80xf32>
    %16 = arith.mulf %0, %15 : vector<8x80xf32>
    %17 = arith.addf %16, %0 : vector<8x80xf32>
    %c0_8 = arith.constant 0 : index
    %c0_9 = arith.constant 0 : index
    %18 = vector.load %arg7[%c0_8, %c0_9] : memref<8x80xf32, #tpu.memory_space<vmem>>, vector<8x80xf32>
    tpu.vector_store %arg7[%c0_8, %c0_9], %17 {strides = array<i32>} : memref<8x80xf32, #tpu.memory_space<vmem>>, vector<8x80xf32>,
    %c0_10 = arith.constant 0 : index
    %c0_11 = arith.constant 0 : index
    %19 = vector.load %arg5[%c0_10, %c0_11] : memref<1x80xf32, #tpu.memory_space<vmem>>, vector<1x80xf32>
    %20 = vector.broadcast %19 : vector<1x80xf32> to vector<8x80xf32>
    %21 = arith.mulf %17, %20 : vector<8x80xf32>
    %cst_12 = arith.constant dense<0.000000e+00> : vector<8xf32>
    %22 = vector.multi_reduction <add>, %21, %cst_12 [1] : vector<8x80xf32> to vector<8xf32>
    %23 = vector.shape_cast %22 : vector<8xf32> to vector<8x1xf32>
    %c0_13 = arith.constant 0 : index
    %c0_14 = arith.constant 0 : index
    %24 = vector.load %arg6[%c0_13, %c0_14] : memref<1x1xf32, #tpu.memory_space<vmem>>, vector<1x1xf32>
    %25 = vector.broadcast %24 : vector<1x1xf32> to vector<8x1xf32>
    %26 = arith.addf %23, %25 : vector<8x1xf32>
    %cst_15 = arith.constant 0.000000e+00 : f32
    %27 = vector.broadcast %cst_15 : f32 to vector<8x1xf32>
    %28 = arith.maximumf %26, %27 : vector<8x1xf32>
    %c0_16 = arith.constant 0 : index
    %c0_17 = arith.constant 0 : index
    %29 = vector.load %arg8[%c0_16, %c0_17] : memref<8x1xf32, #tpu.memory_space<vmem>>, vector<8x1xf32>
    tpu.vector_store %arg8[%c0_16, %c0_17], %28 {strides = array<i32>} : memref<8x1xf32, #tpu.memory_space<vmem>>, vector<8x1xf32>,
    return
  }
  func.func @transform_0(%arg0: i32) -> (i32, i32) {
    %c0_i32 = arith.constant 0 : i32
    %c0_i32_0 = arith.constant 0 : i32
    return %arg0, %c0_i32 : i32, i32
  }
  func.func @transform_1(%arg0: i32) -> (i32, i32) {
    %c0_i32 = arith.constant 0 : i32
    %c0_i32_0 = arith.constant 0 : i32
    return %arg0, %c0_i32 : i32, i32
  }
  func.func @transform_2(%arg0: i32) -> (i32, i32) {
    %c0_i32 = arith.constant 0 : i32
    %c0_i32_0 = arith.constant 0 : i32
    %c0_i32_1 = arith.constant 0 : i32
    return %c0_i32, %c0_i32_0 : i32, i32
  }
  func.func @transform_3(%arg0: i32) -> (i32, i32) {
    %c0_i32 = arith.constant 0 : i32
    %c0_i32_0 = arith.constant 0 : i32
    %c0_i32_1 = arith.constant 0 : i32
    return %c0_i32, %c0_i32_0 : i32, i32
  }
  func.func @transform_4(%arg0: i32) -> (i32, i32) {
    %c0_i32 = arith.constant 0 : i32
    %c0_i32_0 = arith.constant 0 : i32
    %c0_i32_1 = arith.constant 0 : i32
    return %c0_i32, %c0_i32_0 : i32, i32
  }
  func.func @transform_5(%arg0: i32) -> (i32, i32) {
    %c0_i32 = arith.constant 0 : i32
    %c0_i32_0 = arith.constant 0 : i32
    %c0_i32_1 = arith.constant 0 : i32
    return %c0_i32, %c0_i32_0 : i32, i32
  }
  func.func @transform_6(%arg0: i32) -> (i32, i32) {
    %c0_i32 = arith.constant 0 : i32
    %c0_i32_0 = arith.constant 0 : i32
    return %arg0, %c0_i32 : i32, i32
  }
  func.func @transform_7(%arg0: i32) -> (i32, i32) {
    %c0_i32 = arith.constant 0 : i32
    %c0_i32_0 = arith.constant 0 : i32
    return %arg0, %c0_i32 : i32, i32
  }
}

module attributes {stable_mosaic.version = 11 : i64} {
  func.func @_mdsa_kernel(%arg0: i32, %arg1: memref<8x80xf32, #tpu.memory_space<vmem>>, %arg2: memref<8x80xf32, #tpu.memory_space<vmem>>, %arg3: memref<1x80xf32, #tpu.memory_space<vmem>>, %arg4: memref<1x1xf32, #tpu.memory_space<vmem>>, %arg5: memref<80x40xbf16, #tpu.memory_space<vmem>>, %arg6: memref<1x40xf32, #tpu.memory_space<vmem>>, %arg7: memref<8x40xf32, #tpu.memory_space<vmem>>) attributes {dimension_semantics = [#tpu.dimension_semantics<parallel>], iteration_bounds = array<i64: 1>, scalar_prefetch = 0 : i64, scratch_operands = 0 : i64, tpu.core_type = #tpu.core_type<tc>, window_params = [{transform_indices = @transform_0, window_bounds = array<i64: 8, 80>}, {transform_indices = @transform_1, window_bounds = array<i64: 8, 80>}, {pipeline_mode = #tpu.pipeline_mode<synchronous>, transform_indices = @transform_2, window_bounds = array<i64: 1, 80>}, {pipeline_mode = #tpu.pipeline_mode<synchronous>, transform_indices = @transform_3, window_bounds = array<i64: 1, 1>}, {pipeline_mode = #tpu.pipeline_mode<synchronous>, transform_indices = @transform_4, window_bounds = array<i64: 80, 40>}, {pipeline_mode = #tpu.pipeline_mode<synchronous>, transform_indices = @transform_5, window_bounds = array<i64: 1, 40>}, {transform_indices = @transform_6, window_bounds = array<i64: 8, 40>}]} {
    %c0 = arith.constant 0 : index
    %c0_0 = arith.constant 0 : index
    %0 = vector.load %arg1[%c0, %c0_0] : memref<8x80xf32, #tpu.memory_space<vmem>>, vector<8x80xf32>
    %c0_1 = arith.constant 0 : index
    %c0_2 = arith.constant 0 : index
    %1 = vector.load %arg2[%c0_1, %c0_2] : memref<8x80xf32, #tpu.memory_space<vmem>>, vector<8x80xf32>
    %c0_3 = arith.constant 0 : index
    %c0_4 = arith.constant 0 : index
    %2 = vector.load %arg3[%c0_3, %c0_4] : memref<1x80xf32, #tpu.memory_space<vmem>>, vector<1x80xf32>
    %3 = vector.broadcast %2 : vector<1x80xf32> to vector<8x80xf32>
    %4 = arith.mulf %1, %3 : vector<8x80xf32>
    %cst = arith.constant dense<0.000000e+00> : vector<8xf32>
    %5 = vector.multi_reduction <add>, %4, %cst [1] : vector<8x80xf32> to vector<8xf32>
    %6 = vector.shape_cast %5 : vector<8xf32> to vector<8x1xf32>
    %c0_5 = arith.constant 0 : index
    %c0_6 = arith.constant 0 : index
    %7 = vector.load %arg4[%c0_5, %c0_6] : memref<1x1xf32, #tpu.memory_space<vmem>>, vector<1x1xf32>
    %8 = vector.broadcast %7 : vector<1x1xf32> to vector<8x1xf32>
    %9 = arith.addf %6, %8 : vector<8x1xf32>
    %10 = arith.negf %9 : vector<8x1xf32>
    %11 = math.exp %10 : vector<8x1xf32>
    %cst_7 = arith.constant 1.000000e+00 : f32
    %12 = vector.broadcast %cst_7 : f32 to vector<8x1xf32>
    %13 = arith.addf %12, %11 : vector<8x1xf32>
    %14 = arith.divf %12, %13 : vector<8x1xf32>
    %15 = vector.broadcast %14 : vector<8x1xf32> to vector<8x80xf32>
    %16 = arith.mulf %0, %15 : vector<8x80xf32>
    %17 = arith.addf %16, %1 : vector<8x80xf32>
    %18 = arith.truncf %17 : vector<8x80xf32> to vector<8x80xbf16>
    %c0_8 = arith.constant 0 : index
    %c0_9 = arith.constant 0 : index
    %19 = vector.load %arg5[%c0_8, %c0_9] : memref<80x40xbf16, #tpu.memory_space<vmem>>, vector<80x40xbf16>
    %cst_10 = arith.constant dense<0.000000e+00> : vector<8x40xf32>
    %20 = tpu.matmul %18, %19, %cst_10 {dimension_numbers = #tpu.dot_dimension_numbers<[1], [0], [0], [1], [0, 0, 1, 1], [], []>} : vector<8x80xbf16>, vector<80x40xbf16>, vector<8x40xf32> -> vector<8x40xf32>
    %c0_11 = arith.constant 0 : index
    %c0_12 = arith.constant 0 : index
    %21 = vector.load %arg6[%c0_11, %c0_12] : memref<1x40xf32, #tpu.memory_space<vmem>>, vector<1x40xf32>
    %22 = vector.broadcast %21 : vector<1x40xf32> to vector<8x40xf32>
    %23 = arith.addf %20, %22 : vector<8x40xf32>
    %cst_13 = arith.constant 0.000000e+00 : f32
    %24 = vector.broadcast %cst_13 : f32 to vector<8x40xf32>
    %25 = arith.maximumf %23, %24 : vector<8x40xf32>
    %c0_14 = arith.constant 0 : index
    %c0_15 = arith.constant 0 : index
    %26 = vector.load %arg7[%c0_14, %c0_15] : memref<8x40xf32, #tpu.memory_space<vmem>>, vector<8x40xf32>
    tpu.vector_store %arg7[%c0_14, %c0_15], %25 {strides = array<i32>} : memref<8x40xf32, #tpu.memory_space<vmem>>, vector<8x40xf32>,
    return
  }
  func.func @transform_0(%arg0: i32) -> (i32, i32) {
    %c0_i32 = arith.constant 0 : i32
    %c0_i32_0 = arith.constant 0 : i32
    return %arg0, %c0_i32 : i32, i32
  }
  func.func @transform_1(%arg0: i32) -> (i32, i32) {
    %c0_i32 = arith.constant 0 : i32
    %c0_i32_0 = arith.constant 0 : i32
    return %arg0, %c0_i32 : i32, i32
  }
  func.func @transform_2(%arg0: i32) -> (i32, i32) {
    %c0_i32 = arith.constant 0 : i32
    %c0_i32_0 = arith.constant 0 : i32
    %c0_i32_1 = arith.constant 0 : i32
    return %c0_i32, %c0_i32_0 : i32, i32
  }
  func.func @transform_3(%arg0: i32) -> (i32, i32) {
    %c0_i32 = arith.constant 0 : i32
    %c0_i32_0 = arith.constant 0 : i32
    %c0_i32_1 = arith.constant 0 : i32
    return %c0_i32, %c0_i32_0 : i32, i32
  }
  func.func @transform_4(%arg0: i32) -> (i32, i32) {
    %c0_i32 = arith.constant 0 : i32
    %c0_i32_0 = arith.constant 0 : i32
    %c0_i32_1 = arith.constant 0 : i32
    return %c0_i32, %c0_i32_0 : i32, i32
  }
  func.func @transform_5(%arg0: i32) -> (i32, i32) {
    %c0_i32 = arith.constant 0 : i32
    %c0_i32_0 = arith.constant 0 : i32
    %c0_i32_1 = arith.constant 0 : i32
    return %c0_i32, %c0_i32_0 : i32, i32
  }
  func.func @transform_6(%arg0: i32) -> (i32, i32) {
    %c0_i32 = arith.constant 0 : i32
    %c0_i32_0 = arith.constant 0 : i32
    return %arg0, %c0_i32 : i32, i32
  }
}

module attributes {stable_mosaic.version = 11 : i64} {
  func.func @_cnf_kernel(%arg0: i32, %arg1: memref<32x40xf32, #tpu.memory_space<vmem>>, %arg2: memref<32x40xf32, #tpu.memory_space<vmem>>, %arg3: memref<1x40xf32, #tpu.memory_space<vmem>>, %arg4: memref<1x1xf32, #tpu.memory_space<vmem>>, %arg5: memref<1x40xf32, #tpu.memory_space<vmem>>, %arg6: memref<1x1xf32, #tpu.memory_space<vmem>>, %arg7: memref<32x40xf32, #tpu.memory_space<vmem>>, %arg8: memref<32x1xf32, #tpu.memory_space<vmem>>) attributes {dimension_semantics = [#tpu.dimension_semantics<parallel>], iteration_bounds = array<i64: 1>, scalar_prefetch = 0 : i64, scratch_operands = 0 : i64, tpu.core_type = #tpu.core_type<tc>, window_params = [{transform_indices = @transform_0, window_bounds = array<i64: 32, 40>}, {transform_indices = @transform_1, window_bounds = array<i64: 32, 40>}, {pipeline_mode = #tpu.pipeline_mode<synchronous>, transform_indices = @transform_2, window_bounds = array<i64: 1, 40>}, {pipeline_mode = #tpu.pipeline_mode<synchronous>, transform_indices = @transform_3, window_bounds = array<i64: 1, 1>}, {pipeline_mode = #tpu.pipeline_mode<synchronous>, transform_indices = @transform_4, window_bounds = array<i64: 1, 40>}, {pipeline_mode = #tpu.pipeline_mode<synchronous>, transform_indices = @transform_5, window_bounds = array<i64: 1, 1>}, {transform_indices = @transform_6, window_bounds = array<i64: 32, 40>}, {transform_indices = @transform_7, window_bounds = array<i64: 32, 1>}]} {
    %c0 = arith.constant 0 : index
    %c0_0 = arith.constant 0 : index
    %0 = vector.load %arg1[%c0, %c0_0] : memref<32x40xf32, #tpu.memory_space<vmem>>, vector<32x40xf32>
    %c0_1 = arith.constant 0 : index
    %c0_2 = arith.constant 0 : index
    %1 = vector.load %arg2[%c0_1, %c0_2] : memref<32x40xf32, #tpu.memory_space<vmem>>, vector<32x40xf32>
    %c0_3 = arith.constant 0 : index
    %c0_4 = arith.constant 0 : index
    %2 = vector.load %arg3[%c0_3, %c0_4] : memref<1x40xf32, #tpu.memory_space<vmem>>, vector<1x40xf32>
    %3 = vector.broadcast %2 : vector<1x40xf32> to vector<32x40xf32>
    %4 = arith.mulf %1, %3 : vector<32x40xf32>
    %cst = arith.constant dense<0.000000e+00> : vector<32xf32>
    %5 = vector.multi_reduction <add>, %4, %cst [1] : vector<32x40xf32> to vector<32xf32>
    %6 = vector.shape_cast %5 : vector<32xf32> to vector<32x1xf32>
    %c0_5 = arith.constant 0 : index
    %c0_6 = arith.constant 0 : index
    %7 = vector.load %arg4[%c0_5, %c0_6] : memref<1x1xf32, #tpu.memory_space<vmem>>, vector<1x1xf32>
    %8 = vector.broadcast %7 : vector<1x1xf32> to vector<32x1xf32>
    %9 = arith.addf %6, %8 : vector<32x1xf32>
    %10 = arith.negf %9 : vector<32x1xf32>
    %11 = math.exp %10 : vector<32x1xf32>
    %cst_7 = arith.constant 1.000000e+00 : f32
    %12 = vector.broadcast %cst_7 : f32 to vector<32x1xf32>
    %13 = arith.addf %12, %11 : vector<32x1xf32>
    %14 = arith.divf %12, %13 : vector<32x1xf32>
    %15 = vector.broadcast %14 : vector<32x1xf32> to vector<32x40xf32>
    %16 = arith.mulf %0, %15 : vector<32x40xf32>
    %17 = arith.addf %16, %0 : vector<32x40xf32>
    %c0_8 = arith.constant 0 : index
    %c0_9 = arith.constant 0 : index
    %18 = vector.load %arg7[%c0_8, %c0_9] : memref<32x40xf32, #tpu.memory_space<vmem>>, vector<32x40xf32>
    tpu.vector_store %arg7[%c0_8, %c0_9], %17 {strides = array<i32>} : memref<32x40xf32, #tpu.memory_space<vmem>>, vector<32x40xf32>,
    %c0_10 = arith.constant 0 : index
    %c0_11 = arith.constant 0 : index
    %19 = vector.load %arg5[%c0_10, %c0_11] : memref<1x40xf32, #tpu.memory_space<vmem>>, vector<1x40xf32>
    %20 = vector.broadcast %19 : vector<1x40xf32> to vector<32x40xf32>
    %21 = arith.mulf %17, %20 : vector<32x40xf32>
    %cst_12 = arith.constant dense<0.000000e+00> : vector<32xf32>
    %22 = vector.multi_reduction <add>, %21, %cst_12 [1] : vector<32x40xf32> to vector<32xf32>
    %23 = vector.shape_cast %22 : vector<32xf32> to vector<32x1xf32>
    %c0_13 = arith.constant 0 : index
    %c0_14 = arith.constant 0 : index
    %24 = vector.load %arg6[%c0_13, %c0_14] : memref<1x1xf32, #tpu.memory_space<vmem>>, vector<1x1xf32>
    %25 = vector.broadcast %24 : vector<1x1xf32> to vector<32x1xf32>
    %26 = arith.addf %23, %25 : vector<32x1xf32>
    %cst_15 = arith.constant 0.000000e+00 : f32
    %27 = vector.broadcast %cst_15 : f32 to vector<32x1xf32>
    %28 = arith.maximumf %26, %27 : vector<32x1xf32>
    %c0_16 = arith.constant 0 : index
    %c0_17 = arith.constant 0 : index
    %29 = vector.load %arg8[%c0_16, %c0_17] : memref<32x1xf32, #tpu.memory_space<vmem>>, vector<32x1xf32>
    tpu.vector_store %arg8[%c0_16, %c0_17], %28 {strides = array<i32>} : memref<32x1xf32, #tpu.memory_space<vmem>>, vector<32x1xf32>,
    return
  }
  func.func @transform_0(%arg0: i32) -> (i32, i32) {
    %c0_i32 = arith.constant 0 : i32
    %c0_i32_0 = arith.constant 0 : i32
    return %arg0, %c0_i32 : i32, i32
  }
  func.func @transform_1(%arg0: i32) -> (i32, i32) {
    %c0_i32 = arith.constant 0 : i32
    %c0_i32_0 = arith.constant 0 : i32
    return %arg0, %c0_i32 : i32, i32
  }
  func.func @transform_2(%arg0: i32) -> (i32, i32) {
    %c0_i32 = arith.constant 0 : i32
    %c0_i32_0 = arith.constant 0 : i32
    %c0_i32_1 = arith.constant 0 : i32
    return %c0_i32, %c0_i32_0 : i32, i32
  }
  func.func @transform_3(%arg0: i32) -> (i32, i32) {
    %c0_i32 = arith.constant 0 : i32
    %c0_i32_0 = arith.constant 0 : i32
    %c0_i32_1 = arith.constant 0 : i32
    return %c0_i32, %c0_i32_0 : i32, i32
  }
  func.func @transform_4(%arg0: i32) -> (i32, i32) {
    %c0_i32 = arith.constant 0 : i32
    %c0_i32_0 = arith.constant 0 : i32
    %c0_i32_1 = arith.constant 0 : i32
    return %c0_i32, %c0_i32_0 : i32, i32
  }
  func.func @transform_5(%arg0: i32) -> (i32, i32) {
    %c0_i32 = arith.constant 0 : i32
    %c0_i32_0 = arith.constant 0 : i32
    %c0_i32_1 = arith.constant 0 : i32
    return %c0_i32, %c0_i32_0 : i32, i32
  }
  func.func @transform_6(%arg0: i32) -> (i32, i32) {
    %c0_i32 = arith.constant 0 : i32
    %c0_i32_0 = arith.constant 0 : i32
    return %arg0, %c0_i32 : i32, i32
  }
  func.func @transform_7(%arg0: i32) -> (i32, i32) {
    %c0_i32 = arith.constant 0 : i32
    %c0_i32_0 = arith.constant 0 : i32
    return %arg0, %c0_i32 : i32, i32
  }
}

module attributes {stable_mosaic.version = 11 : i64} {
  func.func @_mdsa_kernel(%arg0: i32, %arg1: memref<32x40xf32, #tpu.memory_space<vmem>>, %arg2: memref<32x40xf32, #tpu.memory_space<vmem>>, %arg3: memref<1x40xf32, #tpu.memory_space<vmem>>, %arg4: memref<1x1xf32, #tpu.memory_space<vmem>>, %arg5: memref<40x24xbf16, #tpu.memory_space<vmem>>, %arg6: memref<1x24xf32, #tpu.memory_space<vmem>>, %arg7: memref<32x24xf32, #tpu.memory_space<vmem>>) attributes {dimension_semantics = [#tpu.dimension_semantics<parallel>], iteration_bounds = array<i64: 1>, scalar_prefetch = 0 : i64, scratch_operands = 0 : i64, tpu.core_type = #tpu.core_type<tc>, window_params = [{transform_indices = @transform_0, window_bounds = array<i64: 32, 40>}, {transform_indices = @transform_1, window_bounds = array<i64: 32, 40>}, {pipeline_mode = #tpu.pipeline_mode<synchronous>, transform_indices = @transform_2, window_bounds = array<i64: 1, 40>}, {pipeline_mode = #tpu.pipeline_mode<synchronous>, transform_indices = @transform_3, window_bounds = array<i64: 1, 1>}, {pipeline_mode = #tpu.pipeline_mode<synchronous>, transform_indices = @transform_4, window_bounds = array<i64: 40, 24>}, {pipeline_mode = #tpu.pipeline_mode<synchronous>, transform_indices = @transform_5, window_bounds = array<i64: 1, 24>}, {transform_indices = @transform_6, window_bounds = array<i64: 32, 24>}]} {
    %c0 = arith.constant 0 : index
    %c0_0 = arith.constant 0 : index
    %0 = vector.load %arg1[%c0, %c0_0] : memref<32x40xf32, #tpu.memory_space<vmem>>, vector<32x40xf32>
    %c0_1 = arith.constant 0 : index
    %c0_2 = arith.constant 0 : index
    %1 = vector.load %arg2[%c0_1, %c0_2] : memref<32x40xf32, #tpu.memory_space<vmem>>, vector<32x40xf32>
    %c0_3 = arith.constant 0 : index
    %c0_4 = arith.constant 0 : index
    %2 = vector.load %arg3[%c0_3, %c0_4] : memref<1x40xf32, #tpu.memory_space<vmem>>, vector<1x40xf32>
    %3 = vector.broadcast %2 : vector<1x40xf32> to vector<32x40xf32>
    %4 = arith.mulf %1, %3 : vector<32x40xf32>
    %cst = arith.constant dense<0.000000e+00> : vector<32xf32>
    %5 = vector.multi_reduction <add>, %4, %cst [1] : vector<32x40xf32> to vector<32xf32>
    %6 = vector.shape_cast %5 : vector<32xf32> to vector<32x1xf32>
    %c0_5 = arith.constant 0 : index
    %c0_6 = arith.constant 0 : index
    %7 = vector.load %arg4[%c0_5, %c0_6] : memref<1x1xf32, #tpu.memory_space<vmem>>, vector<1x1xf32>
    %8 = vector.broadcast %7 : vector<1x1xf32> to vector<32x1xf32>
    %9 = arith.addf %6, %8 : vector<32x1xf32>
    %10 = arith.negf %9 : vector<32x1xf32>
    %11 = math.exp %10 : vector<32x1xf32>
    %cst_7 = arith.constant 1.000000e+00 : f32
    %12 = vector.broadcast %cst_7 : f32 to vector<32x1xf32>
    %13 = arith.addf %12, %11 : vector<32x1xf32>
    %14 = arith.divf %12, %13 : vector<32x1xf32>
    %15 = vector.broadcast %14 : vector<32x1xf32> to vector<32x40xf32>
    %16 = arith.mulf %0, %15 : vector<32x40xf32>
    %17 = arith.addf %16, %1 : vector<32x40xf32>
    %18 = arith.truncf %17 : vector<32x40xf32> to vector<32x40xbf16>
    %c0_8 = arith.constant 0 : index
    %c0_9 = arith.constant 0 : index
    %19 = vector.load %arg5[%c0_8, %c0_9] : memref<40x24xbf16, #tpu.memory_space<vmem>>, vector<40x24xbf16>
    %cst_10 = arith.constant dense<0.000000e+00> : vector<32x24xf32>
    %20 = tpu.matmul %18, %19, %cst_10 {dimension_numbers = #tpu.dot_dimension_numbers<[1], [0], [0], [1], [0, 0, 1, 1], [], []>} : vector<32x40xbf16>, vector<40x24xbf16>, vector<32x24xf32> -> vector<32x24xf32>
    %c0_11 = arith.constant 0 : index
    %c0_12 = arith.constant 0 : index
    %21 = vector.load %arg6[%c0_11, %c0_12] : memref<1x24xf32, #tpu.memory_space<vmem>>, vector<1x24xf32>
    %22 = vector.broadcast %21 : vector<1x24xf32> to vector<32x24xf32>
    %23 = arith.addf %20, %22 : vector<32x24xf32>
    %cst_13 = arith.constant 0.000000e+00 : f32
    %24 = vector.broadcast %cst_13 : f32 to vector<32x24xf32>
    %25 = arith.maximumf %23, %24 : vector<32x24xf32>
    %c0_14 = arith.constant 0 : index
    %c0_15 = arith.constant 0 : index
    %26 = vector.load %arg7[%c0_14, %c0_15] : memref<32x24xf32, #tpu.memory_space<vmem>>, vector<32x24xf32>
    tpu.vector_store %arg7[%c0_14, %c0_15], %25 {strides = array<i32>} : memref<32x24xf32, #tpu.memory_space<vmem>>, vector<32x24xf32>,
    return
  }
  func.func @transform_0(%arg0: i32) -> (i32, i32) {
    %c0_i32 = arith.constant 0 : i32
    %c0_i32_0 = arith.constant 0 : i32
    return %arg0, %c0_i32 : i32, i32
  }
  func.func @transform_1(%arg0: i32) -> (i32, i32) {
    %c0_i32 = arith.constant 0 : i32
    %c0_i32_0 = arith.constant 0 : i32
    return %arg0, %c0_i32 : i32, i32
  }
  func.func @transform_2(%arg0: i32) -> (i32, i32) {
    %c0_i32 = arith.constant 0 : i32
    %c0_i32_0 = arith.constant 0 : i32
    %c0_i32_1 = arith.constant 0 : i32
    return %c0_i32, %c0_i32_0 : i32, i32
  }
  func.func @transform_3(%arg0: i32) -> (i32, i32) {
    %c0_i32 = arith.constant 0 : i32
    %c0_i32_0 = arith.constant 0 : i32
    %c0_i32_1 = arith.constant 0 : i32
    return %c0_i32, %c0_i32_0 : i32, i32
  }
  func.func @transform_4(%arg0: i32) -> (i32, i32) {
    %c0_i32 = arith.constant 0 : i32
    %c0_i32_0 = arith.constant 0 : i32
    %c0_i32_1 = arith.constant 0 : i32
    return %c0_i32, %c0_i32_0 : i32, i32
  }
  func.func @transform_5(%arg0: i32) -> (i32, i32) {
    %c0_i32 = arith.constant 0 : i32
    %c0_i32_0 = arith.constant 0 : i32
    %c0_i32_1 = arith.constant 0 : i32
    return %c0_i32, %c0_i32_0 : i32, i32
  }
  func.func @transform_6(%arg0: i32) -> (i32, i32) {
    %c0_i32 = arith.constant 0 : i32
    %c0_i32_0 = arith.constant 0 : i32
    return %arg0, %c0_i32 : i32, i32
  }
}

module attributes {stable_mosaic.version = 11 : i64} {
  func.func @_cnf_kernel(%arg0: i32, %arg1: memref<64x24xf32, #tpu.memory_space<vmem>>, %arg2: memref<64x24xf32, #tpu.memory_space<vmem>>, %arg3: memref<1x24xf32, #tpu.memory_space<vmem>>, %arg4: memref<1x1xf32, #tpu.memory_space<vmem>>, %arg5: memref<1x24xf32, #tpu.memory_space<vmem>>, %arg6: memref<1x1xf32, #tpu.memory_space<vmem>>, %arg7: memref<64x24xf32, #tpu.memory_space<vmem>>, %arg8: memref<64x1xf32, #tpu.memory_space<vmem>>) attributes {dimension_semantics = [#tpu.dimension_semantics<parallel>], iteration_bounds = array<i64: 2>, scalar_prefetch = 0 : i64, scratch_operands = 0 : i64, tpu.core_type = #tpu.core_type<tc>, window_params = [{transform_indices = @transform_0, window_bounds = array<i64: 64, 24>}, {transform_indices = @transform_1, window_bounds = array<i64: 64, 24>}, {pipeline_mode = #tpu.pipeline_mode<synchronous>, transform_indices = @transform_2, window_bounds = array<i64: 1, 24>}, {pipeline_mode = #tpu.pipeline_mode<synchronous>, transform_indices = @transform_3, window_bounds = array<i64: 1, 1>}, {pipeline_mode = #tpu.pipeline_mode<synchronous>, transform_indices = @transform_4, window_bounds = array<i64: 1, 24>}, {pipeline_mode = #tpu.pipeline_mode<synchronous>, transform_indices = @transform_5, window_bounds = array<i64: 1, 1>}, {transform_indices = @transform_6, window_bounds = array<i64: 64, 24>}, {transform_indices = @transform_7, window_bounds = array<i64: 64, 1>}]} {
    %c0 = arith.constant 0 : index
    %c0_0 = arith.constant 0 : index
    %0 = vector.load %arg1[%c0, %c0_0] : memref<64x24xf32, #tpu.memory_space<vmem>>, vector<64x24xf32>
    %c0_1 = arith.constant 0 : index
    %c0_2 = arith.constant 0 : index
    %1 = vector.load %arg2[%c0_1, %c0_2] : memref<64x24xf32, #tpu.memory_space<vmem>>, vector<64x24xf32>
    %c0_3 = arith.constant 0 : index
    %c0_4 = arith.constant 0 : index
    %2 = vector.load %arg3[%c0_3, %c0_4] : memref<1x24xf32, #tpu.memory_space<vmem>>, vector<1x24xf32>
    %3 = vector.broadcast %2 : vector<1x24xf32> to vector<64x24xf32>
    %4 = arith.mulf %1, %3 : vector<64x24xf32>
    %cst = arith.constant dense<0.000000e+00> : vector<64xf32>
    %5 = vector.multi_reduction <add>, %4, %cst [1] : vector<64x24xf32> to vector<64xf32>
    %6 = vector.shape_cast %5 : vector<64xf32> to vector<64x1xf32>
    %c0_5 = arith.constant 0 : index
    %c0_6 = arith.constant 0 : index
    %7 = vector.load %arg4[%c0_5, %c0_6] : memref<1x1xf32, #tpu.memory_space<vmem>>, vector<1x1xf32>
    %8 = vector.broadcast %7 : vector<1x1xf32> to vector<64x1xf32>
    %9 = arith.addf %6, %8 : vector<64x1xf32>
    %10 = arith.negf %9 : vector<64x1xf32>
    %11 = math.exp %10 : vector<64x1xf32>
    %cst_7 = arith.constant 1.000000e+00 : f32
    %12 = vector.broadcast %cst_7 : f32 to vector<64x1xf32>
    %13 = arith.addf %12, %11 : vector<64x1xf32>
    %14 = arith.divf %12, %13 : vector<64x1xf32>
    %15 = vector.broadcast %14 : vector<64x1xf32> to vector<64x24xf32>
    %16 = arith.mulf %0, %15 : vector<64x24xf32>
    %17 = arith.addf %16, %0 : vector<64x24xf32>
    %c0_8 = arith.constant 0 : index
    %c0_9 = arith.constant 0 : index
    %18 = vector.load %arg7[%c0_8, %c0_9] : memref<64x24xf32, #tpu.memory_space<vmem>>, vector<64x24xf32>
    tpu.vector_store %arg7[%c0_8, %c0_9], %17 {strides = array<i32>} : memref<64x24xf32, #tpu.memory_space<vmem>>, vector<64x24xf32>,
    %c0_10 = arith.constant 0 : index
    %c0_11 = arith.constant 0 : index
    %19 = vector.load %arg5[%c0_10, %c0_11] : memref<1x24xf32, #tpu.memory_space<vmem>>, vector<1x24xf32>
    %20 = vector.broadcast %19 : vector<1x24xf32> to vector<64x24xf32>
    %21 = arith.mulf %17, %20 : vector<64x24xf32>
    %cst_12 = arith.constant dense<0.000000e+00> : vector<64xf32>
    %22 = vector.multi_reduction <add>, %21, %cst_12 [1] : vector<64x24xf32> to vector<64xf32>
    %23 = vector.shape_cast %22 : vector<64xf32> to vector<64x1xf32>
    %c0_13 = arith.constant 0 : index
    %c0_14 = arith.constant 0 : index
    %24 = vector.load %arg6[%c0_13, %c0_14] : memref<1x1xf32, #tpu.memory_space<vmem>>, vector<1x1xf32>
    %25 = vector.broadcast %24 : vector<1x1xf32> to vector<64x1xf32>
    %26 = arith.addf %23, %25 : vector<64x1xf32>
    %cst_15 = arith.constant 0.000000e+00 : f32
    %27 = vector.broadcast %cst_15 : f32 to vector<64x1xf32>
    %28 = arith.maximumf %26, %27 : vector<64x1xf32>
    %c0_16 = arith.constant 0 : index
    %c0_17 = arith.constant 0 : index
    %29 = vector.load %arg8[%c0_16, %c0_17] : memref<64x1xf32, #tpu.memory_space<vmem>>, vector<64x1xf32>
    tpu.vector_store %arg8[%c0_16, %c0_17], %28 {strides = array<i32>} : memref<64x1xf32, #tpu.memory_space<vmem>>, vector<64x1xf32>,
    return
  }
  func.func @transform_0(%arg0: i32) -> (i32, i32) {
    %c0_i32 = arith.constant 0 : i32
    %c0_i32_0 = arith.constant 0 : i32
    return %arg0, %c0_i32 : i32, i32
  }
  func.func @transform_1(%arg0: i32) -> (i32, i32) {
    %c0_i32 = arith.constant 0 : i32
    %c0_i32_0 = arith.constant 0 : i32
    return %arg0, %c0_i32 : i32, i32
  }
  func.func @transform_2(%arg0: i32) -> (i32, i32) {
    %c0_i32 = arith.constant 0 : i32
    %c0_i32_0 = arith.constant 0 : i32
    %c0_i32_1 = arith.constant 0 : i32
    return %c0_i32, %c0_i32_0 : i32, i32
  }
  func.func @transform_3(%arg0: i32) -> (i32, i32) {
    %c0_i32 = arith.constant 0 : i32
    %c0_i32_0 = arith.constant 0 : i32
    %c0_i32_1 = arith.constant 0 : i32
    return %c0_i32, %c0_i32_0 : i32, i32
  }
  func.func @transform_4(%arg0: i32) -> (i32, i32) {
    %c0_i32 = arith.constant 0 : i32
    %c0_i32_0 = arith.constant 0 : i32
    %c0_i32_1 = arith.constant 0 : i32
    return %c0_i32, %c0_i32_0 : i32, i32
  }
  func.func @transform_5(%arg0: i32) -> (i32, i32) {
    %c0_i32 = arith.constant 0 : i32
    %c0_i32_0 = arith.constant 0 : i32
    %c0_i32_1 = arith.constant 0 : i32
    return %c0_i32, %c0_i32_0 : i32, i32
  }
  func.func @transform_6(%arg0: i32) -> (i32, i32) {
    %c0_i32 = arith.constant 0 : i32
    %c0_i32_0 = arith.constant 0 : i32
    return %arg0, %c0_i32 : i32, i32
  }
  func.func @transform_7(%arg0: i32) -> (i32, i32) {
    %c0_i32 = arith.constant 0 : i32
    %c0_i32_0 = arith.constant 0 : i32
    return %arg0, %c0_i32 : i32, i32
  }
}

module attributes {stable_mosaic.version = 11 : i64} {
  func.func @_mdsa_kernel(%arg0: i32, %arg1: memref<64x24xf32, #tpu.memory_space<vmem>>, %arg2: memref<64x24xf32, #tpu.memory_space<vmem>>, %arg3: memref<1x24xf32, #tpu.memory_space<vmem>>, %arg4: memref<1x1xf32, #tpu.memory_space<vmem>>, %arg5: memref<24x16xbf16, #tpu.memory_space<vmem>>, %arg6: memref<1x16xf32, #tpu.memory_space<vmem>>, %arg7: memref<64x16xf32, #tpu.memory_space<vmem>>) attributes {dimension_semantics = [#tpu.dimension_semantics<parallel>], iteration_bounds = array<i64: 2>, scalar_prefetch = 0 : i64, scratch_operands = 0 : i64, tpu.core_type = #tpu.core_type<tc>, window_params = [{transform_indices = @transform_0, window_bounds = array<i64: 64, 24>}, {transform_indices = @transform_1, window_bounds = array<i64: 64, 24>}, {pipeline_mode = #tpu.pipeline_mode<synchronous>, transform_indices = @transform_2, window_bounds = array<i64: 1, 24>}, {pipeline_mode = #tpu.pipeline_mode<synchronous>, transform_indices = @transform_3, window_bounds = array<i64: 1, 1>}, {pipeline_mode = #tpu.pipeline_mode<synchronous>, transform_indices = @transform_4, window_bounds = array<i64: 24, 16>}, {pipeline_mode = #tpu.pipeline_mode<synchronous>, transform_indices = @transform_5, window_bounds = array<i64: 1, 16>}, {transform_indices = @transform_6, window_bounds = array<i64: 64, 16>}]} {
    %c0 = arith.constant 0 : index
    %c0_0 = arith.constant 0 : index
    %0 = vector.load %arg1[%c0, %c0_0] : memref<64x24xf32, #tpu.memory_space<vmem>>, vector<64x24xf32>
    %c0_1 = arith.constant 0 : index
    %c0_2 = arith.constant 0 : index
    %1 = vector.load %arg2[%c0_1, %c0_2] : memref<64x24xf32, #tpu.memory_space<vmem>>, vector<64x24xf32>
    %c0_3 = arith.constant 0 : index
    %c0_4 = arith.constant 0 : index
    %2 = vector.load %arg3[%c0_3, %c0_4] : memref<1x24xf32, #tpu.memory_space<vmem>>, vector<1x24xf32>
    %3 = vector.broadcast %2 : vector<1x24xf32> to vector<64x24xf32>
    %4 = arith.mulf %1, %3 : vector<64x24xf32>
    %cst = arith.constant dense<0.000000e+00> : vector<64xf32>
    %5 = vector.multi_reduction <add>, %4, %cst [1] : vector<64x24xf32> to vector<64xf32>
    %6 = vector.shape_cast %5 : vector<64xf32> to vector<64x1xf32>
    %c0_5 = arith.constant 0 : index
    %c0_6 = arith.constant 0 : index
    %7 = vector.load %arg4[%c0_5, %c0_6] : memref<1x1xf32, #tpu.memory_space<vmem>>, vector<1x1xf32>
    %8 = vector.broadcast %7 : vector<1x1xf32> to vector<64x1xf32>
    %9 = arith.addf %6, %8 : vector<64x1xf32>
    %10 = arith.negf %9 : vector<64x1xf32>
    %11 = math.exp %10 : vector<64x1xf32>
    %cst_7 = arith.constant 1.000000e+00 : f32
    %12 = vector.broadcast %cst_7 : f32 to vector<64x1xf32>
    %13 = arith.addf %12, %11 : vector<64x1xf32>
    %14 = arith.divf %12, %13 : vector<64x1xf32>
    %15 = vector.broadcast %14 : vector<64x1xf32> to vector<64x24xf32>
    %16 = arith.mulf %0, %15 : vector<64x24xf32>
    %17 = arith.addf %16, %1 : vector<64x24xf32>
    %18 = arith.truncf %17 : vector<64x24xf32> to vector<64x24xbf16>
    %c0_8 = arith.constant 0 : index
    %c0_9 = arith.constant 0 : index
    %19 = vector.load %arg5[%c0_8, %c0_9] : memref<24x16xbf16, #tpu.memory_space<vmem>>, vector<24x16xbf16>
    %cst_10 = arith.constant dense<0.000000e+00> : vector<64x16xf32>
    %20 = tpu.matmul %18, %19, %cst_10 {dimension_numbers = #tpu.dot_dimension_numbers<[1], [0], [0], [1], [0, 0, 1, 1], [], []>} : vector<64x24xbf16>, vector<24x16xbf16>, vector<64x16xf32> -> vector<64x16xf32>
    %c0_11 = arith.constant 0 : index
    %c0_12 = arith.constant 0 : index
    %21 = vector.load %arg6[%c0_11, %c0_12] : memref<1x16xf32, #tpu.memory_space<vmem>>, vector<1x16xf32>
    %22 = vector.broadcast %21 : vector<1x16xf32> to vector<64x16xf32>
    %23 = arith.addf %20, %22 : vector<64x16xf32>
    %cst_13 = arith.constant 0.000000e+00 : f32
    %24 = vector.broadcast %cst_13 : f32 to vector<64x16xf32>
    %25 = arith.maximumf %23, %24 : vector<64x16xf32>
    %c0_14 = arith.constant 0 : index
    %c0_15 = arith.constant 0 : index
    %26 = vector.load %arg7[%c0_14, %c0_15] : memref<64x16xf32, #tpu.memory_space<vmem>>, vector<64x16xf32>
    tpu.vector_store %arg7[%c0_14, %c0_15], %25 {strides = array<i32>} : memref<64x16xf32, #tpu.memory_space<vmem>>, vector<64x16xf32>,
    return
  }
  func.func @transform_0(%arg0: i32) -> (i32, i32) {
    %c0_i32 = arith.constant 0 : i32
    %c0_i32_0 = arith.constant 0 : i32
    return %arg0, %c0_i32 : i32, i32
  }
  func.func @transform_1(%arg0: i32) -> (i32, i32) {
    %c0_i32 = arith.constant 0 : i32
    %c0_i32_0 = arith.constant 0 : i32
    return %arg0, %c0_i32 : i32, i32
  }
  func.func @transform_2(%arg0: i32) -> (i32, i32) {
    %c0_i32 = arith.constant 0 : i32
    %c0_i32_0 = arith.constant 0 : i32
    %c0_i32_1 = arith.constant 0 : i32
    return %c0_i32, %c0_i32_0 : i32, i32
  }
  func.func @transform_3(%arg0: i32) -> (i32, i32) {
    %c0_i32 = arith.constant 0 : i32
    %c0_i32_0 = arith.constant 0 : i32
    %c0_i32_1 = arith.constant 0 : i32
    return %c0_i32, %c0_i32_0 : i32, i32
  }
  func.func @transform_4(%arg0: i32) -> (i32, i32) {
    %c0_i32 = arith.constant 0 : i32
    %c0_i32_0 = arith.constant 0 : i32
    %c0_i32_1 = arith.constant 0 : i32
    return %c0_i32, %c0_i32_0 : i32, i32
  }
  func.func @transform_5(%arg0: i32) -> (i32, i32) {
    %c0_i32 = arith.constant 0 : i32
    %c0_i32_0 = arith.constant 0 : i32
    %c0_i32_1 = arith.constant 0 : i32
    return %c0_i32, %c0_i32_0 : i32, i32
  }
  func.func @transform_6(%arg0: i32) -> (i32, i32) {
    %c0_i32 = arith.constant 0 : i32
    %c0_i32_0 = arith.constant 0 : i32
    return %arg0, %c0_i32 : i32, i32
  }
}

module attributes {stable_mosaic.version = 11 : i64} {
  func.func @_cnf_kernel(%arg0: i32, %arg1: memref<256x16xf32, #tpu.memory_space<vmem>>, %arg2: memref<256x16xf32, #tpu.memory_space<vmem>>, %arg3: memref<1x16xf32, #tpu.memory_space<vmem>>, %arg4: memref<1x1xf32, #tpu.memory_space<vmem>>, %arg5: memref<1x16xf32, #tpu.memory_space<vmem>>, %arg6: memref<1x1xf32, #tpu.memory_space<vmem>>, %arg7: memref<256x16xf32, #tpu.memory_space<vmem>>, %arg8: memref<256x1xf32, #tpu.memory_space<vmem>>) attributes {dimension_semantics = [#tpu.dimension_semantics<parallel>], iteration_bounds = array<i64: 2>, scalar_prefetch = 0 : i64, scratch_operands = 0 : i64, tpu.core_type = #tpu.core_type<tc>, window_params = [{transform_indices = @transform_0, window_bounds = array<i64: 256, 16>}, {transform_indices = @transform_1, window_bounds = array<i64: 256, 16>}, {pipeline_mode = #tpu.pipeline_mode<synchronous>, transform_indices = @transform_2, window_bounds = array<i64: 1, 16>}, {pipeline_mode = #tpu.pipeline_mode<synchronous>, transform_indices = @transform_3, window_bounds = array<i64: 1, 1>}, {pipeline_mode = #tpu.pipeline_mode<synchronous>, transform_indices = @transform_4, window_bounds = array<i64: 1, 16>}, {pipeline_mode = #tpu.pipeline_mode<synchronous>, transform_indices = @transform_5, window_bounds = array<i64: 1, 1>}, {transform_indices = @transform_6, window_bounds = array<i64: 256, 16>}, {transform_indices = @transform_7, window_bounds = array<i64: 256, 1>}]} {
    %c0 = arith.constant 0 : index
    %c0_0 = arith.constant 0 : index
    %0 = vector.load %arg1[%c0, %c0_0] : memref<256x16xf32, #tpu.memory_space<vmem>>, vector<256x16xf32>
    %c0_1 = arith.constant 0 : index
    %c0_2 = arith.constant 0 : index
    %1 = vector.load %arg2[%c0_1, %c0_2] : memref<256x16xf32, #tpu.memory_space<vmem>>, vector<256x16xf32>
    %c0_3 = arith.constant 0 : index
    %c0_4 = arith.constant 0 : index
    %2 = vector.load %arg3[%c0_3, %c0_4] : memref<1x16xf32, #tpu.memory_space<vmem>>, vector<1x16xf32>
    %3 = vector.broadcast %2 : vector<1x16xf32> to vector<256x16xf32>
    %4 = arith.mulf %1, %3 : vector<256x16xf32>
    %cst = arith.constant dense<0.000000e+00> : vector<256xf32>
    %5 = vector.multi_reduction <add>, %4, %cst [1] : vector<256x16xf32> to vector<256xf32>
    %6 = vector.shape_cast %5 : vector<256xf32> to vector<256x1xf32>
    %c0_5 = arith.constant 0 : index
    %c0_6 = arith.constant 0 : index
    %7 = vector.load %arg4[%c0_5, %c0_6] : memref<1x1xf32, #tpu.memory_space<vmem>>, vector<1x1xf32>
    %8 = vector.broadcast %7 : vector<1x1xf32> to vector<256x1xf32>
    %9 = arith.addf %6, %8 : vector<256x1xf32>
    %10 = arith.negf %9 : vector<256x1xf32>
    %11 = math.exp %10 : vector<256x1xf32>
    %cst_7 = arith.constant 1.000000e+00 : f32
    %12 = vector.broadcast %cst_7 : f32 to vector<256x1xf32>
    %13 = arith.addf %12, %11 : vector<256x1xf32>
    %14 = arith.divf %12, %13 : vector<256x1xf32>
    %15 = vector.broadcast %14 : vector<256x1xf32> to vector<256x16xf32>
    %16 = arith.mulf %0, %15 : vector<256x16xf32>
    %17 = arith.addf %16, %0 : vector<256x16xf32>
    %c0_8 = arith.constant 0 : index
    %c0_9 = arith.constant 0 : index
    %18 = vector.load %arg7[%c0_8, %c0_9] : memref<256x16xf32, #tpu.memory_space<vmem>>, vector<256x16xf32>
    tpu.vector_store %arg7[%c0_8, %c0_9], %17 {strides = array<i32>} : memref<256x16xf32, #tpu.memory_space<vmem>>, vector<256x16xf32>,
    %c0_10 = arith.constant 0 : index
    %c0_11 = arith.constant 0 : index
    %19 = vector.load %arg5[%c0_10, %c0_11] : memref<1x16xf32, #tpu.memory_space<vmem>>, vector<1x16xf32>
    %20 = vector.broadcast %19 : vector<1x16xf32> to vector<256x16xf32>
    %21 = arith.mulf %17, %20 : vector<256x16xf32>
    %cst_12 = arith.constant dense<0.000000e+00> : vector<256xf32>
    %22 = vector.multi_reduction <add>, %21, %cst_12 [1] : vector<256x16xf32> to vector<256xf32>
    %23 = vector.shape_cast %22 : vector<256xf32> to vector<256x1xf32>
    %c0_13 = arith.constant 0 : index
    %c0_14 = arith.constant 0 : index
    %24 = vector.load %arg6[%c0_13, %c0_14] : memref<1x1xf32, #tpu.memory_space<vmem>>, vector<1x1xf32>
    %25 = vector.broadcast %24 : vector<1x1xf32> to vector<256x1xf32>
    %26 = arith.addf %23, %25 : vector<256x1xf32>
    %cst_15 = arith.constant 0.000000e+00 : f32
    %27 = vector.broadcast %cst_15 : f32 to vector<256x1xf32>
    %28 = arith.maximumf %26, %27 : vector<256x1xf32>
    %c0_16 = arith.constant 0 : index
    %c0_17 = arith.constant 0 : index
    %29 = vector.load %arg8[%c0_16, %c0_17] : memref<256x1xf32, #tpu.memory_space<vmem>>, vector<256x1xf32>
    tpu.vector_store %arg8[%c0_16, %c0_17], %28 {strides = array<i32>} : memref<256x1xf32, #tpu.memory_space<vmem>>, vector<256x1xf32>,
    return
  }
  func.func @transform_0(%arg0: i32) -> (i32, i32) {
    %c0_i32 = arith.constant 0 : i32
    %c0_i32_0 = arith.constant 0 : i32
    return %arg0, %c0_i32 : i32, i32
  }
  func.func @transform_1(%arg0: i32) -> (i32, i32) {
    %c0_i32 = arith.constant 0 : i32
    %c0_i32_0 = arith.constant 0 : i32
    return %arg0, %c0_i32 : i32, i32
  }
  func.func @transform_2(%arg0: i32) -> (i32, i32) {
    %c0_i32 = arith.constant 0 : i32
    %c0_i32_0 = arith.constant 0 : i32
    %c0_i32_1 = arith.constant 0 : i32
    return %c0_i32, %c0_i32_0 : i32, i32
  }
  func.func @transform_3(%arg0: i32) -> (i32, i32) {
    %c0_i32 = arith.constant 0 : i32
    %c0_i32_0 = arith.constant 0 : i32
    %c0_i32_1 = arith.constant 0 : i32
    return %c0_i32, %c0_i32_0 : i32, i32
  }
  func.func @transform_4(%arg0: i32) -> (i32, i32) {
    %c0_i32 = arith.constant 0 : i32
    %c0_i32_0 = arith.constant 0 : i32
    %c0_i32_1 = arith.constant 0 : i32
    return %c0_i32, %c0_i32_0 : i32, i32
  }
  func.func @transform_5(%arg0: i32) -> (i32, i32) {
    %c0_i32 = arith.constant 0 : i32
    %c0_i32_0 = arith.constant 0 : i32
    %c0_i32_1 = arith.constant 0 : i32
    return %c0_i32, %c0_i32_0 : i32, i32
  }
  func.func @transform_6(%arg0: i32) -> (i32, i32) {
    %c0_i32 = arith.constant 0 : i32
    %c0_i32_0 = arith.constant 0 : i32
    return %arg0, %c0_i32 : i32, i32
  }
  func.func @transform_7(%arg0: i32) -> (i32, i32) {
    %c0_i32 = arith.constant 0 : i32
    %c0_i32_0 = arith.constant 0 : i32
    return %arg0, %c0_i32 : i32, i32
  }
}

module attributes {stable_mosaic.version = 11 : i64} {
  func.func @_mdsa_kernel(%arg0: i32, %arg1: memref<256x16xf32, #tpu.memory_space<vmem>>, %arg2: memref<256x16xf32, #tpu.memory_space<vmem>>, %arg3: memref<1x16xf32, #tpu.memory_space<vmem>>, %arg4: memref<1x1xf32, #tpu.memory_space<vmem>>, %arg5: memref<16x16xbf16, #tpu.memory_space<vmem>>, %arg6: memref<1x16xf32, #tpu.memory_space<vmem>>, %arg7: memref<256x16xf32, #tpu.memory_space<vmem>>) attributes {dimension_semantics = [#tpu.dimension_semantics<parallel>], iteration_bounds = array<i64: 2>, scalar_prefetch = 0 : i64, scratch_operands = 0 : i64, tpu.core_type = #tpu.core_type<tc>, window_params = [{transform_indices = @transform_0, window_bounds = array<i64: 256, 16>}, {transform_indices = @transform_1, window_bounds = array<i64: 256, 16>}, {pipeline_mode = #tpu.pipeline_mode<synchronous>, transform_indices = @transform_2, window_bounds = array<i64: 1, 16>}, {pipeline_mode = #tpu.pipeline_mode<synchronous>, transform_indices = @transform_3, window_bounds = array<i64: 1, 1>}, {pipeline_mode = #tpu.pipeline_mode<synchronous>, transform_indices = @transform_4, window_bounds = array<i64: 16, 16>}, {pipeline_mode = #tpu.pipeline_mode<synchronous>, transform_indices = @transform_5, window_bounds = array<i64: 1, 16>}, {transform_indices = @transform_6, window_bounds = array<i64: 256, 16>}]} {
    %c0 = arith.constant 0 : index
    %c0_0 = arith.constant 0 : index
    %0 = vector.load %arg1[%c0, %c0_0] : memref<256x16xf32, #tpu.memory_space<vmem>>, vector<256x16xf32>
    %c0_1 = arith.constant 0 : index
    %c0_2 = arith.constant 0 : index
    %1 = vector.load %arg2[%c0_1, %c0_2] : memref<256x16xf32, #tpu.memory_space<vmem>>, vector<256x16xf32>
    %c0_3 = arith.constant 0 : index
    %c0_4 = arith.constant 0 : index
    %2 = vector.load %arg3[%c0_3, %c0_4] : memref<1x16xf32, #tpu.memory_space<vmem>>, vector<1x16xf32>
    %3 = vector.broadcast %2 : vector<1x16xf32> to vector<256x16xf32>
    %4 = arith.mulf %1, %3 : vector<256x16xf32>
    %cst = arith.constant dense<0.000000e+00> : vector<256xf32>
    %5 = vector.multi_reduction <add>, %4, %cst [1] : vector<256x16xf32> to vector<256xf32>
    %6 = vector.shape_cast %5 : vector<256xf32> to vector<256x1xf32>
    %c0_5 = arith.constant 0 : index
    %c0_6 = arith.constant 0 : index
    %7 = vector.load %arg4[%c0_5, %c0_6] : memref<1x1xf32, #tpu.memory_space<vmem>>, vector<1x1xf32>
    %8 = vector.broadcast %7 : vector<1x1xf32> to vector<256x1xf32>
    %9 = arith.addf %6, %8 : vector<256x1xf32>
    %10 = arith.negf %9 : vector<256x1xf32>
    %11 = math.exp %10 : vector<256x1xf32>
    %cst_7 = arith.constant 1.000000e+00 : f32
    %12 = vector.broadcast %cst_7 : f32 to vector<256x1xf32>
    %13 = arith.addf %12, %11 : vector<256x1xf32>
    %14 = arith.divf %12, %13 : vector<256x1xf32>
    %15 = vector.broadcast %14 : vector<256x1xf32> to vector<256x16xf32>
    %16 = arith.mulf %0, %15 : vector<256x16xf32>
    %17 = arith.addf %16, %1 : vector<256x16xf32>
    %18 = arith.truncf %17 : vector<256x16xf32> to vector<256x16xbf16>
    %c0_8 = arith.constant 0 : index
    %c0_9 = arith.constant 0 : index
    %19 = vector.load %arg5[%c0_8, %c0_9] : memref<16x16xbf16, #tpu.memory_space<vmem>>, vector<16x16xbf16>
    %cst_10 = arith.constant dense<0.000000e+00> : vector<256x16xf32>
    %20 = tpu.matmul %18, %19, %cst_10 {dimension_numbers = #tpu.dot_dimension_numbers<[1], [0], [0], [1], [0, 0, 1, 1], [], []>} : vector<256x16xbf16>, vector<16x16xbf16>, vector<256x16xf32> -> vector<256x16xf32>
    %c0_11 = arith.constant 0 : index
    %c0_12 = arith.constant 0 : index
    %21 = vector.load %arg6[%c0_11, %c0_12] : memref<1x16xf32, #tpu.memory_space<vmem>>, vector<1x16xf32>
    %22 = vector.broadcast %21 : vector<1x16xf32> to vector<256x16xf32>
    %23 = arith.addf %20, %22 : vector<256x16xf32>
    %cst_13 = arith.constant 0.000000e+00 : f32
    %24 = vector.broadcast %cst_13 : f32 to vector<256x16xf32>
    %25 = arith.maximumf %23, %24 : vector<256x16xf32>
    %c0_14 = arith.constant 0 : index
    %c0_15 = arith.constant 0 : index
    %26 = vector.load %arg7[%c0_14, %c0_15] : memref<256x16xf32, #tpu.memory_space<vmem>>, vector<256x16xf32>
    tpu.vector_store %arg7[%c0_14, %c0_15], %25 {strides = array<i32>} : memref<256x16xf32, #tpu.memory_space<vmem>>, vector<256x16xf32>,
    return
  }
  func.func @transform_0(%arg0: i32) -> (i32, i32) {
    %c0_i32 = arith.constant 0 : i32
    %c0_i32_0 = arith.constant 0 : i32
    return %arg0, %c0_i32 : i32, i32
  }
  func.func @transform_1(%arg0: i32) -> (i32, i32) {
    %c0_i32 = arith.constant 0 : i32
    %c0_i32_0 = arith.constant 0 : i32
    return %arg0, %c0_i32 : i32, i32
  }
  func.func @transform_2(%arg0: i32) -> (i32, i32) {
    %c0_i32 = arith.constant 0 : i32
    %c0_i32_0 = arith.constant 0 : i32
    %c0_i32_1 = arith.constant 0 : i32
    return %c0_i32, %c0_i32_0 : i32, i32
  }
  func.func @transform_3(%arg0: i32) -> (i32, i32) {
    %c0_i32 = arith.constant 0 : i32
    %c0_i32_0 = arith.constant 0 : i32
    %c0_i32_1 = arith.constant 0 : i32
    return %c0_i32, %c0_i32_0 : i32, i32
  }
  func.func @transform_4(%arg0: i32) -> (i32, i32) {
    %c0_i32 = arith.constant 0 : i32
    %c0_i32_0 = arith.constant 0 : i32
    %c0_i32_1 = arith.constant 0 : i32
    return %c0_i32, %c0_i32_0 : i32, i32
  }
  func.func @transform_5(%arg0: i32) -> (i32, i32) {
    %c0_i32 = arith.constant 0 : i32
    %c0_i32_0 = arith.constant 0 : i32
    %c0_i32_1 = arith.constant 0 : i32
    return %c0_i32, %c0_i32_0 : i32, i32
  }
  func.func @transform_6(%arg0: i32) -> (i32, i32) {
    %c0_i32 = arith.constant 0 : i32
    %c0_i32_0 = arith.constant 0 : i32
    return %arg0, %c0_i32 : i32, i32
  }
}

module attributes {stable_mosaic.version = 11 : i64} {
  func.func @_msa_kernel(%arg0: i32, %arg1: memref<256x16xf32, #tpu.memory_space<vmem>>, %arg2: memref<256x4xf32, #tpu.memory_space<vmem>>, %arg3: memref<1x16xf32, #tpu.memory_space<vmem>>, %arg4: memref<1x1xf32, #tpu.memory_space<vmem>>, %arg5: memref<1x2xf32, #tpu.memory_space<vmem>>, %arg6: memref<4x2xf32, #tpu.memory_space<vmem>>, %arg7: memref<1x2xf32, #tpu.memory_space<vmem>>, %arg8: memref<256x2xf32, #tpu.memory_space<vmem>>) attributes {dimension_semantics = [#tpu.dimension_semantics<parallel>], iteration_bounds = array<i64: 2>, scalar_prefetch = 0 : i64, scratch_operands = 0 : i64, tpu.core_type = #tpu.core_type<tc>, window_params = [{transform_indices = @transform_0, window_bounds = array<i64: 256, 16>}, {transform_indices = @transform_1, window_bounds = array<i64: 256, 4>}, {pipeline_mode = #tpu.pipeline_mode<synchronous>, transform_indices = @transform_2, window_bounds = array<i64: 1, 16>}, {pipeline_mode = #tpu.pipeline_mode<synchronous>, transform_indices = @transform_3, window_bounds = array<i64: 1, 1>}, {pipeline_mode = #tpu.pipeline_mode<synchronous>, transform_indices = @transform_4, window_bounds = array<i64: 1, 2>}, {pipeline_mode = #tpu.pipeline_mode<synchronous>, transform_indices = @transform_5, window_bounds = array<i64: 4, 2>}, {pipeline_mode = #tpu.pipeline_mode<synchronous>, transform_indices = @transform_6, window_bounds = array<i64: 1, 2>}, {transform_indices = @transform_7, window_bounds = array<i64: 256, 2>}]} {
    %c0 = arith.constant 0 : index
    %c0_0 = arith.constant 0 : index
    %0 = vector.load %arg1[%c0, %c0_0] : memref<256x16xf32, #tpu.memory_space<vmem>>, vector<256x16xf32>
    %c0_1 = arith.constant 0 : index
    %c0_2 = arith.constant 0 : index
    %1 = vector.load %arg3[%c0_1, %c0_2] : memref<1x16xf32, #tpu.memory_space<vmem>>, vector<1x16xf32>
    %2 = vector.broadcast %1 : vector<1x16xf32> to vector<256x16xf32>
    %3 = arith.mulf %0, %2 : vector<256x16xf32>
    %cst = arith.constant dense<0.000000e+00> : vector<256xf32>
    %4 = vector.multi_reduction <add>, %3, %cst [1] : vector<256x16xf32> to vector<256xf32>
    %5 = vector.shape_cast %4 : vector<256xf32> to vector<256x1xf32>
    %c0_3 = arith.constant 0 : index
    %c0_4 = arith.constant 0 : index
    %6 = vector.load %arg4[%c0_3, %c0_4] : memref<1x1xf32, #tpu.memory_space<vmem>>, vector<1x1xf32>
    %7 = vector.broadcast %6 : vector<1x1xf32> to vector<256x1xf32>
    %8 = arith.addf %5, %7 : vector<256x1xf32>
    %cst_5 = arith.constant 0.000000e+00 : f32
    %9 = vector.broadcast %cst_5 : f32 to vector<256x1xf32>
    %10 = arith.maximumf %8, %9 : vector<256x1xf32>
    %c0_6 = arith.constant 0 : index
    %c0_7 = arith.constant 0 : index
    %11 = vector.load %arg5[%c0_6, %c0_7] : memref<1x2xf32, #tpu.memory_space<vmem>>, vector<1x2xf32>
    %12 = vector.broadcast %10 : vector<256x1xf32> to vector<256x2xf32>
    %13 = vector.broadcast %11 : vector<1x2xf32> to vector<256x2xf32>
    %14 = arith.mulf %12, %13 : vector<256x2xf32>
    %c0_8 = arith.constant 0 : index
    %c0_9 = arith.constant 0 : index
    %15 = vector.load %arg2[%c0_8, %c0_9] : memref<256x4xf32, #tpu.memory_space<vmem>>, vector<256x4xf32>
    %c0_10 = arith.constant 0 : index
    %c0_11 = arith.constant 0 : index
    %16 = vector.load %arg6[%c0_10, %c0_11] : memref<4x2xf32, #tpu.memory_space<vmem>>, vector<4x2xf32>
    %cst_12 = arith.constant dense<0.000000e+00> : vector<256x2xf32>
    %17 = tpu.matmul %15, %16, %cst_12 {dimension_numbers = #tpu.dot_dimension_numbers<[1], [0], [0], [1], [0, 0, 1, 1], [], []>} : vector<256x4xf32>, vector<4x2xf32>, vector<256x2xf32> -> vector<256x2xf32>
    %18 = arith.addf %14, %17 : vector<256x2xf32>
    %c0_13 = arith.constant 0 : index
    %c0_14 = arith.constant 0 : index
    %19 = vector.load %arg7[%c0_13, %c0_14] : memref<1x2xf32, #tpu.memory_space<vmem>>, vector<1x2xf32>
    %20 = vector.broadcast %19 : vector<1x2xf32> to vector<256x2xf32>
    %21 = arith.addf %18, %20 : vector<256x2xf32>
    %cst_15 = arith.constant dense<0xFF800000> : vector<256xf32>
    %22 = vector.multi_reduction <maximumf>, %21, %cst_15 [1] : vector<256x2xf32> to vector<256xf32>
    %23 = vector.shape_cast %22 : vector<256xf32> to vector<256x1xf32>
    %24 = vector.broadcast %23 : vector<256x1xf32> to vector<256x2xf32>
    %25 = arith.subf %21, %24 : vector<256x2xf32>
    %26 = math.exp %25 : vector<256x2xf32>
    %cst_16 = arith.constant dense<0.000000e+00> : vector<256xf32>
    %27 = vector.multi_reduction <add>, %26, %cst_16 [1] : vector<256x2xf32> to vector<256xf32>
    %28 = vector.shape_cast %27 : vector<256xf32> to vector<256x1xf32>
    %29 = vector.broadcast %28 : vector<256x1xf32> to vector<256x2xf32>
    %30 = arith.divf %26, %29 : vector<256x2xf32>
    %c0_17 = arith.constant 0 : index
    %c0_18 = arith.constant 0 : index
    %31 = vector.load %arg8[%c0_17, %c0_18] : memref<256x2xf32, #tpu.memory_space<vmem>>, vector<256x2xf32>
    tpu.vector_store %arg8[%c0_17, %c0_18], %30 {strides = array<i32>} : memref<256x2xf32, #tpu.memory_space<vmem>>, vector<256x2xf32>,
    return
  }
  func.func @transform_0(%arg0: i32) -> (i32, i32) {
    %c0_i32 = arith.constant 0 : i32
    %c0_i32_0 = arith.constant 0 : i32
    return %arg0, %c0_i32 : i32, i32
  }
  func.func @transform_1(%arg0: i32) -> (i32, i32) {
    %c0_i32 = arith.constant 0 : i32
    %c0_i32_0 = arith.constant 0 : i32
    return %arg0, %c0_i32 : i32, i32
  }
  func.func @transform_2(%arg0: i32) -> (i32, i32) {
    %c0_i32 = arith.constant 0 : i32
    %c0_i32_0 = arith.constant 0 : i32
    %c0_i32_1 = arith.constant 0 : i32
    return %c0_i32, %c0_i32_0 : i32, i32
  }
  func.func @transform_3(%arg0: i32) -> (i32, i32) {
    %c0_i32 = arith.constant 0 : i32
    %c0_i32_0 = arith.constant 0 : i32
    %c0_i32_1 = arith.constant 0 : i32
    return %c0_i32, %c0_i32_0 : i32, i32
  }
  func.func @transform_4(%arg0: i32) -> (i32, i32) {
    %c0_i32 = arith.constant 0 : i32
    %c0_i32_0 = arith.constant 0 : i32
    %c0_i32_1 = arith.constant 0 : i32
    return %c0_i32, %c0_i32_0 : i32, i32
  }
  func.func @transform_5(%arg0: i32) -> (i32, i32) {
    %c0_i32 = arith.constant 0 : i32
    %c0_i32_0 = arith.constant 0 : i32
    %c0_i32_1 = arith.constant 0 : i32
    return %c0_i32, %c0_i32_0 : i32, i32
  }
  func.func @transform_6(%arg0: i32) -> (i32, i32) {
    %c0_i32 = arith.constant 0 : i32
    %c0_i32_0 = arith.constant 0 : i32
    %c0_i32_1 = arith.constant 0 : i32
    return %c0_i32, %c0_i32_0 : i32, i32
  }
  func.func @transform_7(%arg0: i32) -> (i32, i32) {
    %c0_i32 = arith.constant 0 : i32
    %c0_i32_0 = arith.constant 0 : i32
    return %arg0, %c0_i32 : i32, i32
  }
}

</mosaic_0001>

<bundles_post_ra>
// kernel: insinet_forward.26
= control target key start
LH: loop header
LB: loop body
LE: loop exit
PB: predicated region body
PF: predicated region fallthrough
CT: control target
= control target key end

     0   :  { %s839_s12 = smov 0   ;;  %s1043_s0 = inlined_call_operand.vmem [shape: f32[1024,27], index: 0, kind: input, shape index: {}]   ;;  %s1044_s1 = inlined_call_operand.vmem [shape: bf16[27,16], index: 1, kind: input, shape index: {}]   ;;  %s1045_s2 = inlined_call_operand.vmem [shape: f32[1,16], index: 2, kind: input, shape index: {}]   ;;  %s1046_s3 = inlined_call_operand.vmem [shape: f32[1024,16], index: 3, kind: output, shape index: {}]  }
   0x1 LB: > { %s711_s13 = sadd.s32 4294967295, %s816_s12   ;;  %p715_p0 = scmp.ge.s32.totalorder %s816_s12, 1  ;;  %s816_s12 = sphi %s839_s12, %s13_s12  }
   0x2   : > { %p138_p1 = scmp.lt.s32.totalorder %s816_s12, 5 }
   0x4   : > { %p139_p2 = pnand %p715_p0, %p138_p1 }
   0x5   : > { %v808_v0 = vld [vmem:[%s1044_s1] sm:$0xff] (!%p139_p2)   ;;  %vm294_vm0 = vcmask (!%p139_p2), 1044480   ;;  %v809_v1 = vld [vmem:[%s1044_s1 + $0x8] sm:$0x3f] (!%p139_p2)   ;;  %vm295_vm1 = vcmask (!%p139_p2), 1045504   ;;  %s716_s18 = sshll.u32 (!%p139_p2), %s711_s13, 5 }
   0x6   : > { %142 = sbr.rel (%p139_p2) target bundleno = 285 (0x11d), region = 32  ;;  %759 = vmatprep.subr.bf16.mxu0 (!%p139_p2), %v808_v0  ;;  %795 = vmatprep.subr.bf16.mxu1 (!%p139_p2), %v808_v0  ;;  %v818_v2 = vmov (!%p139_p2), 65535   ;;  %p163_p3 = scmp.lt.s32.totalorder (!%p139_p2), %s716_s18, 127  ;;  %vm245_vm2 = vcmask (!%p139_p2), 220160   ;;  %v914_v54 = vld [vmem:[%s1045_s2] ss:$0 sm:$0xff] (!%p139_p2) }
   0x7   : > { %760 = vmatpush3.bf16.msra.mxu0 (!%p139_p2), %v808_v0  ;;  %797 = vmatpush3.bf16.msra.mxu1 (!%p139_p2), %v808_v0  ;;  %v296_v3 = vsel (!%p139_p2), %vm294_vm0, 4294967295, %v818_v2  ;;  %vm622_vm3 = vcmask (!%p139_p2), 130048  }
   0x8   : > { %v297_v4 = vsel (!%p139_p2), %vm295_vm1, %v296_v3, 0 }
   0x9   : > { %v299_v5 = vand.u32 (!%p139_p2), %v809_v1, %v297_v4 }
   0xb   : > { %761 = vmatprep.subr.bf16.mxu0 (!%p139_p2), %v299_v5  ;;  %796 = vmatprep.subr.bf16.mxu1 (!%p139_p2), %v299_v5 }
   0xc   : > { %762 = vmatpush3.bf16.msra.mxu0 (!%p139_p2), %v299_v5  ;;  %798 = vmatpush3.bf16.msra.mxu1 (!%p139_p2), %v299_v5 }
   0xd   : > { %s1048_s18 = smov (!%p163_p3, %s716_s18), 127 }
   0xe   : > { %s717_s19 = sshll.u32 %s1048_s18, 3 }
   0xf   : > { %s861_s22 = scalar_lea.vmem %s1043_s0, %s717_s19  ;;  %s929_s27 = scalar_lea.vmem %s1046_s3, %s717_s19 }
  0x10   : > { %v175_v6 = vld [vmem:[%s861_s22] sm:$0xff]  ;;  %v176_v7 = vld [vmem:[%s861_s22 + $0x8] sm:$0xff]  ;;  %v177_v11 = vld [vmem:[%s861_s22 + $0x10] sm:$0xff] }
  0x11   : > { %v191_v8 = vld [vmem:[%s861_s22 + $0x80] sm:$0xff]  ;;  %v207_v9 = vpack.c.bf16 %v176_v7, %v175_v6  ;;  %v192_v10 = vld [vmem:[%s861_s22 + $0x88] sm:$0xff]  ;;  %v178_v12 = vld [vmem:[%s861_s22 + $0x18] sm:$0xff] }
  0x12   : > { %v215_v13 = vpack.c.bf16 %v192_v10, %v191_v8  ;;  %v208_v14 = vpack.c.bf16 %v178_v12, %v177_v11  ;;  %v193_v15 = vld [vmem:[%s861_s22 + $0x90] sm:$0xff]  ;;  %v194_v16 = vld [vmem:[%s861_s22 + $0x98] sm:$0xff]  ;;  %v179_v17 = vld [vmem:[%s861_s22 + $0x20] sm:$0xff] }
  0x13   : > { %763 = vmatprep.mubr.msk.bf16.mxu0 %vm245_vm2, %v207_v9  ;;  %v216_v18 = vpack.c.bf16 %v194_v16, %v193_v15  ;;  %v180_v19 = vld [vmem:[%s861_s22 + $0x28] sm:$0xff]  ;;  %v195_v20 = vld [vmem:[%s861_s22 + $0xa0] sm:$0xff]  ;;  %v181_v24 = vld [vmem:[%s861_s22 + $0x30] sm:$0xff] }
  0x14   : > { %v196_v21 = vld [vmem:[%s861_s22 + $0xa8] sm:$0xff]  ;;  %779 = vmatprep.mubr.msk.bf16.mxu1 %vm245_vm2, %v215_v13  ;;  %764 = vmatmul.mubr.msk.bf16.vlgmr.msra.gmra.mrb[0].mxu0 %vm245_vm2, %v208_v14  ;;  %v209_v22 = vpack.c.bf16 %v180_v19, %v179_v17  ;;  %v182_v25 = vld [vmem:[%s861_s22 + $0x38] sm:$0xff]  ;;  %v197_v26 = vld [vmem:[%s861_s22 + $0xb0] sm:$0xff] }
  0x15   : > { %v217_v23 = vpack.c.bf16 %v196_v21, %v195_v20  ;;  %780 = vmatmul.mubr.msk.bf16.vlgmr.msra.gmra.mrb[0].mxu1 %vm245_vm2, %v216_v18  ;;  %v198_v27 = vld [vmem:[%s861_s22 + $0xb8] sm:$0xff]  ;;  %v183_v28 = vld [vmem:[%s861_s22 + $0x40] sm:$0xff]  ;;  %v184_v29 = vld [vmem:[%s861_s22 + $0x48] sm:$0xff]  ;;  %v210_v32 = vpack.c.bf16 %v182_v25, %v181_v24 }
  0x16   : > { %767 = vmatprep.mubr.msk.bf16.mxu0 %vm245_vm2, %v209_v22  ;;  %v199_v30 = vld [vmem:[%s861_s22 + $0xc0] sm:$0xff]  ;;  %v200_v31 = vld [vmem:[%s861_s22 + $0xc8] sm:$0xff]  ;;  %v218_v33 = vpack.c.bf16 %v198_v27, %v197_v26  ;;  %v211_v34 = vpack.c.bf16 %v184_v29, %v183_v28  ;;  %v185_v36 = vld [vmem:[%s861_s22 + $0x50] sm:$0xff] }
  0x17   : > { %783 = vmatprep.mubr.msk.bf16.mxu1 %vm245_vm2, %v217_v23  ;;  %v219_v35 = vpack.c.bf16 %v200_v31, %v199_v30  ;;  %v186_v37 = vld [vmem:[%s861_s22 + $0x58] sm:$0xff]  ;;  %v201_v38 = vld [vmem:[%s861_s22 + $0xd0] sm:$0xff]  ;;  %v187_v40 = vld [vmem:[%s861_s22 + $0x60] sm:$0xff] }
  0x18   : > { %v202_v39 = vld [vmem:[%s861_s22 + $0xd8] sm:$0xff]  ;;  %v188_v41 = vld [vmem:[%s861_s22 + $0x68] sm:$0xff]  ;;  %v203_v42 = vld [vmem:[%s861_s22 + $0xe0] sm:$0xff]  ;;  %v212_v44 = vpack.c.bf16 %v186_v37, %v185_v36 }
  0x19   : > { %v204_v43 = vld [vmem:[%s861_s22 + $0xe8] sm:$0xff]  ;;  %v220_v45 = vpack.c.bf16 %v202_v39, %v201_v38  ;;  %v213_v46 = vpack.c.bf16 %v188_v41, %v187_v40  ;;  %v189_v48 = vld [vmem:[%s861_s22 + $0x70] sm:$0xff]  ;;  %v190_v49 = vld [vmem:[%s861_s22 + $0x78] sm:$0xff] }
  0x1a   : > { %v221_v47 = vpack.c.bf16 %v204_v43, %v203_v42  ;;  %v205_v50 = vld [vmem:[%s861_s22 + $0xf0] sm:$0xff]  ;;  %v206_v51 = vld [vmem:[%s861_s22 + $0xf8] sm:$0xff]  ;;  %v214_v52 = vpack.c.bf16 %v190_v49, %v189_v48 }
  0x1b   : > { %v222_v53 = vpack.c.bf16 %v206_v51, %v205_v50 }
  0x1c   : > { %768 = vmatmul.mubr.msk.bf16.gmra.mrb[4].mxu0 %vm245_vm2, %v210_v32 }
  0x1d   : > { %784 = vmatmul.mubr.msk.bf16.gmra.mrb[4].mxu1 %vm245_vm2, %v218_v33  ;;  %771 = vmatprep.mubr.msk.bf16.mxu0 %vm245_vm2, %v211_v34 }
  0x1e   : > { %787 = vmatprep.mubr.msk.bf16.mxu1 %vm245_vm2, %v219_v35 }
  0x24   : > { %772 = vmatmul.mubr.msk.bf16.gmra.mrb[8].mxu0 %vm245_vm2, %v212_v44 }
  0x25   : > { %788 = vmatmul.mubr.msk.bf16.gmra.mrb[8].mxu1 %vm245_vm2, %v220_v45  ;;  %775 = vmatprep.mubr.msk.bf16.mxu0 %vm245_vm2, %v213_v46 }
  0x26   : > { %791 = vmatprep.mubr.msk.bf16.mxu1 %vm245_vm2, %v221_v47 }
  0x2c   : > { %776 = vmatmul.mubr.msk.bf16.gmra.mrb[12].mxu0 %vm245_vm2, %v214_v52 }
  0x2d   : > { %792 = vmatmul.mubr.msk.bf16.gmra.mrb[12].mxu1 %vm245_vm2, %v222_v53 }
  0xe7   : > { %v765_v55 = vpop.f32.mrb[0].mxu0 }
  0xe8   : > { %v344_v56 = vadd.f32 %v765_v55, %v914_v54  ;;  %v781_v57 = vpop.f32.mrb[0].mxu1  ;;  %v335_v58 = vpop.f32.mrb[1].mxu0 }
  0xe9   : > { %v408_v59 = vadd.f32 %v781_v57, %v914_v54  ;;  %v336_v60 = vadd.f32 %v914_v54, %v335_v58  ;;  %v399_v61 = vpop.f32.mrb[1].mxu1  ;;  %v766_v62 = vpop.f32.mrb[2].mxu0 }
  0xea   : > { %v464_v63 = vadd.f32 3.0, %v344_v56  ;;  %v400_v0 = vadd.f32 %v914_v54, %v399_v61  ;;  %v347_v1 = vadd.f32 %v766_v62, %v914_v54  ;;  %v782_v2 = vpop.f32.mrb[2].mxu1  ;;  %v338_v3 = vpop.f32.mrb[3].mxu0 }
  0xeb   : > { %v480_v4 = vadd.f32 3.0, %v408_v59  ;;  %v462_v5 = vadd.f32 3.0, %v336_v60  ;;  %v411_v6 = vadd.f32 %v782_v2, %v914_v54  ;;  %v339_v7 = vadd.f32 %v914_v54, %v338_v3  ;;  %v402_v8 = vpop.f32.mrb[3].mxu1 }
  0xec   : > { %v496_v9 = vmax.f32 %v464_v63, 0.0  ;;  %v478_v10 = vadd.f32 3.0, %v400_v0  ;;  %v465_v11 = vadd.f32 3.0, %v347_v1  ;;  %v403_v12 = vadd.f32 %v914_v54, %v402_v8 }
  0xed   : > { %v512_v13 = vmax.f32 %v480_v4, 0.0  ;;  %v494_v14 = vmax.f32 %v462_v5, 0.0  ;;  %v481_v15 = vadd.f32 3.0, %v411_v6  ;;  %v463_v16 = vadd.f32 3.0, %v339_v7 }
  0xee   : > { %v528_v17 = vmin.f32 %v496_v9, 6.0  ;;  %v510_v18 = vmax.f32 %v478_v10, 0.0  ;;  %v497_v19 = vmax.f32 %v465_v11, 0.0  ;;  %v479_v20 = vadd.f32 3.0, %v403_v12 }
  0xef   : > { %v544_v21 = vmin.f32 %v512_v13, 6.0  ;;  %v526_v22 = vmin.f32 %v494_v14, 6.0  ;;  %v513_v23 = vmax.f32 %v481_v15, 0.0  ;;  %v495_v24 = vmax.f32 %v463_v16, 0.0  ;;  %v769_v25 = vpop.f32.mrb[4].mxu0 }
  0xf0   : > { %v560_v26 = vmul.f32 %v528_v17, %v344_v56  ;;  %v542_v27 = vmin.f32 %v510_v18, 6.0  ;;  %v529_v28 = vmin.f32 %v497_v19, 6.0  ;;  %v511_v29 = vmax.f32 %v479_v20, 0.0  ;;  %v785_v30 = vpop.f32.mrb[4].mxu1  ;;  %v351_v31 = vpop.f32.mrb[5].mxu0 }
  0xf1   : > { %v576_v32 = vmul.f32 %v544_v21, %v408_v59  ;;  %v558_v33 = vmul.f32 %v526_v22, %v336_v60  ;;  %v545_v34 = vmin.f32 %v513_v23, 6.0  ;;  %v527_v35 = vmin.f32 %v495_v24, 6.0  ;;  %v415_v36 = vpop.f32.mrb[5].mxu1  ;;  %v770_v37 = vpop.f32.mrb[6].mxu0 }
  0xf2   : > { %v592_v38 = vmul.f32 0.16666667, %v560_v26  ;;  %v574_v39 = vmul.f32 %v542_v27, %v400_v0  ;;  %v561_v40 = vmul.f32 %v529_v28, %v347_v1  ;;  %v543_v41 = vmin.f32 %v511_v29, 6.0  ;;  %v786_v42 = vpop.f32.mrb[6].mxu1  ;;  %v354_v43 = vpop.f32.mrb[7].mxu0 }
  0xf3   : > { %v608_v44 = vmul.f32 0.16666667, %v576_v32  ;;  %v590_v45 = vmul.f32 0.16666667, %v558_v33  ;;  %v577_v46 = vmul.f32 %v545_v34, %v411_v6  ;;  %v559_v47 = vmul.f32 %v527_v35, %v339_v7  ;;  %v418_v48 = vpop.f32.mrb[7].mxu1 }
  0xf4   : > { %625 = vst.msk [vmem:[%s929_s27 + $0x10] sm:$0xff] %vm622_vm3, %v592_v38  ;;  %v606_v49 = vmul.f32 0.16666667, %v574_v39  ;;  %v593_v50 = vmul.f32 0.16666667, %v561_v40  ;;  %v575_v51 = vmul.f32 %v543_v41, %v403_v12  ;;  %v360_v52 = vadd.f32 %v769_v25, %v914_v54 }
  0xf5   : > { %641 = vst.msk [vmem:[%s929_s27 + $0x90] sm:$0xff] %vm622_vm3, %v608_v44  ;;  %623 = vst.msk [vmem:[%s929_s27] sm:$0xff] %vm622_vm3, %v590_v45  ;;  %v609_v53 = vmul.f32 0.16666667, %v577_v46  ;;  %v591_v55 = vmul.f32 0.16666667, %v559_v47  ;;  %v424_v56 = vadd.f32 %v785_v30, %v914_v54  ;;  %v352_v57 = vadd.f32 %v914_v54, %v351_v31 }
  0xf6   : > { %639 = vst.msk [vmem:[%s929_s27 + $0x80] sm:$0xff] %vm622_vm3, %v606_v49  ;;  %626 = vst.msk [vmem:[%s929_s27 + $0x18] sm:$0xff] %vm622_vm3, %v593_v50  ;;  %v607_v58 = vmul.f32 0.16666667, %v575_v51  ;;  %v468_v59 = vadd.f32 3.0, %v360_v52  ;;  %v416_v60 = vadd.f32 %v914_v54, %v415_v36  ;;  %v363_v61 = vadd.f32 %v770_v37, %v914_v54 }
  0xf7   : > { %642 = vst.msk [vmem:[%s929_s27 + $0x98] sm:$0xff] %vm622_vm3, %v609_v53  ;;  %624 = vst.msk [vmem:[%s929_s27 + $0x8] sm:$0xff] %vm622_vm3, %v591_v55  ;;  %v484_v62 = vadd.f32 3.0, %v424_v56  ;;  %v466_v63 = vadd.f32 3.0, %v352_v57  ;;  %v427_v0 = vadd.f32 %v786_v42, %v914_v54  ;;  %v355_v1 = vadd.f32 %v914_v54, %v354_v43  ;;  %v773_v2 = vpop.f32.mrb[8].mxu0 }
  0xf8   : > { %640 = vst.msk [vmem:[%s929_s27 + $0x88] sm:$0xff] %vm622_vm3, %v607_v58  ;;  %v500_v3 = vmax.f32 %v468_v59, 0.0  ;;  %v482_v4 = vadd.f32 3.0, %v416_v60  ;;  %v469_v5 = vadd.f32 3.0, %v363_v61  ;;  %v419_v6 = vadd.f32 %v914_v54, %v418_v48  ;;  %v789_v7 = vpop.f32.mrb[8].mxu1  ;;  %v367_v8 = vpop.f32.mrb[9].mxu0 }
  0xf9   : > { %v516_v9 = vmax.f32 %v484_v62, 0.0  ;;  %v498_v10 = vmax.f32 %v466_v63, 0.0  ;;  %v485_v11 = vadd.f32 3.0, %v427_v0  ;;  %v467_v12 = vadd.f32 3.0, %v355_v1  ;;  %v431_v13 = vpop.f32.mrb[9].mxu1  ;;  %v774_v14 = vpop.f32.mrb[10].mxu0 }
  0xfa   : > { %v532_v15 = vmin.f32 %v500_v3, 6.0  ;;  %v514_v16 = vmax.f32 %v482_v4, 0.0  ;;  %v501_v17 = vmax.f32 %v469_v5, 0.0  ;;  %v483_v18 = vadd.f32 3.0, %v419_v6  ;;  %v790_v19 = vpop.f32.mrb[10].mxu1  ;;  %v370_v20 = vpop.f32.mrb[11].mxu0 }
  0xfb   : > { %v548_v21 = vmin.f32 %v516_v9, 6.0  ;;  %v530_v22 = vmin.f32 %v498_v10, 6.0  ;;  %v517_v23 = vmax.f32 %v485_v11, 0.0  ;;  %v499_v24 = vmax.f32 %v467_v12, 0.0  ;;  %v434_v25 = vpop.f32.mrb[11].mxu1 }
  0xfc   : > { %v564_v26 = vmul.f32 %v532_v15, %v360_v52  ;;  %v546_v27 = vmin.f32 %v514_v16, 6.0  ;;  %v533_v28 = vmin.f32 %v501_v17, 6.0  ;;  %v515_v29 = vmax.f32 %v483_v18, 0.0 }
  0xfd   : > { %v580_v30 = vmul.f32 %v548_v21, %v424_v56  ;;  %v562_v31 = vmul.f32 %v530_v22, %v352_v57  ;;  %v549_v32 = vmin.f32 %v517_v23, 6.0  ;;  %v531_v33 = vmin.f32 %v499_v24, 6.0 }
  0xfe   : > { %v596_v34 = vmul.f32 0.16666667, %v564_v26  ;;  %v578_v35 = vmul.f32 %v546_v27, %v416_v60  ;;  %v565_v36 = vmul.f32 %v533_v28, %v363_v61  ;;  %v547_v37 = vmin.f32 %v515_v29, 6.0 }
  0xff   : > { %v612_v38 = vmul.f32 0.16666667, %v580_v30  ;;  %v594_v39 = vmul.f32 0.16666667, %v562_v31  ;;  %v581_v40 = vmul.f32 %v549_v32, %v427_v0  ;;  %v563_v41 = vmul.f32 %v531_v33, %v355_v1  ;;  %v955_v42 = vpop.f32.mrb[12].mxu0 }
 0x100   : > { %629 = vst.msk [vmem:[%s929_s27 + $0x30] sm:$0xff] %vm622_vm3, %v596_v34  ;;  %v610_v43 = vmul.f32 0.16666667, %v578_v35  ;;  %v597_v44 = vmul.f32 0.16666667, %v565_v36  ;;  %v579_v45 = vmul.f32 %v547_v37, %v419_v6  ;;  %v376_v46 = vadd.f32 %v773_v2, %v914_v54  ;;  %v960_v47 = vpop.f32.mrb[12].mxu1 }
 0x101   : > { %v962_v48 = vpop.f32.mrb[13].mxu0  ;;  %645 = vst.msk [vmem:[%s929_s27 + $0xb0] sm:$0xff] %vm622_vm3, %v612_v38  ;;  %627 = vst.msk [vmem:[%s929_s27 + $0x20] sm:$0xff] %vm622_vm3, %v594_v39  ;;  %v613_v49 = vmul.f32 0.16666667, %v581_v40  ;;  %v440_v51 = vadd.f32 %v789_v7, %v914_v54  ;;  %v368_v52 = vadd.f32 %v914_v54, %v367_v8  ;;  %v970_v53 = vpop.f32.mrb[13].mxu1  ;;  %v432_v58 = vadd.f32 %v914_v54, %v431_v13 }
 0x102   : > { %v595_v50 = vmul.f32 0.16666667, %v563_v41  ;;  %v972_v55 = vpop.f32.mrb[14].mxu0  ;;  %643 = vst.msk [vmem:[%s929_s27 + $0xa0] sm:$0xff] %vm622_vm3, %v610_v43  ;;  %630 = vst.msk [vmem:[%s929_s27 + $0x38] sm:$0xff] %vm622_vm3, %v597_v44  ;;  %v472_v57 = vadd.f32 3.0, %v376_v46  ;;  %v379_v59 = vadd.f32 %v774_v14, %v914_v54  ;;  %v443_v0 = vadd.f32 %v790_v19, %v914_v54 }
 0x103   : > { %v611_v56 = vmul.f32 0.16666667, %v579_v45  ;;  %v980_v60 = vpop.f32.mrb[14].mxu1  ;;  %v982_v61 = vpop.f32.mrb[15].mxu0  ;;  %646 = vst.msk [vmem:[%s929_s27 + $0xb8] sm:$0xff] %vm622_vm3, %v613_v49  ;;  %v488_v62 = vadd.f32 3.0, %v440_v51  ;;  %v371_v1 = vadd.f32 %v914_v54, %v370_v20  ;;  %v435_v6 = vadd.f32 %v914_v54, %v434_v25 }
 0x104   : > { %628 = vst.msk [vmem:[%s929_s27 + $0x28] sm:$0xff] %vm622_vm3, %v595_v50  ;;  %v470_v63 = vadd.f32 3.0, %v368_v52  ;;  %v450_v2 = vpop.f32.mrb[15].mxu1  ;;  %v504_v3 = vmax.f32 %v472_v57, 0.0  ;;  %v486_v4 = vadd.f32 3.0, %v432_v58  ;;  %v473_v5 = vadd.f32 3.0, %v379_v59 }
 0x105   : > { %644 = vst.msk [vmem:[%s929_s27 + $0xa8] sm:$0xff] %vm622_vm3, %v611_v56  ;;  %v520_v7 = vmax.f32 %v488_v62, 0.0  ;;  %v489_v9 = vadd.f32 3.0, %v443_v0  ;;  %v471_v10 = vadd.f32 3.0, %v371_v1  ;;  %v487_v14 = vadd.f32 3.0, %v435_v6 }
 0x106   : > { %v502_v8 = vmax.f32 %v470_v63, 0.0  ;;  %v536_v11 = vmin.f32 %v504_v3, 6.0  ;;  %v518_v12 = vmax.f32 %v486_v4, 0.0  ;;  %v505_v13 = vmax.f32 %v473_v5, 0.0 }
 0x107   : > { %v552_v15 = vmin.f32 %v520_v7, 6.0  ;;  %v521_v17 = vmax.f32 %v489_v9, 0.0  ;;  %v503_v18 = vmax.f32 %v471_v10, 0.0  ;;  %v519_v22 = vmax.f32 %v487_v14, 0.0 }
 0x108   : > { %v534_v16 = vmin.f32 %v502_v8, 6.0  ;;  %v568_v19 = vmul.f32 %v536_v11, %v376_v46  ;;  %v550_v20 = vmin.f32 %v518_v12, 6.0  ;;  %v537_v21 = vmin.f32 %v505_v13, 6.0 }
 0x109   : > { %v584_v23 = vmul.f32 %v552_v15, %v440_v51  ;;  %v553_v25 = vmin.f32 %v521_v17, 6.0  ;;  %v535_v26 = vmin.f32 %v503_v18, 6.0  ;;  %v551_v30 = vmin.f32 %v519_v22, 6.0 }
 0x10a   : > { %v566_v24 = vmul.f32 %v534_v16, %v368_v52  ;;  %v600_v27 = vmul.f32 0.16666667, %v568_v19  ;;  %v582_v28 = vmul.f32 %v550_v20, %v432_v58  ;;  %v569_v29 = vmul.f32 %v537_v21, %v379_v59 }
 0x10b   : > { %v616_v31 = vmul.f32 0.16666667, %v584_v23  ;;  %v585_v33 = vmul.f32 %v553_v25, %v443_v0  ;;  %v567_v34 = vmul.f32 %v535_v26, %v371_v1  ;;  %v583_v37 = vmul.f32 %v551_v30, %v435_v6 }
 0x10c   : > { %v598_v32 = vmul.f32 0.16666667, %v566_v24  ;;  %633 = vst.msk [vmem:[%s929_s27 + $0x50] sm:$0xff] %vm622_vm3, %v600_v27  ;;  %v614_v35 = vmul.f32 0.16666667, %v582_v28  ;;  %v392_v38 = vadd.f32 %v955_v42, %v914_v54  ;;  %v456_v41 = vadd.f32 %v960_v47, %v914_v54 }
 0x10d   : > { %v601_v36 = vmul.f32 0.16666667, %v569_v29  ;;  %649 = vst.msk [vmem:[%s929_s27 + $0xd0] sm:$0xff] %vm622_vm3, %v616_v31  ;;  %v617_v39 = vmul.f32 0.16666667, %v585_v33  ;;  %v384_v43 = vadd.f32 %v914_v54, %v962_v48  ;;  %v448_v42 = vadd.f32 %v914_v54, %v970_v53 }
 0x10e   : > { %631 = vst.msk [vmem:[%s929_s27 + $0x40] sm:$0xff] %vm622_vm3, %v598_v32  ;;  %v599_v40 = vmul.f32 0.16666667, %v567_v34  ;;  %647 = vst.msk [vmem:[%s929_s27 + $0xc0] sm:$0xff] %vm622_vm3, %v614_v35  ;;  %v615_v44 = vmul.f32 0.16666667, %v583_v37  ;;  %v395_v46 = vadd.f32 %v972_v55, %v914_v54  ;;  %v459_v48 = vadd.f32 %v980_v60, %v914_v54 }
 0x10f   : > { %634 = vst.msk [vmem:[%s929_s27 + $0x58] sm:$0xff] %vm622_vm3, %v601_v36  ;;  %v476_v45 = vadd.f32 3.0, %v392_v38  ;;  %650 = vst.msk [vmem:[%s929_s27 + $0xd8] sm:$0xff] %vm622_vm3, %v617_v39  ;;  %v492_v47 = vadd.f32 3.0, %v456_v41  ;;  %v474_v49 = vadd.f32 3.0, %v384_v43  ;;  %v387_v50 = vadd.f32 %v914_v54, %v982_v61 }
 0x110   : > { %632 = vst.msk [vmem:[%s929_s27 + $0x48] sm:$0xff] %vm622_vm3, %v599_v40  ;;  %648 = vst.msk [vmem:[%s929_s27 + $0xc8] sm:$0xff] %vm622_vm3, %v615_v44  ;;  %v490_v52 = vadd.f32 3.0, %v448_v42  ;;  %v477_v53 = vadd.f32 3.0, %v395_v46  ;;  %v451_v56 = vadd.f32 %v914_v54, %v450_v2  ;;  %v493_v58 = vadd.f32 3.0, %v459_v48 }
 0x111   : > { %v508_v51 = vmax.f32 %v476_v45, 0.0  ;;  %v524_v55 = vmax.f32 %v492_v47, 0.0  ;;  %v506_v57 = vmax.f32 %v474_v49, 0.0  ;;  %v475_v59 = vadd.f32 3.0, %v387_v50 }
 0x112   : > { %v522_v63 = vmax.f32 %v490_v52, 0.0  ;;  %v509_v0 = vmax.f32 %v477_v53, 0.0  ;;  %v491_v1 = vadd.f32 3.0, %v451_v56  ;;  %v525_v4 = vmax.f32 %v493_v58, 0.0 }
 0x113   : > { %v540_v62 = vmin.f32 %v508_v51, 6.0  ;;  %v556_v3 = vmin.f32 %v524_v55, 6.0  ;;  %v538_v60 = vmin.f32 %v506_v57, 6.0  ;;  %v507_v5 = vmax.f32 %v475_v59, 0.0 }
 0x114   : > { %v554_v6 = vmin.f32 %v522_v63, 6.0  ;;  %v541_v7 = vmin.f32 %v509_v0, 6.0  ;;  %v523_v8 = vmax.f32 %v491_v1, 0.0  ;;  %v557_v2 = vmin.f32 %v525_v4, 6.0 }
 0x115   : > { %v572_v61 = vmul.f32 %v540_v62, %v392_v38  ;;  %v588_v9 = vmul.f32 %v556_v3, %v456_v41  ;;  %v570_v54 = vmul.f32 %v538_v60, %v384_v43  ;;  %v539_v10 = vmin.f32 %v507_v5, 6.0 }
 0x116   : > { %v586_v12 = vmul.f32 %v554_v6, %v448_v42  ;;  %v573_v13 = vmul.f32 %v541_v7, %v395_v46  ;;  %v555_v14 = vmin.f32 %v523_v8, 6.0  ;;  %v589_v17 = vmul.f32 %v557_v2, %v459_v48 }
 0x117   : > { %v604_v11 = vmul.f32 0.16666667, %v572_v61  ;;  %v620_v15 = vmul.f32 0.16666667, %v588_v9  ;;  %v602_v16 = vmul.f32 0.16666667, %v570_v54  ;;  %v571_v18 = vmul.f32 %v539_v10, %v387_v50 }
 0x118   : > { %v618_v19 = vmul.f32 0.16666667, %v586_v12  ;;  %v605_v20 = vmul.f32 0.16666667, %v573_v13  ;;  %v587_v21 = vmul.f32 %v555_v14, %v451_v56  ;;  %v621_v22 = vmul.f32 0.16666667, %v589_v17 }
 0x119   : > { %637 = vst.msk [vmem:[%s929_s27 + $0x70] sm:$0xff] %vm622_vm3, %v604_v11  ;;  %653 = vst.msk [vmem:[%s929_s27 + $0xf0] sm:$0xff] %vm622_vm3, %v620_v15  ;;  %v603_v23 = vmul.f32 0.16666667, %v571_v18 }
 0x11a   : > { %635 = vst.msk [vmem:[%s929_s27 + $0x60] sm:$0xff] %vm622_vm3, %v602_v16  ;;  %651 = vst.msk [vmem:[%s929_s27 + $0xe0] sm:$0xff] %vm622_vm3, %v618_v19  ;;  %v619_v24 = vmul.f32 0.16666667, %v587_v21 }
 0x11b   : > { %638 = vst.msk [vmem:[%s929_s27 + $0x78] sm:$0xff] %vm622_vm3, %v605_v20  ;;  %654 = vst.msk [vmem:[%s929_s27 + $0xf8] sm:$0xff] %vm622_vm3, %v621_v22 }
 0x11c   : > { %636 = vst.msk [vmem:[%s929_s27 + $0x68] sm:$0xff] %vm622_vm3, %v603_v23  ;;  %652 = vst.msk [vmem:[%s929_s27 + $0xe8] sm:$0xff] %vm622_vm3, %v619_v24 }
 0x11d PF: > { %s13_s12 = sadd.s32 1, %s816_s12  }
 0x11e   : > { %p10_p4 = scmp.ge.s32.totalorder %s13_s12, 6  }
 0x120   :  { %12 = sbr.rel (!%p10_p4) target bundleno = 1 (0x1), region = 62 }

// kernel: insinet_forward.27
= control target key start
LH: loop header
LB: loop body
LE: loop exit
PB: predicated region body
PF: predicated region fallthrough
CT: control target
= control target key end

     0   :  { %s1474_s24 = smov 0   ;;  %s2104_s0 = inlined_call_operand.vmem [shape: f32[512,16], index: 0, kind: input, shape index: {}]   ;;  %s2105_s1 = inlined_call_operand.vmem [shape: f32[512,16], index: 1, kind: input, shape index: {}]   ;;  %s2106_s2 = inlined_call_operand.vmem [shape: bf16[16,16], index: 2, kind: input, shape index: {}]   ;;  %s2107_s3 = inlined_call_operand.vmem [shape: bf16[16,16], index: 3, kind: input, shape index: {}]   ;;  %s2108_s4 = inlined_call_operand.vmem [shape: f32[1,16], index: 4, kind: input, shape index: {}]   ;;  %s2109_s5 = inlined_call_operand.vmem [shape: f32[512,16], index: 5, kind: output, shape index: {0}]   ;;  %s2110_s6 = inlined_call_operand.vmem [shape: f32[512,16], index: 6, kind: output, shape index: {1}]   ;;  %s2111_s7 = inlined_call_operand.vmem [shape: f32[512,16], index: 7, kind: output, shape index: {2}]  }
   0x1 LB: > { %s1230_s25 = sadd.s32 4294967295, %s1432_s24   ;;  %p1234_p0 = scmp.ge.s32.totalorder %s1432_s24, 1  ;;  %s1432_s24 = sphi %s1474_s24, %s18_s24  }
   0x2   : > { %p254_p1 = scmp.lt.s32.totalorder %s1432_s24, 3 }
   0x4   : > { %p255_p2 = pnand %p1234_p0, %p254_p1 }
   0x6   : > { %258 = sbr.rel (%p255_p2) target bundleno = 305 (0x131), region = 40 }
   0xd   : > { %v1424_v0 = vld [vmem:[%s2107_s3] sm:$0xff]   ;;  %s1235_s28 = sshll.u32 %s1230_s25, 5  ;;  %vm438_vm0 = vcmask 130048  }
   0xe   : > { %v1425_v1 = vld [vmem:[%s2106_s2] sm:$0xff]   ;;  %p302_p3 = scmp.lt.s32.totalorder %s1235_s28, 63  ;;  %1316 = vmatprep.subr.bf16.mxu1 %v1424_v0 }
   0xf   : > { %1350 = vmatprep.subr.bf16.mxu0 %v1425_v1  ;;  %1317 = vmatpush3.bf16.msra.mxu1 %v1424_v0 }
  0x10   : > { %s2158_s28 = smov (!%p302_p3, %s1235_s28), 63  ;;  %1351 = vmatpush3.bf16.msra.mxu0 %v1425_v1 }
  0x11   : > { %s1488_s8 = sshll.u32 %s2158_s28, 3 }
  0x12   : > { %s1494_s11 = scalar_lea.vmem %s2105_s1, %s1488_s8  ;;  %s1500_s14 = scalar_lea.vmem %s2104_s0, %s1488_s8 }
  0x13   : > { %v1503_v2 = vld [vmem:[%s1494_s11] sm:$0xff]  ;;  %v1506_v3 = vld [vmem:[%s1494_s11 + $0x8] sm:$0xff]  ;;  %v1517_v7 = vld [vmem:[%s1494_s11 + $0x10] sm:$0xff]  ;;  %s1800_s19 = scalar_lea.vmem %s2111_s7, %s1488_s8  ;;  %s1808_s22 = scalar_lea.vmem %s2109_s5, %s1488_s8 }
  0x14   : > { %v1509_v4 = vld [vmem:[%s1500_s14] sm:$0xff]  ;;  %v414_v5 = vpack.c.bf16 %v1506_v3, %v1503_v2  ;;  %v1514_v6 = vld [vmem:[%s1500_s14 + $0x8] sm:$0xff]  ;;  %v1520_v8 = vld [vmem:[%s1494_s11 + $0x18] sm:$0xff]  ;;  %s1814_s26 = scalar_lea.vmem %s2110_s6, %s1488_s8 }
  0x15   : > { %v396_v9 = vpack.c.bf16 %v1514_v6, %v1509_v4  ;;  %v415_v10 = vpack.c.bf16 %v1520_v8, %v1517_v7  ;;  %v1527_v11 = vld [vmem:[%s1500_s14 + $0x10] sm:$0xff]  ;;  %v1530_v12 = vld [vmem:[%s1500_s14 + $0x18] sm:$0xff]  ;;  %v1533_v13 = vld [vmem:[%s1494_s11 + $0x20] sm:$0xff] }
  0x16   : > { %1318 = vmatprep.mubr.msk.bf16.mxu1 %vm438_vm0, %v414_v5  ;;  %v397_v14 = vpack.c.bf16 %v1530_v12, %v1527_v11  ;;  %v1539_v15 = vld [vmem:[%s1494_s11 + $0x28] sm:$0xff]  ;;  %v1542_v16 = vld [vmem:[%s1500_s14 + $0x20] sm:$0xff]  ;;  %v1555_v20 = vld [vmem:[%s1494_s11 + $0x30] sm:$0xff] }
  0x17   : > { %v1545_v17 = vld [vmem:[%s1500_s14 + $0x28] sm:$0xff]  ;;  %1352 = vmatprep.mubr.msk.bf16.mxu0 %vm438_vm0, %v396_v9  ;;  %1319 = vmatmul.mubr.msk.bf16.vlgmr.msra.gmra.mrb[0].mxu1 %vm438_vm0, %v415_v10  ;;  %v416_v18 = vpack.c.bf16 %v1539_v15, %v1533_v13  ;;  %v1558_v21 = vld [vmem:[%s1494_s11 + $0x38] sm:$0xff]  ;;  %v1561_v22 = vld [vmem:[%s1500_s14 + $0x30] sm:$0xff] }
  0x18   : > { %v398_v19 = vpack.c.bf16 %v1545_v17, %v1542_v16  ;;  %1353 = vmatmul.mubr.msk.bf16.vlgmr.msra.gmra.mrb[0].mxu0 %vm438_vm0, %v397_v14  ;;  %v1566_v23 = vld [vmem:[%s1500_s14 + $0x38] sm:$0xff]  ;;  %v1569_v24 = vld [vmem:[%s1494_s11 + $0x40] sm:$0xff]  ;;  %v1572_v25 = vld [vmem:[%s1494_s11 + $0x48] sm:$0xff]  ;;  %v417_v28 = vpack.c.bf16 %v1558_v21, %v1555_v20 }
  0x19   : > { %1322 = vmatprep.mubr.msk.bf16.mxu1 %vm438_vm0, %v416_v18  ;;  %v1575_v26 = vld [vmem:[%s1500_s14 + $0x40] sm:$0xff]  ;;  %v1578_v27 = vld [vmem:[%s1500_s14 + $0x48] sm:$0xff]  ;;  %v399_v29 = vpack.c.bf16 %v1566_v23, %v1561_v22  ;;  %v418_v30 = vpack.c.bf16 %v1572_v25, %v1569_v24  ;;  %v1592_v32 = vld [vmem:[%s1494_s11 + $0x50] sm:$0xff] }
  0x1a   : > { %1356 = vmatprep.mubr.msk.bf16.mxu0 %vm438_vm0, %v398_v19  ;;  %v400_v31 = vpack.c.bf16 %v1578_v27, %v1575_v26  ;;  %v1595_v33 = vld [vmem:[%s1494_s11 + $0x58] sm:$0xff]  ;;  %v1598_v34 = vld [vmem:[%s1500_s14 + $0x50] sm:$0xff]  ;;  %v1605_v36 = vld [vmem:[%s1494_s11 + $0x60] sm:$0xff] }
  0x1b   : > { %v1602_v35 = vld [vmem:[%s1500_s14 + $0x58] sm:$0xff]  ;;  %v1608_v37 = vld [vmem:[%s1494_s11 + $0x68] sm:$0xff]  ;;  %v1611_v38 = vld [vmem:[%s1500_s14 + $0x60] sm:$0xff]  ;;  %v419_v40 = vpack.c.bf16 %v1595_v33, %v1592_v32 }
  0x1c   : > { %v1614_v39 = vld [vmem:[%s1500_s14 + $0x68] sm:$0xff]  ;;  %v401_v41 = vpack.c.bf16 %v1602_v35, %v1598_v34  ;;  %v420_v42 = vpack.c.bf16 %v1608_v37, %v1605_v36  ;;  %v1628_v44 = vld [vmem:[%s1494_s11 + $0x70] sm:$0xff]  ;;  %v1631_v45 = vld [vmem:[%s1494_s11 + $0x78] sm:$0xff] }
  0x1d   : > { %v402_v43 = vpack.c.bf16 %v1614_v39, %v1611_v38  ;;  %v1634_v46 = vld [vmem:[%s1500_s14 + $0x70] sm:$0xff]  ;;  %v1638_v47 = vld [vmem:[%s1500_s14 + $0x78] sm:$0xff]  ;;  %v1641_v48 = vld [vmem:[%s1494_s11 + $0x80] sm:$0xff]  ;;  %v421_v52 = vpack.c.bf16 %v1631_v45, %v1628_v44 }
  0x1e   : > { %v1644_v49 = vld [vmem:[%s1494_s11 + $0x88] sm:$0xff]  ;;  %v1647_v50 = vld [vmem:[%s1500_s14 + $0x80] sm:$0xff]  ;;  %v403_v53 = vpack.c.bf16 %v1638_v47, %v1634_v46  ;;  %v1664_v56 = vld [vmem:[%s1494_s11 + $0x90] sm:$0xff] }
  0x1f   : > { %1323 = vmatmul.mubr.msk.bf16.gmra.mrb[4].mxu1 %vm438_vm0, %v417_v28  ;;  %v1650_v51 = vld [vmem:[%s1500_s14 + $0x88] sm:$0xff]  ;;  %v422_v54 = vpack.c.bf16 %v1644_v49, %v1641_v48  ;;  %v1667_v57 = vld [vmem:[%s1494_s11 + $0x98] sm:$0xff]  ;;  %v1670_v58 = vld [vmem:[%s1500_s14 + $0x90] sm:$0xff] }
  0x20   : > { %1357 = vmatmul.mubr.msk.bf16.gmra.mrb[4].mxu0 %vm438_vm0, %v399_v29  ;;  %1326 = vmatprep.mubr.msk.bf16.mxu1 %vm438_vm0, %v418_v30  ;;  %v404_v55 = vpack.c.bf16 %v1650_v51, %v1647_v50  ;;  %v1674_v59 = vld [vmem:[%s1500_s14 + $0x98] sm:$0xff]  ;;  %v1677_v60 = vld [vmem:[%s1494_s11 + $0xa0] sm:$0xff]  ;;  %v1680_v61 = vld [vmem:[%s1494_s11 + $0xa8] sm:$0xff]  ;;  %v423_v0 = vpack.c.bf16 %v1667_v57, %v1664_v56 }
  0x21   : > { %1360 = vmatprep.mubr.msk.bf16.mxu0 %vm438_vm0, %v400_v31  ;;  %v1683_v62 = vld [vmem:[%s1500_s14 + $0xa0] sm:$0xff]  ;;  %v1686_v63 = vld [vmem:[%s1500_s14 + $0xa8] sm:$0xff]  ;;  %v405_v1 = vpack.c.bf16 %v1674_v59, %v1670_v58  ;;  %v424_v5 = vpack.c.bf16 %v1680_v61, %v1677_v60  ;;  %v1700_v10 = vld [vmem:[%s1494_s11 + $0xb0] sm:$0xff] }
  0x22   : > { %v406_v9 = vpack.c.bf16 %v1686_v63, %v1683_v62  ;;  %v1703_v14 = vld [vmem:[%s1494_s11 + $0xb8] sm:$0xff]  ;;  %v1706_v18 = vld [vmem:[%s1500_s14 + $0xb0] sm:$0xff]  ;;  %v1713_v28 = vld [vmem:[%s1494_s11 + $0xc0] sm:$0xff] }
  0x23   : > { %v1710_v19 = vld [vmem:[%s1500_s14 + $0xb8] sm:$0xff]  ;;  %2127 = vst [vmem:[#allocation2_spill] sm:$0xff] %v1713_v28  ;;  %v1716_v29 = vld [vmem:[%s1494_s11 + $0xc8] sm:$0xff]  ;;  %v1719_v30 = vld [vmem:[%s1500_s14 + $0xc0] sm:$0xff] }
  0x24   : > { %2128 = vst [vmem:[#allocation3_spill] sm:$0xff] %v1716_v29  ;;  %2129 = vst [vmem:[#allocation4_spill] sm:$0xff] %v1719_v30  ;;  %v1722_v31 = vld [vmem:[%s1500_s14 + $0xc8] sm:$0xff] }
  0x25   : > { %2130 = vst [vmem:[#allocation5_spill] sm:$0xff] %v1722_v31 }
  0x27   : > { %1327 = vmatmul.mubr.msk.bf16.gmra.mrb[8].mxu1 %vm438_vm0, %v419_v40  ;;  %v425_v40 = vpack.c.bf16 %v1703_v14, %v1700_v10 }
  0x28   : > { %1361 = vmatmul.mubr.msk.bf16.gmra.mrb[8].mxu0 %vm438_vm0, %v401_v41  ;;  %1330 = vmatprep.mubr.msk.bf16.mxu1 %vm438_vm0, %v420_v42  ;;  %v407_v41 = vpack.c.bf16 %v1710_v19, %v1706_v18  ;;  %v426_v42 = vpack.c.bf16 %v1716_v29, %v1713_v28  ;;  %v1772_v29 = vld [vmem:[%s1494_s11 + $0xf0] sm:$0xff] }
  0x29   : > { %1364 = vmatprep.mubr.msk.bf16.mxu0 %vm438_vm0, %v402_v43  ;;  %v408_v43 = vpack.c.bf16 %v1722_v31, %v1719_v30  ;;  %2138 = vst [vmem:[#allocation13_spill] sm:$0xff] %v1772_v29  ;;  %v1775_v31 = vld [vmem:[%s1494_s11 + $0xf8] sm:$0xff] }
  0x2a   : > { %2139 = vst [vmem:[#allocation14_spill] sm:$0xff] %v1775_v31 }
  0x2f   : > { %1331 = vmatmul.mubr.msk.bf16.gmra.mrb[12].mxu1 %vm438_vm0, %v421_v52  ;;  %v1736_v52 = vld [vmem:[%s1494_s11 + $0xd0] sm:$0xff] }
  0x30   : > { %1365 = vmatmul.mubr.msk.bf16.gmra.mrb[12].mxu0 %vm438_vm0, %v403_v53  ;;  %1334 = vmatprep.mubr.msk.bf16.mxu1 %vm438_vm0, %v422_v54  ;;  %2131 = vst [vmem:[#allocation6_spill] sm:$0xff] %v1736_v52  ;;  %v1739_v53 = vld [vmem:[%s1494_s11 + $0xd8] sm:$0xff]  ;;  %v1742_v54 = vld [vmem:[%s1500_s14 + $0xd0] sm:$0xff] }
  0x31   : > { %1368 = vmatprep.mubr.msk.bf16.mxu0 %vm438_vm0, %v404_v55  ;;  %2132 = vst [vmem:[#allocation7_spill] sm:$0xff] %v1739_v53  ;;  %v1746_v55 = vld [vmem:[%s1500_s14 + $0xd8] sm:$0xff] }
  0x32   : > { %2133 = vst [vmem:[#allocation8_spill] sm:$0xff] %v1746_v55 }
  0x37   : > { %1335 = vmatmul.mubr.msk.bf16.gmra.mrb[16].mxu1 %vm438_vm0, %v423_v0  ;;  %v1749_v0 = vld [vmem:[%s1494_s11 + $0xe0] sm:$0xff] }
  0x38   : > { %1369 = vmatmul.mubr.msk.bf16.gmra.mrb[16].mxu0 %vm438_vm0, %v405_v1  ;;  %1338 = vmatprep.mubr.msk.bf16.mxu1 %vm438_vm0, %v424_v5  ;;  %2134 = vst [vmem:[#allocation9_spill] sm:$0xff] %v1749_v0  ;;  %v1752_v1 = vld [vmem:[%s1494_s11 + $0xe8] sm:$0xff]  ;;  %v1755_v5 = vld [vmem:[%s1500_s14 + $0xe0] sm:$0xff] }
  0x39   : > { %1372 = vmatprep.mubr.msk.bf16.mxu0 %vm438_vm0, %v406_v9  ;;  %2135 = vst [vmem:[#allocation10_spill] sm:$0xff] %v1752_v1  ;;  %2136 = vst [vmem:[#allocation11_spill] sm:$0xff] %v1755_v5  ;;  %v1758_v9 = vld [vmem:[%s1500_s14 + $0xe8] sm:$0xff] }
  0x3a   : > { %2137 = vst [vmem:[#allocation12_spill] sm:$0xff] %v1758_v9 }
  0x3f   : > { %1339 = vmatmul.mubr.msk.bf16.gmra.mrb[20].mxu1 %vm438_vm0, %v425_v40  ;;  %v427_v40 = vpack.c.bf16 %v1739_v53, %v1736_v52  ;;  %v1779_v53 = vld [vmem:[%s1500_s14 + $0xf0] sm:$0xff] }
  0x40   : > { %1373 = vmatmul.mubr.msk.bf16.gmra.mrb[20].mxu0 %vm438_vm0, %v407_v41  ;;  %1342 = vmatprep.mubr.msk.bf16.mxu1 %vm438_vm0, %v426_v42  ;;  %v409_v41 = vpack.c.bf16 %v1746_v55, %v1742_v54  ;;  %v428_v42 = vpack.c.bf16 %v1752_v1, %v1749_v0  ;;  %2140 = vst [vmem:[#allocation15_spill] sm:$0xff] %v1779_v53  ;;  %v1782_v55 = vld [vmem:[%s1500_s14 + $0xf8] sm:$0xff] }
  0x41   : > { %1376 = vmatprep.mubr.msk.bf16.mxu0 %vm438_vm0, %v408_v43  ;;  %v410_v43 = vpack.c.bf16 %v1758_v9, %v1755_v5  ;;  %2141 = vst [vmem:[#allocation16_spill] sm:$0xff] %v1782_v55  ;;  %v429_v1 = vpack.c.bf16 %v1775_v31, %v1772_v29 }
  0x47   : > { %1343 = vmatmul.mubr.msk.bf16.gmra.mrb[24].mxu1 %vm438_vm0, %v427_v40  ;;  %v411_v40 = vpack.c.bf16 %v1782_v55, %v1779_v53 }
  0x48   : > { %1377 = vmatmul.mubr.msk.bf16.gmra.mrb[24].mxu0 %vm438_vm0, %v409_v41  ;;  %1346 = vmatprep.mubr.msk.bf16.mxu1 %vm438_vm0, %v428_v42 }
  0x49   : > { %1380 = vmatprep.mubr.msk.bf16.mxu0 %vm438_vm0, %v410_v43  ;;  %v1793_v43 = vld [vmem:[%s2108_s4] ss:$0 sm:$0xff] }
  0x4f   : > { %1347 = vmatmul.mubr.msk.bf16.gmra.mrb[28].mxu1 %vm438_vm0, %v429_v1 }
  0x50   : > { %1381 = vmatmul.mubr.msk.bf16.gmra.mrb[28].mxu0 %vm438_vm0, %v411_v40 }
  0xea   : > { %v1320_v41 = vpop.f32.mrb[0].mxu1 }
  0xeb   : > { %v1354_v42 = vpop.f32.mrb[0].mxu0  ;;  %v521_v9 = vpop.f32.mrb[1].mxu1 }
  0xec   : > { %v745_v0 = vadd.f32 %v1354_v42, %v1320_v41  ;;  %v736_v31 = vpop.f32.mrb[1].mxu0  ;;  %v1321_v5 = vpop.f32.mrb[2].mxu1 }
  0xed   : > { %v737_v29 = vadd.f32 %v736_v31, %v521_v9  ;;  %v1355_v55 = vpop.f32.mrb[2].mxu0  ;;  %v524_v53 = vpop.f32.mrb[3].mxu1 }
  0xee   : > { %v872_v1 = vadd.f32 %v1793_v43, %v745_v0  ;;  %v748_v28 = vadd.f32 %v1355_v55, %v1321_v5  ;;  %v739_v40 = vpop.f32.mrb[3].mxu0 }
  0xef   : > { %v870_v30 = vadd.f32 %v1793_v43, %v737_v29  ;;  %v740_v52 = vadd.f32 %v739_v40, %v524_v53 }
  0xf0   : > { %v904_v41 = vmax.f32 %v872_v1, 0.0  ;;  %v873_v42 = vadd.f32 %v1793_v43, %v748_v28 }
  0xf1   : > { %v902_v31 = vmax.f32 %v870_v30, 0.0  ;;  %v871_v55 = vadd.f32 %v1793_v43, %v740_v52 }
  0xf2   : > { %v936_v29 = vadd.f32 %v904_v41, %v1527_v11  ;;  %v1000_v28 = vadd.f32 %v904_v41, %v1517_v7  ;;  %1064 = vst.msk [vmem:[%s1800_s19 + $0x10] sm:$0xff] %vm438_vm0, %v904_v41  ;;  %v905_v53 = vmax.f32 %v873_v42, 0.0  ;;  %v1324_v0 = vpop.f32.mrb[4].mxu1 }
  0xf3   : > { %v934_v5 = vadd.f32 %v902_v31, %v1509_v4  ;;  %v998_v9 = vadd.f32 %v902_v31, %v1503_v2  ;;  %1062 = vst.msk [vmem:[%s1800_s19] sm:$0xff] %vm438_vm0, %v902_v31  ;;  %v903_v30 = vmax.f32 %v871_v55, 0.0  ;;  %v1358_v52 = vpop.f32.mrb[4].mxu0  ;;  %v537_v1 = vpop.f32.mrb[5].mxu1 }
  0xf4   : > { %968 = vst.msk [vmem:[%s1808_s22 + $0x10] sm:$0xff] %vm438_vm0, %v936_v29  ;;  %1032 = vst.msk [vmem:[%s1814_s26 + $0x10] sm:$0xff] %vm438_vm0, %v1000_v28  ;;  %v937_v7 = vadd.f32 %v905_v53, %v1530_v12  ;;  %v1001_v11 = vadd.f32 %v905_v53, %v1520_v8  ;;  %v761_v4 = vadd.f32 %v1358_v52, %v1324_v0  ;;  %v752_v2 = vpop.f32.mrb[5].mxu0  ;;  %v1325_v40 = vpop.f32.mrb[6].mxu1 }
  0xf5   : > { %1065 = vst.msk [vmem:[%s1800_s19 + $0x18] sm:$0xff] %vm438_vm0, %v905_v53  ;;  %966 = vst.msk [vmem:[%s1808_s22] sm:$0xff] %vm438_vm0, %v934_v5  ;;  %v935_v41 = vadd.f32 %v903_v30, %v1514_v6  ;;  %v999_v42 = vadd.f32 %v903_v30, %v1506_v3  ;;  %v753_v12 = vadd.f32 %v752_v2, %v537_v1  ;;  %v1359_v31 = vpop.f32.mrb[6].mxu0  ;;  %v540_v8 = vpop.f32.mrb[7].mxu1 }
  0xf6   : > { %1030 = vst.msk [vmem:[%s1814_s26] sm:$0xff] %vm438_vm0, %v998_v9  ;;  %1063 = vst.msk [vmem:[%s1800_s19 + $0x8] sm:$0xff] %vm438_vm0, %v903_v30  ;;  %v876_v55 = vadd.f32 %v1793_v43, %v761_v4  ;;  %v764_v29 = vadd.f32 %v1359_v31, %v1325_v40  ;;  %v755_v28 = vpop.f32.mrb[7].mxu0 }
  0xf7   : > { %969 = vst.msk [vmem:[%s1808_s22 + $0x18] sm:$0xff] %vm438_vm0, %v937_v7  ;;  %1033 = vst.msk [vmem:[%s1814_s26 + $0x18] sm:$0xff] %vm438_vm0, %v1001_v11  ;;  %v874_v3 = vadd.f32 %v1793_v43, %v753_v12  ;;  %v756_v6 = vadd.f32 %v755_v28, %v540_v8 }
  0xf8   : > { %967 = vst.msk [vmem:[%s1808_s22 + $0x8] sm:$0xff] %vm438_vm0, %v935_v41  ;;  %1031 = vst.msk [vmem:[%s1814_s26 + $0x8] sm:$0xff] %vm438_vm0, %v999_v42  ;;  %v908_v53 = vmax.f32 %v876_v55, 0.0  ;;  %v877_v0 = vadd.f32 %v1793_v43, %v764_v29 }
  0xf9   : > { %v906_v5 = vmax.f32 %v874_v3, 0.0  ;;  %v875_v9 = vadd.f32 %v1793_v43, %v756_v6 }
  0xfa   : > { %v940_v30 = vadd.f32 %v908_v53, %v1561_v22  ;;  %v1004_v52 = vadd.f32 %v908_v53, %v1555_v20  ;;  %1068 = vst.msk [vmem:[%s1800_s19 + $0x30] sm:$0xff] %vm438_vm0, %v908_v53  ;;  %v909_v1 = vmax.f32 %v877_v0, 0.0  ;;  %v1328_v7 = vpop.f32.mrb[8].mxu1 }
  0xfb   : > { %v938_v11 = vadd.f32 %v906_v5, %v1542_v16  ;;  %v1002_v4 = vadd.f32 %v906_v5, %v1533_v13  ;;  %1066 = vst.msk [vmem:[%s1800_s19 + $0x20] sm:$0xff] %vm438_vm0, %v906_v5  ;;  %v907_v2 = vmax.f32 %v875_v9, 0.0  ;;  %v1362_v40 = vpop.f32.mrb[8].mxu0  ;;  %v553_v41 = vpop.f32.mrb[9].mxu1 }
  0xfc   : > { %972 = vst.msk [vmem:[%s1808_s22 + $0x30] sm:$0xff] %vm438_vm0, %v940_v30  ;;  %1036 = vst.msk [vmem:[%s1814_s26 + $0x30] sm:$0xff] %vm438_vm0, %v1004_v52  ;;  %v941_v20 = vadd.f32 %v909_v1, %v1566_v23  ;;  %v1005_v22 = vadd.f32 %v909_v1, %v1558_v21  ;;  %v777_v16 = vadd.f32 %v1362_v40, %v1328_v7  ;;  %v768_v13 = vpop.f32.mrb[9].mxu0  ;;  %v1329_v42 = vpop.f32.mrb[10].mxu1 }
  0xfd   : > { %1069 = vst.msk [vmem:[%s1800_s19 + $0x38] sm:$0xff] %vm438_vm0, %v909_v1  ;;  %970 = vst.msk [vmem:[%s1808_s22 + $0x20] sm:$0xff] %vm438_vm0, %v938_v11  ;;  %v939_v12 = vadd.f32 %v907_v2, %v1545_v17  ;;  %v1003_v31 = vadd.f32 %v907_v2, %v1539_v15  ;;  %v769_v23 = vadd.f32 %v768_v13, %v553_v41  ;;  %v1363_v8 = vpop.f32.mrb[10].mxu0  ;;  %v556_v21 = vpop.f32.mrb[11].mxu1 }
  0xfe   : > { %1034 = vst.msk [vmem:[%s1814_s26 + $0x20] sm:$0xff] %vm438_vm0, %v1002_v4  ;;  %1067 = vst.msk [vmem:[%s1800_s19 + $0x28] sm:$0xff] %vm438_vm0, %v907_v2  ;;  %v880_v55 = vadd.f32 %v1793_v43, %v777_v16  ;;  %v780_v29 = vadd.f32 %v1363_v8, %v1329_v42  ;;  %v771_v28 = vpop.f32.mrb[11].mxu0 }
  0xff   : > { %973 = vst.msk [vmem:[%s1808_s22 + $0x38] sm:$0xff] %vm438_vm0, %v941_v20  ;;  %1037 = vst.msk [vmem:[%s1814_s26 + $0x38] sm:$0xff] %vm438_vm0, %v1005_v22  ;;  %v878_v15 = vadd.f32 %v1793_v43, %v769_v23  ;;  %v772_v17 = vadd.f32 %v771_v28, %v556_v21 }
 0x100   : > { %971 = vst.msk [vmem:[%s1808_s22 + $0x28] sm:$0xff] %vm438_vm0, %v939_v12  ;;  %1035 = vst.msk [vmem:[%s1814_s26 + $0x28] sm:$0xff] %vm438_vm0, %v1003_v31  ;;  %v912_v3 = vmax.f32 %v880_v55, 0.0  ;;  %v881_v6 = vadd.f32 %v1793_v43, %v780_v29 }
 0x101   : > { %v910_v53 = vmax.f32 %v878_v15, 0.0  ;;  %v879_v0 = vadd.f32 %v1793_v43, %v772_v17 }
 0x102   : > { %v944_v5 = vadd.f32 %v912_v3, %v1598_v34  ;;  %v1008_v9 = vadd.f32 %v912_v3, %v1592_v32  ;;  %1072 = vst.msk [vmem:[%s1800_s19 + $0x50] sm:$0xff] %vm438_vm0, %v912_v3  ;;  %v913_v30 = vmax.f32 %v881_v6, 0.0  ;;  %v1332_v52 = vpop.f32.mrb[12].mxu1 }
 0x103   : > { %v942_v1 = vadd.f32 %v910_v53, %v1575_v26  ;;  %v1006_v7 = vadd.f32 %v910_v53, %v1569_v24  ;;  %1070 = vst.msk [vmem:[%s1800_s19 + $0x40] sm:$0xff] %vm438_vm0, %v910_v53  ;;  %v911_v11 = vmax.f32 %v879_v0, 0.0  ;;  %v1366_v4 = vpop.f32.mrb[12].mxu0  ;;  %v569_v2 = vpop.f32.mrb[13].mxu1 }
 0x104   : > { %976 = vst.msk [vmem:[%s1808_s22 + $0x50] sm:$0xff] %vm438_vm0, %v944_v5  ;;  %1040 = vst.msk [vmem:[%s1814_s26 + $0x50] sm:$0xff] %vm438_vm0, %v1008_v9  ;;  %v945_v32 = vadd.f32 %v913_v30, %v1602_v35  ;;  %v1009_v34 = vadd.f32 %v913_v30, %v1595_v33  ;;  %v793_v26 = vadd.f32 %v1366_v4, %v1332_v52  ;;  %v784_v24 = vpop.f32.mrb[13].mxu0  ;;  %v1333_v40 = vpop.f32.mrb[14].mxu1 }
 0x105   : > { %1073 = vst.msk [vmem:[%s1800_s19 + $0x58] sm:$0xff] %vm438_vm0, %v913_v30  ;;  %974 = vst.msk [vmem:[%s1808_s22 + $0x40] sm:$0xff] %vm438_vm0, %v942_v1  ;;  %v943_v41 = vadd.f32 %v911_v11, %v1578_v27  ;;  %v1007_v20 = vadd.f32 %v911_v11, %v1572_v25  ;;  %v785_v35 = vadd.f32 %v784_v24, %v569_v2  ;;  %v1367_v22 = vpop.f32.mrb[14].mxu0  ;;  %v572_v33 = vpop.f32.mrb[15].mxu1 }
 0x106   : > { %1038 = vst.msk [vmem:[%s1814_s26 + $0x40] sm:$0xff] %vm438_vm0, %v1006_v7  ;;  %1071 = vst.msk [vmem:[%s1800_s19 + $0x48] sm:$0xff] %vm438_vm0, %v911_v11  ;;  %v884_v16 = vadd.f32 %v1793_v43, %v793_v26  ;;  %v796_v13 = vadd.f32 %v1367_v22, %v1333_v40  ;;  %v787_v42 = vpop.f32.mrb[15].mxu0 }
 0x107   : > { %977 = vst.msk [vmem:[%s1808_s22 + $0x58] sm:$0xff] %vm438_vm0, %v945_v32  ;;  %1041 = vst.msk [vmem:[%s1814_s26 + $0x58] sm:$0xff] %vm438_vm0, %v1009_v34  ;;  %v882_v25 = vadd.f32 %v1793_v43, %v785_v35  ;;  %v788_v27 = vadd.f32 %v787_v42, %v572_v33 }
 0x108   : > { %975 = vst.msk [vmem:[%s1808_s22 + $0x48] sm:$0xff] %vm438_vm0, %v943_v41  ;;  %1039 = vst.msk [vmem:[%s1814_s26 + $0x48] sm:$0xff] %vm438_vm0, %v1007_v20  ;;  %v916_v12 = vmax.f32 %v884_v16, 0.0  ;;  %v885_v31 = vadd.f32 %v1793_v43, %v796_v13 }
 0x109   : > { %v914_v23 = vmax.f32 %v882_v25, 0.0  ;;  %v883_v8 = vadd.f32 %v1793_v43, %v788_v27 }
 0x10a   : > { %v948_v21 = vadd.f32 %v916_v12, %v1634_v46  ;;  %v1012_v55 = vadd.f32 %v916_v12, %v1628_v44  ;;  %1076 = vst.msk [vmem:[%s1800_s19 + $0x70] sm:$0xff] %vm438_vm0, %v916_v12  ;;  %v917_v29 = vmax.f32 %v885_v31, 0.0  ;;  %v1336_v28 = vpop.f32.mrb[16].mxu1 }
 0x10b   : > { %v946_v15 = vadd.f32 %v914_v23, %v1611_v38  ;;  %v1010_v17 = vadd.f32 %v914_v23, %v1605_v36  ;;  %1074 = vst.msk [vmem:[%s1800_s19 + $0x60] sm:$0xff] %vm438_vm0, %v914_v23  ;;  %v915_v3 = vmax.f32 %v883_v8, 0.0  ;;  %v1370_v6 = vpop.f32.mrb[16].mxu0  ;;  %v585_v53 = vpop.f32.mrb[17].mxu1 }
 0x10c   : > { %980 = vst.msk [vmem:[%s1808_s22 + $0x70] sm:$0xff] %vm438_vm0, %v948_v21  ;;  %1044 = vst.msk [vmem:[%s1814_s26 + $0x70] sm:$0xff] %vm438_vm0, %v1012_v55  ;;  %v949_v44 = vadd.f32 %v917_v29, %v1638_v47  ;;  %v1013_v46 = vadd.f32 %v917_v29, %v1631_v45  ;;  %v809_v38 = vadd.f32 %v1370_v6, %v1336_v28  ;;  %v800_v36 = vpop.f32.mrb[17].mxu0  ;;  %v1337_v0 = vpop.f32.mrb[18].mxu1 }
 0x10d   : > { %1077 = vst.msk [vmem:[%s1800_s19 + $0x78] sm:$0xff] %vm438_vm0, %v917_v29  ;;  %978 = vst.msk [vmem:[%s1808_s22 + $0x60] sm:$0xff] %vm438_vm0, %v946_v15  ;;  %v947_v5 = vadd.f32 %v915_v3, %v1614_v39  ;;  %v1011_v9 = vadd.f32 %v915_v3, %v1608_v37  ;;  %v801_v47 = vadd.f32 %v800_v36, %v585_v53  ;;  %v1371_v30 = vpop.f32.mrb[18].mxu0  ;;  %v588_v45 = vpop.f32.mrb[19].mxu1 }
 0x10e   : > { %1042 = vst.msk [vmem:[%s1814_s26 + $0x60] sm:$0xff] %vm438_vm0, %v1010_v17  ;;  %1075 = vst.msk [vmem:[%s1800_s19 + $0x68] sm:$0xff] %vm438_vm0, %v915_v3  ;;  %v888_v52 = vadd.f32 %v1793_v43, %v809_v38  ;;  %v812_v1 = vadd.f32 %v1371_v30, %v1337_v0  ;;  %v803_v7 = vpop.f32.mrb[19].mxu0 }
 0x10f   : > { %981 = vst.msk [vmem:[%s1808_s22 + $0x78] sm:$0xff] %vm438_vm0, %v949_v44  ;;  %1045 = vst.msk [vmem:[%s1814_s26 + $0x78] sm:$0xff] %vm438_vm0, %v1013_v46  ;;  %v886_v37 = vadd.f32 %v1793_v43, %v801_v47  ;;  %v804_v39 = vadd.f32 %v803_v7, %v588_v45 }
 0x110   : > { %979 = vst.msk [vmem:[%s1808_s22 + $0x68] sm:$0xff] %vm438_vm0, %v947_v5  ;;  %1043 = vst.msk [vmem:[%s1814_s26 + $0x68] sm:$0xff] %vm438_vm0, %v1011_v9  ;;  %v920_v11 = vmax.f32 %v888_v52, 0.0  ;;  %v889_v4 = vadd.f32 %v1793_v43, %v812_v1 }
 0x111   : > { %v918_v2 = vmax.f32 %v886_v37, 0.0  ;;  %v887_v32 = vadd.f32 %v1793_v43, %v804_v39  ;;  %v2142_v39 = vld [vmem:[#allocation6_spill] sm:$0xff] }
 0x112   : > { %v952_v34 = vadd.f32 %v920_v11, %v1670_v58  ;;  %v1016_v26 = vadd.f32 %v920_v11, %v1664_v56  ;;  %1080 = vst.msk [vmem:[%s1800_s19 + $0x90] sm:$0xff] %vm438_vm0, %v920_v11  ;;  %v921_v24 = vmax.f32 %v889_v4, 0.0  ;;  %v1340_v40 = vpop.f32.mrb[20].mxu1 }
 0x113   : > { %v950_v41 = vadd.f32 %v918_v2, %v1647_v50  ;;  %v1014_v20 = vadd.f32 %v918_v2, %v1641_v48  ;;  %1078 = vst.msk [vmem:[%s1800_s19 + $0x80] sm:$0xff] %vm438_vm0, %v918_v2  ;;  %v919_v35 = vmax.f32 %v887_v32, 0.0  ;;  %v1374_v22 = vpop.f32.mrb[20].mxu0  ;;  %v601_v33 = vpop.f32.mrb[21].mxu1  ;;  %v2143_v32 = vld [vmem:[#allocation4_spill] sm:$0xff] }
 0x114   : > { %984 = vst.msk [vmem:[%s1808_s22 + $0x90] sm:$0xff] %vm438_vm0, %v952_v34  ;;  %1048 = vst.msk [vmem:[%s1814_s26 + $0x90] sm:$0xff] %vm438_vm0, %v1016_v26  ;;  %v953_v56 = vadd.f32 %v921_v24, %v1674_v59  ;;  %v1017_v58 = vadd.f32 %v921_v24, %v1667_v57  ;;  %v825_v50 = vadd.f32 %v1374_v22, %v1340_v40  ;;  %v816_v48 = vpop.f32.mrb[21].mxu0  ;;  %v1341_v16 = vpop.f32.mrb[22].mxu1  ;;  %v2144_v26 = vld [vmem:[#allocation2_spill] sm:$0xff]  ;;  %v2146_v22 = vld [vmem:[#allocation7_spill] sm:$0xff] }
 0x115   : > { %1081 = vst.msk [vmem:[%s1800_s19 + $0x98] sm:$0xff] %vm438_vm0, %v921_v24  ;;  %982 = vst.msk [vmem:[%s1808_s22 + $0x80] sm:$0xff] %vm438_vm0, %v950_v41  ;;  %v951_v13 = vadd.f32 %v919_v35, %v1650_v51  ;;  %v1015_v42 = vadd.f32 %v919_v35, %v1644_v49  ;;  %v817_v59 = vadd.f32 %v816_v48, %v601_v33  ;;  %v1375_v25 = vpop.f32.mrb[22].mxu0  ;;  %v604_v57 = vpop.f32.mrb[23].mxu1  ;;  %v2147_v48 = vld [vmem:[#allocation5_spill] sm:$0xff] }
 0x116   : > { %1046 = vst.msk [vmem:[%s1814_s26 + $0x80] sm:$0xff] %vm438_vm0, %v1014_v20  ;;  %1079 = vst.msk [vmem:[%s1800_s19 + $0x88] sm:$0xff] %vm438_vm0, %v919_v35  ;;  %v892_v27 = vadd.f32 %v1793_v43, %v825_v50  ;;  %v828_v12 = vadd.f32 %v1375_v25, %v1341_v16  ;;  %v819_v31 = vpop.f32.mrb[23].mxu0 }
 0x117   : > { %985 = vst.msk [vmem:[%s1808_s22 + $0x98] sm:$0xff] %vm438_vm0, %v953_v56  ;;  %1049 = vst.msk [vmem:[%s1814_s26 + $0x98] sm:$0xff] %vm438_vm0, %v1017_v58  ;;  %v890_v49 = vadd.f32 %v1793_v43, %v817_v59  ;;  %v820_v51 = vadd.f32 %v819_v31, %v604_v57 }
 0x118   : > { %983 = vst.msk [vmem:[%s1808_s22 + $0x88] sm:$0xff] %vm438_vm0, %v951_v13  ;;  %1047 = vst.msk [vmem:[%s1814_s26 + $0x88] sm:$0xff] %vm438_vm0, %v1015_v42  ;;  %v924_v23 = vmax.f32 %v892_v27, 0.0  ;;  %v893_v8 = vadd.f32 %v1793_v43, %v828_v12  ;;  %v2148_v13 = vld [vmem:[#allocation3_spill] sm:$0xff] }
 0x119   : > { %v922_v21 = vmax.f32 %v890_v49, 0.0  ;;  %v891_v55 = vadd.f32 %v1793_v43, %v820_v51 }
 0x11a   : > { %v956_v29 = vadd.f32 %v924_v23, %v1706_v18  ;;  %v1020_v28 = vadd.f32 %v924_v23, %v1700_v10  ;;  %1084 = vst.msk [vmem:[%s1800_s19 + $0xb0] sm:$0xff] %vm438_vm0, %v924_v23  ;;  %v925_v15 = vmax.f32 %v893_v8, 0.0  ;;  %v1344_v17 = vpop.f32.mrb[24].mxu1 }
 0x11b   : > { %v954_v3 = vadd.f32 %v922_v21, %v1683_v62  ;;  %v1018_v6 = vadd.f32 %v922_v21, %v1677_v60  ;;  %1082 = vst.msk [vmem:[%s1800_s19 + $0xa0] sm:$0xff] %vm438_vm0, %v922_v21  ;;  %v923_v53 = vmax.f32 %v891_v55, 0.0  ;;  %v1378_v44 = vpop.f32.mrb[24].mxu0  ;;  %v617_v46 = vpop.f32.mrb[25].mxu1 }
 0x11c   : > { %988 = vst.msk [vmem:[%s1808_s22 + $0xb0] sm:$0xff] %vm438_vm0, %v956_v29  ;;  %1052 = vst.msk [vmem:[%s1814_s26 + $0xb0] sm:$0xff] %vm438_vm0, %v1020_v28  ;;  %v957_v10 = vadd.f32 %v925_v15, %v1710_v19  ;;  %v1021_v18 = vadd.f32 %v925_v15, %v1703_v14  ;;  %v841_v62 = vadd.f32 %v1378_v44, %v1344_v17  ;;  %v832_v60 = vpop.f32.mrb[25].mxu0  ;;  %v1345_v38 = vpop.f32.mrb[26].mxu1  ;;  %v2149_v29 = vld [vmem:[#allocation15_spill] sm:$0xff]  ;;  %v2152_v44 = vld [vmem:[#allocation9_spill] sm:$0xff] }
 0x11d   : > { %1085 = vst.msk [vmem:[%s1800_s19 + $0xb8] sm:$0xff] %vm438_vm0, %v925_v15  ;;  %986 = vst.msk [vmem:[%s1808_s22 + $0xa0] sm:$0xff] %vm438_vm0, %v954_v3  ;;  %v955_v36 = vadd.f32 %v923_v53, %v1686_v63  ;;  %v1019_v0 = vadd.f32 %v923_v53, %v1680_v61  ;;  %v833_v19 = vadd.f32 %v832_v60, %v617_v46  ;;  %v1379_v5 = vpop.f32.mrb[26].mxu0  ;;  %v620_v14 = vpop.f32.mrb[27].mxu1  ;;  %v2150_v15 = vld [vmem:[#allocation13_spill] sm:$0xff] }
 0x11e   : > { %1050 = vst.msk [vmem:[%s1814_s26 + $0xa0] sm:$0xff] %vm438_vm0, %v1018_v6  ;;  %1083 = vst.msk [vmem:[%s1800_s19 + $0xa8] sm:$0xff] %vm438_vm0, %v923_v53  ;;  %v896_v9 = vadd.f32 %v1793_v43, %v841_v62  ;;  %v844_v47 = vadd.f32 %v1379_v5, %v1345_v38  ;;  %v835_v30 = vpop.f32.mrb[27].mxu0  ;;  %v2151_v6 = vld [vmem:[#allocation11_spill] sm:$0xff]  ;;  %v2154_v62 = vld [vmem:[#allocation14_spill] sm:$0xff] }
 0x11f   : > { %989 = vst.msk [vmem:[%s1808_s22 + $0xb8] sm:$0xff] %vm438_vm0, %v957_v10  ;;  %1053 = vst.msk [vmem:[%s1814_s26 + $0xb8] sm:$0xff] %vm438_vm0, %v1021_v18  ;;  %v894_v61 = vadd.f32 %v1793_v43, %v833_v19  ;;  %v836_v63 = vadd.f32 %v835_v30, %v620_v14  ;;  %v2155_v38 = vld [vmem:[#allocation12_spill] sm:$0xff] }
 0x120   : > { %987 = vst.msk [vmem:[%s1808_s22 + $0xa8] sm:$0xff] %vm438_vm0, %v955_v36  ;;  %1051 = vst.msk [vmem:[%s1814_s26 + $0xa8] sm:$0xff] %vm438_vm0, %v1019_v0  ;;  %v928_v45 = vmax.f32 %v896_v9, 0.0  ;;  %v897_v52 = vadd.f32 %v1793_v43, %v844_v47  ;;  %v2156_v0 = vld [vmem:[#allocation10_spill] sm:$0xff] }
 0x121   : > { %v926_v1 = vmax.f32 %v894_v61, 0.0  ;;  %v895_v7 = vadd.f32 %v1793_v43, %v836_v63 }
 0x122   : > { %v960_v37 = vadd.f32 %v928_v45, %v1742_v54  ;;  %v1024_v11 = vadd.f32 %v928_v45, %v2142_v39  ;;  %1088 = vst.msk [vmem:[%s1800_s19 + $0xd0] sm:$0xff] %vm438_vm0, %v928_v45  ;;  %v929_v4 = vmax.f32 %v897_v52, 0.0  ;;  %v1348_v2 = vpop.f32.mrb[28].mxu1  ;;  %v2145_v54 = vld [vmem:[#allocation8_spill] sm:$0xff] }
 0x123   : > { %v958_v34 = vadd.f32 %v926_v1, %v2143_v32  ;;  %v1022_v24 = vadd.f32 %v926_v1, %v2144_v26  ;;  %1086 = vst.msk [vmem:[%s1800_s19 + $0xc0] sm:$0xff] %vm438_vm0, %v926_v1  ;;  %v927_v40 = vmax.f32 %v895_v7, 0.0  ;;  %v1382_v41 = vpop.f32.mrb[28].mxu0  ;;  %v633_v20 = vpop.f32.mrb[29].mxu1 }
 0x124   : > { %992 = vst.msk [vmem:[%s1808_s22 + $0xd0] sm:$0xff] %vm438_vm0, %v960_v37  ;;  %1056 = vst.msk [vmem:[%s1814_s26 + $0xd0] sm:$0xff] %vm438_vm0, %v1024_v11  ;;  %v961_v35 = vadd.f32 %v929_v4, %v2145_v54  ;;  %v1025_v33 = vadd.f32 %v929_v4, %v2146_v22  ;;  %v857_v56 = vadd.f32 %v1382_v41, %v1348_v2  ;;  %v848_v58 = vpop.f32.mrb[29].mxu0  ;;  %v1349_v50 = vpop.f32.mrb[30].mxu1 }
 0x125   : > { %1089 = vst.msk [vmem:[%s1800_s19 + $0xd8] sm:$0xff] %vm438_vm0, %v929_v4  ;;  %990 = vst.msk [vmem:[%s1808_s22 + $0xc0] sm:$0xff] %vm438_vm0, %v958_v34  ;;  %v959_v16 = vadd.f32 %v927_v40, %v2147_v48  ;;  %v1023_v42 = vadd.f32 %v927_v40, %v2148_v13  ;;  %v849_v59 = vadd.f32 %v848_v58, %v633_v20  ;;  %v1383_v25 = vpop.f32.mrb[30].mxu0  ;;  %v636_v57 = vpop.f32.mrb[31].mxu1 }
 0x126   : > { %1054 = vst.msk [vmem:[%s1814_s26 + $0xc0] sm:$0xff] %vm438_vm0, %v1022_v24  ;;  %1087 = vst.msk [vmem:[%s1800_s19 + $0xc8] sm:$0xff] %vm438_vm0, %v927_v40  ;;  %v900_v27 = vadd.f32 %v1793_v43, %v857_v56  ;;  %v860_v12 = vadd.f32 %v1383_v25, %v1349_v50  ;;  %v851_v31 = vpop.f32.mrb[31].mxu0 }
 0x127   : > { %993 = vst.msk [vmem:[%s1808_s22 + $0xd8] sm:$0xff] %vm438_vm0, %v961_v35  ;;  %1057 = vst.msk [vmem:[%s1814_s26 + $0xd8] sm:$0xff] %vm438_vm0, %v1025_v33  ;;  %v898_v49 = vadd.f32 %v1793_v43, %v849_v59  ;;  %v852_v51 = vadd.f32 %v851_v31, %v636_v57 }
 0x128   : > { %991 = vst.msk [vmem:[%s1808_s22 + $0xc8] sm:$0xff] %vm438_vm0, %v959_v16  ;;  %1055 = vst.msk [vmem:[%s1814_s26 + $0xc8] sm:$0xff] %vm438_vm0, %v1023_v42  ;;  %v932_v23 = vmax.f32 %v900_v27, 0.0  ;;  %v901_v8 = vadd.f32 %v1793_v43, %v860_v12 }
 0x129   : > { %v930_v21 = vmax.f32 %v898_v49, 0.0  ;;  %v899_v55 = vadd.f32 %v1793_v43, %v852_v51  ;;  %v2153_v43 = vld [vmem:[#allocation16_spill] sm:$0xff] }
 0x12a   : > { %v964_v28 = vadd.f32 %v932_v23, %v2149_v29  ;;  %v1028_v17 = vadd.f32 %v932_v23, %v2150_v15  ;;  %1092 = vst.msk [vmem:[%s1800_s19 + $0xf0] sm:$0xff] %vm438_vm0, %v932_v23  ;;  %v933_v3 = vmax.f32 %v901_v8, 0.0 }
 0x12b   : > { %v962_v53 = vadd.f32 %v930_v21, %v2151_v6  ;;  %v1026_v46 = vadd.f32 %v930_v21, %v2152_v44  ;;  %1090 = vst.msk [vmem:[%s1800_s19 + $0xe0] sm:$0xff] %vm438_vm0, %v930_v21  ;;  %v931_v10 = vmax.f32 %v899_v55, 0.0 }
 0x12c   : > { %996 = vst.msk [vmem:[%s1808_s22 + $0xf0] sm:$0xff] %vm438_vm0, %v964_v28  ;;  %1060 = vst.msk [vmem:[%s1814_s26 + $0xf0] sm:$0xff] %vm438_vm0, %v1028_v17  ;;  %v965_v18 = vadd.f32 %v933_v3, %v2153_v43  ;;  %v1029_v60 = vadd.f32 %v933_v3, %v2154_v62 }
 0x12d   : > { %1093 = vst.msk [vmem:[%s1800_s19 + $0xf8] sm:$0xff] %vm438_vm0, %v933_v3  ;;  %994 = vst.msk [vmem:[%s1808_s22 + $0xe0] sm:$0xff] %vm438_vm0, %v962_v53  ;;  %v963_v36 = vadd.f32 %v931_v10, %v2155_v38  ;;  %v1027_v19 = vadd.f32 %v931_v10, %v2156_v0 }
 0x12e   : > { %1058 = vst.msk [vmem:[%s1814_s26 + $0xe0] sm:$0xff] %vm438_vm0, %v1026_v46  ;;  %1091 = vst.msk [vmem:[%s1800_s19 + $0xe8] sm:$0xff] %vm438_vm0, %v931_v10 }
 0x12f   : > { %997 = vst.msk [vmem:[%s1808_s22 + $0xf8] sm:$0xff] %vm438_vm0, %v965_v18  ;;  %1061 = vst.msk [vmem:[%s1814_s26 + $0xf8] sm:$0xff] %vm438_vm0, %v1029_v60 }
 0x130   : > { %995 = vst.msk [vmem:[%s1808_s22 + $0xe8] sm:$0xff] %vm438_vm0, %v963_v36  ;;  %1059 = vst.msk [vmem:[%s1814_s26 + $0xe8] sm:$0xff] %vm438_vm0, %v1027_v19 }
 0x131 PF: > { %s18_s24 = sadd.s32 1, %s1432_s24  }
 0x132   : > { %p15_p4 = scmp.ge.s32.totalorder %s18_s24, 4  }
 0x134   :  { %17 = sbr.rel (!%p15_p4) target bundleno = 1 (0x1), region = 97 }

// kernel: insinet_forward.31
= control target key start
LH: loop header
LB: loop body
LE: loop exit
PB: predicated region body
PF: predicated region fallthrough
CT: control target
= control target key end

     0   :  { %s676_s12 = smov 0   ;;  %s821_s0 = inlined_call_operand.vmem [shape: f32[256,144], index: 0, kind: input, shape index: {}]   ;;  %s822_s1 = inlined_call_operand.vmem [shape: bf16[144,24], index: 1, kind: input, shape index: {}]   ;;  %s823_s2 = inlined_call_operand.vmem [shape: f32[1,24], index: 2, kind: input, shape index: {}]   ;;  %s824_s3 = inlined_call_operand.vmem [shape: f32[256,24], index: 3, kind: output, shape index: {}]  }
   0x1 LB: > { %s580_s13 = sadd.s32 4294967295, %s653_s12   ;;  %p584_p0 = scmp.ge.s32.totalorder %s653_s12, 1  ;;  %s653_s12 = sphi %s676_s12, %s13_s12  }
   0x2   : > { %p139_p1 = scmp.lt.s32.totalorder %s653_s12, 3 }
   0x4   : > { %p140_p2 = pnand %p584_p0, %p139_p1 }
   0x5   : > { %v638_v0 = vld [vmem:[%s822_s1] sm:$0xff] (!%p140_p2)   ;;  %v655_v1 = vmov (!%p140_p2), 0   ;;  %s585_s16 = sshll.u32 (!%p140_p2), %s580_s13, 4  ;;  %v639_v2 = vld [vmem:[%s822_s1 + $0x8] sm:$0xff] (!%p140_p2)   ;;  %v640_v3 = vld [vmem:[%s822_s1 + $0x10] sm:$0xff] (!%p140_p2)   ;;  %vm305_vm0 = vcmask (!%p140_p2), 130048  }
   0x6   : > { %143 = sbr.rel (%p140_p2) target bundleno = 294 (0x126), region = 32  ;;  %330 = vmatprep.subr.bf16.mxu0 (!%p140_p2), %v655_v1  ;;  %611 = vmatprep.subr.bf16.mxu1 (!%p140_p2), %v655_v1  ;;  %p165_p3 = scmp.lt.s32.totalorder (!%p140_p2), %s585_s16, 31  ;;  %v641_v7 = vld [vmem:[%s822_s1 + $0x18] sm:$0xff] (!%p140_p2)   ;;  %v642_v11 = vld [vmem:[%s822_s1 + $0x20] sm:$0xff] (!%p140_p2)   ;;  %v643_v12 = vld [vmem:[%s822_s1 + $0x28] sm:$0xff] (!%p140_p2)   ;;  %vm507_vm1 = vcmask (!%p140_p2), 195584  }
   0x7   : > { %331 = vmatpush1.bf16.msra.mxu0 (!%p140_p2), %v638_v0  ;;  %620 = vmatpush1.bf16.msra.mxu1 (!%p140_p2), %v638_v0  ;;  %v644_v13 = vld [vmem:[%s822_s1 + $0x30] sm:$0xff] (!%p140_p2)   ;;  %v645_v14 = vld [vmem:[%s822_s1 + $0x38] sm:$0xff] (!%p140_p2)   ;;  %v646_v15 = vld [vmem:[%s822_s1 + $0x40] sm:$0xff] (!%p140_p2)  }
   0x8   : > { %332 = vmatprep.subr.bf16.mxu0 (!%p140_p2), %v655_v1  ;;  %612 = vmatprep.subr.bf16.mxu1 (!%p140_p2), %v655_v1  ;;  %v762_v58 = vld [vmem:[%s823_s2] ss:$0 sm:$0xff] (!%p140_p2) }
   0xb   : > { %333 = vmatpush1.bf16.msra.mxu0 (!%p140_p2), %v639_v2  ;;  %621 = vmatpush1.bf16.msra.mxu1 (!%p140_p2), %v639_v2 }
   0xc   : > { %334 = vmatprep.subr.bf16.mxu0 (!%p140_p2), %v655_v1  ;;  %613 = vmatprep.subr.bf16.mxu1 (!%p140_p2), %v655_v1 }
   0xd   : > { %s826_s16 = smov (!%p165_p3, %s585_s16), 31 }
   0xe   : > { %s610_s21 = sshll.u32 %s826_s16, 4  ;;  %s589_s13 = sshll.u32 %s826_s16, 3 }
   0xf   : > { %s699_s24 = scalar_lea.vmem %s821_s0, %s610_s21  ;;  %335 = vmatpush1.bf16.msra.mxu0 %v640_v3  ;;  %622 = vmatpush1.bf16.msra.mxu1 %v640_v3  ;;  %s772_s17 = scalar_lea.vmem %s824_s3, %s589_s13 }
  0x10   : > { %v179_v4 = vld [vmem:[%s699_s24 + $0x8] sm:$0xff]  ;;  %v181_v5 = vld [vmem:[%s699_s24 + $0x18] sm:$0xff]  ;;  %336 = vmatprep.subr.bf16.mxu0 %v655_v1  ;;  %614 = vmatprep.subr.bf16.mxu1 %v655_v1  ;;  %v178_v16 = vld [vmem:[%s699_s24] sm:$0xff] }
  0x11   : > { %v195_v6 = vld [vmem:[%s699_s24 + $0x88] sm:$0xff]  ;;  %v211_v8 = vpack.c.bf16 %v181_v5, %v179_v4  ;;  %v197_v9 = vld [vmem:[%s699_s24 + $0x98] sm:$0xff]  ;;  %v180_v17 = vld [vmem:[%s699_s24 + $0x10] sm:$0xff] }
  0x12   : > { %v219_v10 = vpack.c.bf16 %v197_v9, %v195_v6  ;;  %v194_v18 = vld [vmem:[%s699_s24 + $0x80] sm:$0xff]  ;;  %v196_v19 = vld [vmem:[%s699_s24 + $0x90] sm:$0xff]  ;;  %v183_v20 = vld [vmem:[%s699_s24 + $0x28] sm:$0xff]  ;;  %v210_v24 = vpack.c.bf16 %v180_v17, %v178_v16 }
  0x13   : > { %600 = vmatprep.mubr.msk.bf16.mxu0 %vm305_vm0, %v211_v8  ;;  %337 = vmatpush1.bf16.msra.mxu0 %v641_v7  ;;  %v185_v21 = vld [vmem:[%s699_s24 + $0x38] sm:$0xff]  ;;  %v199_v22 = vld [vmem:[%s699_s24 + $0xa8] sm:$0xff]  ;;  %v218_v25 = vpack.c.bf16 %v196_v19, %v194_v18  ;;  %v182_v28 = vld [vmem:[%s699_s24 + $0x20] sm:$0xff] }
  0x14   : > { %604 = vmatprep.mubr.msk.bf16.mxu1 %vm305_vm0, %v219_v10  ;;  %623 = vmatpush1.bf16.msra.mxu1 %v641_v7  ;;  %v201_v23 = vld [vmem:[%s699_s24 + $0xb8] sm:$0xff]  ;;  %v213_v26 = vpack.c.bf16 %v185_v21, %v183_v20  ;;  %v184_v29 = vld [vmem:[%s699_s24 + $0x30] sm:$0xff]  ;;  %v198_v30 = vld [vmem:[%s699_s24 + $0xa0] sm:$0xff] }
  0x15   : > { %338 = vmatprep.subr.bf16.mxu0 %v655_v1  ;;  %615 = vmatprep.subr.bf16.mxu1 %v655_v1  ;;  %v221_v27 = vpack.c.bf16 %v201_v23, %v199_v22  ;;  %v200_v31 = vld [vmem:[%s699_s24 + $0xb0] sm:$0xff]  ;;  %v187_v32 = vld [vmem:[%s699_s24 + $0x48] sm:$0xff]  ;;  %v189_v33 = vld [vmem:[%s699_s24 + $0x58] sm:$0xff]  ;;  %v212_v36 = vpack.c.bf16 %v184_v29, %v182_v28 }
  0x16   : > { %v203_v34 = vld [vmem:[%s699_s24 + $0xc8] sm:$0xff]  ;;  %v205_v35 = vld [vmem:[%s699_s24 + $0xd8] sm:$0xff]  ;;  %v220_v37 = vpack.c.bf16 %v200_v31, %v198_v30  ;;  %v215_v38 = vpack.c.bf16 %v189_v33, %v187_v32  ;;  %v186_v40 = vld [vmem:[%s699_s24 + $0x40] sm:$0xff] }
  0x17   : > { %339 = vmatpush1.bf16.msra.mxu0 %v642_v11  ;;  %v223_v39 = vpack.c.bf16 %v205_v35, %v203_v34  ;;  %v188_v41 = vld [vmem:[%s699_s24 + $0x50] sm:$0xff]  ;;  %v202_v42 = vld [vmem:[%s699_s24 + $0xc0] sm:$0xff]  ;;  %v191_v44 = vld [vmem:[%s699_s24 + $0x68] sm:$0xff] }
  0x18   : > { %624 = vmatpush1.bf16.msra.mxu1 %v642_v11  ;;  %340 = vmatprep.subr.bf16.mxu0 %v655_v1  ;;  %v204_v43 = vld [vmem:[%s699_s24 + $0xd0] sm:$0xff]  ;;  %v193_v45 = vld [vmem:[%s699_s24 + $0x78] sm:$0xff]  ;;  %v207_v46 = vld [vmem:[%s699_s24 + $0xe8] sm:$0xff]  ;;  %v214_v48 = vpack.c.bf16 %v188_v41, %v186_v40 }
  0x19   : > { %616 = vmatprep.subr.bf16.mxu1 %v655_v1  ;;  %v209_v47 = vld [vmem:[%s699_s24 + $0xf8] sm:$0xff]  ;;  %v222_v49 = vpack.c.bf16 %v204_v43, %v202_v42  ;;  %v217_v50 = vpack.c.bf16 %v193_v45, %v191_v44  ;;  %v190_v52 = vld [vmem:[%s699_s24 + $0x60] sm:$0xff]  ;;  %v192_v53 = vld [vmem:[%s699_s24 + $0x70] sm:$0xff] }
  0x1a   : > { %v225_v51 = vpack.c.bf16 %v209_v47, %v207_v46  ;;  %v206_v54 = vld [vmem:[%s699_s24 + $0xe0] sm:$0xff]  ;;  %v208_v55 = vld [vmem:[%s699_s24 + $0xf0] sm:$0xff]  ;;  %v216_v56 = vpack.c.bf16 %v192_v53, %v190_v52 }
  0x1b   : > { %341 = vmatpush1.bf16.msra.mxu0 %v643_v12  ;;  %v224_v57 = vpack.c.bf16 %v208_v55, %v206_v54 }
  0x1c   : > { %625 = vmatpush1.bf16.msra.mxu1 %v643_v12  ;;  %342 = vmatprep.subr.bf16.mxu0 %v655_v1 }
  0x1d   : > { %617 = vmatprep.subr.bf16.mxu1 %v655_v1 }
  0x1f   : > { %343 = vmatpush1.bf16.msra.mxu0 %v644_v13 }
  0x20   : > { %626 = vmatpush1.bf16.msra.mxu1 %v644_v13  ;;  %344 = vmatprep.subr.bf16.mxu0 %v655_v1 }
  0x21   : > { %618 = vmatprep.subr.bf16.mxu1 %v655_v1 }
  0x23   : > { %345 = vmatpush1.bf16.msra.mxu0 %v645_v14 }
  0x24   : > { %627 = vmatpush1.bf16.msra.mxu1 %v645_v14  ;;  %346 = vmatprep.subr.bf16.mxu0 %v655_v1 }
  0x25   : > { %619 = vmatprep.subr.bf16.mxu1 %v655_v1 }
  0x27   : > { %347 = vmatpush1.bf16.msra.mxu0 %v646_v15 }
  0x28   : > { %628 = vmatpush1.bf16.msra.mxu1 %v646_v15 }
  0x2a   : > { %363 = vmatmul.mubr.bf16.vlgmr.msra.gmra.mrb[0].mxu0 %v210_v24 }
  0x2b   : > { %395 = vmatmul.mubr.bf16.vlgmr.msra.gmra.mrb[0].mxu1 %v218_v25  ;;  %601 = vmatprep.mubr.msk.bf16.mxu0 %vm305_vm0, %v213_v26 }
  0x2c   : > { %605 = vmatprep.mubr.msk.bf16.mxu1 %vm305_vm0, %v221_v27 }
  0x32   : > { %371 = vmatmul.mubr.bf16.gmra.mrb[4].mxu0 %v212_v36 }
  0x33   : > { %403 = vmatmul.mubr.bf16.gmra.mrb[4].mxu1 %v220_v37  ;;  %602 = vmatprep.mubr.msk.bf16.mxu0 %vm305_vm0, %v215_v38 }
  0x34   : > { %606 = vmatprep.mubr.msk.bf16.mxu1 %vm305_vm0, %v223_v39 }
  0x3a   : > { %379 = vmatmul.mubr.bf16.gmra.mrb[8].mxu0 %v214_v48 }
  0x3b   : > { %411 = vmatmul.mubr.bf16.gmra.mrb[8].mxu1 %v222_v49  ;;  %603 = vmatprep.mubr.msk.bf16.mxu0 %vm305_vm0, %v217_v50 }
  0x3c   : > { %607 = vmatprep.mubr.msk.bf16.mxu1 %vm305_vm0, %v225_v51 }
  0x42   : > { %387 = vmatmul.mubr.bf16.gmra.mrb[12].mxu0 %v216_v56 }
  0x43   : > { %419 = vmatmul.mubr.bf16.gmra.mrb[12].mxu1 %v224_v57 }
  0xfd   : > { %v364_v59 = vpop.f32.mrb[0].mxu0 }
  0xfe   : > { %v396_v60 = vpop.f32.mrb[0].mxu1  ;;  %v365_v61 = vadd.f32 %v762_v58, %v364_v59  ;;  %v366_v63 = vpop.f32.mrb[1].mxu0 }
  0xff   : > { %v397_v62 = vadd.f32 %v762_v58, %v396_v60  ;;  %v398_v0 = vpop.f32.mrb[1].mxu1  ;;  %v367_v1 = vpop.f32.mrb[2].mxu0 }
 0x100   : > { %v399_v2 = vpop.f32.mrb[2].mxu1  ;;  %v427_v3 = vadd.f32 3.0, %v365_v61  ;;  %v368_v5 = vadd.f32 %v762_v58, %v367_v1  ;;  %v369_v7 = vpop.f32.mrb[3].mxu0 }
 0x101   : > { %v435_v4 = vadd.f32 3.0, %v397_v62  ;;  %v400_v6 = vadd.f32 %v762_v58, %v399_v2  ;;  %v401_v8 = vpop.f32.mrb[3].mxu1 }
 0x102   : > { %v443_v9 = vmax.f32 %v427_v3, 0.0  ;;  %v428_v11 = vadd.f32 3.0, %v368_v5 }
 0x103   : > { %v451_v10 = vmax.f32 %v435_v4, 0.0  ;;  %v436_v12 = vadd.f32 3.0, %v400_v6 }
 0x104   : > { %v459_v13 = vmin.f32 %v443_v9, 6.0  ;;  %v444_v15 = vmax.f32 %v428_v11, 0.0 }
 0x105   : > { %v467_v14 = vmin.f32 %v451_v10, 6.0  ;;  %v452_v16 = vmax.f32 %v436_v12, 0.0  ;;  %v372_v17 = vpop.f32.mrb[4].mxu0 }
 0x106   : > { %v404_v18 = vpop.f32.mrb[4].mxu1  ;;  %v475_v19 = vmul.f32 %v459_v13, %v365_v61  ;;  %v460_v21 = vmin.f32 %v444_v15, 6.0  ;;  %v374_v23 = vpop.f32.mrb[5].mxu0  ;;  %v373_v25 = vadd.f32 %v762_v58, %v372_v17 }
 0x107   : > { %v483_v20 = vmul.f32 %v467_v14, %v397_v62  ;;  %v468_v22 = vmin.f32 %v452_v16, 6.0  ;;  %v406_v24 = vpop.f32.mrb[5].mxu1  ;;  %v405_v26 = vadd.f32 %v762_v58, %v404_v18  ;;  %v375_v27 = vpop.f32.mrb[6].mxu0 }
 0x108   : > { %v407_v28 = vpop.f32.mrb[6].mxu1  ;;  %v491_v29 = vmul.f32 0.16666667, %v475_v19  ;;  %v476_v31 = vmul.f32 %v460_v21, %v368_v5  ;;  %v377_v33 = vpop.f32.mrb[7].mxu0  ;;  %v429_v35 = vadd.f32 3.0, %v373_v25  ;;  %v376_v37 = vadd.f32 %v762_v58, %v375_v27 }
 0x109   : > { %v499_v30 = vmul.f32 0.16666667, %v483_v20  ;;  %v484_v32 = vmul.f32 %v468_v22, %v400_v6  ;;  %v409_v34 = vpop.f32.mrb[7].mxu1  ;;  %v437_v36 = vadd.f32 3.0, %v405_v26  ;;  %v408_v38 = vadd.f32 %v762_v58, %v407_v28 }
 0x10a   : > { %508 = vst.msk [vmem:[%s772_s17] sm:$0xff] %vm507_vm1, %v491_v29  ;;  %v492_v39 = vmul.f32 0.16666667, %v476_v31  ;;  %v445_v41 = vmax.f32 %v429_v35, 0.0  ;;  %v430_v43 = vadd.f32 3.0, %v376_v37 }
 0x10b   : > { %516 = vst.msk [vmem:[%s772_s17 + $0x40] sm:$0xff] %vm507_vm1, %v499_v30  ;;  %v500_v40 = vmul.f32 0.16666667, %v484_v32  ;;  %v453_v42 = vmax.f32 %v437_v36, 0.0  ;;  %v438_v44 = vadd.f32 3.0, %v408_v38 }
 0x10c   : > { %509 = vst.msk [vmem:[%s772_s17 + $0x8] sm:$0xff] %vm507_vm1, %v492_v39  ;;  %v461_v45 = vmin.f32 %v445_v41, 6.0  ;;  %v446_v47 = vmax.f32 %v430_v43, 0.0 }
 0x10d   : > { %517 = vst.msk [vmem:[%s772_s17 + $0x48] sm:$0xff] %vm507_vm1, %v500_v40  ;;  %v469_v46 = vmin.f32 %v453_v42, 6.0  ;;  %v454_v48 = vmax.f32 %v438_v44, 0.0  ;;  %v380_v49 = vpop.f32.mrb[8].mxu0 }
 0x10e   : > { %v412_v50 = vpop.f32.mrb[8].mxu1  ;;  %v381_v51 = vadd.f32 %v762_v58, %v380_v49  ;;  %v382_v53 = vpop.f32.mrb[9].mxu0  ;;  %v477_v55 = vmul.f32 %v461_v45, %v373_v25  ;;  %v462_v57 = vmin.f32 %v446_v47, 6.0 }
 0x10f   : > { %v413_v52 = vadd.f32 %v762_v58, %v412_v50  ;;  %v414_v54 = vpop.f32.mrb[9].mxu1  ;;  %v485_v56 = vmul.f32 %v469_v46, %v405_v26  ;;  %v470_v59 = vmin.f32 %v454_v48, 6.0  ;;  %v383_v60 = vpop.f32.mrb[10].mxu0 }
 0x110   : > { %v415_v61 = vpop.f32.mrb[10].mxu1  ;;  %v431_v62 = vadd.f32 3.0, %v381_v51  ;;  %v384_v0 = vadd.f32 %v762_v58, %v383_v60  ;;  %v385_v2 = vpop.f32.mrb[11].mxu0  ;;  %v493_v4 = vmul.f32 0.16666667, %v477_v55  ;;  %v478_v6 = vmul.f32 %v462_v57, %v376_v37 }
 0x111   : > { %v439_v63 = vadd.f32 3.0, %v413_v52  ;;  %v416_v1 = vadd.f32 %v762_v58, %v415_v61  ;;  %v417_v3 = vpop.f32.mrb[11].mxu1  ;;  %v501_v5 = vmul.f32 0.16666667, %v485_v56  ;;  %v486_v7 = vmul.f32 %v470_v59, %v408_v38 }
 0x112   : > { %v447_v8 = vmax.f32 %v431_v62, 0.0  ;;  %v432_v10 = vadd.f32 3.0, %v384_v0  ;;  %510 = vst.msk [vmem:[%s772_s17 + $0x10] sm:$0xff] %vm507_vm1, %v493_v4  ;;  %v494_v12 = vmul.f32 0.16666667, %v478_v6 }
 0x113   : > { %v455_v9 = vmax.f32 %v439_v63, 0.0  ;;  %v440_v11 = vadd.f32 3.0, %v416_v1  ;;  %518 = vst.msk [vmem:[%s772_s17 + $0x50] sm:$0xff] %vm507_vm1, %v501_v5  ;;  %v502_v13 = vmul.f32 0.16666667, %v486_v7 }
 0x114   : > { %v463_v14 = vmin.f32 %v447_v8, 6.0  ;;  %v448_v16 = vmax.f32 %v432_v10, 0.0  ;;  %511 = vst.msk [vmem:[%s772_s17 + $0x18] sm:$0xff] %vm507_vm1, %v494_v12 }
 0x115   : > { %v471_v15 = vmin.f32 %v455_v9, 6.0  ;;  %v456_v17 = vmax.f32 %v440_v11, 0.0  ;;  %519 = vst.msk [vmem:[%s772_s17 + $0x58] sm:$0xff] %vm507_vm1, %v502_v13  ;;  %v388_v18 = vpop.f32.mrb[12].mxu0 }
 0x116   : > { %v420_v19 = vpop.f32.mrb[12].mxu1  ;;  %v479_v20 = vmul.f32 %v463_v14, %v381_v51  ;;  %v464_v22 = vmin.f32 %v448_v16, 6.0  ;;  %v390_v24 = vpop.f32.mrb[13].mxu0  ;;  %v389_v26 = vadd.f32 %v762_v58, %v388_v18 }
 0x117   : > { %v487_v21 = vmul.f32 %v471_v15, %v413_v52  ;;  %v472_v23 = vmin.f32 %v456_v17, 6.0  ;;  %v422_v25 = vpop.f32.mrb[13].mxu1  ;;  %v421_v27 = vadd.f32 %v762_v58, %v420_v19  ;;  %v391_v28 = vpop.f32.mrb[14].mxu0 }
 0x118   : > { %v423_v29 = vpop.f32.mrb[14].mxu1  ;;  %v495_v30 = vmul.f32 0.16666667, %v479_v20  ;;  %v480_v32 = vmul.f32 %v464_v22, %v384_v0  ;;  %v393_v34 = vpop.f32.mrb[15].mxu0  ;;  %v433_v36 = vadd.f32 3.0, %v389_v26  ;;  %v392_v38 = vadd.f32 %v762_v58, %v391_v28 }
 0x119   : > { %v503_v31 = vmul.f32 0.16666667, %v487_v21  ;;  %v488_v33 = vmul.f32 %v472_v23, %v416_v1  ;;  %v425_v35 = vpop.f32.mrb[15].mxu1  ;;  %v441_v37 = vadd.f32 3.0, %v421_v27  ;;  %v424_v39 = vadd.f32 %v762_v58, %v423_v29 }
 0x11a   : > { %512 = vst.msk [vmem:[%s772_s17 + $0x20] sm:$0xff] %vm507_vm1, %v495_v30  ;;  %v496_v40 = vmul.f32 0.16666667, %v480_v32  ;;  %v449_v42 = vmax.f32 %v433_v36, 0.0  ;;  %v434_v44 = vadd.f32 3.0, %v392_v38 }
 0x11b   : > { %520 = vst.msk [vmem:[%s772_s17 + $0x60] sm:$0xff] %vm507_vm1, %v503_v31  ;;  %v504_v41 = vmul.f32 0.16666667, %v488_v33  ;;  %v457_v43 = vmax.f32 %v441_v37, 0.0  ;;  %v442_v45 = vadd.f32 3.0, %v424_v39 }
 0x11c   : > { %513 = vst.msk [vmem:[%s772_s17 + $0x28] sm:$0xff] %vm507_vm1, %v496_v40  ;;  %v465_v46 = vmin.f32 %v449_v42, 6.0  ;;  %v450_v58 = vmax.f32 %v434_v44, 0.0 }
 0x11d   : > { %521 = vst.msk [vmem:[%s772_s17 + $0x68] sm:$0xff] %vm507_vm1, %v504_v41  ;;  %v473_v47 = vmin.f32 %v457_v43, 6.0  ;;  %v458_v48 = vmax.f32 %v442_v45, 0.0 }
 0x11e   : > { %v481_v49 = vmul.f32 %v465_v46, %v389_v26  ;;  %v466_v51 = vmin.f32 %v450_v58, 6.0 }
 0x11f   : > { %v489_v50 = vmul.f32 %v473_v47, %v421_v27  ;;  %v474_v52 = vmin.f32 %v458_v48, 6.0 }
 0x120   : > { %v497_v53 = vmul.f32 0.16666667, %v481_v49  ;;  %v482_v55 = vmul.f32 %v466_v51, %v392_v38 }
 0x121   : > { %v505_v54 = vmul.f32 0.16666667, %v489_v50  ;;  %v490_v56 = vmul.f32 %v474_v52, %v424_v39 }
 0x122   : > { %514 = vst.msk [vmem:[%s772_s17 + $0x30] sm:$0xff] %vm507_vm1, %v497_v53  ;;  %v498_v57 = vmul.f32 0.16666667, %v482_v55 }
 0x123   : > { %522 = vst.msk [vmem:[%s772_s17 + $0x70] sm:$0xff] %vm507_vm1, %v505_v54  ;;  %v506_v59 = vmul.f32 0.16666667, %v490_v56 }
 0x124   : > { %515 = vst.msk [vmem:[%s772_s17 + $0x38] sm:$0xff] %vm507_vm1, %v498_v57 }
 0x125   : > { %523 = vst.msk [vmem:[%s772_s17 + $0x78] sm:$0xff] %vm507_vm1, %v506_v59 }
 0x126 PF: > { %s13_s12 = sadd.s32 1, %s653_s12  }
 0x127   : > { %p10_p4 = scmp.ge.s32.totalorder %s13_s12, 4  }
 0x129   :  { %12 = sbr.rel (!%p10_p4) target bundleno = 1 (0x1), region = 62 }

// kernel: insinet_forward.32
= control target key start
LH: loop header
LB: loop body
LE: loop exit
PB: predicated region body
PF: predicated region fallthrough
CT: control target
= control target key end

     0   :  { %s877_s24 = smov 0   ;;  %s1027_s0 = inlined_call_operand.vmem [shape: f32[128,24], index: 0, kind: input, shape index: {}]   ;;  %s1028_s1 = inlined_call_operand.vmem [shape: f32[128,24], index: 1, kind: input, shape index: {}]   ;;  %s1029_s2 = inlined_call_operand.vmem [shape: bf16[24,24], index: 2, kind: input, shape index: {}]   ;;  %s1030_s3 = inlined_call_operand.vmem [shape: bf16[24,24], index: 3, kind: input, shape index: {}]   ;;  %s1031_s4 = inlined_call_operand.vmem [shape: f32[1,24], index: 4, kind: input, shape index: {}]   ;;  %s1032_s5 = inlined_call_operand.vmem [shape: f32[128,24], index: 5, kind: output, shape index: {0}]   ;;  %s1033_s6 = inlined_call_operand.vmem [shape: f32[128,24], index: 6, kind: output, shape index: {1}]   ;;  %s1034_s7 = inlined_call_operand.vmem [shape: f32[128,24], index: 7, kind: output, shape index: {2}]  }
   0x1 LB: > { %s741_s25 = sadd.s32 4294967295, %s835_s24   ;;  %p745_p0 = scmp.ge.s32.totalorder %s835_s24, 1  ;;  %s835_s24 = sphi %s877_s24, %s18_s24  }
   0x2   : > { %p254_p1 = scmp.lt.s32.totalorder %s835_s24, 3 }
   0x4   : > { %p255_p2 = pnand %p745_p0, %p254_p1 }
   0x5   : > { %v825_v0 = vld [vmem:[%s1030_s3] sm:$0xff] (!%p255_p2)   ;;  %vm384_vm0 = vcmask (!%p255_p2), 1043456   ;;  %s746_s30 = sshll.u32 (!%p255_p2), %s741_s25, 3  ;;  %v827_v2 = vld [vmem:[%s1030_s3 + $0x8] ss:$0 sps:$4 sm:$0xff] (!%p255_p2)   ;;  %vm371_vm1 = vcmask (!%p255_p2), 195584  }
   0x6   : > { %258 = sbr.rel (%p255_p2) target bundleno = 254 (0xfe), region = 40  ;;  %v826_v1 = vld [vmem:[%s1029_s2] sm:$0xff] (!%p255_p2)   ;;  %783 = vmatprep.subr.bf16.mxu1 (!%p255_p2), %v825_v0  ;;  %v828_v3 = vld [vmem:[%s1029_s2 + $0x8] ss:$0 sps:$4 sm:$0xff] (!%p255_p2)   ;;  %p302_p3 = scmp.lt.s32.totalorder (!%p255_p2), %s746_s30, 15  ;;  %v386_v4 = vsel (!%p255_p2), %vm384_vm0, %v827_v2, 0 }
   0x7   : > { %795 = vmatprep.subr.bf16.mxu0 (!%p255_p2), %v826_v1  ;;  %784 = vmatpush3.bf16.msra.mxu1 (!%p255_p2), %v825_v0  ;;  %v475_v5 = vsel (!%p255_p2), %vm384_vm0, %v828_v3, 0  ;;  %v768_v32 = vld [vmem:[%s1031_s4] ss:$0 sm:$0xff] (!%p255_p2) }
   0x8   : > { %796 = vmatpush3.bf16.msra.mxu0 (!%p255_p2), %v826_v1  ;;  %815 = vmatprep.subr.msk.bf16.mxu1 (!%p255_p2), %vm384_vm0, %v827_v2 }
   0x9   : > { %816 = vmatprep.subr.msk.bf16.mxu0 (!%p255_p2), %vm384_vm0, %v828_v3 }
   0xb   : > { %786 = vmatpush3.bf16.msra.mxu1 (!%p255_p2), %v386_v4 }
   0xc   : > { %798 = vmatpush3.bf16.msra.mxu0 (!%p255_p2), %v475_v5 }
   0xd   : > { %s1036_s30 = smov (!%p302_p3, %s746_s30), 15 }
   0xe   : > { %s897_s12 = sshll.u32 %s1036_s30, 3 }
   0xf   : > { %s311_s15 = scalar_lea.vmem %s1028_s1, %s897_s12  ;;  %s305_s18 = scalar_lea.vmem %s1027_s0, %s897_s12 }
  0x10   : > { %v340_v6 = vld [vmem:[%s311_s15] sm:$0xff]  ;;  %v907_v7 = vld [vmem:[%s311_s15 + $0x8] sm:$0xff]  ;;  %v342_v11 = vld [vmem:[%s311_s15 + $0x10] sm:$0xff]  ;;  %s952_s23 = scalar_lea.vmem %s1034_s7, %s897_s12  ;;  %s958_s27 = scalar_lea.vmem %s1032_s5, %s897_s12 }
  0x11   : > { %v332_v8 = vld [vmem:[%s305_s18] sm:$0xff]  ;;  %v355_v9 = vpack.c.bf16 %v907_v7, %v340_v6  ;;  %v910_v10 = vld [vmem:[%s305_s18 + $0x8] sm:$0xff]  ;;  %v343_v12 = vld [vmem:[%s311_s15 + $0x18] sm:$0xff]  ;;  %s964_s30 = scalar_lea.vmem %s1033_s6, %s897_s12 }
  0x12   : > { %v348_v13 = vpack.c.bf16 %v910_v10, %v332_v8  ;;  %v356_v14 = vpack.c.bf16 %v343_v12, %v342_v11  ;;  %v334_v15 = vld [vmem:[%s305_s18 + $0x10] sm:$0xff]  ;;  %v335_v16 = vld [vmem:[%s305_s18 + $0x18] sm:$0xff]  ;;  %v913_v17 = vld [vmem:[%s311_s15 + $0x20] sm:$0xff] }
  0x13   : > { %787 = vmatprep.mubr.msk.bf16.mxu1 %vm371_vm1, %v355_v9  ;;  %v349_v18 = vpack.c.bf16 %v335_v16, %v334_v15  ;;  %v916_v19 = vld [vmem:[%s311_s15 + $0x28] sm:$0xff]  ;;  %v918_v20 = vld [vmem:[%s305_s18 + $0x20] sm:$0xff]  ;;  %v929_v24 = vld [vmem:[%s311_s15 + $0x30] sm:$0xff] }
  0x14   : > { %v920_v21 = vld [vmem:[%s305_s18 + $0x28] sm:$0xff]  ;;  %799 = vmatprep.mubr.msk.bf16.mxu0 %vm371_vm1, %v348_v13  ;;  %788 = vmatmul.mubr.msk.bf16.vlgmr.msra.gmra.mrb[0].mxu1 %vm371_vm1, %v356_v14  ;;  %v357_v22 = vpack.c.bf16 %v916_v19, %v913_v17  ;;  %v931_v25 = vld [vmem:[%s311_s15 + $0x38] sm:$0xff]  ;;  %v935_v26 = vld [vmem:[%s305_s18 + $0x30] sm:$0xff] }
  0x15   : > { %v350_v23 = vpack.c.bf16 %v920_v21, %v918_v20  ;;  %800 = vmatmul.mubr.msk.bf16.vlgmr.msra.gmra.mrb[0].mxu0 %vm371_vm1, %v349_v18  ;;  %v937_v27 = vld [vmem:[%s305_s18 + $0x38] sm:$0xff]  ;;  %v358_v28 = vpack.c.bf16 %v931_v25, %v929_v24 }
  0x16   : > { %791 = vmatprep.mubr.msk.bf16.mxu1 %vm371_vm1, %v357_v22  ;;  %v351_v29 = vpack.c.bf16 %v937_v27, %v935_v26 }
  0x17   : > { %803 = vmatprep.mubr.msk.bf16.mxu0 %vm371_vm1, %v350_v23 }
  0x1c   : > { %792 = vmatmul.mubr.msk.bf16.gmra.mrb[4].mxu1 %vm371_vm1, %v358_v28 }
  0x1d   : > { %804 = vmatmul.mubr.msk.bf16.gmra.mrb[4].mxu0 %vm371_vm1, %v351_v29 }
  0xe7   : > { %v789_v30 = vpop.f32.mrb[0].mxu1 }
  0xe8   : > { %v801_v31 = vpop.f32.mrb[0].mxu0  ;;  %v422_v33 = vpop.f32.mrb[1].mxu1 }
  0xe9   : > { %v520_v34 = vadd.f32 %v801_v31, %v789_v30  ;;  %v511_v35 = vpop.f32.mrb[1].mxu0  ;;  %v790_v36 = vpop.f32.mrb[2].mxu1 }
  0xea   : > { %v512_v37 = vadd.f32 %v511_v35, %v422_v33  ;;  %v802_v38 = vpop.f32.mrb[2].mxu0  ;;  %v425_v39 = vpop.f32.mrb[3].mxu1 }
  0xeb   : > { %v551_v40 = vadd.f32 %v768_v32, %v520_v34  ;;  %v523_v41 = vadd.f32 %v802_v38, %v790_v36  ;;  %v514_v42 = vpop.f32.mrb[3].mxu0 }
  0xec   : > { %v549_v43 = vadd.f32 %v768_v32, %v512_v37  ;;  %v515_v44 = vadd.f32 %v514_v42, %v425_v39 }
  0xed   : > { %v559_v45 = vmax.f32 %v551_v40, 0.0  ;;  %v552_v46 = vadd.f32 %v768_v32, %v523_v41 }
  0xee   : > { %v557_v47 = vmax.f32 %v549_v43, 0.0  ;;  %v550_v48 = vadd.f32 %v768_v32, %v515_v44 }
  0xef   : > { %v567_v49 = vadd.f32 %v559_v45, %v334_v15  ;;  %v583_v50 = vadd.f32 %v559_v45, %v342_v11  ;;  %599 = vst.msk [vmem:[%s952_s23 + $0x10] sm:$0xff] %vm371_vm1, %v559_v45  ;;  %v560_v51 = vmax.f32 %v552_v46, 0.0  ;;  %v793_v52 = vpop.f32.mrb[4].mxu1 }
  0xf0   : > { %v565_v53 = vadd.f32 %v557_v47, %v332_v8  ;;  %v581_v54 = vadd.f32 %v557_v47, %v340_v6  ;;  %597 = vst.msk [vmem:[%s952_s23] sm:$0xff] %vm371_vm1, %v557_v47  ;;  %v558_v55 = vmax.f32 %v550_v48, 0.0  ;;  %v805_v56 = vpop.f32.mrb[4].mxu0  ;;  %v438_v57 = vpop.f32.mrb[5].mxu1 }
  0xf1   : > { %575 = vst.msk [vmem:[%s958_s27 + $0x10] sm:$0xff] %vm371_vm1, %v567_v49  ;;  %591 = vst.msk [vmem:[%s964_s30 + $0x10] sm:$0xff] %vm371_vm1, %v583_v50  ;;  %v568_v58 = vadd.f32 %v560_v51, %v335_v16  ;;  %v584_v59 = vadd.f32 %v560_v51, %v343_v12  ;;  %v536_v60 = vadd.f32 %v805_v56, %v793_v52  ;;  %v527_v61 = vpop.f32.mrb[5].mxu0  ;;  %v794_v62 = vpop.f32.mrb[6].mxu1 }
  0xf2   : > { %600 = vst.msk [vmem:[%s952_s23 + $0x18] sm:$0xff] %vm371_vm1, %v560_v51  ;;  %573 = vst.msk [vmem:[%s958_s27] sm:$0xff] %vm371_vm1, %v565_v53  ;;  %v566_v63 = vadd.f32 %v558_v55, %v910_v10  ;;  %v582_v0 = vadd.f32 %v558_v55, %v907_v7  ;;  %v528_v1 = vadd.f32 %v527_v61, %v438_v57  ;;  %v806_v2 = vpop.f32.mrb[6].mxu0  ;;  %v441_v3 = vpop.f32.mrb[7].mxu1 }
  0xf3   : > { %589 = vst.msk [vmem:[%s964_s30] sm:$0xff] %vm371_vm1, %v581_v54  ;;  %598 = vst.msk [vmem:[%s952_s23 + $0x8] sm:$0xff] %vm371_vm1, %v558_v55  ;;  %v555_v4 = vadd.f32 %v768_v32, %v536_v60  ;;  %v539_v5 = vadd.f32 %v806_v2, %v794_v62  ;;  %v530_v6 = vpop.f32.mrb[7].mxu0 }
  0xf4   : > { %576 = vst.msk [vmem:[%s958_s27 + $0x18] sm:$0xff] %vm371_vm1, %v568_v58  ;;  %592 = vst.msk [vmem:[%s964_s30 + $0x18] sm:$0xff] %vm371_vm1, %v584_v59  ;;  %v553_v7 = vadd.f32 %v768_v32, %v528_v1  ;;  %v531_v8 = vadd.f32 %v530_v6, %v441_v3 }
  0xf5   : > { %574 = vst.msk [vmem:[%s958_s27 + $0x8] sm:$0xff] %vm371_vm1, %v566_v63  ;;  %590 = vst.msk [vmem:[%s964_s30 + $0x8] sm:$0xff] %vm371_vm1, %v582_v0  ;;  %v563_v9 = vmax.f32 %v555_v4, 0.0  ;;  %v556_v10 = vadd.f32 %v768_v32, %v539_v5 }
  0xf6   : > { %v561_v11 = vmax.f32 %v553_v7, 0.0  ;;  %v554_v12 = vadd.f32 %v768_v32, %v531_v8 }
  0xf7   : > { %v571_v13 = vadd.f32 %v563_v9, %v935_v26  ;;  %v587_v14 = vadd.f32 %v563_v9, %v929_v24  ;;  %603 = vst.msk [vmem:[%s952_s23 + $0x30] sm:$0xff] %vm371_vm1, %v563_v9  ;;  %v564_v15 = vmax.f32 %v556_v10, 0.0 }
  0xf8   : > { %v569_v16 = vadd.f32 %v561_v11, %v918_v20  ;;  %v585_v18 = vadd.f32 %v561_v11, %v913_v17  ;;  %601 = vst.msk [vmem:[%s952_s23 + $0x20] sm:$0xff] %vm371_vm1, %v561_v11  ;;  %v562_v22 = vmax.f32 %v554_v12, 0.0 }
  0xf9   : > { %579 = vst.msk [vmem:[%s958_s27 + $0x30] sm:$0xff] %vm371_vm1, %v571_v13  ;;  %595 = vst.msk [vmem:[%s964_s30 + $0x30] sm:$0xff] %vm371_vm1, %v587_v14  ;;  %v572_v23 = vadd.f32 %v564_v15, %v937_v27  ;;  %v588_v24 = vadd.f32 %v564_v15, %v931_v25 }
  0xfa   : > { %604 = vst.msk [vmem:[%s952_s23 + $0x38] sm:$0xff] %vm371_vm1, %v564_v15  ;;  %577 = vst.msk [vmem:[%s958_s27 + $0x20] sm:$0xff] %vm371_vm1, %v569_v16  ;;  %v570_v17 = vadd.f32 %v562_v22, %v920_v21  ;;  %v586_v20 = vadd.f32 %v562_v22, %v916_v19 }
  0xfb   : > { %593 = vst.msk [vmem:[%s964_s30 + $0x20] sm:$0xff] %vm371_vm1, %v585_v18  ;;  %602 = vst.msk [vmem:[%s952_s23 + $0x28] sm:$0xff] %vm371_vm1, %v562_v22 }
  0xfc   : > { %580 = vst.msk [vmem:[%s958_s27 + $0x38] sm:$0xff] %vm371_vm1, %v572_v23  ;;  %596 = vst.msk [vmem:[%s964_s30 + $0x38] sm:$0xff] %vm371_vm1, %v588_v24 }
  0xfd   : > { %578 = vst.msk [vmem:[%s958_s27 + $0x28] sm:$0xff] %vm371_vm1, %v570_v17  ;;  %594 = vst.msk [vmem:[%s964_s30 + $0x28] sm:$0xff] %vm371_vm1, %v586_v20 }
  0xfe PF: > { %s18_s24 = sadd.s32 1, %s835_s24  }
  0xff   : > { %p15_p4 = scmp.ge.s32.totalorder %s18_s24, 4  }
 0x101   :  { %17 = sbr.rel (!%p15_p4) target bundleno = 1 (0x1), region = 97 }

// kernel: insinet_forward.36
= control target key start
LH: loop header
LB: loop body
LE: loop exit
PB: predicated region body
PF: predicated region fallthrough
CT: control target
= control target key end

     0   :  { %v351_v0 = vmov 0   ;;  %vm154_vm0 = vcmask 719872   ;;  %vm167_vm1 = vcmask 1043456   ;;  %vm276_vm2 = vcmask 326656   ;;  %s529_s1 = inlined_call_operand.vmem [shape: bf16[216,40], index: 1, kind: input, shape index: {}]   ;;  %s530_s0 = inlined_call_operand.vmem [shape: f32[64,216], index: 0, kind: input, shape index: {}]   ;;  %s531_s2 = inlined_call_operand.vmem [shape: f32[1,40], index: 2, kind: input, shape index: {}]   ;;  %s532_s3 = inlined_call_operand.vmem [shape: f32[64,40], index: 3, kind: output, shape index: {}]  }
   0x1   :  { %171 = vmatprep.subr.bf16.mxu0 %v351_v0  ;;  %308 = vmatprep.subr.bf16.mxu1 %v351_v0  ;;  %v337_v1 = vld [vmem:[%s529_s1] sm:$0xff]   ;;  %v338_v2 = vld [vmem:[%s529_s1 + $0x8] sm:$0xff]   ;;  %v339_v3 = vld [vmem:[%s529_s1 + $0x10] sm:$0xff]  }
   0x2   :  { %172 = vmatpush1.bf16.msra.mxu0 %v337_v1  ;;  %322 = vmatpush1.bf16.msra.mxu1 %v337_v1  ;;  %v340_v4 = vld [vmem:[%s529_s1 + $0x18] sm:$0xff]   ;;  %v341_v5 = vld [vmem:[%s529_s1 + $0x20] sm:$0xff]   ;;  %v16_v6 = vld [vmem:[%s530_s0 + $0x8] sm:$0xff] }
   0x3   :  { %173 = vmatprep.subr.bf16.mxu0 %v351_v0  ;;  %309 = vmatprep.subr.bf16.mxu1 %v351_v0  ;;  %v18_v7 = vld [vmem:[%s530_s0 + $0x18] sm:$0xff]  ;;  %v24_v8 = vld [vmem:[%s530_s0 + $0x48] sm:$0xff]  ;;  %v343_v13 = vld [vmem:[%s529_s1 + $0x30] sm:$0xff]  }
   0x4   :  { %v26_v9 = vld [vmem:[%s530_s0 + $0x58] sm:$0xff]  ;;  %v32_v10 = vpack.c.bf16 %v18_v7, %v16_v6  ;;  %v342_v12 = vld [vmem:[%s529_s1 + $0x28] sm:$0xff]   ;;  %v345_v15 = vld [vmem:[%s529_s1 + $0x40] sm:$0xff]  }
   0x5   :  { %v36_v11 = vpack.c.bf16 %v26_v9, %v24_v8  ;;  %v344_v14 = vld [vmem:[%s529_s1 + $0x38] sm:$0xff]   ;;  %v346_v16 = vld [vmem:[%s529_s1 + $0x48] sm:$0xff]   ;;  %v347_v17 = vld [vmem:[%s529_s1 + $0x50] sm:$0xff]  }
   0x6   :  { %174 = vmatpush1.bf16.msra.mxu0 %v338_v2  ;;  %323 = vmatpush1.bf16.msra.mxu1 %v338_v2  ;;  %v348_v18 = vld [vmem:[%s529_s1 + $0x58] sm:$0xff]   ;;  %v349_v19 = vld [vmem:[%s529_s1 + $0x60] sm:$0xff]   ;;  %v350_v20 = vld [vmem:[%s529_s1 + $0x68] ss:$0 sps:$4 sm:$0xff]  }
   0x7   :  { %175 = vmatprep.subr.bf16.mxu0 %v351_v0  ;;  %310 = vmatprep.subr.bf16.mxu1 %v351_v0  ;;  %v15_v21 = vld [vmem:[%s530_s0] sm:$0xff]  ;;  %v17_v22 = vld [vmem:[%s530_s0 + $0x10] sm:$0xff]  ;;  %v20_v25 = vld [vmem:[%s530_s0 + $0x28] sm:$0xff]  ;;  %v169_v26 = vsel %vm167_vm1, %v350_v20, 0 }
   0x8   :  { %304 = vmatprep.mubr.msk.bf16.mxu0 %vm154_vm0, %v32_v10  ;;  %306 = vmatprep.mubr.msk.bf16.mxu1 %vm154_vm0, %v36_v11  ;;  %v23_v23 = vld [vmem:[%s530_s0 + $0x40] sm:$0xff]  ;;  %v25_v24 = vld [vmem:[%s530_s0 + $0x50] sm:$0xff]  ;;  %v22_v27 = vld [vmem:[%s530_s0 + $0x38] sm:$0xff]  ;;  %v31_v30 = vpack.c.bf16 %v17_v22, %v15_v21 }
   0x9   :  { %v28_v28 = vld [vmem:[%s530_s0 + $0x68] sm:$0xff]  ;;  %v30_v29 = vld [vmem:[%s530_s0 + $0x78] sm:$0xff]  ;;  %v35_v31 = vpack.c.bf16 %v25_v24, %v23_v23  ;;  %v34_v32 = vpack.c.bf16 %v22_v27, %v20_v25  ;;  %v19_v34 = vld [vmem:[%s530_s0 + $0x20] sm:$0xff] }
   0xa   :  { %176 = vmatpush1.bf16.msra.mxu0 %v339_v3  ;;  %324 = vmatpush1.bf16.msra.mxu1 %v339_v3  ;;  %v38_v33 = vpack.c.bf16 %v30_v29, %v28_v28  ;;  %v21_v35 = vld [vmem:[%s530_s0 + $0x30] sm:$0xff]  ;;  %v27_v36 = vld [vmem:[%s530_s0 + $0x60] sm:$0xff] }
   0xb   :  { %177 = vmatprep.subr.bf16.mxu0 %v351_v0  ;;  %311 = vmatprep.subr.bf16.mxu1 %v351_v0  ;;  %v29_v37 = vld [vmem:[%s530_s0 + $0x70] sm:$0xff]  ;;  %v33_v38 = vpack.c.bf16 %v21_v35, %v19_v34  ;;  %v289_v40 = vld [vmem:[%s531_s2] ss:$0 sm:$0xff] }
   0xc   :  { %v37_v39 = vpack.c.bf16 %v29_v37, %v27_v36 }
   0xe   :  { %178 = vmatpush1.bf16.msra.mxu0 %v340_v4  ;;  %325 = vmatpush1.bf16.msra.mxu1 %v340_v4 }
   0xf   :  { %179 = vmatprep.subr.bf16.mxu0 %v351_v0  ;;  %312 = vmatprep.subr.bf16.mxu1 %v351_v0 }
  0x12   :  { %180 = vmatpush1.bf16.msra.mxu0 %v341_v5  ;;  %326 = vmatpush1.bf16.msra.mxu1 %v341_v5 }
  0x13   :  { %181 = vmatprep.subr.bf16.mxu0 %v351_v0  ;;  %313 = vmatprep.subr.bf16.mxu1 %v351_v0 }
  0x16   :  { %182 = vmatpush1.bf16.msra.mxu0 %v342_v12  ;;  %327 = vmatpush1.bf16.msra.mxu1 %v342_v12 }
  0x17   :  { %183 = vmatprep.subr.bf16.mxu0 %v351_v0  ;;  %314 = vmatprep.subr.bf16.mxu1 %v351_v0 }
  0x1a   :  { %184 = vmatpush1.bf16.msra.mxu0 %v343_v13  ;;  %328 = vmatpush1.bf16.msra.mxu1 %v343_v13 }
  0x1b   :  { %185 = vmatprep.subr.bf16.mxu0 %v351_v0  ;;  %315 = vmatprep.subr.bf16.mxu1 %v351_v0 }
  0x1e   :  { %186 = vmatpush1.bf16.msra.mxu0 %v344_v14  ;;  %329 = vmatpush1.bf16.msra.mxu1 %v344_v14 }
  0x1f   :  { %187 = vmatprep.subr.bf16.mxu0 %v351_v0  ;;  %316 = vmatprep.subr.bf16.mxu1 %v351_v0 }
  0x22   :  { %188 = vmatpush1.bf16.msra.mxu0 %v345_v15  ;;  %330 = vmatpush1.bf16.msra.mxu1 %v345_v15 }
  0x23   :  { %189 = vmatprep.subr.bf16.mxu0 %v351_v0  ;;  %317 = vmatprep.subr.bf16.mxu1 %v351_v0 }
  0x26   :  { %190 = vmatpush1.bf16.msra.mxu0 %v346_v16  ;;  %331 = vmatpush1.bf16.msra.mxu1 %v346_v16 }
  0x27   :  { %191 = vmatprep.subr.bf16.mxu0 %v351_v0  ;;  %318 = vmatprep.subr.bf16.mxu1 %v351_v0 }
  0x2a   :  { %192 = vmatpush1.bf16.msra.mxu0 %v347_v17  ;;  %332 = vmatpush1.bf16.msra.mxu1 %v347_v17 }
  0x2b   :  { %193 = vmatprep.subr.bf16.mxu0 %v351_v0  ;;  %319 = vmatprep.subr.bf16.mxu1 %v351_v0 }
  0x2e   :  { %194 = vmatpush1.bf16.msra.mxu0 %v348_v18  ;;  %333 = vmatpush1.bf16.msra.mxu1 %v348_v18 }
  0x2f   :  { %195 = vmatprep.subr.bf16.mxu0 %v351_v0  ;;  %320 = vmatprep.subr.bf16.mxu1 %v351_v0 }
  0x32   :  { %196 = vmatpush1.bf16.msra.mxu0 %v349_v19  ;;  %334 = vmatpush1.bf16.msra.mxu1 %v349_v19 }
  0x33   :  { %197 = vmatprep.subr.bf16.mxu0 %v351_v0  ;;  %321 = vmatprep.subr.bf16.mxu1 %v351_v0 }
  0x36   :  { %198 = vmatpush1.bf16.msra.mxu0 %v169_v26  ;;  %335 = vmatpush1.bf16.msra.mxu1 %v169_v26 }
  0x39   :  { %204 = vmatmul.mubr.bf16.vlgmr.msra.gmra.mrb[0].mxu0 %v31_v30  ;;  %220 = vmatmul.mubr.bf16.vlgmr.msra.gmra.mrb[0].mxu1 %v35_v31 }
  0x3a   :  { %305 = vmatprep.mubr.msk.bf16.mxu0 %vm154_vm0, %v34_v32  ;;  %307 = vmatprep.mubr.msk.bf16.mxu1 %vm154_vm0, %v38_v33 }
  0x41   :  { %212 = vmatmul.mubr.bf16.gmra.mrb[4].mxu0 %v33_v38  ;;  %228 = vmatmul.mubr.bf16.gmra.mrb[4].mxu1 %v37_v39 }
 0x10c   :  { %v205_v41 = vpop.f32.mrb[0].mxu0  ;;  %v221_v42 = vpop.f32.mrb[0].mxu1 }
 0x10d   :  { %v206_v43 = vadd.f32 %v289_v40, %v205_v41  ;;  %v222_v44 = vadd.f32 %v289_v40, %v221_v42  ;;  %v207_v45 = vpop.f32.mrb[1].mxu0  ;;  %v223_v46 = vpop.f32.mrb[1].mxu1 }
 0x10e   :  { %v208_v47 = vpop.f32.mrb[2].mxu0  ;;  %v224_v48 = vpop.f32.mrb[2].mxu1 }
 0x10f   :  { %v236_v49 = vadd.f32 3.0, %v206_v43  ;;  %v240_v50 = vadd.f32 3.0, %v222_v44  ;;  %v209_v51 = vadd.f32 %v289_v40, %v208_v47  ;;  %v225_v52 = vadd.f32 %v289_v40, %v224_v48  ;;  %v210_v53 = vpop.f32.mrb[3].mxu0  ;;  %v226_v54 = vpop.f32.mrb[3].mxu1 }
 0x111   :  { %v244_v55 = vmax.f32 %v236_v49, 0.0  ;;  %v248_v56 = vmax.f32 %v240_v50, 0.0  ;;  %v237_v57 = vadd.f32 3.0, %v209_v51  ;;  %v241_v58 = vadd.f32 3.0, %v225_v52 }
 0x113   :  { %v252_v59 = vmin.f32 %v244_v55, 6.0  ;;  %v256_v60 = vmin.f32 %v248_v56, 6.0  ;;  %v245_v61 = vmax.f32 %v237_v57, 0.0  ;;  %v249_v62 = vmax.f32 %v241_v58, 0.0 }
 0x114   :  { %v213_v63 = vpop.f32.mrb[4].mxu0  ;;  %v229_v0 = vpop.f32.mrb[4].mxu1 }
 0x115   :  { %v260_v1 = vmul.f32 %v252_v59, %v206_v43  ;;  %v264_v2 = vmul.f32 %v256_v60, %v222_v44  ;;  %v253_v3 = vmin.f32 %v245_v61, 6.0  ;;  %v257_v4 = vmin.f32 %v249_v62, 6.0  ;;  %v215_v5 = vpop.f32.mrb[5].mxu0  ;;  %v231_v6 = vpop.f32.mrb[5].mxu1 }
 0x116   :  { %v214_v7 = vadd.f32 %v289_v40, %v213_v63  ;;  %v230_v8 = vadd.f32 %v289_v40, %v229_v0  ;;  %v216_v9 = vpop.f32.mrb[6].mxu0  ;;  %v232_v10 = vpop.f32.mrb[6].mxu1 }
 0x117   :  { %v268_v11 = vmul.f32 0.16666667, %v260_v1  ;;  %v272_v12 = vmul.f32 0.16666667, %v264_v2  ;;  %v261_v13 = vmul.f32 %v253_v3, %v209_v51  ;;  %v265_v14 = vmul.f32 %v257_v4, %v225_v52  ;;  %v218_v15 = vpop.f32.mrb[7].mxu0  ;;  %v234_v16 = vpop.f32.mrb[7].mxu1 }
 0x118   :  { %v238_v17 = vadd.f32 3.0, %v214_v7  ;;  %v242_v18 = vadd.f32 3.0, %v230_v8  ;;  %v217_v19 = vadd.f32 %v289_v40, %v216_v9  ;;  %v233_v20 = vadd.f32 %v289_v40, %v232_v10 }
 0x119   :  { %277 = vst.msk [vmem:[%s532_s3] sm:$0xff] %vm276_vm2, %v268_v11  ;;  %281 = vst.msk [vmem:[%s532_s3 + $0x20] sm:$0xff] %vm276_vm2, %v272_v12  ;;  %v269_v21 = vmul.f32 0.16666667, %v261_v13  ;;  %v273_v22 = vmul.f32 0.16666667, %v265_v14 }
 0x11a   :  { %v246_v23 = vmax.f32 %v238_v17, 0.0  ;;  %v250_v24 = vmax.f32 %v242_v18, 0.0  ;;  %v239_v25 = vadd.f32 3.0, %v217_v19  ;;  %v243_v26 = vadd.f32 3.0, %v233_v20 }
 0x11b   :  { %278 = vst.msk [vmem:[%s532_s3 + $0x8] sm:$0xff] %vm276_vm2, %v269_v21  ;;  %282 = vst.msk [vmem:[%s532_s3 + $0x28] sm:$0xff] %vm276_vm2, %v273_v22 }
 0x11c   :  { %v254_v27 = vmin.f32 %v246_v23, 6.0  ;;  %v258_v28 = vmin.f32 %v250_v24, 6.0  ;;  %v247_v29 = vmax.f32 %v239_v25, 0.0  ;;  %v251_v30 = vmax.f32 %v243_v26, 0.0 }
 0x11e   :  { %v262_v31 = vmul.f32 %v254_v27, %v214_v7  ;;  %v266_v32 = vmul.f32 %v258_v28, %v230_v8  ;;  %v255_v33 = vmin.f32 %v247_v29, 6.0  ;;  %v259_v34 = vmin.f32 %v251_v30, 6.0 }
 0x120   :  { %v270_v35 = vmul.f32 0.16666667, %v262_v31  ;;  %v274_v36 = vmul.f32 0.16666667, %v266_v32  ;;  %v263_v37 = vmul.f32 %v255_v33, %v217_v19  ;;  %v267_v38 = vmul.f32 %v259_v34, %v233_v20 }
 0x122   :  { %279 = vst.msk [vmem:[%s532_s3 + $0x10] sm:$0xff] %vm276_vm2, %v270_v35  ;;  %283 = vst.msk [vmem:[%s532_s3 + $0x30] sm:$0xff] %vm276_vm2, %v274_v36  ;;  %v271_v39 = vmul.f32 0.16666667, %v263_v37  ;;  %v275_v40 = vmul.f32 0.16666667, %v267_v38 }
 0x124   :  { %280 = vst.msk [vmem:[%s532_s3 + $0x18] sm:$0xff] %vm276_vm2, %v271_v39  ;;  %284 = vst.msk [vmem:[%s532_s3 + $0x38] sm:$0xff] %vm276_vm2, %v275_v40 }

// kernel: insinet_forward.37
= control target key start
LH: loop header
LB: loop body
LE: loop exit
PB: predicated region body
PF: predicated region fallthrough
CT: control target
= control target key end

     0   :  { %vm68_vm0 = vcmask 1043456   ;;  %vm61_vm1 = vcmask 326656   ;;  %s439_s3 = inlined_call_operand.vmem [shape: bf16[40,40], index: 3, kind: input, shape index: {}]   ;;  %s440_s2 = inlined_call_operand.vmem [shape: bf16[40,40], index: 2, kind: input, shape index: {}]   ;;  %s441_s1 = inlined_call_operand.vmem [shape: f32[32,40], index: 1, kind: input, shape index: {}]   ;;  %s442_s0 = inlined_call_operand.vmem [shape: f32[32,40], index: 0, kind: input, shape index: {}]   ;;  %s443_s4 = inlined_call_operand.vmem [shape: f32[1,40], index: 4, kind: input, shape index: {}]   ;;  %s444_s7 = inlined_call_operand.vmem [shape: f32[32,40], index: 7, kind: output, shape index: {2}]   ;;  %s445_s5 = inlined_call_operand.vmem [shape: f32[32,40], index: 5, kind: output, shape index: {0}]   ;;  %s446_s6 = inlined_call_operand.vmem [shape: f32[32,40], index: 6, kind: output, shape index: {1}]  }
   0x1   :  { %v288_v0 = vld [vmem:[%s439_s3] sm:$0xff]   ;;  %v290_v2 = vld [vmem:[%s439_s3 + $0x8] sm:$0xff]   ;;  %v292_v4 = vld [vmem:[%s439_s3 + $0x10] ss:$0 sps:$4 sm:$0xff]  }
   0x2   :  { %v289_v1 = vld [vmem:[%s440_s2] sm:$0xff]   ;;  %262 = vmatprep.subr.bf16.mxu1 %v288_v0  ;;  %v291_v3 = vld [vmem:[%s440_s2 + $0x8] sm:$0xff]   ;;  %v293_v5 = vld [vmem:[%s440_s2 + $0x10] ss:$0 sps:$4 sm:$0xff]   ;;  %v70_v14 = vsel %vm68_vm0, %v292_v4, 0 }
   0x3   :  { %272 = vmatprep.subr.bf16.mxu0 %v289_v1  ;;  %263 = vmatpush3.bf16.msra.mxu1 %v288_v0  ;;  %v28_v6 = vld [vmem:[%s441_s1] sm:$0xff]  ;;  %v358_v7 = vld [vmem:[%s441_s1 + $0x8] sm:$0xff]  ;;  %v30_v12 = vld [vmem:[%s441_s1 + $0x10] sm:$0xff]  ;;  %v143_v17 = vsel %vm68_vm0, %v293_v5, 0 }
   0x4   :  { %273 = vmatpush3.bf16.msra.mxu0 %v289_v1  ;;  %264 = vmatprep.subr.bf16.mxu1 %v290_v2  ;;  %v39_v8 = vpack.c.bf16 %v358_v7, %v28_v6  ;;  %v24_v9 = vld [vmem:[%s442_s0] sm:$0xff]  ;;  %v25_v10 = vld [vmem:[%s442_s0 + $0x8] sm:$0xff]  ;;  %v31_v13 = vld [vmem:[%s441_s1 + $0x18] sm:$0xff] }
   0x5   :  { %274 = vmatprep.subr.bf16.mxu0 %v291_v3  ;;  %v32_v11 = vpack.c.bf16 %v25_v10, %v24_v9  ;;  %v26_v15 = vld [vmem:[%s442_s0 + $0x10] sm:$0xff]  ;;  %v27_v16 = vld [vmem:[%s442_s0 + $0x18] sm:$0xff]  ;;  %v40_v18 = vpack.c.bf16 %v31_v13, %v30_v12  ;;  %v251_v22 = vld [vmem:[%s443_s4] ss:$0 sm:$0xff] }
   0x6   :  { %268 = vmatprep.mubr.msk.bf16.mxu1 %vm61_vm1, %v39_v8  ;;  %v33_v19 = vpack.c.bf16 %v27_v16, %v26_v15 }
   0x7   :  { %265 = vmatpush3.bf16.msra.mxu1 %v290_v2  ;;  %278 = vmatprep.mubr.msk.bf16.mxu0 %vm61_vm1, %v32_v11 }
   0x8   :  { %275 = vmatpush3.bf16.msra.mxu0 %v291_v3  ;;  %286 = vmatprep.subr.msk.bf16.mxu1 %vm68_vm0, %v292_v4 }
   0x9   :  { %287 = vmatprep.subr.msk.bf16.mxu0 %vm68_vm0, %v293_v5 }
   0xb   :  { %267 = vmatpush3.bf16.msra.mxu1 %v70_v14 }
   0xc   :  { %277 = vmatpush3.bf16.msra.mxu0 %v143_v17 }
   0xe   :  { %269 = vmatmul.mubr.msk.bf16.vlgmr.msra.gmra.mrb[0].mxu1 %vm61_vm1, %v40_v18 }
   0xf   :  { %279 = vmatmul.mubr.msk.bf16.vlgmr.msra.gmra.mrb[0].mxu0 %vm61_vm1, %v33_v19 }
  0xe1   :  { %v270_v20 = vpop.f32.mrb[0].mxu1 }
  0xe2   :  { %v280_v21 = vpop.f32.mrb[0].mxu0  ;;  %v106_v23 = vpop.f32.mrb[1].mxu1 }
  0xe3   :  { %v188_v24 = vadd.f32 %v280_v21, %v270_v20  ;;  %v179_v25 = vpop.f32.mrb[1].mxu0  ;;  %v271_v26 = vpop.f32.mrb[2].mxu1 }
  0xe4   :  { %v180_v27 = vadd.f32 %v179_v25, %v106_v23  ;;  %v281_v28 = vpop.f32.mrb[2].mxu0  ;;  %v109_v29 = vpop.f32.mrb[3].mxu1 }
  0xe5   :  { %v203_v30 = vadd.f32 %v251_v22, %v188_v24  ;;  %v191_v31 = vadd.f32 %v281_v28, %v271_v26  ;;  %v182_v32 = vpop.f32.mrb[3].mxu0 }
  0xe6   :  { %v201_v33 = vadd.f32 %v251_v22, %v180_v27  ;;  %v183_v34 = vadd.f32 %v182_v32, %v109_v29 }
  0xe7   :  { %v207_v35 = vmax.f32 %v203_v30, 0.0  ;;  %v204_v36 = vadd.f32 %v251_v22, %v191_v31 }
  0xe8   :  { %v205_v37 = vmax.f32 %v201_v33, 0.0  ;;  %v202_v38 = vadd.f32 %v251_v22, %v183_v34 }
  0xe9   :  { %v211_v39 = vadd.f32 %v207_v35, %v26_v15  ;;  %v219_v40 = vadd.f32 %v207_v35, %v30_v12  ;;  %227 = vst.msk [vmem:[%s444_s7 + $0x10] sm:$0xff] %vm61_vm1, %v207_v35  ;;  %v208_v41 = vmax.f32 %v204_v36, 0.0 }
  0xea   :  { %v209_v42 = vadd.f32 %v205_v37, %v24_v9  ;;  %v217_v43 = vadd.f32 %v205_v37, %v28_v6  ;;  %225 = vst.msk [vmem:[%s444_s7] sm:$0xff] %vm61_vm1, %v205_v37  ;;  %v206_v44 = vmax.f32 %v202_v38, 0.0 }
  0xeb   :  { %215 = vst.msk [vmem:[%s445_s5 + $0x10] sm:$0xff] %vm61_vm1, %v211_v39  ;;  %223 = vst.msk [vmem:[%s446_s6 + $0x10] sm:$0xff] %vm61_vm1, %v219_v40  ;;  %v212_v45 = vadd.f32 %v208_v41, %v27_v16  ;;  %v220_v46 = vadd.f32 %v208_v41, %v31_v13 }
  0xec   :  { %228 = vst.msk [vmem:[%s444_s7 + $0x18] sm:$0xff] %vm61_vm1, %v208_v41  ;;  %213 = vst.msk [vmem:[%s445_s5] sm:$0xff] %vm61_vm1, %v209_v42  ;;  %v210_v47 = vadd.f32 %v206_v44, %v25_v10  ;;  %v218_v48 = vadd.f32 %v206_v44, %v358_v7 }
  0xed   :  { %221 = vst.msk [vmem:[%s446_s6] sm:$0xff] %vm61_vm1, %v217_v43  ;;  %226 = vst.msk [vmem:[%s444_s7 + $0x8] sm:$0xff] %vm61_vm1, %v206_v44 }
  0xee   :  { %216 = vst.msk [vmem:[%s445_s5 + $0x18] sm:$0xff] %vm61_vm1, %v212_v45  ;;  %224 = vst.msk [vmem:[%s446_s6 + $0x18] sm:$0xff] %vm61_vm1, %v220_v46 }
  0xef   :  { %214 = vst.msk [vmem:[%s445_s5 + $0x8] sm:$0xff] %vm61_vm1, %v210_v47  ;;  %222 = vst.msk [vmem:[%s446_s6 + $0x8] sm:$0xff] %vm61_vm1, %v218_v48 }

// kernel: insinet_forward.42
= control target key start
LH: loop header
LB: loop body
LE: loop exit
PB: predicated region body
PF: predicated region fallthrough
CT: control target
= control target key end

     0   :  { %v286_v0 = vmov 0.0   ;;  %vm287_vm0 = vmmov 0   ;;  %vm78_vm1 = vcmask 654336   ;;  %s381_s3 = inlined_call_operand.vmem [shape: bf16[80,80], index: 3, kind: input, shape index: {}]   ;;  %s382_s2 = inlined_call_operand.vmem [shape: bf16[80,80], index: 2, kind: input, shape index: {}]   ;;  %s383_s1 = inlined_call_operand.vmem [shape: f32[8,80], index: 1, kind: input, shape index: {}]   ;;  %s384_s0 = inlined_call_operand.vmem [shape: f32[8,80], index: 0, kind: input, shape index: {}]   ;;  %s385_s4 = inlined_call_operand.vmem [shape: f32[1,80], index: 4, kind: input, shape index: {}]   ;;  %s386_s7 = inlined_call_operand.vmem [shape: f32[8,80], index: 7, kind: output, shape index: {2}]   ;;  %s387_s5 = inlined_call_operand.vmem [shape: f32[8,80], index: 5, kind: output, shape index: {0}]   ;;  %s388_s6 = inlined_call_operand.vmem [shape: f32[8,80], index: 6, kind: output, shape index: {1}]  }
   0x1   :  { %246 = vmatprep.subr.bf16.mxu0 %v286_v0  ;;  %260 = vmatprep.subr.bf16.mxu1 %v286_v0  ;;  %v276_v1 = vld [vmem:[%s381_s3] sm:$0xff]   ;;  %v278_v3 = vld [vmem:[%s381_s3 + $0x8] sm:$0xff]   ;;  %v280_v5 = vld [vmem:[%s381_s3 + $0x10] sm:$0xff]  }
   0x2   :  { %v277_v2 = vld [vmem:[%s382_s2] sm:$0xff]   ;;  %256 = vmatprep.mubr.msk.bf16.mxu0 %vm287_vm0, %v286_v0  ;;  %270 = vmatprep.mubr.msk.bf16.mxu1 %vm287_vm0, %v286_v0  ;;  %v279_v4 = vld [vmem:[%s382_s2 + $0x8] sm:$0xff]   ;;  %v281_v6 = vld [vmem:[%s382_s2 + $0x10] sm:$0xff]  }
   0x3   :  { %247 = vmatpush3.bf16.msra.mxu0 %v276_v1  ;;  %261 = vmatpush3.bf16.msra.mxu1 %v277_v2  ;;  %v282_v7 = vld [vmem:[%s381_s3 + $0x18] sm:$0xff]   ;;  %v284_v9 = vld [vmem:[%s381_s3 + $0x20] sm:$0xff]  }
   0x4   :  { %248 = vmatprep.subr.bf16.mxu0 %v286_v0  ;;  %262 = vmatprep.subr.bf16.mxu1 %v286_v0  ;;  %v283_v8 = vld [vmem:[%s382_s2 + $0x18] sm:$0xff]   ;;  %v25_v10 = vld [vmem:[%s383_s1] sm:$0xff] }
   0x5   :  { %v285_v11 = vld [vmem:[%s382_s2 + $0x20] sm:$0xff]   ;;  %v37_v13 = vpack.c.bf16 %v25_v10, %v25_v10 }
   0x6   :  { %v24_v12 = vld [vmem:[%s384_s0] sm:$0xff] }
   0x7   :  { %249 = vmatpush3.bf16.msra.mxu0 %v278_v3  ;;  %263 = vmatpush3.bf16.msra.mxu1 %v279_v4  ;;  %v26_v14 = vpack.c.bf16 %v24_v12, %v24_v12  ;;  %v233_v17 = vld [vmem:[%s385_s4] ss:$0 sm:$0xff] }
   0x8   :  { %250 = vmatprep.subr.bf16.mxu0 %v286_v0  ;;  %264 = vmatprep.subr.bf16.mxu1 %v286_v0 }
   0xb   :  { %251 = vmatpush3.bf16.msra.mxu0 %v280_v5  ;;  %265 = vmatpush3.bf16.msra.mxu1 %v281_v6 }
   0xc   :  { %252 = vmatprep.subr.bf16.mxu0 %v286_v0  ;;  %266 = vmatprep.subr.bf16.mxu1 %v286_v0 }
   0xf   :  { %253 = vmatpush3.bf16.msra.mxu0 %v282_v7  ;;  %267 = vmatpush3.bf16.msra.mxu1 %v283_v8 }
  0x10   :  { %254 = vmatprep.subr.bf16.mxu0 %v286_v0  ;;  %268 = vmatprep.subr.bf16.mxu1 %v286_v0 }
  0x13   :  { %255 = vmatpush3.bf16.msra.mxu0 %v284_v9  ;;  %269 = vmatpush3.bf16.msra.mxu1 %v285_v11 }
  0x16   :  { %257 = vmatmul.mubr.msk.bf16.vlgmr.msra.gmra.mrb[0].mxu0 %vm78_vm1, %v37_v13  ;;  %271 = vmatmul.mubr.msk.bf16.vlgmr.msra.gmra.mrb[0].mxu1 %vm78_vm1, %v26_v14 }
  0xe9   :  { %v116_v15 = vpop.f32.mrb[0].mxu0  ;;  %v189_v16 = vpop.f32.mrb[0].mxu1 }
  0xea   :  { %v258_v18 = vpop.f32.mrb[1].mxu0  ;;  %v190_v19 = vadd.f32 %v189_v16, %v116_v15  ;;  %v272_v20 = vpop.f32.mrb[1].mxu1 }
  0xeb   :  { %v119_v21 = vpop.f32.mrb[2].mxu0  ;;  %v192_v22 = vpop.f32.mrb[2].mxu1 }
  0xec   :  { %v259_v23 = vpop.f32.mrb[3].mxu0  ;;  %v202_v24 = vadd.f32 %v233_v17, %v190_v19  ;;  %v273_v25 = vpop.f32.mrb[3].mxu1 }
  0xee   :  { %v203_v26 = vmax.f32 %v202_v24, 0.0 }
  0xf0   :  { %v204_v27 = vadd.f32 %v203_v26, %v24_v12  ;;  %v206_v28 = vadd.f32 %v203_v26, %v25_v10  ;;  %208 = vst.msk [vmem:[%s386_s7] sm:$0xff] %vm78_vm1, %v203_v26 }
  0xf2   :  { %205 = vst.msk [vmem:[%s387_s5] sm:$0xff] %vm78_vm1, %v204_v27  ;;  %207 = vst.msk [vmem:[%s388_s6] sm:$0xff] %vm78_vm1, %v206_v28 }

// kernel: insinet_forward.41
= control target key start
LH: loop header
LB: loop body
LE: loop exit
PB: predicated region body
PF: predicated region fallthrough
CT: control target
= control target key end

     0   :  { %v416_v1 = vmov 0.0   ;;  %vm417_vm0 = vmmov 0   ;;  %vm215_vm1 = vcmask 1043456   ;;  %vm211_vm2 = vcmask 850944   ;;  %s534_s1 = inlined_call_operand.vmem [shape: bf16[360,80], index: 1, kind: input, shape index: {}]   ;;  %s535_s0 = inlined_call_operand.vmem [shape: f32[16,360], index: 0, kind: input, shape index: {}]   ;;  %s536_s2 = inlined_call_operand.vmem [shape: f32[1,80], index: 2, kind: input, shape index: {}]   ;;  %s537_s3 = inlined_call_operand.vmem [shape: f32[16,80], index: 3, kind: output, shape index: {}]  }
   0x1   :  { %v393_v0 = vld [vmem:[%s534_s1 + $0x40] sm:$0xff]   ;;  %373 = vmatprep.subr.bf16.mxu1 %v416_v1  ;;  %387 = vmatprep.mubr.msk.bf16.mxu1 %vm417_vm0, %v416_v1  ;;  %v395_v3 = vld [vmem:[%s534_s1 + $0x48] sm:$0xff]   ;;  %v398_v6 = vld [vmem:[%s534_s1 + $0x50] sm:$0xff]   ;;  %vm311_vm3 = vcmask 654336  }
   0x2   :  { %v394_v2 = vld [vmem:[%s534_s1] sm:$0xff]   ;;  %343 = vmatprep.subr.bf16.mxu0 %v393_v0  ;;  %v396_v4 = vld [vmem:[%s534_s1 + $0x8] sm:$0xff]   ;;  %v399_v7 = vld [vmem:[%s534_s1 + $0x10] sm:$0xff]  }
   0x3   :  { %344 = vmatpush3.bf16.msra.mxu0 %v394_v2  ;;  %v397_v5 = vld [vmem:[%s534_s1 + $0x80] sm:$0xff]   ;;  %v400_v8 = vld [vmem:[%s534_s1 + $0x88] sm:$0xff]   ;;  %v401_v9 = vld [vmem:[%s534_s1 + $0x58] sm:$0xff]  }
   0x4   :  { %345 = vmatprep.subr.bf16.mxu0 %v395_v3  ;;  %374 = vmatpush3.bf16.msra.mxu1 %v397_v5  ;;  %v403_v10 = vld [vmem:[%s534_s1 + $0x90] sm:$0xff]   ;;  %v402_v11 = vld [vmem:[%s534_s1 + $0x18] sm:$0xff]   ;;  %v404_v12 = vld [vmem:[%s534_s1 + $0x60] sm:$0xff]  }
   0x5   :  { %375 = vmatprep.subr.bf16.mxu1 %v416_v1  ;;  %v406_v13 = vld [vmem:[%s534_s1 + $0x98] sm:$0xff]   ;;  %v405_v14 = vld [vmem:[%s534_s1 + $0x20] sm:$0xff]   ;;  %v407_v15 = vld [vmem:[%s534_s1 + $0x68] sm:$0xff]  }
   0x6   :  { %v409_v16 = vld [vmem:[%s534_s1 + $0xa0] sm:$0xff]   ;;  %v408_v17 = vld [vmem:[%s534_s1 + $0x28] sm:$0xff]   ;;  %v410_v18 = vld [vmem:[%s534_s1 + $0x70] sm:$0xff]  }
   0x7   :  { %346 = vmatpush3.bf16.msra.mxu0 %v396_v4  ;;  %v412_v19 = vld [vmem:[%s534_s1 + $0xa8] sm:$0xff]   ;;  %v19_v21 = vld [vmem:[%s535_s0 + $0x20] sm:$0xff]  ;;  %v411_v22 = vld [vmem:[%s534_s1 + $0x30] sm:$0xff]  }
   0x8   :  { %347 = vmatprep.subr.bf16.mxu0 %v398_v6  ;;  %376 = vmatpush3.bf16.msra.mxu1 %v400_v8  ;;  %v16_v20 = vld [vmem:[%s535_s0 + $0x8] sm:$0xff]  ;;  %v415_v24 = vld [vmem:[%s534_s1 + $0xb0] ss:$0 sps:$4 sm:$0xff]   ;;  %v413_v25 = vld [vmem:[%s534_s1 + $0x78] sm:$0xff]  }
   0x9   :  { %377 = vmatprep.subr.bf16.mxu1 %v416_v1  ;;  %v22_v23 = vpack.c.bf16 %v19_v21, %v16_v20  ;;  %v17_v26 = vld [vmem:[%s535_s0 + $0x10] sm:$0xff]  ;;  %v20_v27 = vld [vmem:[%s535_s0 + $0x28] sm:$0xff]  ;;  %v414_v28 = vld [vmem:[%s534_s1 + $0x38] sm:$0xff]   ;;  %v217_v29 = vsel %vm215_vm1, %v415_v24, 0 }
   0xa   :  { %v15_v30 = vld [vmem:[%s535_s0] sm:$0xff]  ;;  %v18_v31 = vld [vmem:[%s535_s0 + $0x18] sm:$0xff]  ;;  %v23_v32 = vpack.c.bf16 %v20_v27, %v17_v26 }
   0xb   :  { %348 = vmatpush3.bf16.msra.mxu0 %v399_v7  ;;  %251 = vmatprep.mubr.bf16.mxu0 %v22_v23  ;;  %v21_v33 = vpack.c.bf16 %v18_v31, %v15_v30  ;;  %v318_v38 = vld [vmem:[%s536_s2] ss:$0 sm:$0xff] }
   0xc   :  { %349 = vmatprep.subr.bf16.mxu0 %v401_v9  ;;  %378 = vmatpush3.bf16.msra.mxu1 %v403_v10 }
   0xd   :  { %379 = vmatprep.subr.bf16.mxu1 %v416_v1 }
   0xf   :  { %350 = vmatpush3.bf16.msra.mxu0 %v402_v11 }
  0x10   :  { %351 = vmatprep.subr.bf16.mxu0 %v404_v12  ;;  %380 = vmatpush3.bf16.msra.mxu1 %v406_v13 }
  0x11   :  { %381 = vmatprep.subr.bf16.mxu1 %v416_v1 }
  0x13   :  { %352 = vmatpush3.bf16.msra.mxu0 %v405_v14 }
  0x14   :  { %353 = vmatprep.subr.bf16.mxu0 %v407_v15  ;;  %382 = vmatpush3.bf16.msra.mxu1 %v409_v16 }
  0x15   :  { %383 = vmatprep.subr.bf16.mxu1 %v416_v1 }
  0x17   :  { %354 = vmatpush3.bf16.msra.mxu0 %v408_v17 }
  0x18   :  { %355 = vmatprep.subr.bf16.mxu0 %v410_v18  ;;  %384 = vmatpush3.bf16.msra.mxu1 %v412_v19 }
  0x19   :  { %385 = vmatprep.subr.bf16.mxu1 %v416_v1 }
  0x1b   :  { %356 = vmatpush3.bf16.msra.mxu0 %v411_v22 }
  0x1c   :  { %357 = vmatprep.subr.bf16.mxu0 %v413_v25  ;;  %386 = vmatpush3.bf16.msra.mxu1 %v217_v29 }
  0x1f   :  { %358 = vmatpush3.bf16.msra.mxu0 %v414_v28  ;;  %388 = vmatmul.mubr.msk.bf16.vlgmr.msra.gmra.mrb[0].mxu1 %vm211_vm2, %v23_v32 }
  0x22   :  { %252 = vmatmul.mubr.bf16.vlgmr.msra.gmra.mrb[0].mxu0 %v21_v33 }
  0xf2   :  { %v294_v34 = vpop.f32.mrb[0].mxu1 }
  0xf3   :  { %v389_v36 = vpop.f32.mrb[1].mxu1 }
  0xf4   :  { %v297_v39 = vpop.f32.mrb[2].mxu1 }
  0xf5   :  { %v359_v35 = vpop.f32.mrb[0].mxu0  ;;  %v390_v42 = vpop.f32.mrb[3].mxu1 }
  0xf6   :  { %v360_v37 = vpop.f32.mrb[1].mxu0 }
  0xf7   :  { %v361_v40 = vadd.f32 %v360_v37, %v359_v35  ;;  %v362_v41 = vpop.f32.mrb[2].mxu0 }
  0xf8   :  { %v363_v43 = vpop.f32.mrb[3].mxu0 }
  0xf9   :  { %v254_v44 = vadd.f32 %v361_v40, %v318_v38  ;;  %v364_v45 = vadd.f32 %v363_v43, %v362_v41 }
  0xfb   :  { %v295_v46 = vadd.f32 %v294_v34, %v254_v44  ;;  %v257_v47 = vadd.f32 %v364_v45, %v318_v38 }
  0xfd   :  { %v301_v48 = vadd.f32 3.0, %v295_v46  ;;  %v298_v49 = vadd.f32 %v297_v39, %v257_v47 }
  0xff   :  { %v303_v50 = vmax.f32 %v301_v48, 0.0  ;;  %v302_v51 = vadd.f32 3.0, %v298_v49 }
 0x101   :  { %v305_v52 = vmin.f32 %v303_v50, 6.0  ;;  %v304_v53 = vmax.f32 %v302_v51, 0.0 }
 0x103   :  { %v307_v54 = vmul.f32 %v305_v52, %v295_v46  ;;  %v306_v55 = vmin.f32 %v304_v53, 6.0 }
 0x105   :  { %v309_v56 = vmul.f32 0.16666667, %v307_v54  ;;  %v308_v57 = vmul.f32 %v306_v55, %v298_v49 }
 0x107   :  { %312 = vst.msk [vmem:[%s537_s3] sm:$0xff] %vm311_vm3, %v309_v56  ;;  %v310_v58 = vmul.f32 0.16666667, %v308_v57 }
 0x109   :  { %313 = vst.msk [vmem:[%s537_s3 + $0x8] sm:$0xff] %vm311_vm3, %v310_v58 }

// kernel: insinet_forward.46
= control target key start
LH: loop header
LB: loop body
LE: loop exit
PB: predicated region body
PF: predicated region fallthrough
CT: control target
= control target key end

     0   :  { %v271_v0 = vmov 0.0   ;;  %vm272_vm0 = vmmov 0   ;;  %vm75_vm1 = vcmask 654336   ;;  %s348_s3 = inlined_call_operand.vmem [shape: bf16[80,80], index: 3, kind: input, shape index: {}]   ;;  %s349_s2 = inlined_call_operand.vmem [shape: bf16[80,80], index: 2, kind: input, shape index: {}]   ;;  %s350_s1 = inlined_call_operand.vmem [shape: f32[8,80], index: 1, kind: input, shape index: {}]   ;;  %s351_s0 = inlined_call_operand.vmem [shape: f32[8,80], index: 0, kind: input, shape index: {}]   ;;  %s352_s4 = inlined_call_operand.vmem [shape: f32[1,80], index: 4, kind: input, shape index: {}]   ;;  %s353_s5 = inlined_call_operand.vmem [shape: f32[8,80], index: 5, kind: output, shape index: {}]  }
   0x1   :  { %231 = vmatprep.subr.bf16.mxu0 %v271_v0  ;;  %245 = vmatprep.subr.bf16.mxu1 %v271_v0  ;;  %v261_v1 = vld [vmem:[%s348_s3] sm:$0xff]   ;;  %v263_v3 = vld [vmem:[%s348_s3 + $0x8] sm:$0xff]   ;;  %v265_v5 = vld [vmem:[%s348_s3 + $0x10] sm:$0xff]  }
   0x2   :  { %v262_v2 = vld [vmem:[%s349_s2] sm:$0xff]   ;;  %241 = vmatprep.mubr.msk.bf16.mxu0 %vm272_vm0, %v271_v0  ;;  %255 = vmatprep.mubr.msk.bf16.mxu1 %vm272_vm0, %v271_v0  ;;  %v264_v4 = vld [vmem:[%s349_s2 + $0x8] sm:$0xff]   ;;  %v266_v6 = vld [vmem:[%s349_s2 + $0x10] sm:$0xff]  }
   0x3   :  { %232 = vmatpush3.bf16.msra.mxu0 %v261_v1  ;;  %246 = vmatpush3.bf16.msra.mxu1 %v262_v2  ;;  %v267_v7 = vld [vmem:[%s348_s3 + $0x18] sm:$0xff]   ;;  %v269_v9 = vld [vmem:[%s348_s3 + $0x20] sm:$0xff]  }
   0x4   :  { %233 = vmatprep.subr.bf16.mxu0 %v271_v0  ;;  %247 = vmatprep.subr.bf16.mxu1 %v271_v0  ;;  %v268_v8 = vld [vmem:[%s349_s2 + $0x18] sm:$0xff]   ;;  %v33_v10 = vld [vmem:[%s350_s1] sm:$0xff] }
   0x5   :  { %v270_v11 = vld [vmem:[%s349_s2 + $0x20] sm:$0xff]   ;;  %v34_v13 = vpack.c.bf16 %v33_v10, %v33_v10 }
   0x6   :  { %v21_v12 = vld [vmem:[%s351_s0] sm:$0xff] }
   0x7   :  { %234 = vmatpush3.bf16.msra.mxu0 %v263_v3  ;;  %248 = vmatpush3.bf16.msra.mxu1 %v264_v4  ;;  %v22_v14 = vpack.c.bf16 %v21_v12, %v21_v12  ;;  %v218_v17 = vld [vmem:[%s352_s4] ss:$0 sm:$0xff] }
   0x8   :  { %235 = vmatprep.subr.bf16.mxu0 %v271_v0  ;;  %249 = vmatprep.subr.bf16.mxu1 %v271_v0 }
   0xb   :  { %236 = vmatpush3.bf16.msra.mxu0 %v265_v5  ;;  %250 = vmatpush3.bf16.msra.mxu1 %v266_v6 }
   0xc   :  { %237 = vmatprep.subr.bf16.mxu0 %v271_v0  ;;  %251 = vmatprep.subr.bf16.mxu1 %v271_v0 }
   0xf   :  { %238 = vmatpush3.bf16.msra.mxu0 %v267_v7  ;;  %252 = vmatpush3.bf16.msra.mxu1 %v268_v8 }
  0x10   :  { %239 = vmatprep.subr.bf16.mxu0 %v271_v0  ;;  %253 = vmatprep.subr.bf16.mxu1 %v271_v0 }
  0x13   :  { %240 = vmatpush3.bf16.msra.mxu0 %v269_v9  ;;  %254 = vmatpush3.bf16.msra.mxu1 %v270_v11 }
  0x16   :  { %242 = vmatmul.mubr.msk.bf16.vlgmr.msra.gmra.mrb[0].mxu0 %vm75_vm1, %v34_v13  ;;  %256 = vmatmul.mubr.msk.bf16.vlgmr.msra.gmra.mrb[0].mxu1 %vm75_vm1, %v22_v14 }
  0xe9   :  { %v113_v15 = vpop.f32.mrb[0].mxu0  ;;  %v186_v16 = vpop.f32.mrb[0].mxu1 }
  0xea   :  { %v243_v18 = vpop.f32.mrb[1].mxu0  ;;  %v187_v19 = vadd.f32 %v186_v16, %v113_v15  ;;  %v257_v20 = vpop.f32.mrb[1].mxu1 }
  0xeb   :  { %v116_v21 = vpop.f32.mrb[2].mxu0  ;;  %v189_v22 = vpop.f32.mrb[2].mxu1 }
  0xec   :  { %v244_v23 = vpop.f32.mrb[3].mxu0  ;;  %v199_v24 = vadd.f32 %v218_v17, %v187_v19  ;;  %v258_v25 = vpop.f32.mrb[3].mxu1 }
  0xee   :  { %v200_v26 = vmax.f32 %v199_v24, 0.0 }
  0xf0   :  { %201 = vst.msk [vmem:[%s353_s5] sm:$0xff] %vm75_vm1, %v200_v26 }

// kernel: insinet_forward.45
= control target key start
LH: loop header
LB: loop body
LE: loop exit
PB: predicated region body
PF: predicated region fallthrough
CT: control target
= control target key end

     0   :  { %vm39_vm0 = vcmask 654336   ;;  %v106_v5 = vmov 0   ;;  %vm85_vm1 = vcmask 7168   ;;  %s174_s1 = inlined_call_operand.vmem [shape: f32[8,80], index: 1, kind: input, shape index: {}]   ;;  %s175_s2 = inlined_call_operand.vmem [shape: f32[1,80], index: 2, kind: input, shape index: {}]   ;;  %s176_s3 = inlined_call_operand.<no memory space> [shape: f32[1,1], index: 3, kind: input, shape index: {}]   ;;  %s177_s5 = inlined_call_operand.<no memory space> [shape: f32[1,1], index: 5, kind: input, shape index: {}]   ;;  %s178_s0 = inlined_call_operand.vmem [shape: f32[8,80], index: 0, kind: input, shape index: {}]   ;;  %s179_s4 = inlined_call_operand.vmem [shape: f32[1,80], index: 4, kind: input, shape index: {}]   ;;  %s180_s6 = inlined_call_operand.vmem [shape: f32[8,80], index: 6, kind: output, shape index: {0}]   ;;  %s181_s7 = inlined_call_operand.vmem [shape: f32[8,1], index: 7, kind: output, shape index: {1}]  }
   0x1   :  { %v30_v0 = vld [vmem:[%s174_s1] sm:$0xff]  ;;  %v13_v2 = vstv %s176_s3  ;;  %101 = vset.pattern.permute.xlu0 %v106_v5  ;;  %v15_v13 = vstv %s177_s5 }
   0x2   :  { %v95_v1 = vld [vmem:[%s175_s2] ss:$0 sm:$0xff]  ;;  %14 = vst [vmem:[#allocation2] sm:$0x1] %v13_v2  ;;  %16 = vst [vmem:[#allocation3] sm:$0x1] %v15_v13 }
   0x3   :  { %v38_v3 = vmul.f32 %v95_v1, %v30_v0  ;;  %v29_v14 = vld [vmem:[%s178_s0] sm:$0xff] }
   0x4   :  { %v98_v17 = vld [vmem:[%s179_s4] ss:$0 sm:$0xff] }
   0x5   :  { %v40_v4 = vsel %vm39_vm0, %v38_v3, 0.0 }
   0x6   :  { %41 = vadd.xlane.f32.xlu0 %v40_v4 }
   0x9   :  { %v96_v6 = vld [vmem:[#allocation2] ss:$0 sm:$0xff]  ;;  %v99_v21 = vld [vmem:[#allocation3] ss:$0 sm:$0xff] }
  0x93   :  { %v42_v7 = vpop.xlane.xlu0 %41 }
  0x94   :  { %v50_v8 = vadd.f32 %v96_v6, %v42_v7 }
  0x96   :  { %v97_v9 = vmul.f32 -1.442695, %v50_v8 }
  0x98   :  { %102 = vpow2.f32 %v97_v9 }
  0xa2   :  { %v103_v10 = vpop.eup %102 }
  0xa3   :  { %v54_v11 = vadd.f32 1.0, %v103_v10 }
  0xa5   :  { %104 = vrcp.f32 %v54_v11 }
  0xaf   :  { %v105_v12 = vpop.eup %104 }
  0xb0   :  { %59 = vperm.xlu0 %101, %v105_v12  }
 0x12f   :  { %v60_v15 = vpop.permute.xlu0 %59 }
 0x130   :  { %v62_v16 = vmul.f32 %v60_v15, %v29_v14 }
 0x132   :  { %v63_v18 = vadd.f32 %v62_v16, %v29_v14 }
 0x134   :  { %64 = vst.msk [vmem:[%s180_s6] sm:$0xff] %vm39_vm0, %v63_v18  ;;  %v72_v19 = vmul.f32 %v98_v17, %v63_v18 }
 0x136   :  { %v73_v20 = vsel %vm39_vm0, %v72_v19, 0.0 }
 0x137   :  { %74 = vadd.xlane.f32.xlu1 %v73_v20 }
 0x1c4   :  { %v75_v22 = vpop.xlane.xlu1 %74 }
 0x1c5   :  { %v83_v23 = vadd.f32 %v99_v21, %v75_v22 }
 0x1c7   :  { %v84_v24 = vmax.f32 %v83_v23, 0.0 }
 0x1c9   :  { %86 = vst.msk [vmem:[%s181_s7] sm:$0xff] %vm85_vm1, %v84_v24 }

// kernel: insinet_forward.44
= control target key start
LH: loop header
LB: loop body
LE: loop exit
PB: predicated region body
PF: predicated region fallthrough
CT: control target
= control target key end

     0   :  { %13 = vsyncpa [#allocation3], 0  ;;  %v358_v1 = vmov 0.0   ;;  %vm359_vm0 = vmmov 0   ;;  %s473_s0 = inlined_call_operand.vmem [shape: f32[8,80], index: 0, kind: input, shape index: {}]   ;;  %s474_s1 = inlined_call_operand.vmem [shape: f32[8,80], index: 1, kind: input, shape index: {}]   ;;  %s475_s2 = inlined_call_operand.vmem [shape: bf16[80,80], index: 2, kind: input, shape index: {}]   ;;  %s476_s3 = inlined_call_operand.vmem [shape: bf16[80,80], index: 3, kind: input, shape index: {}]   ;;  %s477_s4 = inlined_call_operand.vmem [shape: f32[1,80], index: 4, kind: input, shape index: {}]   ;;  %s478_s5 = inlined_call_operand.hbm [shape: f32[8,80], index: 5, kind: output, shape index: {0}]   ;;  %s479_s6 = inlined_call_operand.hbm [shape: f32[8,80], index: 6, kind: output, shape index: {1}]   ;;  %s480_s7 = inlined_call_operand.vmem [shape: f32[8,80], index: 7, kind: output, shape index: {2}]  }
   0x1   :  { %v300_v0 = vld [vmem:[%s476_s3] sm:$0xff]   ;;  %268 = vmatprep.subr.bf16.mxu0 %v358_v1  ;;  %282 = vmatprep.subr.bf16.mxu1 %v358_v1  ;;  %v302_v3 = vld [vmem:[%s476_s3 + $0x8] sm:$0xff]   ;;  %v304_v5 = vld [vmem:[%s476_s3 + $0x10] sm:$0xff]  }
   0x2   :  { %v301_v2 = vld [vmem:[%s475_s2] sm:$0xff]   ;;  %269 = vmatpush3.bf16.msra.mxu0 %v300_v0  ;;  %278 = vmatprep.mubr.msk.bf16.mxu0 %vm359_vm0, %v358_v1  ;;  %v303_v4 = vld [vmem:[%s475_s2 + $0x8] sm:$0xff]   ;;  %v305_v6 = vld [vmem:[%s475_s2 + $0x10] sm:$0xff]  }
   0x3   :  { %283 = vmatpush3.bf16.msra.mxu1 %v301_v2  ;;  %270 = vmatprep.subr.bf16.mxu0 %v358_v1  ;;  %v306_v7 = vld [vmem:[%s476_s3 + $0x18] sm:$0xff]  }
   0x4   :  { %284 = vmatprep.subr.bf16.mxu1 %v358_v1  ;;  %292 = vmatprep.mubr.msk.bf16.mxu1 %vm359_vm0, %v358_v1 }
   0x6   :  { %271 = vmatpush3.bf16.msra.mxu0 %v302_v3 }
   0x7   :  { %285 = vmatpush3.bf16.msra.mxu1 %v303_v4  ;;  %272 = vmatprep.subr.bf16.mxu0 %v358_v1 }
   0x8   :  { %286 = vmatprep.subr.bf16.mxu1 %v358_v1 }
   0xa   :  { %273 = vmatpush3.bf16.msra.mxu0 %v304_v5 }
   0xb   :  { %14 = vsyncpa [#allocation5], 0  ;;  %287 = vmatpush3.bf16.msra.mxu1 %v305_v6  ;;  %274 = vmatprep.subr.bf16.mxu0 %v358_v1  ;;  %v307_v8 = vld [vmem:[%s475_s2 + $0x18] sm:$0xff]   ;;  %v308_v9 = vld [vmem:[%s476_s3 + $0x20] sm:$0xff]   ;;  %vm80_vm1 = vcmask 654336   ;;  %s361_s25 = smov [#allocation4]  }
   0xc   :  { %288 = vmatprep.subr.bf16.mxu1 %v358_v1  ;;  %v27_v10 = vld [vmem:[%s474_s1] sm:$0xff]  ;;  %s227_s26 = sshll.u32 %s361_s25, 4  ;;  %s228_s26 = int_to_ptr.vmem [resolvable:$true] %s227_s26 }
   0xd   :  { %v309_v11 = vld [vmem:[%s475_s2 + $0x20] sm:$0xff]   ;;  %v39_v13 = vpack.c.bf16 %v27_v10, %v27_v10 }
   0xe   :  { %275 = vmatpush3.bf16.msra.mxu0 %v306_v7  ;;  %v26_v12 = vld [vmem:[%s473_s0] sm:$0xff]  ;;  %s360_s0 = smov [#allocation2]  }
   0xf   :  { %289 = vmatpush3.bf16.msra.mxu1 %v307_v8  ;;  %276 = vmatprep.subr.bf16.mxu0 %v358_v1  ;;  %v28_v14 = vpack.c.bf16 %v26_v12, %v26_v12  ;;  %v255_v17 = vld [vmem:[%s477_s4] ss:$0 sm:$0xff]  ;;  %s217_s2 = sshll.u32 %s360_s0, 4  ;;  %s218_s2 = int_to_ptr.vmem [resolvable:$true] %s217_s2 }
  0x10   :  { %290 = vmatprep.subr.bf16.mxu1 %v358_v1  ;;  %s310_s4 = scalar_lea.vmem %s218_s2, 128  ;;  %p315_p1 = scmp.lt.s32.totalorder %s218_s2, %s218_s2 }
  0x11   :  { %p311_p0 = scmp.ne.s32.totalorder %s218_s2, %s310_s4  ;;  %p316_p2 = scmp.lt.s32.totalorder %s310_s4, %s310_s4 }
  0x12   :  { %277 = vmatpush3.bf16.msra.mxu0 %v308_v9 }
  0x13   :  { %291 = vmatpush3.bf16.msra.mxu1 %v309_v11  ;;  %p317_p3 = por %p316_p2, %p315_p1 }
  0x15   :  { %279 = vmatmul.mubr.msk.bf16.vlgmr.msra.gmra.mrb[0].mxu0 %vm80_vm1, %v39_v13  ;;  %p318_p4 = pnand %p317_p3, %p311_p0 }
  0x16   :  { %293 = vmatmul.mubr.msk.bf16.vlgmr.msra.gmra.mrb[0].mxu1 %vm80_vm1, %v28_v14 }
  0xe8   :  { %v118_v15 = vpop.f32.mrb[0].mxu0 }
  0xe9   :  { %v191_v16 = vpop.f32.mrb[0].mxu1  ;;  %v280_v18 = vpop.f32.mrb[1].mxu0 }
  0xea   :  { %v192_v19 = vadd.f32 %v191_v16, %v118_v15  ;;  %v294_v20 = vpop.f32.mrb[1].mxu1  ;;  %v121_v21 = vpop.f32.mrb[2].mxu0 }
  0xeb   :  { %v194_v22 = vpop.f32.mrb[2].mxu1  ;;  %v281_v23 = vpop.f32.mrb[3].mxu0 }
  0xec   :  { %v204_v24 = vadd.f32 %v255_v17, %v192_v19  ;;  %v295_v25 = vpop.f32.mrb[3].mxu1 }
  0xee   :  { %v205_v26 = vmax.f32 %v204_v24, 0.0 }
  0xf0   :  { %210 = vst.msk [vmem:[%s480_s7] sm:$0xff] %vm80_vm1, %v205_v26  ;;  %v206_v27 = vadd.f32 %v205_v26, %v26_v12  ;;  %v208_v28 = vadd.f32 %v205_v26, %v27_v10 }
  0xf2   :  { %207 = vst.msk [vmem:[#allocation2] sm:$0xff] %vm80_vm1, %v206_v27  ;;  %209 = vst.msk [vmem:[#allocation4] sm:$0xff] %vm80_vm1, %v208_v28 }
  0xf3   :  { %321 = shalt.err (!%p318_p4)
}
  0xf4   :  { %s322_s8 = scalar_lea.hbm %s478_s5, 128 }
  0xf5   :  { %p323_p5 = scmp.ne.s32.totalorder %s478_s5, %s322_s8  ;;  %p326_p6 = scmp.lt.u32.totalorder %s322_s8, %s478_s5 }
  0xf7   :  { %p328_p7 = pnand %p326_p6, %p323_p5 }
  0xf9   :  { %331 = shalt.err (!%p328_p7)
}
  0xfa   :  { %220 = dma.vmem_to_hbm [thread:$0]  %s218_s2, 128, %s478_s5, [#allocation3]  }
  0xfb   :  { %s332_s14 = scalar_lea.vmem %s228_s26, 128  ;;  %p337_p9 = scmp.lt.s32.totalorder %s228_s26, %s228_s26 }
  0xfc   :  { %p333_p8 = scmp.ne.s32.totalorder %s228_s26, %s332_s14  ;;  %p338_p10 = scmp.lt.s32.totalorder %s332_s14, %s332_s14 }
  0xfe   :  { %p339_p11 = por %p338_p10, %p337_p9 }
 0x100   :  { %p340_p12 = pnand %p339_p11, %p333_p8 }
 0x102   :  { %343 = shalt.err (!%p340_p12)
}
 0x103   :  { %s344_s17 = scalar_lea.hbm %s479_s6, 128 }
 0x104   :  { %p345_p13 = scmp.ne.s32.totalorder %s479_s6, %s344_s17  ;;  %p348_p0 = scmp.lt.u32.totalorder %s344_s17, %s479_s6 }
 0x106   :  { %p350_p1 = pnand %p348_p0, %p345_p13 }
 0x108   :  { %353 = shalt.err (!%p350_p1)
}
 0x109   :  { %230 = dma.vmem_to_hbm [thread:$0]  %s228_s26, 128, %s479_s6, [#allocation5]  }
 0x10a   :  { %354 = dma.done.wait [#allocation3], 128  }
 0x10b   :  { %355 = vsyncadd [#allocation3], 4294967168 }
 0x10c   :  { %356 = dma.done.wait [#allocation5], 128  }
 0x10d   :  { %357 = vsyncadd [#allocation5], 4294967168 }
 0x10e   :  { %241 = vsyncpa [#allocation3], 1 }
 0x10f   :  { %242 = vsyncpa [#allocation5], 1 }

// kernel: insinet_forward.47
= control target key start
LH: loop header
LB: loop body
LE: loop exit
PB: predicated region body
PF: predicated region fallthrough
CT: control target
= control target key end

     0   :  { %vm36_vm0 = vcmask 654336   ;;  %v202_v5 = vmov 0   ;;  %v203_v6 = vmov 0.0   ;;  %vm204_vm1 = vmmov 0   ;;  %s275_s1 = inlined_call_operand.vmem [shape: f32[8,80], index: 1, kind: input, shape index: {}]   ;;  %s276_s2 = inlined_call_operand.vmem [shape: f32[1,80], index: 2, kind: input, shape index: {}]   ;;  %s277_s3 = inlined_call_operand.<no memory space> [shape: f32[1,1], index: 3, kind: input, shape index: {}]   ;;  %s278_s4 = inlined_call_operand.vmem [shape: bf16[80,40], index: 4, kind: input, shape index: {}]   ;;  %s279_s0 = inlined_call_operand.vmem [shape: f32[8,80], index: 0, kind: input, shape index: {}]   ;;  %s280_s5 = inlined_call_operand.vmem [shape: f32[1,40], index: 5, kind: input, shape index: {}]   ;;  %s281_s6 = inlined_call_operand.vmem [shape: f32[8,40], index: 6, kind: output, shape index: {}]  }
   0x1   :  { %v27_v0 = vld [vmem:[%s275_s1] sm:$0xff]  ;;  %v11_v2 = vstv %s277_s3  ;;  %192 = vset.pattern.permute.xlu0 %v202_v5  ;;  %175 = vmatprep.subr.bf16.mxu0 %v203_v6  ;;  %v194_v8 = vld [vmem:[%s278_s4 + $0x8] sm:$0xff]   ;;  %v195_v9 = vld [vmem:[%s278_s4 + $0x10] sm:$0xff]   ;;  %vm153_vm2 = vcmask 326656  }
   0x2   :  { %v159_v1 = vld [vmem:[%s276_s2] ss:$0 sm:$0xff]  ;;  %12 = vst [vmem:[#allocation2] sm:$0x1] %v11_v2  ;;  %v196_v10 = vld [vmem:[%s278_s4 + $0x18] sm:$0xff]   ;;  %185 = vmatprep.mubr.msk.bf16.mxu0 %vm204_vm1, %v203_v6 }
   0x3   :  { %v35_v3 = vmul.f32 %v159_v1, %v27_v0  ;;  %v193_v7 = vld [vmem:[%s278_s4] sm:$0xff]  }
   0x4   :  { %176 = vmatpush3.bf16.msra.mxu0 %v193_v7  ;;  %v197_v18 = vld [vmem:[%s278_s4 + $0x20] sm:$0xff]  }
   0x5   :  { %v37_v4 = vsel %vm36_vm0, %v35_v3, 0.0  ;;  %177 = vmatprep.subr.bf16.mxu0 %v203_v6  ;;  %v26_v19 = vld [vmem:[%s279_s0] sm:$0xff] }
   0x6   :  { %38 = vadd.xlane.f32.xlu0 %v37_v4  ;;  %v162_v24 = vld [vmem:[%s280_s5] ss:$0 sm:$0xff] }
   0x8   :  { %178 = vmatpush3.bf16.msra.mxu0 %v194_v8 }
   0x9   :  { %179 = vmatprep.subr.bf16.mxu0 %v203_v6  ;;  %v160_v11 = vld [vmem:[#allocation2] ss:$0 sm:$0xff] }
   0xc   :  { %180 = vmatpush3.bf16.msra.mxu0 %v195_v9 }
   0xd   :  { %181 = vmatprep.subr.bf16.mxu0 %v203_v6 }
  0x10   :  { %182 = vmatpush3.bf16.msra.mxu0 %v196_v10 }
  0x11   :  { %183 = vmatprep.subr.bf16.mxu0 %v203_v6 }
  0x14   :  { %184 = vmatpush3.bf16.msra.mxu0 %v197_v18 }
  0x93   :  { %v39_v12 = vpop.xlane.xlu0 %38 }
  0x94   :  { %v47_v13 = vadd.f32 %v160_v11, %v39_v12 }
  0x96   :  { %v161_v14 = vmul.f32 -1.442695, %v47_v13 }
  0x98   :  { %198 = vpow2.f32 %v161_v14 }
  0xa2   :  { %v199_v15 = vpop.eup %198 }
  0xa3   :  { %v51_v16 = vadd.f32 1.0, %v199_v15 }
  0xa5   :  { %200 = vrcp.f32 %v51_v16 }
  0xaf   :  { %v201_v17 = vpop.eup %200 }
  0xb0   :  { %56 = vperm.xlu0 %192, %v201_v17  }
 0x12f   :  { %v57_v20 = vpop.permute.xlu0 %56 }
 0x130   :  { %v59_v21 = vmul.f32 %v57_v20, %v26_v19 }
 0x132   :  { %v60_v22 = vadd.f32 %v59_v21, %v27_v0 }
 0x134   :  { %v61_v23 = vpack.c.bf16 %v60_v22, %v60_v22 }
 0x136   :  { %186 = vmatmul.mubr.msk.bf16.vlgmr.msra.gmra.mrb[0].mxu0 %vm36_vm0, %v61_v23 }
 0x209   :  { %v146_v25 = vpop.f32.mrb[0].mxu0 }
 0x20a   :  { %v147_v26 = vadd.f32 %v162_v24, %v146_v25  ;;  %v187_v27 = vpop.f32.mrb[1].mxu0 }
 0x20b   :  { %v149_v28 = vpop.f32.mrb[2].mxu0 }
 0x20c   :  { %v152_v29 = vmax.f32 %v147_v26, 0.0  ;;  %v188_v30 = vpop.f32.mrb[3].mxu0 }
 0x20e   :  { %154 = vst.msk [vmem:[%s281_s6] sm:$0xff] %vm153_vm2, %v152_v29 }

// kernel: insinet_forward.40
= control target key start
LH: loop header
LB: loop body
LE: loop exit
PB: predicated region body
PF: predicated region fallthrough
CT: control target
= control target key end

     0   :  { %vm48_vm0 = vcmask 326656   ;;  %v206_v14 = vmov 0   ;;  %vm166_vm1 = vcmask 7168   ;;  %s319_s1 = inlined_call_operand.vmem [shape: f32[32,40], index: 1, kind: input, shape index: {}]   ;;  %s320_s2 = inlined_call_operand.vmem [shape: f32[1,40], index: 2, kind: input, shape index: {}]   ;;  %s321_s3 = inlined_call_operand.<no memory space> [shape: f32[1,1], index: 3, kind: input, shape index: {}]   ;;  %s322_s5 = inlined_call_operand.<no memory space> [shape: f32[1,1], index: 5, kind: input, shape index: {}]   ;;  %s323_s0 = inlined_call_operand.vmem [shape: f32[32,40], index: 0, kind: input, shape index: {}]   ;;  %s324_s4 = inlined_call_operand.vmem [shape: f32[1,40], index: 4, kind: input, shape index: {}]   ;;  %s325_s6 = inlined_call_operand.vmem [shape: f32[32,40], index: 6, kind: output, shape index: {0}]   ;;  %s326_s7 = inlined_call_operand.vmem [shape: f32[32,1], index: 7, kind: output, shape index: {1}]  }
   0x1   :  { %v33_v0 = vld [vmem:[%s319_s1] sm:$0xff]  ;;  %v34_v2 = vld [vmem:[%s319_s1 + $0x8] sm:$0xff]  ;;  %v13_v3 = vstv %s321_s3  ;;  %v35_v6 = vld [vmem:[%s319_s1 + $0x10] sm:$0xff]  ;;  %188 = vset.pattern.permute.xlu0 %v206_v14  ;;  %189 = vset.pattern.permute.xlu1 %v206_v14 }
   0x2   :  { %v179_v1 = vld [vmem:[%s320_s2] ss:$0 sm:$0xff]  ;;  %v36_v7 = vld [vmem:[%s319_s1 + $0x18] sm:$0xff]  ;;  %14 = vst [vmem:[#allocation2] sm:$0x1] %v13_v3  ;;  %v15_v40 = vstv %s322_s5  ;;  %v30_v44 = vld [vmem:[%s323_s0 + $0x8] sm:$0xff] }
   0x3   :  { %v44_v4 = vmul.f32 %v179_v1, %v33_v0  ;;  %v45_v5 = vmul.f32 %v179_v1, %v34_v2  ;;  %v46_v8 = vmul.f32 %v179_v1, %v35_v6  ;;  %v47_v9 = vmul.f32 %v179_v1, %v36_v7  ;;  %16 = vst [vmem:[#allocation3] sm:$0x1] %v15_v40  ;;  %v29_v41 = vld [vmem:[%s323_s0] sm:$0xff]  ;;  %v31_v50 = vld [vmem:[%s323_s0 + $0x10] sm:$0xff]  ;;  %v32_v56 = vld [vmem:[%s323_s0 + $0x18] sm:$0xff] }
   0x4   :  { %v185_v45 = vld [vmem:[%s324_s4] ss:$0 sm:$0xff] }
   0x5   :  { %v49_v10 = vsel %vm48_vm0, %v44_v4, 0.0  ;;  %v55_v11 = vsel %vm48_vm0, %v46_v8, 0.0  ;;  %v52_v12 = vsel %vm48_vm0, %v45_v5, 0.0  ;;  %v58_v13 = vsel %vm48_vm0, %v47_v9, 0.0 }
   0x6   :  { %50 = vadd.xlane.f32.xlu0 %v49_v10  ;;  %56 = vadd.xlane.f32.xlu1 %v55_v11 }
   0x9   :  { %v180_v15 = vld [vmem:[#allocation2] ss:$0 sm:$0xff] }
   0xa   :  { %53 = vadd.xlane.f32.xlu0 %v52_v12  ;;  %59 = vadd.xlane.f32.xlu1 %v58_v13  ;;  %v186_v2 = vld [vmem:[#allocation3] ss:$0 sm:$0xff] }
  0x93   :  { %v51_v16 = vpop.xlane.xlu0 %50  ;;  %v57_v18 = vpop.xlane.xlu1 %56 }
  0x94   :  { %v68_v17 = vadd.f32 %v180_v15, %v51_v16  ;;  %v70_v19 = vadd.f32 %v180_v15, %v57_v18 }
  0x96   :  { %v181_v20 = vmul.f32 -1.442695, %v68_v17  ;;  %v183_v22 = vmul.f32 -1.442695, %v70_v19 }
  0x97   :  { %v54_v21 = vpop.xlane.xlu0 %53  ;;  %v60_v24 = vpop.xlane.xlu1 %59 }
  0x98   :  { %190 = vpow2.f32 %v181_v20  ;;  %v69_v23 = vadd.f32 %v180_v15, %v54_v21  ;;  %v71_v25 = vadd.f32 %v180_v15, %v60_v24 }
  0x99   :  { %192 = vpow2.f32 %v183_v22 }
  0x9a   :  { %v182_v26 = vmul.f32 -1.442695, %v69_v23  ;;  %v184_v27 = vmul.f32 -1.442695, %v71_v25 }
  0x9c   :  { %194 = vpow2.f32 %v182_v26 }
  0x9d   :  { %196 = vpow2.f32 %v184_v27 }
  0xa2   :  { %v191_v28 = vpop.eup %190 }
  0xa3   :  { %v84_v29 = vadd.f32 1.0, %v191_v28  ;;  %v193_v30 = vpop.eup %192 }
  0xa4   :  { %v86_v33 = vadd.f32 1.0, %v193_v30 }
  0xa5   :  { %198 = vrcp.f32 %v84_v29 }
  0xa6   :  { %v195_v31 = vpop.eup %194 }
  0xa7   :  { %v85_v32 = vadd.f32 1.0, %v195_v31  ;;  %v197_v34 = vpop.eup %196 }
  0xa8   :  { %v87_v35 = vadd.f32 1.0, %v197_v34 }
  0xa9   :  { %200 = vrcp.f32 %v85_v32 }
  0xaa   :  { %202 = vrcp.f32 %v86_v33 }
  0xab   :  { %204 = vrcp.f32 %v87_v35 }
  0xaf   :  { %v199_v36 = vpop.eup %198 }
  0xb0   :  { %98 = vperm.xlu0 %188, %v199_v36  }
  0xb3   :  { %v201_v37 = vpop.eup %200 }
  0xb4   :  { %103 = vperm.xlu1 %189, %v201_v37   ;;  %v203_v38 = vpop.eup %202 }
  0xb5   :  { %v205_v39 = vpop.eup %204 }
  0xb8   :  { %108 = vperm.xlu1 %189, %v203_v38  }
  0xbc   :  { %113 = vperm.xlu1 %189, %v205_v39  }
 0x12f   :  { %v99_v42 = vpop.permute.xlu0 %98 }
 0x130   :  { %v116_v43 = vmul.f32 %v99_v42, %v29_v41 }
 0x132   :  { %v120_v46 = vadd.f32 %v116_v43, %v29_v41 }
 0x133   :  { %v104_v47 = vpop.permute.xlu1 %103 }
 0x134   :  { %124 = vst.msk [vmem:[%s325_s6] sm:$0xff] %vm48_vm0, %v120_v46  ;;  %v117_v48 = vmul.f32 %v104_v47, %v30_v44  ;;  %v135_v49 = vmul.f32 %v185_v45, %v120_v46 }
 0x136   :  { %v121_v51 = vadd.f32 %v117_v48, %v30_v44  ;;  %v139_v52 = vsel %vm48_vm0, %v135_v49, 0.0 }
 0x137   :  { %v109_v53 = vpop.permute.xlu1 %108  ;;  %140 = vadd.xlane.f32.xlu1 %v139_v52 }
 0x138   :  { %125 = vst.msk [vmem:[%s325_s6 + $0x8] sm:$0xff] %vm48_vm0, %v121_v51  ;;  %v118_v54 = vmul.f32 %v109_v53, %v31_v50  ;;  %v136_v55 = vmul.f32 %v185_v45, %v121_v51 }
 0x13a   :  { %v122_v57 = vadd.f32 %v118_v54, %v31_v50  ;;  %v142_v58 = vsel %vm48_vm0, %v136_v55, 0.0 }
 0x13b   :  { %v114_v59 = vpop.permute.xlu1 %113  ;;  %143 = vadd.xlane.f32.xlu0 %v142_v58 }
 0x13c   :  { %126 = vst.msk [vmem:[%s325_s6 + $0x10] sm:$0xff] %vm48_vm0, %v122_v57  ;;  %v119_v60 = vmul.f32 %v114_v59, %v32_v56  ;;  %v137_v61 = vmul.f32 %v185_v45, %v122_v57 }
 0x13e   :  { %v123_v62 = vadd.f32 %v119_v60, %v32_v56  ;;  %v145_v63 = vsel %vm48_vm0, %v137_v61, 0.0 }
 0x13f   :  { %146 = vadd.xlane.f32.xlu1 %v145_v63 }
 0x140   :  { %127 = vst.msk [vmem:[%s325_s6 + $0x18] sm:$0xff] %vm48_vm0, %v123_v62  ;;  %v138_v0 = vmul.f32 %v185_v45, %v123_v62 }
 0x142   :  { %v148_v1 = vsel %vm48_vm0, %v138_v0, 0.0 }
 0x143   :  { %149 = vadd.xlane.f32.xlu1 %v148_v1 }
 0x1c4   :  { %v141_v3 = vpop.xlane.xlu1 %140 }
 0x1c5   :  { %v158_v4 = vadd.f32 %v186_v2, %v141_v3 }
 0x1c7   :  { %v162_v5 = vmax.f32 %v158_v4, 0.0 }
 0x1c8   :  { %v144_v6 = vpop.xlane.xlu0 %143 }
 0x1c9   :  { %167 = vst.msk [vmem:[%s326_s7] sm:$0xff] %vm166_vm1, %v162_v5  ;;  %v159_v7 = vadd.f32 %v186_v2, %v144_v6 }
 0x1cb   :  { %v163_v8 = vmax.f32 %v159_v7, 0.0 }
 0x1cc   :  { %v147_v9 = vpop.xlane.xlu1 %146 }
 0x1cd   :  { %168 = vst.msk [vmem:[%s326_s7 + $0x8] sm:$0xff] %vm166_vm1, %v163_v8  ;;  %v160_v10 = vadd.f32 %v186_v2, %v147_v9 }
 0x1cf   :  { %v164_v11 = vmax.f32 %v160_v10, 0.0 }
 0x1d0   :  { %v150_v12 = vpop.xlane.xlu1 %149 }
 0x1d1   :  { %169 = vst.msk [vmem:[%s326_s7 + $0x10] sm:$0xff] %vm166_vm1, %v164_v11  ;;  %v161_v13 = vadd.f32 %v186_v2, %v150_v12 }
 0x1d3   :  { %v165_v14 = vmax.f32 %v161_v13, 0.0 }
 0x1d5   :  { %170 = vst.msk [vmem:[%s326_s7 + $0x18] sm:$0xff] %vm166_vm1, %v165_v14 }

// kernel: insinet_forward.48
= control target key start
LH: loop header
LB: loop body
LE: loop exit
PB: predicated region body
PF: predicated region fallthrough
CT: control target
= control target key end

     0   :  { %vm45_vm0 = vcmask 326656   ;;  %v272_v14 = vmov 0   ;;  %vm156_vm1 = vcmask 1043456   ;;  %vm213_vm2 = vcmask 195584   ;;  %s384_s1 = inlined_call_operand.vmem [shape: f32[32,40], index: 1, kind: input, shape index: {}]   ;;  %s385_s2 = inlined_call_operand.vmem [shape: f32[1,40], index: 2, kind: input, shape index: {}]   ;;  %s386_s3 = inlined_call_operand.<no memory space> [shape: f32[1,1], index: 3, kind: input, shape index: {}]   ;;  %s387_s4 = inlined_call_operand.vmem [shape: bf16[40,24], index: 4, kind: input, shape index: {}]   ;;  %s388_s0 = inlined_call_operand.vmem [shape: f32[32,40], index: 0, kind: input, shape index: {}]   ;;  %s389_s5 = inlined_call_operand.vmem [shape: f32[1,24], index: 5, kind: input, shape index: {}]   ;;  %s390_s6 = inlined_call_operand.vmem [shape: f32[32,24], index: 6, kind: output, shape index: {}]  }
   0x1   :  { %v311_v0 = vld [vmem:[%s384_s1] sm:$0xff]  ;;  %v319_v2 = vld [vmem:[%s384_s1 + $0x8] sm:$0xff]  ;;  %v11_v3 = vstv %s386_s3  ;;  %v329_v6 = vld [vmem:[%s384_s1 + $0x10] sm:$0xff]  ;;  %251 = vset.pattern.permute.xlu0 %v272_v14  ;;  %252 = vset.pattern.permute.xlu1 %v272_v14 }
   0x2   :  { %v222_v1 = vld [vmem:[%s385_s2] ss:$0 sm:$0xff]  ;;  %v334_v7 = vld [vmem:[%s384_s1 + $0x18] sm:$0xff]  ;;  %12 = vst [vmem:[#allocation2] sm:$0x1] %v11_v3  ;;  %v254_v40 = vld [vmem:[%s387_s4 + $0x8] sm:$0xff]  }
   0x3   :  { %v41_v4 = vmul.f32 %v222_v1, %v311_v0  ;;  %v42_v5 = vmul.f32 %v222_v1, %v319_v2  ;;  %v43_v8 = vmul.f32 %v222_v1, %v329_v6  ;;  %v44_v9 = vmul.f32 %v222_v1, %v334_v7  ;;  %v253_v38 = vld [vmem:[%s387_s4] sm:$0xff]   ;;  %v255_v42 = vld [vmem:[%s387_s4 + $0x10] ss:$0 sps:$4 sm:$0xff]   ;;  %v27_v46 = vld [vmem:[%s388_s0 + $0x8] sm:$0xff] }
   0x4   :  { %239 = vmatprep.subr.bf16.mxu0 %v253_v38  ;;  %v158_v43 = vsel %vm156_vm1, %v255_v42, 0  ;;  %v26_v45 = vld [vmem:[%s388_s0] sm:$0xff]  ;;  %v28_v53 = vld [vmem:[%s388_s0 + $0x10] sm:$0xff]  ;;  %v29_v55 = vld [vmem:[%s388_s0 + $0x18] sm:$0xff] }
   0x5   :  { %v46_v10 = vsel %vm45_vm0, %v41_v4, 0.0  ;;  %v52_v11 = vsel %vm45_vm0, %v43_v8, 0.0  ;;  %v49_v12 = vsel %vm45_vm0, %v42_v5, 0.0  ;;  %v55_v13 = vsel %vm45_vm0, %v44_v9, 0.0  ;;  %240 = vmatpush3.bf16.msra.mxu0 %v253_v38  ;;  %v228_v62 = vld [vmem:[%s389_s5] ss:$0 sm:$0xff] }
   0x6   :  { %47 = vadd.xlane.f32.xlu0 %v46_v10  ;;  %53 = vadd.xlane.f32.xlu1 %v52_v11 }
   0x7   :  { %241 = vmatprep.subr.bf16.mxu0 %v254_v40 }
   0x9   :  { %v223_v15 = vld [vmem:[#allocation2] ss:$0 sm:$0xff]  ;;  %242 = vmatpush3.bf16.msra.mxu0 %v254_v40 }
   0xa   :  { %50 = vadd.xlane.f32.xlu0 %v49_v12  ;;  %56 = vadd.xlane.f32.xlu1 %v55_v13 }
   0xb   :  { %249 = vmatprep.subr.msk.bf16.mxu0 %vm156_vm1, %v255_v42 }
   0xd   :  { %244 = vmatpush3.bf16.msra.mxu0 %v158_v43 }
  0x93   :  { %v48_v16 = vpop.xlane.xlu0 %47  ;;  %v54_v18 = vpop.xlane.xlu1 %53 }
  0x94   :  { %v65_v17 = vadd.f32 %v223_v15, %v48_v16  ;;  %v67_v19 = vadd.f32 %v223_v15, %v54_v18 }
  0x96   :  { %v224_v20 = vmul.f32 -1.442695, %v65_v17  ;;  %v226_v22 = vmul.f32 -1.442695, %v67_v19 }
  0x97   :  { %v51_v21 = vpop.xlane.xlu0 %50  ;;  %v57_v24 = vpop.xlane.xlu1 %56 }
  0x98   :  { %256 = vpow2.f32 %v224_v20  ;;  %v66_v23 = vadd.f32 %v223_v15, %v51_v21  ;;  %v68_v25 = vadd.f32 %v223_v15, %v57_v24 }
  0x99   :  { %258 = vpow2.f32 %v226_v22 }
  0x9a   :  { %v225_v26 = vmul.f32 -1.442695, %v66_v23  ;;  %v227_v27 = vmul.f32 -1.442695, %v68_v25 }
  0x9c   :  { %260 = vpow2.f32 %v225_v26 }
  0x9d   :  { %262 = vpow2.f32 %v227_v27 }
  0xa2   :  { %v257_v28 = vpop.eup %256 }
  0xa3   :  { %v81_v29 = vadd.f32 1.0, %v257_v28  ;;  %v259_v30 = vpop.eup %258 }
  0xa4   :  { %v83_v33 = vadd.f32 1.0, %v259_v30 }
  0xa5   :  { %264 = vrcp.f32 %v81_v29 }
  0xa6   :  { %v261_v31 = vpop.eup %260 }
  0xa7   :  { %v82_v32 = vadd.f32 1.0, %v261_v31  ;;  %v263_v34 = vpop.eup %262 }
  0xa8   :  { %v84_v35 = vadd.f32 1.0, %v263_v34 }
  0xa9   :  { %266 = vrcp.f32 %v82_v32 }
  0xaa   :  { %268 = vrcp.f32 %v83_v33 }
  0xab   :  { %270 = vrcp.f32 %v84_v35 }
  0xaf   :  { %v265_v36 = vpop.eup %264 }
  0xb0   :  { %95 = vperm.xlu0 %251, %v265_v36  }
  0xb3   :  { %v267_v37 = vpop.eup %266 }
  0xb4   :  { %100 = vperm.xlu1 %252, %v267_v37   ;;  %v269_v39 = vpop.eup %268 }
  0xb5   :  { %v271_v41 = vpop.eup %270 }
  0xb8   :  { %105 = vperm.xlu1 %252, %v269_v39  }
  0xbc   :  { %110 = vperm.xlu1 %252, %v271_v41  }
 0x12f   :  { %v96_v44 = vpop.permute.xlu0 %95 }
 0x130   :  { %v113_v47 = vmul.f32 %v96_v44, %v26_v45 }
 0x132   :  { %v117_v50 = vadd.f32 %v113_v47, %v311_v0 }
 0x133   :  { %v101_v48 = vpop.permute.xlu1 %100 }
 0x134   :  { %v114_v49 = vmul.f32 %v101_v48, %v27_v46 }
 0x136   :  { %v118_v51 = vadd.f32 %v114_v49, %v319_v2 }
 0x137   :  { %v106_v52 = vpop.permute.xlu1 %105 }
 0x138   :  { %v121_v54 = vpack.c.bf16 %v118_v51, %v117_v50  ;;  %v115_v56 = vmul.f32 %v106_v52, %v28_v53 }
 0x13a   :  { %245 = vmatprep.mubr.msk.bf16.mxu0 %vm45_vm0, %v121_v54  ;;  %v119_v59 = vadd.f32 %v115_v56, %v329_v6 }
 0x13b   :  { %v111_v57 = vpop.permute.xlu1 %110 }
 0x13c   :  { %v116_v58 = vmul.f32 %v111_v57, %v29_v55 }
 0x13e   :  { %v120_v60 = vadd.f32 %v116_v58, %v334_v7 }
 0x140   :  { %v122_v61 = vpack.c.bf16 %v120_v60, %v119_v59 }
 0x142   :  { %246 = vmatmul.mubr.msk.bf16.vlgmr.msra.gmra.mrb[0].mxu0 %vm45_vm0, %v122_v61 }
 0x215   :  { %v247_v63 = vpop.f32.mrb[0].mxu0 }
 0x216   :  { %v203_v0 = vadd.f32 %v247_v63, %v228_v62  ;;  %v194_v1 = vpop.f32.mrb[1].mxu0 }
 0x217   :  { %v195_v2 = vadd.f32 %v228_v62, %v194_v1  ;;  %v248_v3 = vpop.f32.mrb[2].mxu0 }
 0x218   :  { %v211_v4 = vmax.f32 %v203_v0, 0.0  ;;  %v206_v5 = vadd.f32 %v248_v3, %v228_v62  ;;  %v197_v8 = vpop.f32.mrb[3].mxu0 }
 0x219   :  { %v209_v9 = vmax.f32 %v195_v2, 0.0  ;;  %v198_v6 = vadd.f32 %v228_v62, %v197_v8 }
 0x21a   :  { %216 = vst.msk [vmem:[%s390_s6 + $0x10] sm:$0xff] %vm213_vm2, %v211_v4  ;;  %v212_v7 = vmax.f32 %v206_v5, 0.0 }
 0x21b   :  { %214 = vst.msk [vmem:[%s390_s6] sm:$0xff] %vm213_vm2, %v209_v9  ;;  %v210_v10 = vmax.f32 %v198_v6, 0.0 }
 0x21c   :  { %217 = vst.msk [vmem:[%s390_s6 + $0x18] sm:$0xff] %vm213_vm2, %v212_v7 }
 0x21d   :  { %215 = vst.msk [vmem:[%s390_s6 + $0x8] sm:$0xff] %vm213_vm2, %v210_v10 }

// kernel: insinet_forward.35
= control target key start
LH: loop header
LB: loop body
LE: loop exit
PB: predicated region body
PF: predicated region fallthrough
CT: control target
= control target key end

     0   :  { %s803_s28 = smov 0   ;;  %s900_s0 = inlined_call_operand.vmem [shape: f32[128,24], index: 0, kind: input, shape index: {}]   ;;  %s901_s1 = inlined_call_operand.vmem [shape: f32[128,24], index: 1, kind: input, shape index: {}]   ;;  %s902_s2 = inlined_call_operand.vmem [shape: f32[1,24], index: 2, kind: input, shape index: {}]   ;;  %s903_s3 = inlined_call_operand.<no memory space> [shape: f32[1,1], index: 3, kind: input, shape index: {}]   ;;  %s904_s4 = inlined_call_operand.vmem [shape: f32[1,24], index: 4, kind: input, shape index: {}]   ;;  %s905_s6 = inlined_call_operand.vmem [shape: f32[128,24], index: 6, kind: output, shape index: {0}]   ;;  %s906_s7 = inlined_call_operand.vmem [shape: f32[128,1], index: 7, kind: output, shape index: {1}]   ;;  %s907_s5 = inlined_call_operand.<no memory space> [shape: f32[1,1], index: 5, kind: input, shape index: {}]  }
   0x1   :  { %v13_v0 = vstv %s903_s3  ;;  %v15_v1 = vstv %s907_s5 }
   0x2   :  { %14 = vst [vmem:[#allocation2] sm:$0x1] %v13_v0  ;;  %16 = vst [vmem:[#allocation3] sm:$0x1] %v15_v1 }
   0x3 LB: > { %s678_s29 = sadd.s32 4294967295, %s754_s28   ;;  %p682_p0 = scmp.ge.s32.totalorder %s754_s28, 1  ;;  %s754_s28 = sphi %s803_s28, %s22_s28  }
   0x4   : > { %p256_p1 = scmp.lt.s32.totalorder %s754_s28, 3 }
   0x6   : > { %p257_p2 = pnand %p682_p0, %p256_p1 }
   0x7   : > { %s683_s3 = sshll.u32 (!%p257_p2), %s678_s29, 3  ;;  %v691_v2 = vld [vmem:[%s902_s2] ss:$0 sm:$0xff] (!%p257_p2)  ;;  %vm353_vm0 = vcmask (!%p257_p2), 195584   ;;  %v756_v27 = vmov (!%p257_p2), 0   ;;  %vm567_vm1 = vcmask (!%p257_p2), 7168  }
   0x8   : > { %260 = sbr.rel (%p257_p2) target bundleno = 502 (0x1f6), region = 44  ;;  %p299_p3 = scmp.lt.s32.totalorder (!%p257_p2), %s683_s3, 15  ;;  %714 = vset.pattern.permute.xlu0 (!%p257_p2), %v756_v27  ;;  %715 = vset.pattern.permute.xlu1 (!%p257_p2), %v756_v27 }
   0x9   : > { %v692_v28 = vld [vmem:[#allocation2] ss:$0 sm:$0xff] (!%p257_p2) }
   0xf   : > { %s909_s3 = smov (!%p299_p3, %s683_s3), 15 }
  0x10   : > { %s811_s5 = sshll.u32 %s909_s3, 3 }
  0x11   : > { %s308_s11 = scalar_lea.vmem %s901_s1, %s811_s5  ;;  %s832_s14 = scalar_lea.vmem %s900_s0, %s811_s5 }
  0x12   : > { %v330_v3 = vld [vmem:[%s308_s11] sm:$0xff]  ;;  %v331_v4 = vld [vmem:[%s308_s11 + $0x8] sm:$0xff]  ;;  %v332_v5 = vld [vmem:[%s308_s11 + $0x10] sm:$0xff]  ;;  %s839_s17 = scalar_lea.vmem %s905_s6, %s811_s5  ;;  %s879_s22 = scalar_lea.vmem %s906_s7, %s811_s5 }
  0x13   : > { %v345_v6 = vmul.f32 %v691_v2, %v330_v3  ;;  %v346_v7 = vmul.f32 %v691_v2, %v331_v4  ;;  %v347_v8 = vmul.f32 %v691_v2, %v332_v5  ;;  %v333_v9 = vld [vmem:[%s308_s11 + $0x18] sm:$0xff]  ;;  %v334_v11 = vld [vmem:[%s308_s11 + $0x20] sm:$0xff]  ;;  %v335_v12 = vld [vmem:[%s308_s11 + $0x28] sm:$0xff] }
  0x14   : > { %v348_v10 = vmul.f32 %v691_v2, %v333_v9  ;;  %v349_v17 = vmul.f32 %v691_v2, %v334_v11  ;;  %v350_v18 = vmul.f32 %v691_v2, %v335_v12  ;;  %v336_v19 = vld [vmem:[%s308_s11 + $0x30] sm:$0xff]  ;;  %v337_v20 = vld [vmem:[%s308_s11 + $0x38] sm:$0xff] }
  0x15   : > { %v354_v13 = vsel %vm353_vm0, %v345_v6, 0.0  ;;  %v360_v14 = vsel %vm353_vm0, %v347_v8, 0.0  ;;  %v357_v15 = vsel %vm353_vm0, %v346_v7, 0.0  ;;  %v351_v23 = vmul.f32 %v691_v2, %v336_v19 }
  0x16   : > { %355 = vadd.xlane.f32.xlu0 %v354_v13  ;;  %361 = vadd.xlane.f32.xlu1 %v360_v14  ;;  %v363_v16 = vsel %vm353_vm0, %v348_v10, 0.0  ;;  %v366_v21 = vsel %vm353_vm0, %v349_v17, 0.0  ;;  %v369_v22 = vsel %vm353_vm0, %v350_v18, 0.0  ;;  %v352_v24 = vmul.f32 %v691_v2, %v337_v20  ;;  %v322_v13 = vld [vmem:[%s832_s14] sm:$0xff] }
  0x17   : > { %v372_v25 = vsel %vm353_vm0, %v351_v23, 0.0  ;;  %v701_v17 = vld [vmem:[%s904_s4] ss:$0 sm:$0xff] }
  0x18   : > { %v375_v26 = vsel %vm353_vm0, %v352_v24, 0.0 }
  0x1a   : > { %358 = vadd.xlane.f32.xlu0 %v357_v15  ;;  %364 = vadd.xlane.f32.xlu1 %v363_v16  ;;  %v323_v16 = vld [vmem:[%s832_s14 + $0x8] sm:$0xff] }
  0x1e   : > { %367 = vadd.xlane.f32.xlu0 %v366_v21  ;;  %370 = vadd.xlane.f32.xlu1 %v369_v22  ;;  %v324_v22 = vld [vmem:[%s832_s14 + $0x10] sm:$0xff] }
  0x22   : > { %373 = vadd.xlane.f32.xlu0 %v372_v25  ;;  %376 = vadd.xlane.f32.xlu1 %v375_v26 }
  0xa3   : > { %v356_v29 = vpop.xlane.xlu0 %355  ;;  %v362_v30 = vpop.xlane.xlu1 %361 }
  0xa4   : > { %v385_v31 = vadd.f32 %v692_v28, %v356_v29  ;;  %v387_v32 = vadd.f32 %v692_v28, %v362_v30 }
  0xa6   : > { %v693_v33 = vmul.f32 -1.442695, %v385_v31  ;;  %v695_v34 = vmul.f32 -1.442695, %v387_v32 }
  0xa7   : > { %v359_v35 = vpop.xlane.xlu0 %358  ;;  %v365_v36 = vpop.xlane.xlu1 %364 }
  0xa8   : > { %716 = vpow2.f32 %v693_v33  ;;  %v386_v37 = vadd.f32 %v692_v28, %v359_v35  ;;  %v388_v38 = vadd.f32 %v692_v28, %v365_v36 }
  0xa9   : > { %718 = vpow2.f32 %v695_v34  ;;  %v326_v34 = vld [vmem:[%s832_s14 + $0x20] sm:$0xff] }
  0xaa   : > { %v694_v39 = vmul.f32 -1.442695, %v386_v37  ;;  %v696_v40 = vmul.f32 -1.442695, %v388_v38 }
  0xab   : > { %v368_v41 = vpop.xlane.xlu0 %367  ;;  %v371_v42 = vpop.xlane.xlu1 %370 }
  0xac   : > { %720 = vpow2.f32 %v694_v39  ;;  %v389_v43 = vadd.f32 %v692_v28, %v368_v41  ;;  %v390_v45 = vadd.f32 %v692_v28, %v371_v42 }
  0xad   : > { %722 = vpow2.f32 %v696_v40  ;;  %v327_v40 = vld [vmem:[%s832_s14 + $0x28] sm:$0xff] }
  0xae   : > { %v697_v44 = vmul.f32 -1.442695, %v389_v43  ;;  %v698_v48 = vmul.f32 -1.442695, %v390_v45 }
  0xaf   : > { %v374_v46 = vpop.xlane.xlu0 %373  ;;  %v377_v51 = vpop.xlane.xlu1 %376 }
  0xb0   : > { %724 = vpow2.f32 %v697_v44  ;;  %v391_v49 = vadd.f32 %v692_v28, %v374_v46  ;;  %v392_v55 = vadd.f32 %v692_v28, %v377_v51  ;;  %v325_v28 = vld [vmem:[%s832_s14 + $0x18] sm:$0xff]  ;;  %v328_v46 = vld [vmem:[%s832_s14 + $0x30] sm:$0xff] }
  0xb2   : > { %v717_v47 = vpop.eup %716  ;;  %v699_v54 = vmul.f32 -1.442695, %v391_v49  ;;  %v700_v59 = vmul.f32 -1.442695, %v392_v55 }
  0xb3   : > { %v417_v50 = vadd.f32 1.0, %v717_v47  ;;  %v719_v52 = vpop.eup %718 }
  0xb4   : > { %v419_v57 = vadd.f32 1.0, %v719_v52  ;;  %v329_v52 = vld [vmem:[%s832_s14 + $0x38] sm:$0xff] }
  0xb5   : > { %726 = vrcp.f32 %v417_v50 }
  0xb6   : > { %v721_v53 = vpop.eup %720  ;;  %728 = vpow2.f32 %v698_v48 }
  0xb7   : > { %v418_v56 = vadd.f32 1.0, %v721_v53  ;;  %v723_v58 = vpop.eup %722 }
  0xb8   : > { %v420_v60 = vadd.f32 1.0, %v723_v58 }
  0xb9   : > { %730 = vrcp.f32 %v418_v56 }
  0xba   : > { %732 = vpow2.f32 %v699_v54  ;;  %v725_v61 = vpop.eup %724 }
  0xbb   : > { %734 = vrcp.f32 %v419_v57  ;;  %v421_v63 = vadd.f32 1.0, %v725_v61 }
  0xbc   : > { %736 = vpow2.f32 %v700_v59 }
  0xbd   : > { %738 = vrcp.f32 %v420_v60 }
  0xbe   : > { %740 = vrcp.f32 %v421_v63 }
  0xbf   : > { %v727_v62 = vpop.eup %726 }
  0xc0   : > { %v729_v0 = vpop.eup %728  ;;  %443 = vperm.xlu0 %714, %v727_v62   ;;  %v702_v62 = vld [vmem:[#allocation3] ss:$0 sm:$0xff] }
  0xc1   : > { %v422_v2 = vadd.f32 1.0, %v729_v0 }
  0xc3   : > { %v731_v1 = vpop.eup %730  ;;  %742 = vrcp.f32 %v422_v2 }
  0xc4   : > { %v733_v3 = vpop.eup %732  ;;  %448 = vperm.xlu1 %715, %v731_v1  }
  0xc5   : > { %v735_v4 = vpop.eup %734  ;;  %v423_v5 = vadd.f32 1.0, %v733_v3 }
  0xc6   : > { %v737_v6 = vpop.eup %736 }
  0xc7   : > { %v739_v7 = vpop.eup %738  ;;  %744 = vrcp.f32 %v423_v5  ;;  %v424_v8 = vadd.f32 1.0, %v737_v6 }
  0xc8   : > { %453 = vperm.xlu1 %715, %v735_v4   ;;  %v741_v9 = vpop.eup %740 }
  0xc9   : > { %746 = vrcp.f32 %v424_v8 }
  0xcc   : > { %458 = vperm.xlu1 %715, %v739_v7  }
  0xcd   : > { %v743_v10 = vpop.eup %742 }
  0xd0   : > { %463 = vperm.xlu1 %715, %v741_v9  }
  0xd1   : > { %v745_v11 = vpop.eup %744 }
  0xd3   : > { %v747_v12 = vpop.eup %746 }
  0xd4   : > { %468 = vperm.xlu1 %715, %v743_v10  }
  0xd8   : > { %473 = vperm.xlu1 %715, %v745_v11  }
  0xdc   : > { %478 = vperm.xlu1 %715, %v747_v12  }
 0x13f   : > { %v444_v14 = vpop.permute.xlu0 %443 }
 0x140   : > { %v481_v15 = vmul.f32 %v444_v14, %v322_v13 }
 0x142   : > { %v489_v18 = vadd.f32 %v481_v15, %v322_v13 }
 0x143   : > { %v449_v19 = vpop.permute.xlu1 %448 }
 0x144   : > { %497 = vst.msk [vmem:[%s839_s17] sm:$0xff] %vm353_vm0, %v489_v18  ;;  %v482_v20 = vmul.f32 %v449_v19, %v323_v16  ;;  %v512_v21 = vmul.f32 %v701_v17, %v489_v18 }
 0x146   : > { %v490_v23 = vadd.f32 %v482_v20, %v323_v16  ;;  %v520_v24 = vsel %vm353_vm0, %v512_v21, 0.0 }
 0x147   : > { %v454_v25 = vpop.permute.xlu1 %453  ;;  %521 = vadd.xlane.f32.xlu1 %v520_v24 }
 0x148   : > { %498 = vst.msk [vmem:[%s839_s17 + $0x8] sm:$0xff] %vm353_vm0, %v490_v23  ;;  %v483_v26 = vmul.f32 %v454_v25, %v324_v22  ;;  %v513_v27 = vmul.f32 %v701_v17, %v490_v23 }
 0x14a   : > { %v491_v29 = vadd.f32 %v483_v26, %v324_v22  ;;  %v523_v30 = vsel %vm353_vm0, %v513_v27, 0.0 }
 0x14b   : > { %v459_v31 = vpop.permute.xlu1 %458  ;;  %524 = vadd.xlane.f32.xlu0 %v523_v30 }
 0x14c   : > { %499 = vst.msk [vmem:[%s839_s17 + $0x10] sm:$0xff] %vm353_vm0, %v491_v29  ;;  %v484_v32 = vmul.f32 %v459_v31, %v325_v28  ;;  %v514_v33 = vmul.f32 %v701_v17, %v491_v29 }
 0x14e   : > { %v492_v35 = vadd.f32 %v484_v32, %v325_v28  ;;  %v526_v36 = vsel %vm353_vm0, %v514_v33, 0.0 }
 0x14f   : > { %v464_v37 = vpop.permute.xlu1 %463  ;;  %527 = vadd.xlane.f32.xlu0 %v526_v36 }
 0x150   : > { %500 = vst.msk [vmem:[%s839_s17 + $0x18] sm:$0xff] %vm353_vm0, %v492_v35  ;;  %v485_v38 = vmul.f32 %v464_v37, %v326_v34  ;;  %v515_v39 = vmul.f32 %v701_v17, %v492_v35 }
 0x152   : > { %v493_v41 = vadd.f32 %v485_v38, %v326_v34  ;;  %v529_v42 = vsel %vm353_vm0, %v515_v39, 0.0 }
 0x153   : > { %v469_v43 = vpop.permute.xlu1 %468  ;;  %530 = vadd.xlane.f32.xlu1 %v529_v42 }
 0x154   : > { %501 = vst.msk [vmem:[%s839_s17 + $0x20] sm:$0xff] %vm353_vm0, %v493_v41  ;;  %v486_v44 = vmul.f32 %v469_v43, %v327_v40  ;;  %v516_v45 = vmul.f32 %v701_v17, %v493_v41 }
 0x156   : > { %v494_v47 = vadd.f32 %v486_v44, %v327_v40  ;;  %v532_v48 = vsel %vm353_vm0, %v516_v45, 0.0 }
 0x157   : > { %v474_v49 = vpop.permute.xlu1 %473  ;;  %533 = vadd.xlane.f32.xlu0 %v532_v48 }
 0x158   : > { %502 = vst.msk [vmem:[%s839_s17 + $0x28] sm:$0xff] %vm353_vm0, %v494_v47  ;;  %v487_v50 = vmul.f32 %v474_v49, %v328_v46  ;;  %v517_v51 = vmul.f32 %v701_v17, %v494_v47 }
 0x15a   : > { %v495_v53 = vadd.f32 %v487_v50, %v328_v46  ;;  %v535_v54 = vsel %vm353_vm0, %v517_v51, 0.0 }
 0x15b   : > { %v479_v55 = vpop.permute.xlu1 %478  ;;  %536 = vadd.xlane.f32.xlu1 %v535_v54 }
 0x15c   : > { %503 = vst.msk [vmem:[%s839_s17 + $0x30] sm:$0xff] %vm353_vm0, %v495_v53  ;;  %v488_v56 = vmul.f32 %v479_v55, %v329_v52  ;;  %v518_v57 = vmul.f32 %v701_v17, %v495_v53 }
 0x15e   : > { %v496_v58 = vadd.f32 %v488_v56, %v329_v52  ;;  %v538_v59 = vsel %vm353_vm0, %v518_v57, 0.0 }
 0x15f   : > { %539 = vadd.xlane.f32.xlu0 %v538_v59 }
 0x160   : > { %504 = vst.msk [vmem:[%s839_s17 + $0x38] sm:$0xff] %vm353_vm0, %v496_v58  ;;  %v519_v60 = vmul.f32 %v701_v17, %v496_v58 }
 0x162   : > { %v541_v61 = vsel %vm353_vm0, %v519_v60, 0.0 }
 0x163   : > { %542 = vadd.xlane.f32.xlu1 %v541_v61 }
 0x1d4   : > { %v522_v63 = vpop.xlane.xlu1 %521 }
 0x1d5   : > { %v551_v0 = vadd.f32 %v702_v62, %v522_v63 }
 0x1d7   : > { %v559_v1 = vmax.f32 %v551_v0, 0.0 }
 0x1d8   : > { %v525_v2 = vpop.xlane.xlu0 %524 }
 0x1d9   : > { %568 = vst.msk [vmem:[%s879_s22] sm:$0xff] %vm567_vm1, %v559_v1  ;;  %v552_v3 = vadd.f32 %v702_v62, %v525_v2 }
 0x1db   : > { %v560_v4 = vmax.f32 %v552_v3, 0.0 }
 0x1dc   : > { %v528_v5 = vpop.xlane.xlu0 %527 }
 0x1dd   : > { %569 = vst.msk [vmem:[%s879_s22 + $0x8] sm:$0xff] %vm567_vm1, %v560_v4  ;;  %v553_v6 = vadd.f32 %v702_v62, %v528_v5 }
 0x1df   : > { %v561_v7 = vmax.f32 %v553_v6, 0.0 }
 0x1e0   : > { %v531_v8 = vpop.xlane.xlu1 %530 }
 0x1e1   : > { %570 = vst.msk [vmem:[%s879_s22 + $0x10] sm:$0xff] %vm567_vm1, %v561_v7  ;;  %v554_v9 = vadd.f32 %v702_v62, %v531_v8 }
 0x1e3   : > { %v562_v10 = vmax.f32 %v554_v9, 0.0 }
 0x1e4   : > { %v534_v11 = vpop.xlane.xlu0 %533 }
 0x1e5   : > { %571 = vst.msk [vmem:[%s879_s22 + $0x18] sm:$0xff] %vm567_vm1, %v562_v10  ;;  %v555_v12 = vadd.f32 %v702_v62, %v534_v11 }
 0x1e7   : > { %v563_v13 = vmax.f32 %v555_v12, 0.0 }
 0x1e8   : > { %v537_v14 = vpop.xlane.xlu1 %536 }
 0x1e9   : > { %572 = vst.msk [vmem:[%s879_s22 + $0x20] sm:$0xff] %vm567_vm1, %v563_v13  ;;  %v556_v15 = vadd.f32 %v702_v62, %v537_v14 }
 0x1eb   : > { %v564_v16 = vmax.f32 %v556_v15, 0.0 }
 0x1ec   : > { %v540_v17 = vpop.xlane.xlu0 %539 }
 0x1ed   : > { %573 = vst.msk [vmem:[%s879_s22 + $0x28] sm:$0xff] %vm567_vm1, %v564_v16  ;;  %v557_v18 = vadd.f32 %v702_v62, %v540_v17 }
 0x1ef   : > { %v565_v19 = vmax.f32 %v557_v18, 0.0 }
 0x1f0   : > { %v543_v20 = vpop.xlane.xlu1 %542 }
 0x1f1   : > { %574 = vst.msk [vmem:[%s879_s22 + $0x30] sm:$0xff] %vm567_vm1, %v565_v19  ;;  %v558_v21 = vadd.f32 %v702_v62, %v543_v20 }
 0x1f3   : > { %v566_v22 = vmax.f32 %v558_v21, 0.0 }
 0x1f5   : > { %575 = vst.msk [vmem:[%s879_s22 + $0x38] sm:$0xff] %vm567_vm1, %v566_v22 }
 0x1f6 PF: > { %s22_s28 = sadd.s32 1, %s754_s28  }
 0x1f7   : > { %p19_p4 = scmp.ge.s32.totalorder %s22_s28, 4  }
 0x1f9   :  { %21 = sbr.rel (!%p19_p4) target bundleno = 3 (0x3), region = 89 }

// kernel: insinet_forward.49
= control target key start
LH: loop header
LB: loop body
LE: loop exit
PB: predicated region body
PF: predicated region fallthrough
CT: control target
= control target key end

     0   :  { %s790_s23 = smov 0   ;;  %s889_s0 = inlined_call_operand.vmem [shape: f32[128,24], index: 0, kind: input, shape index: {}]   ;;  %s890_s1 = inlined_call_operand.vmem [shape: f32[128,24], index: 1, kind: input, shape index: {}]   ;;  %s891_s2 = inlined_call_operand.vmem [shape: f32[1,24], index: 2, kind: input, shape index: {}]   ;;  %s892_s3 = inlined_call_operand.<no memory space> [shape: f32[1,1], index: 3, kind: input, shape index: {}]   ;;  %s893_s4 = inlined_call_operand.vmem [shape: bf16[24,16], index: 4, kind: input, shape index: {}]   ;;  %s894_s5 = inlined_call_operand.vmem [shape: f32[1,16], index: 5, kind: input, shape index: {}]   ;;  %s895_s6 = inlined_call_operand.vmem [shape: f32[128,16], index: 6, kind: output, shape index: {}]  }
   0x1   :  { %v11_v0 = vstv %s892_s3 }
   0x2   :  { %12 = vst [vmem:[#allocation2] sm:$0x1] %v11_v0 }
   0x3 LB: > { %s644_s24 = sadd.s32 4294967295, %s749_s23   ;;  %p648_p0 = scmp.ge.s32.totalorder %s749_s23, 1  ;;  %s749_s23 = sphi %s790_s23, %s18_s23  }
   0x4   : > { %p226_p1 = scmp.lt.s32.totalorder %s749_s23, 3 }
   0x6   : > { %p227_p2 = pnand %p648_p0, %p226_p1 }
   0x7   : > { %s649_s25 = sshll.u32 (!%p227_p2), %s644_s24, 3  ;;  %v655_v1 = vld [vmem:[%s891_s2] ss:$0 sm:$0xff] (!%p227_p2)  ;;  %vm311_vm0 = vcmask (!%p227_p2), 195584   ;;  %v751_v26 = vmov (!%p227_p2), 0   ;;  %vm490_vm1 = vcmask (!%p227_p2), 1043456  }
   0x8   : > { %230 = sbr.rel (%p227_p2) target bundleno = 574 (0x23e), region = 44  ;;  %p262_p3 = scmp.lt.s32.totalorder (!%p227_p2), %s649_s25, 15  ;;  %707 = vset.pattern.permute.xlu0 (!%p227_p2), %v751_v26  ;;  %708 = vset.pattern.permute.xlu1 (!%p227_p2), %v751_v26  ;;  %vm567_vm2 = vcmask (!%p227_p2), 130048  }
   0x9   : > { %v656_v27 = vld [vmem:[#allocation2] ss:$0 sm:$0xff] (!%p227_p2) }
   0xf   : > { %s897_s25 = smov (!%p262_p3, %s649_s25), 15 }
  0x10   : > { %s798_s3 = sshll.u32 %s897_s25, 3 }
  0x11   : > { %s271_s30 = scalar_lea.vmem %s890_s1, %s798_s3  ;;  %s849_s13 = scalar_lea.vmem %s889_s0, %s798_s3 }
  0x12   : > { %v807_v2 = vld [vmem:[%s271_s30] sm:$0xff]  ;;  %v809_v3 = vld [vmem:[%s271_s30 + $0x8] sm:$0xff]  ;;  %v819_v10 = vld [vmem:[%s271_s30 + $0x10] sm:$0xff]  ;;  %s277_s18 = scalar_lea.vmem %s895_s6, %s798_s3 }
  0x13   : > { %v811_v4 = vld [vmem:[%s271_s30 + $0x20] sm:$0xff]  ;;  %v303_v5 = vmul.f32 %v655_v1, %v807_v2  ;;  %v304_v6 = vmul.f32 %v655_v1, %v809_v3  ;;  %v816_v8 = vld [vmem:[%s271_s30 + $0x28] sm:$0xff]  ;;  %v821_v11 = vld [vmem:[%s271_s30 + $0x18] sm:$0xff]  ;;  %v305_v16 = vmul.f32 %v655_v1, %v819_v10 }
  0x14   : > { %v307_v7 = vmul.f32 %v655_v1, %v811_v4  ;;  %v308_v9 = vmul.f32 %v655_v1, %v816_v8  ;;  %v306_v17 = vmul.f32 %v655_v1, %v821_v11  ;;  %v829_v18 = vld [vmem:[%s271_s30 + $0x30] sm:$0xff]  ;;  %v831_v19 = vld [vmem:[%s271_s30 + $0x38] sm:$0xff] }
  0x15   : > { %v312_v12 = vsel %vm311_vm0, %v303_v5, 0.0  ;;  %v315_v14 = vsel %vm311_vm0, %v304_v6, 0.0  ;;  %v318_v20 = vsel %vm311_vm0, %v305_v16, 0.0  ;;  %v309_v22 = vmul.f32 %v655_v1, %v829_v18 }
  0x16   : > { %v324_v13 = vsel %vm311_vm0, %v307_v7, 0.0  ;;  %313 = vadd.xlane.f32.xlu0 %v312_v12  ;;  %v327_v15 = vsel %vm311_vm0, %v308_v9, 0.0  ;;  %v321_v21 = vsel %vm311_vm0, %v306_v17, 0.0  ;;  %v310_v23 = vmul.f32 %v655_v1, %v831_v19  ;;  %v710_v17 = vld [vmem:[%s893_s4 + $0x8] ss:$0 sps:$4 sm:$0xff]  }
  0x17   : > { %325 = vadd.xlane.f32.xlu1 %v324_v13  ;;  %v330_v24 = vsel %vm311_vm0, %v309_v22, 0.0 }
  0x18   : > { %v333_v25 = vsel %vm311_vm0, %v310_v23, 0.0 }
  0x1a   : > { %316 = vadd.xlane.f32.xlu0 %v315_v14 }
  0x1b   : > { %328 = vadd.xlane.f32.xlu1 %v327_v15  ;;  %v709_v15 = vld [vmem:[%s893_s4] sm:$0xff]  }
  0x1c   : > { %680 = vmatprep.subr.bf16.mxu0 %v709_v15  ;;  %692 = vmatprep.subr.bf16.mxu1 %v709_v15 }
  0x1d   : > { %681 = vmatpush3.bf16.msra.mxu0 %v709_v15  ;;  %694 = vmatpush3.bf16.msra.mxu1 %v709_v15 }
  0x1e   : > { %319 = vadd.xlane.f32.xlu0 %v318_v20  ;;  %696 = vmatprep.subr.msk.bf16.mxu0 %vm490_vm1, %v710_v17 }
  0x1f   : > { %322 = vadd.xlane.f32.xlu1 %v321_v21  ;;  %v492_v21 = vsel %vm490_vm1, %v710_v17, 0  ;;  %697 = vmatprep.subr.msk.bf16.mxu1 %vm490_vm1, %v710_v17 }
  0x21   : > { %683 = vmatpush3.bf16.msra.mxu0 %v492_v21  ;;  %695 = vmatpush3.bf16.msra.mxu1 %v492_v21 }
  0x22   : > { %331 = vadd.xlane.f32.xlu0 %v330_v24  ;;  %v280_v24 = vld [vmem:[%s849_s13] sm:$0xff] }
  0x23   : > { %334 = vadd.xlane.f32.xlu1 %v333_v25  ;;  %v281_v25 = vld [vmem:[%s849_s13 + $0x8] sm:$0xff] }
  0xa3   : > { %v314_v28 = vpop.xlane.xlu0 %313 }
  0xa4   : > { %v326_v29 = vpop.xlane.xlu1 %325  ;;  %v343_v30 = vadd.f32 %v656_v27, %v314_v28 }
  0xa5   : > { %v347_v31 = vadd.f32 %v656_v27, %v326_v29 }
  0xa6   : > { %v657_v32 = vmul.f32 -1.442695, %v343_v30 }
  0xa7   : > { %v661_v33 = vmul.f32 -1.442695, %v347_v31  ;;  %v317_v34 = vpop.xlane.xlu0 %316 }
  0xa8   : > { %v329_v35 = vpop.xlane.xlu1 %328  ;;  %711 = vpow2.f32 %v657_v32  ;;  %v344_v36 = vadd.f32 %v656_v27, %v317_v34  ;;  %v284_v32 = vld [vmem:[%s849_s13 + $0x20] sm:$0xff]  ;;  %v285_v34 = vld [vmem:[%s849_s13 + $0x28] sm:$0xff] }
  0xa9   : > { %v348_v37 = vadd.f32 %v656_v27, %v329_v35  ;;  %713 = vpow2.f32 %v661_v33 }
  0xaa   : > { %v658_v38 = vmul.f32 -1.442695, %v344_v36 }
  0xab   : > { %v662_v39 = vmul.f32 -1.442695, %v348_v37  ;;  %v320_v40 = vpop.xlane.xlu0 %319 }
  0xac   : > { %v323_v41 = vpop.xlane.xlu1 %322  ;;  %715 = vpow2.f32 %v658_v38  ;;  %v345_v42 = vadd.f32 %v656_v27, %v320_v40 }
  0xad   : > { %717 = vpow2.f32 %v662_v39  ;;  %v346_v44 = vadd.f32 %v656_v27, %v323_v41  ;;  %v282_v41 = vld [vmem:[%s849_s13 + $0x10] sm:$0xff] }
  0xae   : > { %v659_v43 = vmul.f32 -1.442695, %v345_v42  ;;  %v283_v42 = vld [vmem:[%s849_s13 + $0x18] sm:$0xff] }
  0xaf   : > { %v332_v45 = vpop.xlane.xlu0 %331  ;;  %v660_v47 = vmul.f32 -1.442695, %v346_v44 }
  0xb0   : > { %719 = vpow2.f32 %v659_v43  ;;  %v349_v48 = vadd.f32 %v656_v27, %v332_v45  ;;  %v335_v50 = vpop.xlane.xlu1 %334 }
  0xb1   : > { %v350_v54 = vadd.f32 %v656_v27, %v335_v50 }
  0xb2   : > { %v712_v46 = vpop.eup %711  ;;  %v663_v53 = vmul.f32 -1.442695, %v349_v48  ;;  %v286_v48 = vld [vmem:[%s849_s13 + $0x30] sm:$0xff] }
  0xb3   : > { %v375_v49 = vadd.f32 1.0, %v712_v46  ;;  %v714_v51 = vpop.eup %713  ;;  %v664_v58 = vmul.f32 -1.442695, %v350_v54 }
  0xb4   : > { %v379_v56 = vadd.f32 1.0, %v714_v51 }
  0xb5   : > { %721 = vrcp.f32 %v375_v49 }
  0xb6   : > { %v716_v52 = vpop.eup %715  ;;  %723 = vpow2.f32 %v660_v47 }
  0xb7   : > { %v376_v55 = vadd.f32 1.0, %v716_v52  ;;  %v718_v57 = vpop.eup %717 }
  0xb8   : > { %v380_v59 = vadd.f32 1.0, %v718_v57 }
  0xb9   : > { %725 = vrcp.f32 %v376_v55 }
  0xba   : > { %727 = vpow2.f32 %v663_v53  ;;  %v720_v60 = vpop.eup %719 }
  0xbb   : > { %729 = vrcp.f32 %v379_v56  ;;  %v377_v62 = vadd.f32 1.0, %v720_v60 }
  0xbc   : > { %731 = vpow2.f32 %v664_v58 }
  0xbd   : > { %733 = vrcp.f32 %v380_v59 }
  0xbe   : > { %735 = vrcp.f32 %v377_v62 }
  0xbf   : > { %v722_v61 = vpop.eup %721 }
  0xc0   : > { %v724_v63 = vpop.eup %723  ;;  %401 = vperm.xlu0 %707, %v722_v61  }
  0xc1   : > { %v378_v1 = vadd.f32 1.0, %v724_v63 }
  0xc3   : > { %v726_v0 = vpop.eup %725  ;;  %737 = vrcp.f32 %v378_v1 }
  0xc4   : > { %v728_v5 = vpop.eup %727  ;;  %406 = vperm.xlu1 %708, %v726_v0  }
  0xc5   : > { %v730_v6 = vpop.eup %729  ;;  %v381_v7 = vadd.f32 1.0, %v728_v5 }
  0xc6   : > { %v732_v9 = vpop.eup %731 }
  0xc7   : > { %v734_v12 = vpop.eup %733  ;;  %739 = vrcp.f32 %v381_v7  ;;  %v382_v13 = vadd.f32 1.0, %v732_v9 }
  0xc8   : > { %421 = vperm.xlu1 %708, %v730_v6   ;;  %v736_v14 = vpop.eup %735 }
  0xc9   : > { %741 = vrcp.f32 %v382_v13 }
  0xcc   : > { %426 = vperm.xlu1 %708, %v734_v12  }
  0xcd   : > { %v738_v16 = vpop.eup %737 }
  0xd0   : > { %411 = vperm.xlu1 %708, %v736_v14  }
  0xd1   : > { %v740_v20 = vpop.eup %739 }
  0xd3   : > { %v742_v22 = vpop.eup %741 }
  0xd4   : > { %416 = vperm.xlu1 %708, %v738_v16  }
  0xd8   : > { %431 = vperm.xlu1 %708, %v740_v20  }
  0xdc   : > { %436 = vperm.xlu1 %708, %v742_v22  }
 0x13f   : > { %v402_v23 = vpop.permute.xlu0 %401 }
 0x140   : > { %v439_v26 = vmul.f32 %v402_v23, %v280_v24 }
 0x142   : > { %v447_v29 = vadd.f32 %v439_v26, %v807_v2 }
 0x143   : > { %v407_v27 = vpop.permute.xlu1 %406 }
 0x144   : > { %v440_v28 = vmul.f32 %v407_v27, %v281_v25 }
 0x146   : > { %v448_v30 = vadd.f32 %v440_v28, %v809_v3 }
 0x147   : > { %v422_v31 = vpop.permute.xlu1 %421 }
 0x148   : > { %v455_v33 = vpack.c.bf16 %v448_v30, %v447_v29  ;;  %v443_v35 = vmul.f32 %v422_v31, %v284_v32 }
 0x14a   : > { %684 = vmatprep.mubr.msk.bf16.mxu0 %vm311_vm0, %v455_v33  ;;  %v451_v38 = vadd.f32 %v443_v35, %v811_v4  ;;  %v287_v4 = vld [vmem:[%s849_s13 + $0x38] sm:$0xff] }
 0x14b   : > { %v427_v36 = vpop.permute.xlu1 %426 }
 0x14c   : > { %v444_v37 = vmul.f32 %v427_v36, %v285_v34 }
 0x14e   : > { %v452_v39 = vadd.f32 %v444_v37, %v816_v8 }
 0x14f   : > { %v412_v40 = vpop.permute.xlu1 %411 }
 0x150   : > { %v457_v2 = vpack.c.bf16 %v452_v39, %v451_v38  ;;  %v441_v3 = vmul.f32 %v412_v40, %v282_v41 }
 0x152   : > { %688 = vmatprep.mubr.msk.bf16.mxu1 %vm311_vm0, %v457_v2  ;;  %v449_v45 = vadd.f32 %v441_v3, %v819_v10  ;;  %v665_v10 = vld [vmem:[%s894_s5] ss:$0 sm:$0xff] }
 0x153   : > { %v417_v43 = vpop.permute.xlu1 %416 }
 0x154   : > { %v442_v44 = vmul.f32 %v417_v43, %v283_v42 }
 0x156   : > { %v450_v46 = vadd.f32 %v442_v44, %v821_v11 }
 0x157   : > { %v432_v47 = vpop.permute.xlu1 %431 }
 0x158   : > { %v456_v49 = vpack.c.bf16 %v450_v46, %v449_v45  ;;  %v445_v50 = vmul.f32 %v432_v47, %v286_v48 }
 0x15a   : > { %685 = vmatmul.mubr.msk.bf16.vlgmr.msra.gmra.mrb[0].mxu0 %vm311_vm0, %v456_v49  ;;  %v453_v52 = vadd.f32 %v445_v50, %v829_v18 }
 0x15b   : > { %v437_v8 = vpop.permute.xlu1 %436 }
 0x15c   : > { %v446_v51 = vmul.f32 %v437_v8, %v287_v4 }
 0x15e   : > { %v454_v53 = vadd.f32 %v446_v51, %v831_v19 }
 0x160   : > { %v458_v54 = vpack.c.bf16 %v454_v53, %v453_v52 }
 0x162   : > { %689 = vmatmul.mubr.msk.bf16.vlgmr.msra.gmra.mrb[0].mxu1 %vm311_vm0, %v458_v54 }
 0x22d   : > { %v686_v11 = vpop.f32.mrb[0].mxu0 }
 0x22e   : > { %v537_v55 = vadd.f32 %v686_v11, %v665_v10  ;;  %v528_v56 = vpop.f32.mrb[1].mxu0 }
 0x22f   : > { %v529_v57 = vadd.f32 %v665_v10, %v528_v56  ;;  %v687_v58 = vpop.f32.mrb[2].mxu0 }
 0x230   : > { %v561_v18 = vmax.f32 %v537_v55, 0.0  ;;  %v540_v59 = vadd.f32 %v687_v58, %v665_v10  ;;  %v531_v19 = vpop.f32.mrb[3].mxu0 }
 0x231   : > { %v559_v60 = vmax.f32 %v529_v57, 0.0  ;;  %v532_v61 = vadd.f32 %v665_v10, %v531_v19 }
 0x232   : > { %570 = vst.msk [vmem:[%s277_s18 + $0x10] sm:$0xff] %vm567_vm2, %v561_v18  ;;  %v562_v62 = vmax.f32 %v540_v59, 0.0 }
 0x233   : > { %568 = vst.msk [vmem:[%s277_s18] sm:$0xff] %vm567_vm2, %v559_v60  ;;  %v560_v63 = vmax.f32 %v532_v61, 0.0 }
 0x234   : > { %571 = vst.msk [vmem:[%s277_s18 + $0x18] sm:$0xff] %vm567_vm2, %v562_v62 }
 0x235   : > { %569 = vst.msk [vmem:[%s277_s18 + $0x8] sm:$0xff] %vm567_vm2, %v560_v63  ;;  %v690_v0 = vpop.f32.mrb[0].mxu1 }
 0x236   : > { %v553_v1 = vadd.f32 %v690_v0, %v665_v10  ;;  %v544_v5 = vpop.f32.mrb[1].mxu1 }
 0x237   : > { %v545_v6 = vadd.f32 %v665_v10, %v544_v5  ;;  %v691_v7 = vpop.f32.mrb[2].mxu1 }
 0x238   : > { %v565_v9 = vmax.f32 %v553_v1, 0.0  ;;  %v556_v12 = vadd.f32 %v691_v7, %v665_v10  ;;  %v547_v13 = vpop.f32.mrb[3].mxu1 }
 0x239   : > { %v563_v14 = vmax.f32 %v545_v6, 0.0  ;;  %v548_v15 = vadd.f32 %v665_v10, %v547_v13 }
 0x23a   : > { %574 = vst.msk [vmem:[%s277_s18 + $0x30] sm:$0xff] %vm567_vm2, %v565_v9  ;;  %v566_v16 = vmax.f32 %v556_v12, 0.0 }
 0x23b   : > { %572 = vst.msk [vmem:[%s277_s18 + $0x20] sm:$0xff] %vm567_vm2, %v563_v14  ;;  %v564_v17 = vmax.f32 %v548_v15, 0.0 }
 0x23c   : > { %575 = vst.msk [vmem:[%s277_s18 + $0x38] sm:$0xff] %vm567_vm2, %v566_v16 }
 0x23d   : > { %573 = vst.msk [vmem:[%s277_s18 + $0x28] sm:$0xff] %vm567_vm2, %v564_v17 }
 0x23e PF: > { %s18_s23 = sadd.s32 1, %s749_s23  }
 0x23f   : > { %p15_p4 = scmp.ge.s32.totalorder %s18_s23, 4  }
 0x241   :  { %17 = sbr.rel (!%p15_p4) target bundleno = 3 (0x3), region = 77 }

// kernel: insinet_forward.30
= control target key start
LH: loop header
LB: loop body
LE: loop exit
PB: predicated region body
PF: predicated region fallthrough
CT: control target
= control target key end

     0   :  { %s1595_s28 = smov 0   ;;  %s2038_s0 = inlined_call_operand.vmem [shape: f32[512,16], index: 0, kind: input, shape index: {}]   ;;  %s2039_s1 = inlined_call_operand.vmem [shape: f32[512,16], index: 1, kind: input, shape index: {}]   ;;  %s2040_s2 = inlined_call_operand.vmem [shape: f32[1,16], index: 2, kind: input, shape index: {}]   ;;  %s2041_s3 = inlined_call_operand.<no memory space> [shape: f32[1,1], index: 3, kind: input, shape index: {}]   ;;  %s2042_s4 = inlined_call_operand.vmem [shape: f32[1,16], index: 4, kind: input, shape index: {}]   ;;  %s2043_s6 = inlined_call_operand.vmem [shape: f32[512,16], index: 6, kind: output, shape index: {0}]   ;;  %s2044_s7 = inlined_call_operand.vmem [shape: f32[512,1], index: 7, kind: output, shape index: {1}]   ;;  %s2045_s5 = inlined_call_operand.<no memory space> [shape: f32[1,1], index: 5, kind: input, shape index: {}]  }
   0x1   :  { %v13_v0 = vstv %s2041_s3  ;;  %v15_v1 = vstv %s2045_s5 }
   0x2   :  { %14 = vst [vmem:[#allocation2] sm:$0x1] %v13_v0  ;;  %16 = vst [vmem:[#allocation3] sm:$0x1] %v15_v1 }
   0x3 LB: > { %s1350_s29 = sadd.s32 4294967295, %s1546_s28   ;;  %p1354_p0 = scmp.ge.s32.totalorder %s1546_s28, 1  ;;  %s1546_s28 = sphi %s1595_s28, %s22_s28  }
   0x4   : > { %p256_p1 = scmp.lt.s32.totalorder %s1546_s28, 3 }
   0x6   : > { %p257_p2 = pnand %p1354_p0, %p256_p1 }
   0x7   : > { %s1355_s3 = sshll.u32 (!%p257_p2), %s1350_s29, 5  ;;  %v1608_v2 = vld [vmem:[%s2040_s2] ss:$0 sm:$0xff] (!%p257_p2)  ;;  %vm425_vm0 = vcmask (!%p257_p2), 130048   ;;  %vm1215_vm1 = vcmask (!%p257_p2), 7168  }
   0x8   : > { %260 = sbr.rel (%p257_p2) target bundleno = 551 (0x227), region = 44  ;;  %p299_p3 = scmp.lt.s32.totalorder (!%p257_p2), %s1355_s3, 63 }
   0xf   : > { %s2047_s3 = smov (!%p299_p3, %s1355_s3), 63 }
  0x10   : > { %s1603_s5 = sshll.u32 %s2047_s3, 3 }
  0x11   : > { %s1614_s11 = scalar_lea.vmem %s2039_s1, %s1603_s5  ;;  %s1750_s14 = scalar_lea.vmem %s2038_s0, %s1603_s5 }
  0x12   : > { %v356_v3 = vld [vmem:[%s1614_s11 + $0x10] sm:$0xff]  ;;  %v354_v4 = vld [vmem:[%s1614_s11] sm:$0xff]  ;;  %v357_v5 = vld [vmem:[%s1614_s11 + $0x18] sm:$0xff]  ;;  %s1757_s17 = scalar_lea.vmem %s2043_s6, %s1603_s5  ;;  %s1938_s22 = scalar_lea.vmem %s2044_s7, %s1603_s5 }
  0x13   : > { %v395_v6 = vmul.f32 %v1608_v2, %v356_v3  ;;  %v393_v7 = vmul.f32 %v1608_v2, %v354_v4  ;;  %v396_v8 = vmul.f32 %v1608_v2, %v357_v5  ;;  %v355_v9 = vld [vmem:[%s1614_s11 + $0x8] sm:$0xff]  ;;  %v358_v12 = vld [vmem:[%s1614_s11 + $0x20] sm:$0xff]  ;;  %v361_v19 = vld [vmem:[%s1614_s11 + $0x38] sm:$0xff] }
  0x14   : > { %v394_v10 = vmul.f32 %v1608_v2, %v355_v9  ;;  %v359_v11 = vld [vmem:[%s1614_s11 + $0x28] sm:$0xff]  ;;  %v397_v18 = vmul.f32 %v1608_v2, %v358_v12  ;;  %v360_v20 = vld [vmem:[%s1614_s11 + $0x30] sm:$0xff]  ;;  %v400_v22 = vmul.f32 %v1608_v2, %v361_v19  ;;  %v362_v26 = vld [vmem:[%s1614_s11 + $0x40] sm:$0xff] }
  0x15   : > { %v432_v13 = vsel %vm425_vm0, %v395_v6, 0.0  ;;  %v426_v14 = vsel %vm425_vm0, %v393_v7, 0.0  ;;  %v435_v15 = vsel %vm425_vm0, %v396_v8, 0.0  ;;  %v398_v17 = vmul.f32 %v1608_v2, %v359_v11  ;;  %v363_v25 = vld [vmem:[%s1614_s11 + $0x48] sm:$0xff]  ;;  %v365_v31 = vld [vmem:[%s1614_s11 + $0x58] sm:$0xff]  ;;  %v364_v32 = vld [vmem:[%s1614_s11 + $0x50] sm:$0xff] }
  0x16   : > { %433 = vadd.xlane.f32.xlu1 %v432_v13  ;;  %427 = vadd.xlane.f32.xlu0 %v426_v14  ;;  %v429_v16 = vsel %vm425_vm0, %v394_v10, 0.0  ;;  %v438_v23 = vsel %vm425_vm0, %v397_v18, 0.0  ;;  %v399_v24 = vmul.f32 %v1608_v2, %v360_v20  ;;  %v447_v27 = vsel %vm425_vm0, %v400_v22, 0.0  ;;  %v367_v37 = vld [vmem:[%s1614_s11 + $0x68] sm:$0xff]  ;;  %v366_v38 = vld [vmem:[%s1614_s11 + $0x60] sm:$0xff]  ;;  %v369_v43 = vld [vmem:[%s1614_s11 + $0x78] sm:$0xff] }
  0x17   : > { %v441_v21 = vsel %vm425_vm0, %v398_v17, 0.0  ;;  %v402_v28 = vmul.f32 %v1608_v2, %v363_v25  ;;  %v401_v30 = vmul.f32 %v1608_v2, %v362_v26  ;;  %v404_v34 = vmul.f32 %v1608_v2, %v365_v31  ;;  %v368_v44 = vld [vmem:[%s1614_s11 + $0x70] sm:$0xff]  ;;  %v371_v49 = vld [vmem:[%s1614_s11 + $0x88] sm:$0xff]  ;;  %v370_v50 = vld [vmem:[%s1614_s11 + $0x80] sm:$0xff] }
  0x18   : > { %v444_v29 = vsel %vm425_vm0, %v399_v24, 0.0  ;;  %v403_v36 = vmul.f32 %v1608_v2, %v364_v32  ;;  %v406_v40 = vmul.f32 %v1608_v2, %v367_v37  ;;  %v405_v42 = vmul.f32 %v1608_v2, %v366_v38  ;;  %v373_v55 = vld [vmem:[%s1614_s11 + $0x98] sm:$0xff]  ;;  %v372_v56 = vld [vmem:[%s1614_s11 + $0x90] sm:$0xff]  ;;  %v375_v61 = vld [vmem:[%s1614_s11 + $0xa8] sm:$0xff] }
  0x19   : > { %v453_v33 = vsel %vm425_vm0, %v402_v28, 0.0  ;;  %v450_v35 = vsel %vm425_vm0, %v401_v30, 0.0  ;;  %v459_v39 = vsel %vm425_vm0, %v404_v34, 0.0  ;;  %v408_v46 = vmul.f32 %v1608_v2, %v369_v43  ;;  %v374_v62 = vld [vmem:[%s1614_s11 + $0xa0] sm:$0xff]  ;;  %v377_v4 = vld [vmem:[%s1614_s11 + $0xb8] sm:$0xff]  ;;  %v376_v5 = vld [vmem:[%s1614_s11 + $0xb0] sm:$0xff] }
  0x1a   : > { %436 = vadd.xlane.f32.xlu1 %v435_v15  ;;  %430 = vadd.xlane.f32.xlu0 %v429_v16  ;;  %v456_v41 = vsel %vm425_vm0, %v403_v36, 0.0  ;;  %v465_v45 = vsel %vm425_vm0, %v406_v40, 0.0  ;;  %v462_v47 = vsel %vm425_vm0, %v405_v42, 0.0  ;;  %v407_v48 = vmul.f32 %v1608_v2, %v368_v44  ;;  %v379_v8 = vld [vmem:[%s1614_s11 + $0xc8] sm:$0xff]  ;;  %v378_v11 = vld [vmem:[%s1614_s11 + $0xc0] sm:$0xff]  ;;  %v381_v16 = vld [vmem:[%s1614_s11 + $0xd8] sm:$0xff] }
  0x1b   : > { %v471_v51 = vsel %vm425_vm0, %v408_v46, 0.0  ;;  %v410_v52 = vmul.f32 %v1608_v2, %v371_v49  ;;  %v409_v54 = vmul.f32 %v1608_v2, %v370_v50  ;;  %v412_v58 = vmul.f32 %v1608_v2, %v373_v55  ;;  %v380_v17 = vld [vmem:[%s1614_s11 + $0xd0] sm:$0xff]  ;;  %v382_v24 = vld [vmem:[%s1614_s11 + $0xe0] sm:$0xff] }
  0x1c   : > { %v468_v53 = vsel %vm425_vm0, %v407_v48, 0.0  ;;  %v411_v60 = vmul.f32 %v1608_v2, %v372_v56  ;;  %v414_v0 = vmul.f32 %v1608_v2, %v375_v61  ;;  %v413_v3 = vmul.f32 %v1608_v2, %v374_v62  ;;  %v384_v30 = vld [vmem:[%s1614_s11 + $0xf0] sm:$0xff]  ;;  %v1712_v37 = vld [vmem:[#allocation2] ss:$0 sm:$0xff] }
  0x1d   : > { %v477_v57 = vsel %vm425_vm0, %v410_v52, 0.0  ;;  %v474_v59 = vsel %vm425_vm0, %v409_v54, 0.0  ;;  %v483_v63 = vsel %vm425_vm0, %v412_v58, 0.0  ;;  %v416_v7 = vmul.f32 %v1608_v2, %v377_v4 }
  0x1e   : > { %442 = vadd.xlane.f32.xlu1 %v441_v21  ;;  %439 = vadd.xlane.f32.xlu0 %v438_v23  ;;  %v480_v1 = vsel %vm425_vm0, %v411_v60, 0.0  ;;  %v489_v6 = vsel %vm425_vm0, %v414_v0, 0.0  ;;  %v486_v9 = vsel %vm425_vm0, %v413_v3, 0.0  ;;  %v415_v10 = vmul.f32 %v1608_v2, %v376_v5  ;;  %v383_v23 = vld [vmem:[%s1614_s11 + $0xe8] sm:$0xff] }
  0x1f   : > { %v418_v12 = vmul.f32 %v1608_v2, %v379_v8  ;;  %v495_v13 = vsel %vm425_vm0, %v416_v7, 0.0  ;;  %v417_v15 = vmul.f32 %v1608_v2, %v378_v11  ;;  %v1548_v18 = vmov 0  }
  0x20   : > { %v492_v14 = vsel %vm425_vm0, %v415_v10, 0.0  ;;  %1410 = vset.pattern.permute.xlu0 %v1548_v18  ;;  %1411 = vset.pattern.permute.xlu1 %v1548_v18  ;;  %v420_v20 = vmul.f32 %v1608_v2, %v381_v16  ;;  %v419_v22 = vmul.f32 %v1608_v2, %v380_v17  ;;  %v422_v26 = vmul.f32 %v1608_v2, %v383_v23 }
  0x21   : > { %v501_v19 = vsel %vm425_vm0, %v418_v12, 0.0  ;;  %v498_v21 = vsel %vm425_vm0, %v417_v15, 0.0  ;;  %v421_v28 = vmul.f32 %v1608_v2, %v382_v24  ;;  %v423_v34 = vmul.f32 %v1608_v2, %v384_v30 }
  0x22   : > { %448 = vadd.xlane.f32.xlu1 %v447_v27  ;;  %445 = vadd.xlane.f32.xlu0 %v444_v29  ;;  %v507_v25 = vsel %vm425_vm0, %v420_v20, 0.0  ;;  %v504_v27 = vsel %vm425_vm0, %v419_v22, 0.0  ;;  %v385_v29 = vld [vmem:[%s1614_s11 + $0xf8] sm:$0xff]  ;;  %v513_v31 = vsel %vm425_vm0, %v422_v26, 0.0 }
  0x23   : > { %v424_v32 = vmul.f32 %v1608_v2, %v385_v29  ;;  %v516_v36 = vsel %vm425_vm0, %v423_v34, 0.0 }
  0x26   : > { %454 = vadd.xlane.f32.xlu1 %v453_v33  ;;  %451 = vadd.xlane.f32.xlu0 %v450_v35  ;;  %v510_v33 = vsel %vm425_vm0, %v421_v28, 0.0  ;;  %v519_v35 = vsel %vm425_vm0, %v424_v32, 0.0 }
  0x2a   : > { %460 = vadd.xlane.f32.xlu1 %v459_v39  ;;  %457 = vadd.xlane.f32.xlu0 %v456_v41 }
  0x2e   : > { %466 = vadd.xlane.f32.xlu1 %v465_v45  ;;  %463 = vadd.xlane.f32.xlu0 %v462_v47 }
  0x32   : > { %472 = vadd.xlane.f32.xlu1 %v471_v51  ;;  %469 = vadd.xlane.f32.xlu0 %v468_v53 }
  0x36   : > { %478 = vadd.xlane.f32.xlu1 %v477_v57  ;;  %475 = vadd.xlane.f32.xlu0 %v474_v59 }
  0x3a   : > { %484 = vadd.xlane.f32.xlu1 %v483_v63  ;;  %481 = vadd.xlane.f32.xlu0 %v480_v1 }
  0x3e   : > { %490 = vadd.xlane.f32.xlu1 %v489_v6  ;;  %487 = vadd.xlane.f32.xlu0 %v486_v9 }
  0x42   : > { %496 = vadd.xlane.f32.xlu1 %v495_v13  ;;  %493 = vadd.xlane.f32.xlu0 %v492_v14 }
  0x46   : > { %502 = vadd.xlane.f32.xlu1 %v501_v19  ;;  %499 = vadd.xlane.f32.xlu0 %v498_v21 }
  0x4a   : > { %508 = vadd.xlane.f32.xlu1 %v507_v25  ;;  %505 = vadd.xlane.f32.xlu0 %v504_v27 }
  0x4e   : > { %514 = vadd.xlane.f32.xlu1 %v513_v31  ;;  %511 = vadd.xlane.f32.xlu0 %v510_v33 }
  0x52   : > { %520 = vadd.xlane.f32.xlu1 %v519_v35  ;;  %517 = vadd.xlane.f32.xlu0 %v516_v36 }
  0xa3   : > { %v434_v38 = vpop.xlane.xlu1 %433  ;;  %v428_v39 = vpop.xlane.xlu0 %427 }
  0xa4   : > { %v531_v40 = vadd.f32 %v1712_v37, %v434_v38  ;;  %v529_v41 = vadd.f32 %v1712_v37, %v428_v39 }
  0xa6   : > { %v1367_v42 = vmul.f32 -1.442695, %v531_v40  ;;  %v1365_v43 = vmul.f32 -1.442695, %v529_v41 }
  0xa7   : > { %v437_v44 = vpop.xlane.xlu1 %436  ;;  %v431_v2 = vpop.xlane.xlu0 %430 }
  0xa8   : > { %v532_v45 = vadd.f32 %v1712_v37, %v437_v44  ;;  %v530_v46 = vadd.f32 %v1712_v37, %v431_v2  ;;  %1412 = vpow2.f32 %v1365_v43 }
  0xa9   : > { %1414 = vpow2.f32 %v1367_v42 }
  0xaa   : > { %v1368_v47 = vmul.f32 -1.442695, %v532_v45  ;;  %v1366_v48 = vmul.f32 -1.442695, %v530_v46 }
  0xab   : > { %v443_v49 = vpop.xlane.xlu1 %442  ;;  %v440_v50 = vpop.xlane.xlu0 %439 }
  0xac   : > { %v534_v51 = vadd.f32 %v1712_v37, %v443_v49  ;;  %v533_v52 = vadd.f32 %v1712_v37, %v440_v50  ;;  %1416 = vpow2.f32 %v1366_v48 }
  0xad   : > { %1418 = vpow2.f32 %v1368_v47 }
  0xae   : > { %v1370_v53 = vmul.f32 -1.442695, %v534_v51  ;;  %v1369_v54 = vmul.f32 -1.442695, %v533_v52 }
  0xaf   : > { %v449_v55 = vpop.xlane.xlu1 %448  ;;  %v446_v56 = vpop.xlane.xlu0 %445 }
  0xb0   : > { %1420 = vpow2.f32 %v1370_v53  ;;  %v535_v57 = vadd.f32 %v1712_v37, %v446_v56  ;;  %v536_v1 = vadd.f32 %v1712_v37, %v449_v55 }
  0xb1   : > { %1422 = vpow2.f32 %v1369_v54 }
  0xb2   : > { %v1413_v58 = vpop.eup %1412  ;;  %v1371_v0 = vmul.f32 -1.442695, %v535_v57  ;;  %v1372_v12 = vmul.f32 -1.442695, %v536_v1 }
  0xb3   : > { %v455_v59 = vpop.xlane.xlu1 %454  ;;  %v452_v60 = vpop.xlane.xlu0 %451  ;;  %v657_v62 = vadd.f32 1.0, %v1413_v58 }
  0xb4   : > { %v1415_v61 = vpop.eup %1414  ;;  %v538_v63 = vadd.f32 %v1712_v37, %v455_v59  ;;  %v537_v11 = vadd.f32 %v1712_v37, %v452_v60 }
  0xb5   : > { %1424 = vrcp.f32 %v657_v62  ;;  %v659_v5 = vadd.f32 1.0, %v1415_v61 }
  0xb6   : > { %v1374_v3 = vmul.f32 -1.442695, %v538_v63  ;;  %v1417_v4 = vpop.eup %1416  ;;  %v1373_v21 = vmul.f32 -1.442695, %v537_v11 }
  0xb7   : > { %v461_v6 = vpop.xlane.xlu1 %460  ;;  %v458_v7 = vpop.xlane.xlu0 %457  ;;  %v658_v9 = vadd.f32 1.0, %v1417_v4 }
  0xb8   : > { %v1419_v8 = vpop.eup %1418  ;;  %1426 = vpow2.f32 %v1374_v3  ;;  %v540_v10 = vadd.f32 %v1712_v37, %v461_v6  ;;  %v539_v20 = vadd.f32 %v1712_v37, %v458_v7 }
  0xb9   : > { %1428 = vpow2.f32 %v1371_v0  ;;  %v660_v15 = vadd.f32 1.0, %v1419_v8 }
  0xba   : > { %1430 = vrcp.f32 %v658_v9  ;;  %v1376_v13 = vmul.f32 -1.442695, %v540_v10  ;;  %v1421_v14 = vpop.eup %1420  ;;  %v1375_v30 = vmul.f32 -1.442695, %v539_v20 }
  0xbb   : > { %1432 = vrcp.f32 %v659_v5  ;;  %v467_v16 = vpop.xlane.xlu1 %466  ;;  %v464_v17 = vpop.xlane.xlu0 %463  ;;  %v662_v22 = vadd.f32 1.0, %v1421_v14 }
  0xbc   : > { %v1423_v18 = vpop.eup %1422  ;;  %1434 = vpow2.f32 %v1376_v13  ;;  %v542_v19 = vadd.f32 %v1712_v37, %v467_v16  ;;  %v541_v26 = vadd.f32 %v1712_v37, %v464_v17 }
  0xbd   : > { %1436 = vpow2.f32 %v1372_v12  ;;  %v661_v24 = vadd.f32 1.0, %v1423_v18 }
  0xbe   : > { %v1378_v23 = vmul.f32 -1.442695, %v542_v19  ;;  %1438 = vrcp.f32 %v660_v15  ;;  %v1377_v36 = vmul.f32 -1.442695, %v541_v26 }
  0xbf   : > { %v473_v25 = vpop.xlane.xlu1 %472  ;;  %v470_v27 = vpop.xlane.xlu0 %469 }
  0xc0   : > { %v1425_v28 = vpop.eup %1424  ;;  %1440 = vpow2.f32 %v1378_v23  ;;  %v544_v29 = vadd.f32 %v1712_v37, %v473_v25  ;;  %v543_v38 = vadd.f32 %v1712_v37, %v470_v27 }
  0xc1   : > { %755 = vperm.xlu0 %1410, %v1425_v28   ;;  %1442 = vpow2.f32 %v1373_v21 }
  0xc2   : > { %v1427_v31 = vpop.eup %1426  ;;  %1444 = vrcp.f32 %v662_v22  ;;  %v1380_v32 = vmul.f32 -1.442695, %v544_v29  ;;  %v1379_v47 = vmul.f32 -1.442695, %v543_v38 }
  0xc3   : > { %v1429_v33 = vpop.eup %1428  ;;  %v666_v34 = vadd.f32 1.0, %v1427_v31  ;;  %1446 = vrcp.f32 %v661_v24  ;;  %v479_v35 = vpop.xlane.xlu1 %478 }
  0xc4   : > { %v476_v39 = vpop.xlane.xlu0 %475  ;;  %v1431_v40 = vpop.eup %1430  ;;  %v546_v41 = vadd.f32 %v1712_v37, %v479_v35  ;;  %1448 = vpow2.f32 %v1375_v30  ;;  %v663_v44 = vadd.f32 1.0, %v1429_v33 }
  0xc5   : > { %v1433_v42 = vpop.eup %1432  ;;  %1450 = vrcp.f32 %v666_v34  ;;  %760 = vperm.xlu1 %1411, %v1431_v40   ;;  %v545_v52 = vadd.f32 %v1712_v37, %v476_v39 }
  0xc6   : > { %v1435_v43 = vpop.eup %1434  ;;  %1452 = vpow2.f32 %v1380_v32  ;;  %v1382_v2 = vmul.f32 -1.442695, %v546_v41 }
  0xc7   : > { %v668_v45 = vadd.f32 1.0, %v1435_v43  ;;  %v485_v46 = vpop.xlane.xlu1 %484  ;;  %1454 = vpow2.f32 %v1377_v36  ;;  %v1437_v49 = vpop.eup %1436  ;;  %v1381_v63 = vmul.f32 -1.442695, %v545_v52 }
  0xc8   : > { %v482_v48 = vpop.xlane.xlu0 %481  ;;  %1456 = vpow2.f32 %v1382_v2  ;;  %v548_v50 = vadd.f32 %v1712_v37, %v485_v46  ;;  %v1439_v51 = vpop.eup %1438  ;;  %v664_v56 = vadd.f32 1.0, %v1437_v49 }
  0xc9   : > { %1458 = vrcp.f32 %v668_v45  ;;  %765 = vperm.xlu1 %1411, %v1433_v42   ;;  %v547_v6 = vadd.f32 %v1712_v37, %v482_v48 }
  0xca   : > { %v1441_v53 = vpop.eup %1440  ;;  %1460 = vrcp.f32 %v663_v44  ;;  %v1384_v54 = vmul.f32 -1.442695, %v548_v50 }
  0xcb   : > { %v1443_v55 = vpop.eup %1442  ;;  %v670_v57 = vadd.f32 1.0, %v1441_v53  ;;  %v491_v58 = vpop.xlane.xlu1 %490  ;;  %1462 = vpow2.f32 %v1379_v47  ;;  %v1383_v18 = vmul.f32 -1.442695, %v547_v6 }
  0xcc   : > { %v488_v59 = vpop.xlane.xlu0 %487  ;;  %v1445_v60 = vpop.eup %1444  ;;  %1464 = vpow2.f32 %v1384_v54  ;;  %v550_v61 = vadd.f32 %v1712_v37, %v491_v58  ;;  %v665_v1 = vadd.f32 1.0, %v1443_v55 }
  0xcd   : > { %v1447_v62 = vpop.eup %1446  ;;  %1466 = vrcp.f32 %v670_v57  ;;  %770 = vperm.xlu1 %1411, %v1439_v51   ;;  %v549_v19 = vadd.f32 %v1712_v37, %v488_v59 }
  0xce   : > { %v1449_v0 = vpop.eup %1448  ;;  %v1386_v3 = vmul.f32 -1.442695, %v550_v61  ;;  %1468 = vrcp.f32 %v664_v56 }
  0xcf   : > { %v1451_v4 = vpop.eup %1450  ;;  %v497_v5 = vpop.xlane.xlu1 %496  ;;  %v667_v13 = vadd.f32 1.0, %v1449_v0  ;;  %v1385_v30 = vmul.f32 -1.442695, %v549_v19 }
  0xd0   : > { %v494_v7 = vpop.xlane.xlu0 %493  ;;  %v1453_v8 = vpop.eup %1452  ;;  %1470 = vpow2.f32 %v1386_v3  ;;  %v552_v9 = vadd.f32 %v1712_v37, %v497_v5  ;;  %800 = vperm.xlu0 %1410, %v1451_v4  }
  0xd1   : > { %v1455_v10 = vpop.eup %1454  ;;  %v672_v11 = vadd.f32 1.0, %v1453_v8  ;;  %775 = vperm.xlu1 %1411, %v1447_v62   ;;  %1472 = vpow2.f32 %v1381_v63  ;;  %v551_v31 = vadd.f32 %v1712_v37, %v494_v7 }
  0xd2   : > { %v1457_v12 = vpop.eup %1456  ;;  %1474 = vrcp.f32 %v665_v1  ;;  %v1388_v14 = vmul.f32 -1.442695, %v552_v9  ;;  %v669_v25 = vadd.f32 1.0, %v1455_v10 }
  0xd3   : > { %v1459_v15 = vpop.eup %1458  ;;  %1476 = vrcp.f32 %v672_v11  ;;  %v674_v16 = vadd.f32 1.0, %v1457_v12  ;;  %v503_v17 = vpop.xlane.xlu1 %502  ;;  %v1387_v42 = vmul.f32 -1.442695, %v551_v31 }
  0xd4   : > { %v500_v20 = vpop.xlane.xlu0 %499  ;;  %v1461_v21 = vpop.eup %1460  ;;  %1478 = vpow2.f32 %v1388_v14  ;;  %v554_v22 = vadd.f32 %v1712_v37, %v503_v17  ;;  %810 = vperm.xlu0 %1410, %v1459_v15  }
  0xd5   : > { %v1463_v23 = vpop.eup %1462  ;;  %1480 = vrcp.f32 %v674_v16  ;;  %780 = vperm.xlu1 %1411, %v1445_v60   ;;  %v553_v43 = vadd.f32 %v1712_v37, %v500_v20 }
  0xd6   : > { %v1465_v24 = vpop.eup %1464  ;;  %1482 = vrcp.f32 %v667_v13  ;;  %v1390_v26 = vmul.f32 -1.442695, %v554_v22  ;;  %v671_v36 = vadd.f32 1.0, %v1463_v23 }
  0xd7   : > { %v1467_v27 = vpop.eup %1466  ;;  %v676_v28 = vadd.f32 1.0, %v1465_v24  ;;  %v509_v29 = vpop.xlane.xlu1 %508  ;;  %1484 = vpow2.f32 %v1383_v18  ;;  %v1389_v53 = vmul.f32 -1.442695, %v553_v43  ;;  %v323_v43 = vld [vmem:[%s1750_s14 + $0x8] sm:$0xff] }
  0xd8   : > { %1486 = vpow2.f32 %v1390_v26  ;;  %v556_v32 = vadd.f32 %v1712_v37, %v509_v29  ;;  %820 = vperm.xlu0 %1410, %v1467_v27   ;;  %v506_v33 = vpop.xlane.xlu0 %505  ;;  %v1469_v34 = vpop.eup %1468 }
  0xd9   : > { %1488 = vrcp.f32 %v676_v28  ;;  %785 = vperm.xlu1 %1411, %v1461_v21   ;;  %v555_v54 = vadd.f32 %v1712_v37, %v506_v33 }
  0xda   : > { %v1471_v35 = vpop.eup %1470  ;;  %1490 = vrcp.f32 %v669_v25  ;;  %v1392_v38 = vmul.f32 -1.442695, %v556_v32 }
  0xdb   : > { %v1473_v39 = vpop.eup %1472  ;;  %v678_v40 = vadd.f32 1.0, %v1471_v35  ;;  %v515_v41 = vpop.xlane.xlu1 %514  ;;  %1492 = vpow2.f32 %v1385_v30  ;;  %v1391_v62 = vmul.f32 -1.442695, %v555_v54  ;;  %v325_v54 = vld [vmem:[%s1750_s14 + $0x18] sm:$0xff] }
  0xdc   : > { %v1475_v44 = vpop.eup %1474  ;;  %1494 = vpow2.f32 %v1392_v38  ;;  %v558_v2 = vadd.f32 %v1712_v37, %v515_v41  ;;  %v673_v47 = vadd.f32 1.0, %v1473_v39  ;;  %v512_v49 = vpop.xlane.xlu0 %511 }
  0xdd   : > { %v1477_v45 = vpop.eup %1476  ;;  %1496 = vrcp.f32 %v678_v40  ;;  %790 = vperm.xlu1 %1411, %v1469_v34   ;;  %v557_v63 = vadd.f32 %v1712_v37, %v512_v49  ;;  %v322_v40 = vld [vmem:[%s1750_s14] sm:$0xff] }
  0xde   : > { %v1479_v46 = vpop.eup %1478  ;;  %1498 = vrcp.f32 %v671_v36  ;;  %v1394_v48 = vmul.f32 -1.442695, %v558_v2  ;;  %830 = vperm.xlu0 %1410, %v1477_v45  }
  0xdf   : > { %v1481_v50 = vpop.eup %1480  ;;  %v680_v51 = vadd.f32 1.0, %v1479_v46  ;;  %v521_v52 = vpop.xlane.xlu1 %520  ;;  %1500 = vpow2.f32 %v1387_v42  ;;  %v1393_v8 = vmul.f32 -1.442695, %v557_v63 }
  0xe0   : > { %v1483_v55 = vpop.eup %1482  ;;  %1502 = vpow2.f32 %v1394_v48  ;;  %v560_v56 = vadd.f32 %v1712_v37, %v521_v52  ;;  %v518_v3 = vpop.xlane.xlu0 %517  ;;  %v324_v48 = vld [vmem:[%s1750_s14 + $0x10] sm:$0xff] }
  0xe1   : > { %v1485_v57 = vpop.eup %1484  ;;  %1504 = vrcp.f32 %v680_v51  ;;  %795 = vperm.xlu1 %1411, %v1475_v44   ;;  %v559_v9 = vadd.f32 %v1712_v37, %v518_v3  ;;  %v1763_v44 = vld [vmem:[%s2042_s4] ss:$0 sm:$0xff] }
  0xe2   : > { %v1487_v58 = vpop.eup %1486  ;;  %1506 = vrcp.f32 %v673_v47  ;;  %v1396_v59 = vmul.f32 -1.442695, %v560_v56  ;;  %840 = vperm.xlu0 %1410, %v1481_v50   ;;  %v675_v1 = vadd.f32 1.0, %v1485_v57 }
  0xe3   : > { %v1489_v60 = vpop.eup %1488  ;;  %v682_v61 = vadd.f32 1.0, %v1487_v58  ;;  %1508 = vpow2.f32 %v1389_v53  ;;  %v1395_v16 = vmul.f32 -1.442695, %v559_v9 }
  0xe4   : > { %v1491_v0 = vpop.eup %1490  ;;  %1510 = vpow2.f32 %v1396_v59  ;;  %v331_v59 = vld [vmem:[%s1750_s14 + $0x48] sm:$0xff] }
  0xe5   : > { %v1493_v4 = vpop.eup %1492  ;;  %1512 = vrcp.f32 %v682_v61  ;;  %805 = vperm.xlu1 %1411, %v1483_v55   ;;  %v326_v61 = vld [vmem:[%s1750_s14 + $0x20] sm:$0xff] }
  0xe6   : > { %v1495_v5 = vpop.eup %1494  ;;  %850 = vperm.xlu0 %1410, %v1489_v60   ;;  %1514 = vpow2.f32 %v1391_v62  ;;  %v677_v11 = vadd.f32 1.0, %v1493_v4 }
  0xe7   : > { %v1497_v6 = vpop.eup %1496  ;;  %v684_v7 = vadd.f32 1.0, %v1495_v5  ;;  %1516 = vrcp.f32 %v675_v1  ;;  %v333_v5 = vld [vmem:[%s1750_s14 + $0x58] sm:$0xff] }
  0xe8   : > { %v1499_v10 = vpop.eup %1498 }
  0xe9   : > { %v1501_v12 = vpop.eup %1500  ;;  %1518 = vrcp.f32 %v684_v7  ;;  %815 = vperm.xlu1 %1411, %v1491_v0  }
  0xea   : > { %v1503_v13 = vpop.eup %1502  ;;  %860 = vperm.xlu0 %1410, %v1497_v6   ;;  %1520 = vpow2.f32 %v1393_v8  ;;  %v679_v18 = vadd.f32 1.0, %v1501_v12  ;;  %v327_v8 = vld [vmem:[%s1750_s14 + $0x28] sm:$0xff] }
  0xeb   : > { %v1505_v14 = vpop.eup %1504  ;;  %v686_v15 = vadd.f32 1.0, %v1503_v13  ;;  %1522 = vrcp.f32 %v677_v11 }
  0xec   : > { %v1507_v17 = vpop.eup %1506 }
  0xed   : > { %v1509_v19 = vpop.eup %1508  ;;  %1524 = vrcp.f32 %v686_v15  ;;  %825 = vperm.xlu1 %1411, %v1499_v10   ;;  %v335_v15 = vld [vmem:[%s1750_s14 + $0x68] sm:$0xff] }
  0xee   : > { %v1511_v20 = vpop.eup %1510  ;;  %870 = vperm.xlu0 %1410, %v1505_v14   ;;  %1526 = vpow2.f32 %v1395_v16  ;;  %v681_v22 = vadd.f32 1.0, %v1509_v19 }
  0xef   : > { %v1513_v37 = vpop.eup %1512  ;;  %v688_v21 = vadd.f32 1.0, %v1511_v20  ;;  %1528 = vrcp.f32 %v679_v18  ;;  %v328_v18 = vld [vmem:[%s1750_s14 + $0x30] sm:$0xff] }
  0xf0   : > { %v1515_v23 = vpop.eup %1514 }
  0xf1   : > { %1530 = vrcp.f32 %v688_v21  ;;  %835 = vperm.xlu1 %1411, %v1507_v17   ;;  %v1517_v24 = vpop.eup %1516  ;;  %v683_v26 = vadd.f32 1.0, %v1515_v23 }
  0xf2   : > { %880 = vperm.xlu0 %1410, %v1513_v37   ;;  %1532 = vrcp.f32 %v681_v22 }
  0xf3   : > { %v1519_v25 = vpop.eup %1518  ;;  %1534 = vrcp.f32 %v683_v26  ;;  %v329_v26 = vld [vmem:[%s1750_s14 + $0x38] sm:$0xff] }
  0xf4   : > { %v1521_v27 = vpop.eup %1520 }
  0xf5   : > { %845 = vperm.xlu1 %1411, %v1517_v24   ;;  %v1523_v28 = vpop.eup %1522  ;;  %v685_v30 = vadd.f32 1.0, %v1521_v27 }
  0xf6   : > { %890 = vperm.xlu0 %1410, %v1519_v25  }
  0xf7   : > { %v1525_v29 = vpop.eup %1524  ;;  %1536 = vrcp.f32 %v685_v30 }
  0xf8   : > { %v1527_v31 = vpop.eup %1526 }
  0xf9   : > { %855 = vperm.xlu1 %1411, %v1523_v28   ;;  %v1529_v32 = vpop.eup %1528  ;;  %v687_v34 = vadd.f32 1.0, %v1527_v31  ;;  %v337_v28 = vld [vmem:[%s1750_s14 + $0x78] sm:$0xff] }
  0xfa   : > { %900 = vperm.xlu0 %1410, %v1525_v29  }
  0xfb   : > { %v1531_v33 = vpop.eup %1530  ;;  %1538 = vrcp.f32 %v687_v34 }
  0xfc   : > { %v1533_v35 = vpop.eup %1532 }
  0xfd   : > { %865 = vperm.xlu1 %1411, %v1529_v32   ;;  %v1535_v36 = vpop.eup %1534 }
  0xfe   : > { %910 = vperm.xlu0 %1410, %v1531_v33  }
 0x101   : > { %875 = vperm.xlu1 %1411, %v1533_v35   ;;  %v1537_v38 = vpop.eup %1536  ;;  %v330_v35 = vld [vmem:[%s1750_s14 + $0x40] sm:$0xff] }
 0x105   : > { %885 = vperm.xlu1 %1411, %v1535_v36   ;;  %v1539_v39 = vpop.eup %1538 }
 0x109   : > { %895 = vperm.xlu1 %1411, %v1537_v38   ;;  %v339_v38 = vld [vmem:[%s1750_s14 + $0x88] sm:$0xff] }
 0x10d   : > { %905 = vperm.xlu1 %1411, %v1539_v39  }
 0x140   : > { %v756_v41 = vpop.permute.xlu0 %755 }
 0x141   : > { %v913_v42 = vmul.f32 %v756_v41, %v322_v40 }
 0x143   : > { %v945_v2 = vadd.f32 %v913_v42, %v322_v40 }
 0x144   : > { %v761_v45 = vpop.permute.xlu1 %760 }
 0x145   : > { %977 = vst.msk [vmem:[%s1757_s17] sm:$0xff] %vm425_vm0, %v945_v2  ;;  %v914_v46 = vmul.f32 %v761_v45, %v323_v43  ;;  %v1016_v47 = vmul.f32 %v1763_v44, %v945_v2 }
 0x147   : > { %v946_v49 = vadd.f32 %v914_v46, %v323_v43  ;;  %v1048_v50 = vsel %vm425_vm0, %v1016_v47, 0.0  ;;  %v332_v46 = vld [vmem:[%s1750_s14 + $0x50] sm:$0xff] }
 0x148   : > { %v766_v51 = vpop.permute.xlu1 %765  ;;  %1049 = vadd.xlane.f32.xlu1 %v1048_v50 }
 0x149   : > { %978 = vst.msk [vmem:[%s1757_s17 + $0x8] sm:$0xff] %vm425_vm0, %v946_v49  ;;  %v915_v52 = vmul.f32 %v766_v51, %v324_v48  ;;  %v1017_v53 = vmul.f32 %v1763_v44, %v946_v49 }
 0x14b   : > { %v947_v55 = vadd.f32 %v915_v52, %v324_v48  ;;  %v1051_v56 = vsel %vm425_vm0, %v1017_v53, 0.0  ;;  %v341_v48 = vld [vmem:[%s1750_s14 + $0x98] sm:$0xff] }
 0x14c   : > { %v771_v57 = vpop.permute.xlu1 %770  ;;  %1052 = vadd.xlane.f32.xlu0 %v1051_v56 }
 0x14d   : > { %979 = vst.msk [vmem:[%s1757_s17 + $0x10] sm:$0xff] %vm425_vm0, %v947_v55  ;;  %v916_v58 = vmul.f32 %v771_v57, %v325_v54  ;;  %v1018_v60 = vmul.f32 %v1763_v44, %v947_v55  ;;  %v334_v57 = vld [vmem:[%s1750_s14 + $0x60] sm:$0xff] }
 0x14f   : > { %v948_v62 = vadd.f32 %v916_v58, %v325_v54  ;;  %v801_v63 = vpop.permute.xlu0 %800  ;;  %v1054_v0 = vsel %vm425_vm0, %v1018_v60, 0.0 }
 0x150   : > { %v776_v1 = vpop.permute.xlu1 %775  ;;  %v922_v3 = vmul.f32 %v801_v63, %v331_v59  ;;  %1055 = vadd.xlane.f32.xlu0 %v1054_v0 }
 0x151   : > { %980 = vst.msk [vmem:[%s1757_s17 + $0x18] sm:$0xff] %vm425_vm0, %v948_v62  ;;  %v917_v4 = vmul.f32 %v776_v1, %v326_v61  ;;  %v1019_v6 = vmul.f32 %v1763_v44, %v948_v62 }
 0x152   : > { %v954_v7 = vadd.f32 %v922_v3, %v331_v59  ;;  %v343_v59 = vld [vmem:[%s1750_s14 + $0xa8] sm:$0xff] }
 0x153   : > { %v949_v9 = vadd.f32 %v917_v4, %v326_v61  ;;  %v811_v10 = vpop.permute.xlu0 %810  ;;  %v1057_v11 = vsel %vm425_vm0, %v1019_v6, 0.0  ;;  %v336_v6 = vld [vmem:[%s1750_s14 + $0x70] sm:$0xff] }
 0x154   : > { %986 = vst.msk [vmem:[%s1757_s17 + $0x48] sm:$0xff] %vm425_vm0, %v954_v7  ;;  %v781_v12 = vpop.permute.xlu1 %780  ;;  %v924_v13 = vmul.f32 %v811_v10, %v333_v5  ;;  %1058 = vadd.xlane.f32.xlu1 %v1057_v11  ;;  %v1025_v50 = vmul.f32 %v1763_v44, %v954_v7 }
 0x155   : > { %981 = vst.msk [vmem:[%s1757_s17 + $0x20] sm:$0xff] %vm425_vm0, %v949_v9  ;;  %v918_v14 = vmul.f32 %v781_v12, %v327_v8  ;;  %v1020_v16 = vmul.f32 %v1763_v44, %v949_v9 }
 0x156   : > { %v956_v17 = vadd.f32 %v924_v13, %v333_v5  ;;  %v1075_v61 = vsel %vm425_vm0, %v1025_v50, 0.0 }
 0x157   : > { %v950_v19 = vadd.f32 %v918_v14, %v327_v8  ;;  %v821_v20 = vpop.permute.xlu0 %820  ;;  %v1060_v37 = vsel %vm425_vm0, %v1020_v16, 0.0  ;;  %v345_v8 = vld [vmem:[%s1750_s14 + $0xb8] sm:$0xff] }
 0x158   : > { %988 = vst.msk [vmem:[%s1757_s17 + $0x58] sm:$0xff] %vm425_vm0, %v956_v17  ;;  %v786_v21 = vpop.permute.xlu1 %785  ;;  %v926_v22 = vmul.f32 %v821_v20, %v335_v15  ;;  %1061 = vadd.xlane.f32.xlu0 %v1060_v37  ;;  %v1027_v62 = vmul.f32 %v1763_v44, %v956_v17  ;;  %v347_v20 = vld [vmem:[%s1750_s14 + $0xc8] sm:$0xff] }
 0x159   : > { %982 = vst.msk [vmem:[%s1757_s17 + $0x28] sm:$0xff] %vm425_vm0, %v950_v19  ;;  %v919_v23 = vmul.f32 %v786_v21, %v328_v18  ;;  %v1021_v24 = vmul.f32 %v1763_v44, %v950_v19 }
 0x15a   : > { %v958_v25 = vadd.f32 %v926_v22, %v335_v15  ;;  %v1081_v10 = vsel %vm425_vm0, %v1027_v62, 0.0 }
 0x15b   : > { %v951_v27 = vadd.f32 %v919_v23, %v328_v18  ;;  %v1063_v29 = vsel %vm425_vm0, %v1021_v24, 0.0  ;;  %v338_v18 = vld [vmem:[%s1750_s14 + $0x80] sm:$0xff] }
 0x15c   : > { %990 = vst.msk [vmem:[%s1757_s17 + $0x68] sm:$0xff] %vm425_vm0, %v958_v25  ;;  %v791_v30 = vpop.permute.xlu1 %790  ;;  %1064 = vadd.xlane.f32.xlu1 %v1063_v29  ;;  %v1029_v11 = vmul.f32 %v1763_v44, %v958_v25  ;;  %v340_v29 = vld [vmem:[%s1750_s14 + $0x90] sm:$0xff] }
 0x15d   : > { %983 = vst.msk [vmem:[%s1757_s17 + $0x30] sm:$0xff] %vm425_vm0, %v951_v27  ;;  %v920_v31 = vmul.f32 %v791_v30, %v329_v26  ;;  %v831_v32 = vpop.permute.xlu0 %830  ;;  %v1022_v33 = vmul.f32 %v1763_v44, %v951_v27 }
 0x15e   : > { %v928_v34 = vmul.f32 %v831_v32, %v337_v28  ;;  %v1087_v21 = vsel %vm425_vm0, %v1029_v11, 0.0 }
 0x15f   : > { %v952_v36 = vadd.f32 %v920_v31, %v329_v26  ;;  %v1066_v39 = vsel %vm425_vm0, %v1022_v33, 0.0  ;;  %v349_v31 = vld [vmem:[%s1750_s14 + $0xd8] sm:$0xff] }
 0x160   : > { %v960_v40 = vadd.f32 %v928_v34, %v337_v28  ;;  %v796_v41 = vpop.permute.xlu1 %795  ;;  %1067 = vadd.xlane.f32.xlu0 %v1066_v39 }
 0x161   : > { %984 = vst.msk [vmem:[%s1757_s17 + $0x38] sm:$0xff] %vm425_vm0, %v952_v36  ;;  %v921_v42 = vmul.f32 %v796_v41, %v330_v35  ;;  %v841_v43 = vpop.permute.xlu0 %840  ;;  %v1023_v2 = vmul.f32 %v1763_v44, %v952_v36 }
 0x162   : > { %992 = vst.msk [vmem:[%s1757_s17 + $0x78] sm:$0xff] %vm425_vm0, %v960_v40  ;;  %v930_v45 = vmul.f32 %v841_v43, %v339_v38  ;;  %v1031_v22 = vmul.f32 %v1763_v44, %v960_v40 }
 0x163   : > { %v953_v47 = vadd.f32 %v921_v42, %v330_v35  ;;  %v1069_v49 = vsel %vm425_vm0, %v1023_v2, 0.0  ;;  %v342_v42 = vld [vmem:[%s1750_s14 + $0xa0] sm:$0xff]  ;;  %v351_v2 = vld [vmem:[%s1750_s14 + $0xe8] sm:$0xff] }
 0x164   : > { %v962_v51 = vadd.f32 %v930_v45, %v339_v38  ;;  %v806_v52 = vpop.permute.xlu1 %805  ;;  %1070 = vadd.xlane.f32.xlu1 %v1069_v49  ;;  %v1093_v33 = vsel %vm425_vm0, %v1031_v22, 0.0 }
 0x165   : > { %985 = vst.msk [vmem:[%s1757_s17 + $0x40] sm:$0xff] %vm425_vm0, %v953_v47  ;;  %v923_v53 = vmul.f32 %v806_v52, %v332_v46  ;;  %v851_v54 = vpop.permute.xlu0 %850  ;;  %v1024_v55 = vmul.f32 %v1763_v44, %v953_v47 }
 0x166   : > { %994 = vst.msk [vmem:[%s1757_s17 + $0x88] sm:$0xff] %vm425_vm0, %v962_v51  ;;  %v932_v56 = vmul.f32 %v851_v54, %v341_v48  ;;  %v1033_v34 = vmul.f32 %v1763_v44, %v962_v51  ;;  %v344_v54 = vld [vmem:[%s1750_s14 + $0xb0] sm:$0xff] }
 0x167   : > { %v955_v58 = vadd.f32 %v923_v53, %v332_v46  ;;  %v1072_v60 = vsel %vm425_vm0, %v1024_v55, 0.0 }
 0x168   : > { %v1830_v63 = vadd.f32 %v932_v56, %v341_v48  ;;  %v816_v0 = vpop.permute.xlu1 %815  ;;  %1073 = vadd.xlane.f32.xlu0 %v1072_v60  ;;  %1076 = vadd.xlane.f32.xlu1 %v1075_v61  ;;  %v1099_v46 = vsel %vm425_vm0, %v1033_v34, 0.0  ;;  %v353_v56 = vld [vmem:[%s1750_s14 + $0xf8] sm:$0xff] }
 0x169   : > { %987 = vst.msk [vmem:[%s1757_s17 + $0x50] sm:$0xff] %vm425_vm0, %v955_v58  ;;  %v925_v1 = vmul.f32 %v816_v0, %v334_v57  ;;  %v861_v3 = vpop.permute.xlu0 %860  ;;  %v1026_v4 = vmul.f32 %v1763_v44, %v955_v58 }
 0x16a   : > { %996 = vst.msk [vmem:[%s1757_s17 + $0x98] sm:$0xff] %vm425_vm0, %v1830_v63  ;;  %v934_v5 = vmul.f32 %v861_v3, %v343_v59  ;;  %v1035_v47 = vmul.f32 %v1763_v44, %v1830_v63  ;;  %v346_v3 = vld [vmem:[%s1750_s14 + $0xc0] sm:$0xff] }
 0x16b   : > { %v957_v7 = vadd.f32 %v925_v1, %v334_v57  ;;  %v1078_v9 = vsel %vm425_vm0, %v1026_v4, 0.0 }
 0x16c   : > { %v1843_v12 = vadd.f32 %v934_v5, %v343_v59  ;;  %v826_v13 = vpop.permute.xlu1 %825  ;;  %1079 = vadd.xlane.f32.xlu0 %v1078_v9  ;;  %1082 = vadd.xlane.f32.xlu1 %v1081_v10  ;;  %v1105_v58 = vsel %vm425_vm0, %v1035_v47, 0.0 }
 0x16d   : > { %989 = vst.msk [vmem:[%s1757_s17 + $0x60] sm:$0xff] %vm425_vm0, %v957_v7  ;;  %v927_v14 = vmul.f32 %v826_v13, %v336_v6  ;;  %v871_v15 = vpop.permute.xlu0 %870  ;;  %v1028_v16 = vmul.f32 %v1763_v44, %v957_v7 }
 0x16e   : > { %998 = vst.msk [vmem:[%s1757_s17 + $0xa8] sm:$0xff] %vm425_vm0, %v1843_v12  ;;  %v936_v17 = vmul.f32 %v871_v15, %v345_v8  ;;  %v1037_v59 = vmul.f32 %v1763_v44, %v1843_v12  ;;  %v348_v12 = vld [vmem:[%s1750_s14 + $0xd0] sm:$0xff] }
 0x16f   : > { %v959_v19 = vadd.f32 %v927_v14, %v336_v6  ;;  %v1084_v37 = vsel %vm425_vm0, %v1028_v16, 0.0 }
 0x170   : > { %v968_v23 = vadd.f32 %v936_v17, %v345_v8  ;;  %v836_v24 = vpop.permute.xlu1 %835  ;;  %1085 = vadd.xlane.f32.xlu0 %v1084_v37  ;;  %1088 = vadd.xlane.f32.xlu1 %v1087_v21  ;;  %v1111_v6 = vsel %vm425_vm0, %v1037_v59, 0.0 }
 0x171   : > { %991 = vst.msk [vmem:[%s1757_s17 + $0x70] sm:$0xff] %vm425_vm0, %v959_v19  ;;  %v929_v25 = vmul.f32 %v836_v24, %v338_v18  ;;  %v881_v26 = vpop.permute.xlu0 %880  ;;  %v1030_v27 = vmul.f32 %v1763_v44, %v959_v19 }
 0x172   : > { %1000 = vst.msk [vmem:[%s1757_s17 + $0xb8] sm:$0xff] %vm425_vm0, %v968_v23  ;;  %v938_v28 = vmul.f32 %v881_v26, %v347_v20  ;;  %v1039_v7 = vmul.f32 %v1763_v44, %v968_v23 }
 0x173   : > { %v961_v30 = vadd.f32 %v929_v25, %v338_v18  ;;  %v1090_v32 = vsel %vm425_vm0, %v1030_v27, 0.0  ;;  %v352_v27 = vld [vmem:[%s1750_s14 + $0xf0] sm:$0xff] }
 0x174   : > { %v970_v35 = vadd.f32 %v938_v28, %v347_v20  ;;  %v846_v36 = vpop.permute.xlu1 %845  ;;  %1091 = vadd.xlane.f32.xlu0 %v1090_v32  ;;  %1094 = vadd.xlane.f32.xlu1 %v1093_v33  ;;  %v1117_v15 = vsel %vm425_vm0, %v1039_v7, 0.0  ;;  %v350_v20 = vld [vmem:[%s1750_s14 + $0xe0] sm:$0xff] }
 0x175   : > { %993 = vst.msk [vmem:[%s1757_s17 + $0x80] sm:$0xff] %vm425_vm0, %v961_v30  ;;  %v931_v38 = vmul.f32 %v846_v36, %v340_v29  ;;  %v891_v39 = vpop.permute.xlu0 %890  ;;  %v1032_v40 = vmul.f32 %v1763_v44, %v961_v30 }
 0x176   : > { %1002 = vst.msk [vmem:[%s1757_s17 + $0xc8] sm:$0xff] %vm425_vm0, %v970_v35  ;;  %v940_v41 = vmul.f32 %v891_v39, %v349_v31  ;;  %v1041_v16 = vmul.f32 %v1763_v44, %v970_v35 }
 0x177   : > { %v963_v43 = vadd.f32 %v931_v38, %v340_v29  ;;  %v1096_v45 = vsel %vm425_vm0, %v1032_v40, 0.0 }
 0x178   : > { %v972_v48 = vadd.f32 %v940_v41, %v349_v31  ;;  %v856_v49 = vpop.permute.xlu1 %855  ;;  %1097 = vadd.xlane.f32.xlu0 %v1096_v45  ;;  %1100 = vadd.xlane.f32.xlu1 %v1099_v46  ;;  %v1123_v22 = vsel %vm425_vm0, %v1041_v16, 0.0 }
 0x179   : > { %995 = vst.msk [vmem:[%s1757_s17 + $0x90] sm:$0xff] %vm425_vm0, %v963_v43  ;;  %v933_v50 = vmul.f32 %v856_v49, %v342_v42  ;;  %v901_v51 = vpop.permute.xlu0 %900  ;;  %v1034_v52 = vmul.f32 %v1763_v44, %v963_v43  ;;  %v1931_v43 = vld [vmem:[#allocation3] ss:$0 sm:$0xff] }
 0x17a   : > { %1004 = vst.msk [vmem:[%s1757_s17 + $0xd8] sm:$0xff] %vm425_vm0, %v972_v48  ;;  %v942_v53 = vmul.f32 %v901_v51, %v351_v2  ;;  %v1043_v23 = vmul.f32 %v1763_v44, %v972_v48 }
 0x17b   : > { %v965_v55 = vadd.f32 %v933_v50, %v342_v42  ;;  %v1102_v57 = vsel %vm425_vm0, %v1034_v52, 0.0 }
 0x17c   : > { %v974_v60 = vadd.f32 %v942_v53, %v351_v2  ;;  %v866_v61 = vpop.permute.xlu1 %865  ;;  %1103 = vadd.xlane.f32.xlu0 %v1102_v57  ;;  %1106 = vadd.xlane.f32.xlu1 %v1105_v58  ;;  %v1129_v30 = vsel %vm425_vm0, %v1043_v23, 0.0 }
 0x17d   : > { %997 = vst.msk [vmem:[%s1757_s17 + $0xa0] sm:$0xff] %vm425_vm0, %v965_v55  ;;  %v935_v62 = vmul.f32 %v866_v61, %v344_v54  ;;  %v911_v63 = vpop.permute.xlu0 %910  ;;  %v1036_v0 = vmul.f32 %v1763_v44, %v965_v55 }
 0x17e   : > { %1006 = vst.msk [vmem:[%s1757_s17 + $0xe8] sm:$0xff] %vm425_vm0, %v974_v60  ;;  %v944_v1 = vmul.f32 %v911_v63, %v353_v56  ;;  %v1045_v31 = vmul.f32 %v1763_v44, %v974_v60 }
 0x17f   : > { %v967_v4 = vadd.f32 %v935_v62, %v344_v54  ;;  %v1108_v5 = vsel %vm425_vm0, %v1036_v0, 0.0 }
 0x180   : > { %v976_v8 = vadd.f32 %v944_v1, %v353_v56  ;;  %v876_v9 = vpop.permute.xlu1 %875  ;;  %1109 = vadd.xlane.f32.xlu0 %v1108_v5  ;;  %1112 = vadd.xlane.f32.xlu1 %v1111_v6  ;;  %v1135_v38 = vsel %vm425_vm0, %v1045_v31, 0.0 }
 0x181   : > { %999 = vst.msk [vmem:[%s1757_s17 + $0xb0] sm:$0xff] %vm425_vm0, %v967_v4  ;;  %v937_v10 = vmul.f32 %v876_v9, %v346_v3  ;;  %v1038_v11 = vmul.f32 %v1763_v44, %v967_v4 }
 0x182   : > { %1008 = vst.msk [vmem:[%s1757_s17 + $0xf8] sm:$0xff] %vm425_vm0, %v976_v8  ;;  %v1047_v39 = vmul.f32 %v1763_v44, %v976_v8 }
 0x183   : > { %v969_v13 = vadd.f32 %v937_v10, %v346_v3  ;;  %v1114_v14 = vsel %vm425_vm0, %v1038_v11, 0.0 }
 0x184   : > { %v886_v17 = vpop.permute.xlu1 %885  ;;  %1115 = vadd.xlane.f32.xlu0 %v1114_v14  ;;  %1118 = vadd.xlane.f32.xlu1 %v1117_v15  ;;  %v1141_v42 = vsel %vm425_vm0, %v1047_v39, 0.0 }
 0x185   : > { %1001 = vst.msk [vmem:[%s1757_s17 + $0xc0] sm:$0xff] %vm425_vm0, %v969_v13  ;;  %v939_v18 = vmul.f32 %v886_v17, %v348_v12  ;;  %v1040_v19 = vmul.f32 %v1763_v44, %v969_v13 }
 0x187   : > { %v971_v37 = vadd.f32 %v939_v18, %v348_v12  ;;  %v1120_v21 = vsel %vm425_vm0, %v1040_v19, 0.0 }
 0x188   : > { %v896_v24 = vpop.permute.xlu1 %895  ;;  %1121 = vadd.xlane.f32.xlu0 %v1120_v21  ;;  %1124 = vadd.xlane.f32.xlu1 %v1123_v22 }
 0x189   : > { %1003 = vst.msk [vmem:[%s1757_s17 + $0xd0] sm:$0xff] %vm425_vm0, %v971_v37  ;;  %v941_v25 = vmul.f32 %v896_v24, %v350_v20  ;;  %v1042_v26 = vmul.f32 %v1763_v44, %v971_v37 }
 0x18b   : > { %v973_v28 = vadd.f32 %v941_v25, %v350_v20  ;;  %v1126_v29 = vsel %vm425_vm0, %v1042_v26, 0.0 }
 0x18c   : > { %v906_v32 = vpop.permute.xlu1 %905  ;;  %1127 = vadd.xlane.f32.xlu0 %v1126_v29  ;;  %1130 = vadd.xlane.f32.xlu1 %v1129_v30 }
 0x18d   : > { %1005 = vst.msk [vmem:[%s1757_s17 + $0xe0] sm:$0xff] %vm425_vm0, %v973_v28  ;;  %v943_v33 = vmul.f32 %v906_v32, %v352_v27  ;;  %v1044_v34 = vmul.f32 %v1763_v44, %v973_v28 }
 0x18f   : > { %v975_v35 = vadd.f32 %v943_v33, %v352_v27  ;;  %v1132_v36 = vsel %vm425_vm0, %v1044_v34, 0.0 }
 0x190   : > { %1133 = vadd.xlane.f32.xlu0 %v1132_v36  ;;  %1136 = vadd.xlane.f32.xlu1 %v1135_v38 }
 0x191   : > { %1007 = vst.msk [vmem:[%s1757_s17 + $0xf0] sm:$0xff] %vm425_vm0, %v975_v35  ;;  %v1046_v40 = vmul.f32 %v1763_v44, %v975_v35 }
 0x193   : > { %v1138_v41 = vsel %vm425_vm0, %v1046_v40, 0.0 }
 0x194   : > { %1139 = vadd.xlane.f32.xlu0 %v1138_v41  ;;  %1142 = vadd.xlane.f32.xlu1 %v1141_v42 }
 0x1d5   : > { %v1050_v2 = vpop.xlane.xlu1 %1049 }
 0x1d6   : > { %v1151_v45 = vadd.f32 %v1931_v43, %v1050_v2 }
 0x1d8   : > { %v1183_v44 = vmax.f32 %v1151_v45, 0.0 }
 0x1d9   : > { %v1053_v46 = vpop.xlane.xlu0 %1052 }
 0x1da   : > { %1216 = vst.msk [vmem:[%s1938_s22] sm:$0xff] %vm1215_vm1, %v1183_v44  ;;  %v1152_v47 = vadd.f32 %v1931_v43, %v1053_v46 }
 0x1dc   : > { %v1184_v48 = vmax.f32 %v1152_v47, 0.0 }
 0x1dd   : > { %v1056_v49 = vpop.xlane.xlu0 %1055 }
 0x1de   : > { %1217 = vst.msk [vmem:[%s1938_s22 + $0x8] sm:$0xff] %vm1215_vm1, %v1184_v48  ;;  %v1153_v50 = vadd.f32 %v1931_v43, %v1056_v49 }
 0x1e0   : > { %v1185_v51 = vmax.f32 %v1153_v50, 0.0 }
 0x1e1   : > { %v1059_v52 = vpop.xlane.xlu1 %1058 }
 0x1e2   : > { %1218 = vst.msk [vmem:[%s1938_s22 + $0x10] sm:$0xff] %vm1215_vm1, %v1185_v51  ;;  %v1154_v53 = vadd.f32 %v1931_v43, %v1059_v52 }
 0x1e4   : > { %v1186_v54 = vmax.f32 %v1154_v53, 0.0 }
 0x1e5   : > { %v1062_v55 = vpop.xlane.xlu0 %1061 }
 0x1e6   : > { %1219 = vst.msk [vmem:[%s1938_s22 + $0x18] sm:$0xff] %vm1215_vm1, %v1186_v54  ;;  %v1155_v56 = vadd.f32 %v1931_v43, %v1062_v55 }
 0x1e8   : > { %v1187_v57 = vmax.f32 %v1155_v56, 0.0 }
 0x1e9   : > { %v1065_v58 = vpop.xlane.xlu1 %1064 }
 0x1ea   : > { %1220 = vst.msk [vmem:[%s1938_s22 + $0x20] sm:$0xff] %vm1215_vm1, %v1187_v57  ;;  %v1156_v59 = vadd.f32 %v1931_v43, %v1065_v58 }
 0x1ec   : > { %v1188_v60 = vmax.f32 %v1156_v59, 0.0 }
 0x1ed   : > { %v1068_v61 = vpop.xlane.xlu0 %1067 }
 0x1ee   : > { %1221 = vst.msk [vmem:[%s1938_s22 + $0x28] sm:$0xff] %vm1215_vm1, %v1188_v60  ;;  %v1157_v62 = vadd.f32 %v1931_v43, %v1068_v61 }
 0x1f0   : > { %v1189_v63 = vmax.f32 %v1157_v62, 0.0 }
 0x1f1   : > { %v1071_v0 = vpop.xlane.xlu1 %1070 }
 0x1f2   : > { %1222 = vst.msk [vmem:[%s1938_s22 + $0x30] sm:$0xff] %vm1215_vm1, %v1189_v63  ;;  %v1158_v1 = vadd.f32 %v1931_v43, %v1071_v0 }
 0x1f4   : > { %v1190_v3 = vmax.f32 %v1158_v1, 0.0 }
 0x1f5   : > { %v1074_v4 = vpop.xlane.xlu0 %1073  ;;  %v1077_v5 = vpop.xlane.xlu1 %1076 }
 0x1f6   : > { %1223 = vst.msk [vmem:[%s1938_s22 + $0x38] sm:$0xff] %vm1215_vm1, %v1190_v3  ;;  %v1159_v6 = vadd.f32 %v1931_v43, %v1074_v4  ;;  %v1160_v7 = vadd.f32 %v1931_v43, %v1077_v5 }
 0x1f8   : > { %v1191_v8 = vmax.f32 %v1159_v6, 0.0  ;;  %v1192_v9 = vmax.f32 %v1160_v7, 0.0 }
 0x1f9   : > { %v1080_v10 = vpop.xlane.xlu0 %1079  ;;  %v1083_v11 = vpop.xlane.xlu1 %1082 }
 0x1fa   : > { %1224 = vst.msk [vmem:[%s1938_s22 + $0x40] sm:$0xff] %vm1215_vm1, %v1191_v8  ;;  %1225 = vst.msk [vmem:[%s1938_s22 + $0x48] sm:$0xff] %vm1215_vm1, %v1192_v9  ;;  %v1161_v12 = vadd.f32 %v1931_v43, %v1080_v10  ;;  %v1162_v13 = vadd.f32 %v1931_v43, %v1083_v11 }
 0x1fc   : > { %v1193_v14 = vmax.f32 %v1161_v12, 0.0  ;;  %v1194_v15 = vmax.f32 %v1162_v13, 0.0 }
 0x1fd   : > { %v1086_v16 = vpop.xlane.xlu0 %1085  ;;  %v1089_v17 = vpop.xlane.xlu1 %1088 }
 0x1fe   : > { %1226 = vst.msk [vmem:[%s1938_s22 + $0x50] sm:$0xff] %vm1215_vm1, %v1193_v14  ;;  %1227 = vst.msk [vmem:[%s1938_s22 + $0x58] sm:$0xff] %vm1215_vm1, %v1194_v15  ;;  %v1163_v18 = vadd.f32 %v1931_v43, %v1086_v16  ;;  %v1164_v19 = vadd.f32 %v1931_v43, %v1089_v17 }
 0x200   : > { %v1195_v20 = vmax.f32 %v1163_v18, 0.0  ;;  %v1196_v37 = vmax.f32 %v1164_v19, 0.0 }
 0x201   : > { %v1092_v21 = vpop.xlane.xlu0 %1091  ;;  %v1095_v22 = vpop.xlane.xlu1 %1094 }
 0x202   : > { %1228 = vst.msk [vmem:[%s1938_s22 + $0x60] sm:$0xff] %vm1215_vm1, %v1195_v20  ;;  %1229 = vst.msk [vmem:[%s1938_s22 + $0x68] sm:$0xff] %vm1215_vm1, %v1196_v37  ;;  %v1165_v23 = vadd.f32 %v1931_v43, %v1092_v21  ;;  %v1166_v24 = vadd.f32 %v1931_v43, %v1095_v22 }
 0x204   : > { %v1197_v25 = vmax.f32 %v1165_v23, 0.0  ;;  %v1198_v26 = vmax.f32 %v1166_v24, 0.0 }
 0x205   : > { %v1098_v27 = vpop.xlane.xlu0 %1097  ;;  %v1101_v28 = vpop.xlane.xlu1 %1100 }
 0x206   : > { %1230 = vst.msk [vmem:[%s1938_s22 + $0x70] sm:$0xff] %vm1215_vm1, %v1197_v25  ;;  %1231 = vst.msk [vmem:[%s1938_s22 + $0x78] sm:$0xff] %vm1215_vm1, %v1198_v26  ;;  %v1167_v29 = vadd.f32 %v1931_v43, %v1098_v27  ;;  %v1168_v30 = vadd.f32 %v1931_v43, %v1101_v28 }
 0x208   : > { %v1199_v31 = vmax.f32 %v1167_v29, 0.0  ;;  %v1200_v32 = vmax.f32 %v1168_v30, 0.0 }
 0x209   : > { %v1104_v33 = vpop.xlane.xlu0 %1103  ;;  %v1107_v34 = vpop.xlane.xlu1 %1106 }
 0x20a   : > { %1232 = vst.msk [vmem:[%s1938_s22 + $0x80] sm:$0xff] %vm1215_vm1, %v1199_v31  ;;  %1233 = vst.msk [vmem:[%s1938_s22 + $0x88] sm:$0xff] %vm1215_vm1, %v1200_v32  ;;  %v1169_v35 = vadd.f32 %v1931_v43, %v1104_v33  ;;  %v1170_v36 = vadd.f32 %v1931_v43, %v1107_v34 }
 0x20c   : > { %v1201_v38 = vmax.f32 %v1169_v35, 0.0  ;;  %v1202_v39 = vmax.f32 %v1170_v36, 0.0 }
 0x20d   : > { %v1110_v40 = vpop.xlane.xlu0 %1109  ;;  %v1113_v41 = vpop.xlane.xlu1 %1112 }
 0x20e   : > { %1234 = vst.msk [vmem:[%s1938_s22 + $0x90] sm:$0xff] %vm1215_vm1, %v1201_v38  ;;  %1235 = vst.msk [vmem:[%s1938_s22 + $0x98] sm:$0xff] %vm1215_vm1, %v1202_v39  ;;  %v1171_v42 = vadd.f32 %v1931_v43, %v1110_v40  ;;  %v1172_v2 = vadd.f32 %v1931_v43, %v1113_v41 }
 0x210   : > { %v1203_v45 = vmax.f32 %v1171_v42, 0.0  ;;  %v1204_v44 = vmax.f32 %v1172_v2, 0.0 }
 0x211   : > { %v1116_v46 = vpop.xlane.xlu0 %1115  ;;  %v1119_v47 = vpop.xlane.xlu1 %1118 }
 0x212   : > { %1236 = vst.msk [vmem:[%s1938_s22 + $0xa0] sm:$0xff] %vm1215_vm1, %v1203_v45  ;;  %1237 = vst.msk [vmem:[%s1938_s22 + $0xa8] sm:$0xff] %vm1215_vm1, %v1204_v44  ;;  %v1173_v48 = vadd.f32 %v1931_v43, %v1116_v46  ;;  %v1174_v49 = vadd.f32 %v1931_v43, %v1119_v47 }
 0x214   : > { %v1205_v50 = vmax.f32 %v1173_v48, 0.0  ;;  %v1206_v51 = vmax.f32 %v1174_v49, 0.0 }
 0x215   : > { %v1122_v52 = vpop.xlane.xlu0 %1121  ;;  %v1125_v53 = vpop.xlane.xlu1 %1124 }
 0x216   : > { %1238 = vst.msk [vmem:[%s1938_s22 + $0xb0] sm:$0xff] %vm1215_vm1, %v1205_v50  ;;  %1239 = vst.msk [vmem:[%s1938_s22 + $0xb8] sm:$0xff] %vm1215_vm1, %v1206_v51  ;;  %v1175_v54 = vadd.f32 %v1931_v43, %v1122_v52  ;;  %v1176_v55 = vadd.f32 %v1931_v43, %v1125_v53 }
 0x218   : > { %v1207_v56 = vmax.f32 %v1175_v54, 0.0  ;;  %v1208_v57 = vmax.f32 %v1176_v55, 0.0 }
 0x219   : > { %v1128_v58 = vpop.xlane.xlu0 %1127  ;;  %v1131_v59 = vpop.xlane.xlu1 %1130 }
 0x21a   : > { %1240 = vst.msk [vmem:[%s1938_s22 + $0xc0] sm:$0xff] %vm1215_vm1, %v1207_v56  ;;  %1241 = vst.msk [vmem:[%s1938_s22 + $0xc8] sm:$0xff] %vm1215_vm1, %v1208_v57  ;;  %v1177_v60 = vadd.f32 %v1931_v43, %v1128_v58  ;;  %v1178_v61 = vadd.f32 %v1931_v43, %v1131_v59 }
 0x21c   : > { %v1209_v62 = vmax.f32 %v1177_v60, 0.0  ;;  %v1210_v63 = vmax.f32 %v1178_v61, 0.0 }
 0x21d   : > { %v1134_v0 = vpop.xlane.xlu0 %1133  ;;  %v1137_v1 = vpop.xlane.xlu1 %1136 }
 0x21e   : > { %1242 = vst.msk [vmem:[%s1938_s22 + $0xd0] sm:$0xff] %vm1215_vm1, %v1209_v62  ;;  %1243 = vst.msk [vmem:[%s1938_s22 + $0xd8] sm:$0xff] %vm1215_vm1, %v1210_v63  ;;  %v1179_v3 = vadd.f32 %v1931_v43, %v1134_v0  ;;  %v1180_v4 = vadd.f32 %v1931_v43, %v1137_v1 }
 0x220   : > { %v1211_v5 = vmax.f32 %v1179_v3, 0.0  ;;  %v1212_v6 = vmax.f32 %v1180_v4, 0.0 }
 0x221   : > { %v1140_v7 = vpop.xlane.xlu0 %1139  ;;  %v1143_v8 = vpop.xlane.xlu1 %1142 }
 0x222   : > { %1244 = vst.msk [vmem:[%s1938_s22 + $0xe0] sm:$0xff] %vm1215_vm1, %v1211_v5  ;;  %1245 = vst.msk [vmem:[%s1938_s22 + $0xe8] sm:$0xff] %vm1215_vm1, %v1212_v6  ;;  %v1181_v9 = vadd.f32 %v1931_v43, %v1140_v7  ;;  %v1182_v10 = vadd.f32 %v1931_v43, %v1143_v8 }
 0x224   : > { %v1213_v11 = vmax.f32 %v1181_v9, 0.0  ;;  %v1214_v12 = vmax.f32 %v1182_v10, 0.0 }
 0x226   : > { %1246 = vst.msk [vmem:[%s1938_s22 + $0xf0] sm:$0xff] %vm1215_vm1, %v1213_v11  ;;  %1247 = vst.msk [vmem:[%s1938_s22 + $0xf8] sm:$0xff] %vm1215_vm1, %v1214_v12 }
 0x227 PF: > { %s22_s28 = sadd.s32 1, %s1546_s28  }
 0x228   : > { %p19_p4 = scmp.ge.s32.totalorder %s22_s28, 4  }
 0x22a   :  { %21 = sbr.rel (!%p19_p4) target bundleno = 3 (0x3), region = 89 }

// kernel: insinet_forward.50
= control target key start
LH: loop header
LB: loop body
LE: loop exit
PB: predicated region body
PF: predicated region fallthrough
CT: control target
= control target key end

     0   :  { %s1612_s23 = smov 0   ;;  %s2058_s0 = inlined_call_operand.vmem [shape: f32[512,16], index: 0, kind: input, shape index: {}]   ;;  %s2059_s1 = inlined_call_operand.vmem [shape: f32[512,16], index: 1, kind: input, shape index: {}]   ;;  %s2060_s2 = inlined_call_operand.vmem [shape: f32[1,16], index: 2, kind: input, shape index: {}]   ;;  %s2061_s3 = inlined_call_operand.<no memory space> [shape: f32[1,1], index: 3, kind: input, shape index: {}]   ;;  %s2062_s4 = inlined_call_operand.vmem [shape: bf16[16,16], index: 4, kind: input, shape index: {}]   ;;  %s2063_s5 = inlined_call_operand.vmem [shape: f32[1,16], index: 5, kind: input, shape index: {}]   ;;  %s2064_s6 = inlined_call_operand.vmem [shape: f32[512,16], index: 6, kind: output, shape index: {}]  }
   0x1   :  { %v11_v0 = vstv %s2061_s3 }
   0x2   :  { %12 = vst [vmem:[#allocation2] sm:$0x1] %v11_v0 }
   0x3 LB: > { %s1307_s24 = sadd.s32 4294967295, %s1571_s23   ;;  %p1311_p0 = scmp.ge.s32.totalorder %s1571_s23, 1  ;;  %s1571_s23 = sphi %s1612_s23, %s18_s23  }
   0x4   : > { %p226_p1 = scmp.lt.s32.totalorder %s1571_s23, 3 }
   0x6   : > { %p227_p2 = pnand %p1311_p0, %p226_p1 }
   0x7   : > { %s1312_s25 = sshll.u32 (!%p227_p2), %s1307_s24, 5  ;;  %v1625_v1 = vld [vmem:[%s2060_s2] ss:$0 sm:$0xff] (!%p227_p2)  ;;  %vm383_vm0 = vcmask (!%p227_p2), 130048  }
   0x8   : > { %230 = sbr.rel (%p227_p2) target bundleno = 623 (0x26f), region = 44  ;;  %p262_p3 = scmp.lt.s32.totalorder (!%p227_p2), %s1312_s25, 63 }
   0xf   : > { %s2066_s25 = smov (!%p262_p3, %s1312_s25), 63 }
  0x10   : > { %s1620_s3 = sshll.u32 %s2066_s25, 3 }
  0x11   : > { %s1631_s30 = scalar_lea.vmem %s2059_s1, %s1620_s3  ;;  %s1866_s11 = scalar_lea.vmem %s2058_s0, %s1620_s3 }
  0x12   : > { %v1634_v2 = vld [vmem:[%s1631_s30 + $0x80] sm:$0xff]  ;;  %v1640_v4 = vld [vmem:[%s1631_s30 + $0x88] sm:$0xff]  ;;  %v1654_v10 = vld [vmem:[%s1631_s30 + $0x18] sm:$0xff]  ;;  %s1958_s16 = scalar_lea.vmem %s2064_s6, %s1620_s3 }
  0x13   : > { %v1637_v3 = vld [vmem:[%s1631_s30] sm:$0xff]  ;;  %v367_v5 = vmul.f32 %v1625_v1, %v1634_v2  ;;  %v368_v7 = vmul.f32 %v1625_v1, %v1640_v4  ;;  %v1649_v8 = vld [vmem:[%s1631_s30 + $0x8] sm:$0xff]  ;;  %v1657_v11 = vld [vmem:[%s1631_s30 + $0x10] sm:$0xff]  ;;  %v354_v16 = vmul.f32 %v1625_v1, %v1654_v10 }
  0x14   : > { %v351_v6 = vmul.f32 %v1625_v1, %v1637_v3  ;;  %v352_v9 = vmul.f32 %v1625_v1, %v1649_v8  ;;  %v353_v17 = vmul.f32 %v1625_v1, %v1657_v11  ;;  %v1668_v18 = vld [vmem:[%s1631_s30 + $0x98] sm:$0xff]  ;;  %v1671_v19 = vld [vmem:[%s1631_s30 + $0x90] sm:$0xff]  ;;  %v1680_v24 = vld [vmem:[%s1631_s30 + $0x28] sm:$0xff] }
  0x15   : > { %v432_v12 = vsel %vm383_vm0, %v367_v5, 0.0  ;;  %v435_v14 = vsel %vm383_vm0, %v368_v7, 0.0  ;;  %v393_v20 = vsel %vm383_vm0, %v354_v16, 0.0  ;;  %v370_v21 = vmul.f32 %v1625_v1, %v1668_v18  ;;  %v1683_v25 = vld [vmem:[%s1631_s30 + $0x20] sm:$0xff]  ;;  %v1692_v30 = vld [vmem:[%s1631_s30 + $0xa8] sm:$0xff]  ;;  %v1704_v36 = vld [vmem:[%s1631_s30 + $0x38] sm:$0xff] }
  0x16   : > { %v384_v13 = vsel %vm383_vm0, %v351_v6, 0.0  ;;  %433 = vadd.xlane.f32.xlu1 %v432_v12  ;;  %v387_v15 = vsel %vm383_vm0, %v352_v9, 0.0  ;;  %v390_v22 = vsel %vm383_vm0, %v353_v17, 0.0  ;;  %v369_v23 = vmul.f32 %v1625_v1, %v1671_v19  ;;  %v1695_v31 = vld [vmem:[%s1631_s30 + $0xa0] sm:$0xff]  ;;  %v1707_v37 = vld [vmem:[%s1631_s30 + $0x30] sm:$0xff]  ;;  %v1716_v42 = vld [vmem:[%s1631_s30 + $0xb8] sm:$0xff] }
  0x17   : > { %385 = vadd.xlane.f32.xlu0 %v384_v13  ;;  %v441_v26 = vsel %vm383_vm0, %v370_v21, 0.0  ;;  %v356_v27 = vmul.f32 %v1625_v1, %v1680_v24  ;;  %v355_v29 = vmul.f32 %v1625_v1, %v1683_v25  ;;  %v372_v33 = vmul.f32 %v1625_v1, %v1692_v30  ;;  %v1719_v43 = vld [vmem:[%s1631_s30 + $0xb0] sm:$0xff]  ;;  %v1728_v48 = vld [vmem:[%s1631_s30 + $0x48] sm:$0xff]  ;;  %v1731_v49 = vld [vmem:[%s1631_s30 + $0x40] sm:$0xff] }
  0x18   : > { %v438_v28 = vsel %vm383_vm0, %v369_v23, 0.0  ;;  %v371_v35 = vmul.f32 %v1625_v1, %v1695_v31  ;;  %v358_v39 = vmul.f32 %v1625_v1, %v1704_v36  ;;  %v357_v41 = vmul.f32 %v1625_v1, %v1707_v37  ;;  %v1740_v54 = vld [vmem:[%s1631_s30 + $0xc8] sm:$0xff]  ;;  %v1743_v55 = vld [vmem:[%s1631_s30 + $0xc0] sm:$0xff]  ;;  %v1752_v60 = vld [vmem:[%s1631_s30 + $0x58] sm:$0xff] }
  0x19   : > { %v399_v32 = vsel %vm383_vm0, %v356_v27, 0.0  ;;  %v396_v34 = vsel %vm383_vm0, %v355_v29, 0.0  ;;  %v447_v38 = vsel %vm383_vm0, %v372_v33, 0.0  ;;  %v374_v45 = vmul.f32 %v1625_v1, %v1716_v42  ;;  %v1755_v61 = vld [vmem:[%s1631_s30 + $0x50] sm:$0xff]  ;;  %v1764_v6 = vld [vmem:[%s1631_s30 + $0xd8] sm:$0xff]  ;;  %v1773_v13 = vld [vmem:[%s1631_s30 + $0x68] sm:$0xff] }
  0x1a   : > { %436 = vadd.xlane.f32.xlu1 %v435_v14  ;;  %v444_v40 = vsel %vm383_vm0, %v371_v35, 0.0  ;;  %v405_v44 = vsel %vm383_vm0, %v358_v39, 0.0  ;;  %v402_v46 = vsel %vm383_vm0, %v357_v41, 0.0  ;;  %v373_v47 = vmul.f32 %v1625_v1, %v1719_v43  ;;  %v1767_v7 = vld [vmem:[%s1631_s30 + $0xd0] sm:$0xff]  ;;  %v1779_v16 = vld [vmem:[%s1631_s30 + $0x60] sm:$0xff]  ;;  %v1788_v23 = vld [vmem:[%s1631_s30 + $0xe8] sm:$0xff] }
  0x1b   : > { %388 = vadd.xlane.f32.xlu0 %v387_v15  ;;  %v453_v50 = vsel %vm383_vm0, %v374_v45, 0.0  ;;  %v360_v51 = vmul.f32 %v1625_v1, %v1728_v48  ;;  %v359_v53 = vmul.f32 %v1625_v1, %v1731_v49  ;;  %v376_v57 = vmul.f32 %v1625_v1, %v1740_v54  ;;  %v1803_v35 = vld [vmem:[%s1631_s30 + $0x70] sm:$0xff] }
  0x1c   : > { %v450_v52 = vsel %vm383_vm0, %v373_v47, 0.0  ;;  %v375_v59 = vmul.f32 %v1625_v1, %v1743_v55  ;;  %v362_v63 = vmul.f32 %v1625_v1, %v1752_v60  ;;  %v361_v5 = vmul.f32 %v1625_v1, %v1755_v61  ;;  %v1815_v45 = vld [vmem:[%s1631_s30 + $0xf0] sm:$0xff] }
  0x1d   : > { %v411_v56 = vsel %vm383_vm0, %v360_v51, 0.0  ;;  %v408_v58 = vsel %vm383_vm0, %v359_v53, 0.0  ;;  %v459_v62 = vsel %vm383_vm0, %v376_v57, 0.0  ;;  %v378_v12 = vmul.f32 %v1625_v1, %v1764_v6 }
  0x1e   : > { %394 = vadd.xlane.f32.xlu1 %v393_v20  ;;  %v456_v0 = vsel %vm383_vm0, %v375_v59, 0.0  ;;  %v417_v9 = vsel %vm383_vm0, %v362_v63, 0.0  ;;  %v414_v14 = vsel %vm383_vm0, %v361_v5, 0.0  ;;  %v377_v15 = vmul.f32 %v1625_v1, %v1767_v7 }
  0x1f   : > { %391 = vadd.xlane.f32.xlu0 %v390_v22  ;;  %v364_v17 = vmul.f32 %v1625_v1, %v1773_v13  ;;  %v465_v20 = vsel %vm383_vm0, %v378_v12, 0.0  ;;  %v363_v22 = vmul.f32 %v1625_v1, %v1779_v16  ;;  %v1573_v27 = vmov 0  }
  0x20   : > { %v462_v21 = vsel %vm383_vm0, %v377_v15, 0.0  ;;  %1434 = vset.pattern.permute.xlu0 %v1573_v27  ;;  %1435 = vset.pattern.permute.xlu1 %v1573_v27  ;;  %v380_v29 = vmul.f32 %v1625_v1, %v1788_v23  ;;  %v365_v41 = vmul.f32 %v1625_v1, %v1803_v35  ;;  %v381_v51 = vmul.f32 %v1625_v1, %v1815_v45 }
  0x22   : > { %442 = vadd.xlane.f32.xlu1 %v441_v26  ;;  %v1791_v26 = vld [vmem:[%s1631_s30 + $0xe0] sm:$0xff]  ;;  %v474_v53 = vsel %vm383_vm0, %v381_v51, 0.0 }
  0x23   : > { %439 = vadd.xlane.f32.xlu0 %v438_v28  ;;  %v423_v28 = vsel %vm383_vm0, %v364_v17, 0.0  ;;  %v379_v33 = vmul.f32 %v1625_v1, %v1791_v26 }
  0x26   : > { %400 = vadd.xlane.f32.xlu1 %v399_v32  ;;  %v420_v32 = vsel %vm383_vm0, %v363_v22, 0.0 }
  0x27   : > { %397 = vadd.xlane.f32.xlu0 %v396_v34  ;;  %v1800_v34 = vld [vmem:[%s1631_s30 + $0x78] sm:$0xff] }
  0x28   : > { %v366_v39 = vmul.f32 %v1625_v1, %v1800_v34 }
  0x2a   : > { %448 = vadd.xlane.f32.xlu1 %v447_v38  ;;  %v471_v38 = vsel %vm383_vm0, %v380_v29, 0.0 }
  0x2b   : > { %445 = vadd.xlane.f32.xlu0 %v444_v40  ;;  %v468_v40 = vsel %vm383_vm0, %v379_v33, 0.0 }
  0x2e   : > { %406 = vadd.xlane.f32.xlu1 %v405_v44  ;;  %v1812_v44 = vld [vmem:[%s1631_s30 + $0xf8] sm:$0xff] }
  0x2f   : > { %403 = vadd.xlane.f32.xlu0 %v402_v46  ;;  %v429_v46 = vsel %vm383_vm0, %v366_v39, 0.0  ;;  %v382_v47 = vmul.f32 %v1625_v1, %v1812_v44 }
  0x32   : > { %454 = vadd.xlane.f32.xlu1 %v453_v50  ;;  %v426_v50 = vsel %vm383_vm0, %v365_v41, 0.0 }
  0x33   : > { %451 = vadd.xlane.f32.xlu0 %v450_v52  ;;  %v477_v52 = vsel %vm383_vm0, %v382_v47, 0.0 }
  0x36   : > { %412 = vadd.xlane.f32.xlu1 %v411_v56  ;;  %v1825_v56 = vld [vmem:[#allocation2] ss:$0 sm:$0xff] }
  0x37   : > { %409 = vadd.xlane.f32.xlu0 %v408_v58 }
  0x3a   : > { %460 = vadd.xlane.f32.xlu1 %v459_v62 }
  0x3b   : > { %457 = vadd.xlane.f32.xlu0 %v456_v0 }
  0x3e   : > { %418 = vadd.xlane.f32.xlu1 %v417_v9 }
  0x3f   : > { %415 = vadd.xlane.f32.xlu0 %v414_v14 }
  0x42   : > { %466 = vadd.xlane.f32.xlu1 %v465_v20 }
  0x43   : > { %463 = vadd.xlane.f32.xlu0 %v462_v21 }
  0x46   : > { %424 = vadd.xlane.f32.xlu1 %v423_v28 }
  0x47   : > { %421 = vadd.xlane.f32.xlu0 %v420_v32 }
  0x4a   : > { %472 = vadd.xlane.f32.xlu1 %v471_v38 }
  0x4b   : > { %469 = vadd.xlane.f32.xlu0 %v468_v40 }
  0x4e   : > { %430 = vadd.xlane.f32.xlu1 %v429_v46 }
  0x4f   : > { %427 = vadd.xlane.f32.xlu0 %v426_v50 }
  0x52   : > { %478 = vadd.xlane.f32.xlu1 %v477_v52 }
  0x53   : > { %475 = vadd.xlane.f32.xlu0 %v474_v53 }
  0xa3   : > { %v434_v57 = vpop.xlane.xlu1 %433 }
  0xa4   : > { %v386_v58 = vpop.xlane.xlu0 %385  ;;  %v503_v59 = vadd.f32 %v1825_v56, %v434_v57 }
  0xa5   : > { %v487_v62 = vadd.f32 %v1825_v56, %v386_v58 }
  0xa6   : > { %v1336_v63 = vmul.f32 -1.442695, %v503_v59 }
  0xa7   : > { %v1320_v0 = vmul.f32 -1.442695, %v487_v62  ;;  %v437_v5 = vpop.xlane.xlu1 %436 }
  0xa8   : > { %v389_v1 = vpop.xlane.xlu0 %388  ;;  %v504_v9 = vadd.f32 %v1825_v56, %v437_v5 }
  0xa9   : > { %v488_v12 = vadd.f32 %v1825_v56, %v389_v1  ;;  %1437 = vpow2.f32 %v1320_v0 }
  0xaa   : > { %1439 = vpow2.f32 %v1336_v63  ;;  %v1337_v14 = vmul.f32 -1.442695, %v504_v9 }
  0xab   : > { %v1321_v15 = vmul.f32 -1.442695, %v488_v12  ;;  %v395_v17 = vpop.xlane.xlu1 %394 }
  0xac   : > { %v392_v20 = vpop.xlane.xlu0 %391  ;;  %v490_v21 = vadd.f32 %v1825_v56, %v395_v17 }
  0xad   : > { %v489_v22 = vadd.f32 %v1825_v56, %v392_v20  ;;  %1441 = vpow2.f32 %v1321_v15 }
  0xae   : > { %1443 = vpow2.f32 %v1337_v14  ;;  %v1323_v27 = vmul.f32 -1.442695, %v490_v21 }
  0xaf   : > { %v1322_v28 = vmul.f32 -1.442695, %v489_v22  ;;  %v443_v29 = vpop.xlane.xlu1 %442 }
  0xb0   : > { %v440_v32 = vpop.xlane.xlu0 %439  ;;  %1445 = vpow2.f32 %v1323_v27  ;;  %v506_v51 = vadd.f32 %v1825_v56, %v443_v29 }
  0xb1   : > { %v505_v33 = vadd.f32 %v1825_v56, %v440_v32  ;;  %1447 = vpow2.f32 %v1322_v28 }
  0xb2   : > { %v1339_v1 = vmul.f32 -1.442695, %v506_v51 }
  0xb3   : > { %v1438_v38 = vpop.eup %1437  ;;  %v401_v39 = vpop.xlane.xlu1 %400  ;;  %v1338_v50 = vmul.f32 -1.442695, %v505_v33 }
  0xb4   : > { %v398_v40 = vpop.xlane.xlu0 %397  ;;  %v1440_v41 = vpop.eup %1439  ;;  %v615_v46 = vadd.f32 1.0, %v1438_v38  ;;  %v492_v47 = vadd.f32 %v1825_v56, %v401_v39 }
  0xb5   : > { %v631_v57 = vadd.f32 1.0, %v1440_v41  ;;  %v491_v5 = vadd.f32 %v1825_v56, %v398_v40 }
  0xb6   : > { %1449 = vrcp.f32 %v615_v46  ;;  %v1325_v52 = vmul.f32 -1.442695, %v492_v47 }
  0xb7   : > { %v1442_v53 = vpop.eup %1441  ;;  %v449_v58 = vpop.xlane.xlu1 %448  ;;  %v1324_v27 = vmul.f32 -1.442695, %v491_v5 }
  0xb8   : > { %v446_v59 = vpop.xlane.xlu0 %445  ;;  %v1444_v62 = vpop.eup %1443  ;;  %v616_v63 = vadd.f32 1.0, %v1442_v53  ;;  %1451 = vpow2.f32 %v1325_v52  ;;  %v508_v0 = vadd.f32 %v1825_v56, %v449_v58 }
  0xb9   : > { %1453 = vpow2.f32 %v1338_v50  ;;  %v632_v14 = vadd.f32 1.0, %v1444_v62  ;;  %v507_v22 = vadd.f32 %v1825_v56, %v446_v59 }
  0xba   : > { %1455 = vrcp.f32 %v616_v63  ;;  %v1341_v9 = vmul.f32 -1.442695, %v508_v0  ;;  %v1446_v12 = vpop.eup %1445 }
  0xbb   : > { %1457 = vrcp.f32 %v631_v57  ;;  %v407_v15 = vpop.xlane.xlu1 %406  ;;  %v1448_v20 = vpop.eup %1447  ;;  %v618_v28 = vadd.f32 1.0, %v1446_v12  ;;  %v1340_v46 = vmul.f32 -1.442695, %v507_v22 }
  0xbc   : > { %v404_v17 = vpop.xlane.xlu0 %403  ;;  %1459 = vpow2.f32 %v1341_v9  ;;  %v494_v21 = vadd.f32 %v1825_v56, %v407_v15  ;;  %v617_v32 = vadd.f32 1.0, %v1448_v20 }
  0xbd   : > { %1461 = vpow2.f32 %v1339_v1  ;;  %v493_v38 = vadd.f32 %v1825_v56, %v404_v17 }
  0xbe   : > { %v1327_v29 = vmul.f32 -1.442695, %v494_v21  ;;  %1463 = vrcp.f32 %v632_v14 }
  0xbf   : > { %v455_v33 = vpop.xlane.xlu1 %454  ;;  %v1326_v57 = vmul.f32 -1.442695, %v493_v38 }
  0xc0   : > { %v452_v39 = vpop.xlane.xlu0 %451  ;;  %v1450_v40 = vpop.eup %1449  ;;  %1465 = vpow2.f32 %v1327_v29  ;;  %v510_v41 = vadd.f32 %v1825_v56, %v455_v33 }
  0xc1   : > { %713 = vperm.xlu0 %1434, %v1450_v40   ;;  %1467 = vpow2.f32 %v1324_v27  ;;  %v509_v58 = vadd.f32 %v1825_v56, %v452_v39 }
  0xc2   : > { %v1452_v47 = vpop.eup %1451  ;;  %1469 = vrcp.f32 %v618_v28  ;;  %v1343_v50 = vmul.f32 -1.442695, %v510_v41 }
  0xc3   : > { %v1454_v51 = vpop.eup %1453  ;;  %v620_v52 = vadd.f32 1.0, %v1452_v47  ;;  %1471 = vrcp.f32 %v617_v32  ;;  %v413_v53 = vpop.xlane.xlu1 %412  ;;  %v1342_v15 = vmul.f32 -1.442695, %v509_v58 }
  0xc4   : > { %v410_v59 = vpop.xlane.xlu0 %409  ;;  %v1456_v62 = vpop.eup %1455  ;;  %v496_v63 = vadd.f32 %v1825_v56, %v413_v53  ;;  %1473 = vpow2.f32 %v1340_v46  ;;  %v633_v1 = vadd.f32 1.0, %v1454_v51 }
  0xc5   : > { %v1458_v0 = vpop.eup %1457  ;;  %1475 = vrcp.f32 %v620_v52  ;;  %718 = vperm.xlu1 %1435, %v1456_v62   ;;  %v495_v27 = vadd.f32 %v1825_v56, %v410_v59 }
  0xc6   : > { %v1460_v5 = vpop.eup %1459  ;;  %1477 = vpow2.f32 %v1343_v50  ;;  %v1329_v9 = vmul.f32 -1.442695, %v496_v63 }
  0xc7   : > { %v636_v12 = vadd.f32 1.0, %v1460_v5  ;;  %v461_v14 = vpop.xlane.xlu1 %460  ;;  %1479 = vpow2.f32 %v1326_v57  ;;  %v1462_v20 = vpop.eup %1461  ;;  %v1328_v50 = vmul.f32 -1.442695, %v495_v27 }
  0xc8   : > { %v458_v17 = vpop.xlane.xlu0 %457  ;;  %1481 = vpow2.f32 %v1329_v9  ;;  %v512_v21 = vadd.f32 %v1825_v56, %v461_v14  ;;  %v1464_v22 = vpop.eup %1463  ;;  %v634_v33 = vadd.f32 1.0, %v1462_v20 }
  0xc9   : > { %1483 = vrcp.f32 %v636_v12  ;;  %793 = vperm.xlu1 %1435, %v1458_v0   ;;  %v511_v59 = vadd.f32 %v1825_v56, %v458_v17 }
  0xca   : > { %v1466_v28 = vpop.eup %1465  ;;  %1485 = vrcp.f32 %v633_v1  ;;  %v1345_v29 = vmul.f32 -1.442695, %v512_v21 }
  0xcb   : > { %v1468_v32 = vpop.eup %1467  ;;  %v622_v38 = vadd.f32 1.0, %v1466_v28  ;;  %v419_v39 = vpop.xlane.xlu1 %418  ;;  %1487 = vpow2.f32 %v1342_v15 }
  0xcc   : > { %v416_v40 = vpop.xlane.xlu0 %415  ;;  %v1470_v41 = vpop.eup %1469  ;;  %1489 = vpow2.f32 %v1345_v29  ;;  %v498_v46 = vadd.f32 %v1825_v56, %v419_v39  ;;  %v619_v52 = vadd.f32 1.0, %v1468_v32 }
  0xcd   : > { %v1472_v47 = vpop.eup %1471  ;;  %1491 = vrcp.f32 %v622_v38  ;;  %798 = vperm.xlu1 %1435, %v1464_v22   ;;  %v1344_v22 = vmul.f32 -1.442695, %v511_v59  ;;  %v497_v17 = vadd.f32 %v1825_v56, %v416_v40 }
  0xce   : > { %v1474_v51 = vpop.eup %1473  ;;  %v1331_v53 = vmul.f32 -1.442695, %v498_v46  ;;  %1493 = vrcp.f32 %v634_v33  ;;  %v1436_v46 = vld [vmem:[%s2062_s4] sm:$0xff]  }
  0xcf   : > { %v1476_v57 = vpop.eup %1475  ;;  %v467_v58 = vpop.xlane.xlu1 %466  ;;  %v635_v12 = vadd.f32 1.0, %v1474_v51  ;;  %v1330_v51 = vmul.f32 -1.442695, %v497_v17  ;;  %1389 = vmatprep.subr.bf16.mxu0 %v1436_v46  ;;  %1423 = vmatprep.subr.bf16.mxu1 %v1436_v46 }
  0xd0   : > { %v464_v62 = vpop.xlane.xlu0 %463  ;;  %v1478_v63 = vpop.eup %1477  ;;  %1495 = vpow2.f32 %v1331_v53  ;;  %v514_v0 = vadd.f32 %v1825_v56, %v467_v58  ;;  %738 = vperm.xlu0 %1434, %v1476_v57   ;;  %1390 = vmatpush3.bf16.msra.mxu0 %v1436_v46 }
  0xd1   : > { %v1480_v5 = vpop.eup %1479  ;;  %v638_v1 = vadd.f32 1.0, %v1478_v63  ;;  %723 = vperm.xlu1 %1435, %v1472_v47   ;;  %1497 = vpow2.f32 %v1328_v50  ;;  %1424 = vmatpush3.bf16.msra.mxu1 %v1436_v46 }
  0xd2   : > { %v1482_v9 = vpop.eup %1481  ;;  %1499 = vrcp.f32 %v619_v52  ;;  %v1347_v14 = vmul.f32 -1.442695, %v514_v0  ;;  %v621_v38 = vadd.f32 1.0, %v1480_v5  ;;  %v513_v52 = vadd.f32 %v1825_v56, %v464_v62 }
  0xd3   : > { %v1484_v15 = vpop.eup %1483  ;;  %1501 = vrcp.f32 %v638_v1  ;;  %v624_v20 = vadd.f32 1.0, %v1482_v9  ;;  %v425_v21 = vpop.xlane.xlu1 %424 }
  0xd4   : > { %v422_v27 = vpop.xlane.xlu0 %421  ;;  %v1486_v28 = vpop.eup %1485  ;;  %1503 = vpow2.f32 %v1347_v14  ;;  %v500_v29 = vadd.f32 %v1825_v56, %v425_v21  ;;  %818 = vperm.xlu0 %1434, %v1484_v15   ;;  %v1346_v62 = vmul.f32 -1.442695, %v513_v52 }
  0xd5   : > { %v1488_v32 = vpop.eup %1487  ;;  %1505 = vrcp.f32 %v624_v20  ;;  %728 = vperm.xlu1 %1435, %v1470_v41   ;;  %v499_v9 = vadd.f32 %v1825_v56, %v422_v27 }
  0xd6   : > { %v1490_v33 = vpop.eup %1489  ;;  %1507 = vrcp.f32 %v635_v12  ;;  %v1333_v39 = vmul.f32 -1.442695, %v500_v29  ;;  %v637_v59 = vadd.f32 1.0, %v1488_v32 }
  0xd7   : > { %v1492_v47 = vpop.eup %1491  ;;  %v640_v50 = vadd.f32 1.0, %v1490_v33  ;;  %v473_v40 = vpop.xlane.xlu1 %472  ;;  %1509 = vpow2.f32 %v1344_v22  ;;  %v1332_v33 = vmul.f32 -1.442695, %v499_v9 }
  0xd8   : > { %1511 = vpow2.f32 %v1333_v39  ;;  %v516_v53 = vadd.f32 %v1825_v56, %v473_v40  ;;  %748 = vperm.xlu0 %1434, %v1492_v47   ;;  %v470_v41 = vpop.xlane.xlu0 %469  ;;  %v1494_v57 = vpop.eup %1493 }
  0xd9   : > { %1513 = vrcp.f32 %v640_v50  ;;  %803 = vperm.xlu1 %1435, %v1486_v28   ;;  %v515_v27 = vadd.f32 %v1825_v56, %v470_v41 }
  0xda   : > { %v1496_v58 = vpop.eup %1495  ;;  %1515 = vrcp.f32 %v621_v38  ;;  %v1349_v63 = vmul.f32 -1.442695, %v516_v53 }
  0xdb   : > { %v1498_v0 = vpop.eup %1497  ;;  %v626_v5 = vadd.f32 1.0, %v1496_v58  ;;  %v431_v1 = vpop.xlane.xlu1 %430  ;;  %1517 = vpow2.f32 %v1330_v51  ;;  %v1348_v52 = vmul.f32 -1.442695, %v515_v27 }
  0xdc   : > { %v1500_v12 = vpop.eup %1499  ;;  %1519 = vpow2.f32 %v1349_v63  ;;  %v502_v14 = vadd.f32 %v1825_v56, %v431_v1  ;;  %v623_v21 = vadd.f32 1.0, %v1498_v0  ;;  %v428_v17 = vpop.xlane.xlu0 %427 }
  0xdd   : > { %v1502_v15 = vpop.eup %1501  ;;  %1521 = vrcp.f32 %v626_v5  ;;  %808 = vperm.xlu1 %1435, %v1494_v57   ;;  %v501_v53 = vadd.f32 %v1825_v56, %v428_v17 }
  0xde   : > { %v1504_v20 = vpop.eup %1503  ;;  %1523 = vrcp.f32 %v637_v59  ;;  %v1335_v22 = vmul.f32 -1.442695, %v502_v14  ;;  %828 = vperm.xlu0 %1434, %v1502_v15  }
  0xdf   : > { %v1506_v28 = vpop.eup %1505  ;;  %v642_v29 = vadd.f32 1.0, %v1504_v20  ;;  %v479_v32 = vpop.xlane.xlu1 %478  ;;  %1525 = vpow2.f32 %v1346_v62  ;;  %v1334_v1 = vmul.f32 -1.442695, %v501_v53 }
  0xe0   : > { %v1508_v38 = vpop.eup %1507  ;;  %1527 = vpow2.f32 %v1335_v22  ;;  %v518_v39 = vadd.f32 %v1825_v56, %v479_v32  ;;  %v476_v41 = vpop.xlane.xlu0 %475 }
  0xe1   : > { %v1510_v46 = vpop.eup %1509  ;;  %1529 = vrcp.f32 %v642_v29  ;;  %733 = vperm.xlu1 %1435, %v1500_v12   ;;  %v517_v62 = vadd.f32 %v1825_v56, %v476_v41 }
  0xe2   : > { %v1512_v47 = vpop.eup %1511  ;;  %1531 = vrcp.f32 %v623_v21  ;;  %v1351_v50 = vmul.f32 -1.442695, %v518_v39  ;;  %758 = vperm.xlu0 %1434, %v1506_v28   ;;  %v639_v58 = vadd.f32 1.0, %v1510_v46 }
  0xe3   : > { %v1514_v40 = vpop.eup %1513  ;;  %v628_v51 = vadd.f32 1.0, %v1512_v47  ;;  %1533 = vpow2.f32 %v1332_v33  ;;  %v1350_v22 = vmul.f32 -1.442695, %v517_v62  ;;  %v280_v62 = vld [vmem:[%s1866_s11] sm:$0xff] }
  0xe4   : > { %v1516_v57 = vpop.eup %1515  ;;  %1535 = vpow2.f32 %v1351_v50 }
  0xe5   : > { %v1518_v59 = vpop.eup %1517  ;;  %1537 = vrcp.f32 %v628_v51  ;;  %813 = vperm.xlu1 %1435, %v1508_v38  }
  0xe6   : > { %v1520_v63 = vpop.eup %1519  ;;  %838 = vperm.xlu0 %1434, %v1514_v40   ;;  %1539 = vpow2.f32 %v1348_v52  ;;  %v625_v12 = vadd.f32 1.0, %v1518_v59 }
  0xe7   : > { %v1522_v0 = vpop.eup %1521  ;;  %v644_v5 = vadd.f32 1.0, %v1520_v63  ;;  %1541 = vrcp.f32 %v639_v58 }
  0xe8   : > { %v1524_v9 = vpop.eup %1523 }
  0xe9   : > { %v1526_v14 = vpop.eup %1525  ;;  %1543 = vrcp.f32 %v644_v5  ;;  %743 = vperm.xlu1 %1435, %v1516_v57  }
  0xea   : > { %v1528_v15 = vpop.eup %1527  ;;  %768 = vperm.xlu0 %1434, %v1522_v0   ;;  %1545 = vpow2.f32 %v1334_v1  ;;  %v641_v28 = vadd.f32 1.0, %v1526_v14 }
  0xeb   : > { %v1530_v20 = vpop.eup %1529  ;;  %v630_v21 = vadd.f32 1.0, %v1528_v15  ;;  %1547 = vrcp.f32 %v625_v12 }
  0xec   : > { %v1532_v17 = vpop.eup %1531 }
  0xed   : > { %v1534_v29 = vpop.eup %1533  ;;  %1549 = vrcp.f32 %v630_v21  ;;  %823 = vperm.xlu1 %1435, %v1524_v9   ;;  %v281_v9 = vld [vmem:[%s1866_s11 + $0x8] sm:$0xff] }
  0xee   : > { %v1536_v32 = vpop.eup %1535  ;;  %848 = vperm.xlu0 %1434, %v1530_v20   ;;  %1551 = vpow2.f32 %v1350_v22  ;;  %v627_v27 = vadd.f32 1.0, %v1534_v29  ;;  %v297_v29 = vld [vmem:[%s1866_s11 + $0x88] sm:$0xff] }
  0xef   : > { %v1538_v56 = vpop.eup %1537  ;;  %v646_v33 = vadd.f32 1.0, %v1536_v32  ;;  %1553 = vrcp.f32 %v641_v28 }
  0xf0   : > { %v1540_v38 = vpop.eup %1539 }
  0xf1   : > { %1555 = vrcp.f32 %v646_v33  ;;  %753 = vperm.xlu1 %1435, %v1532_v17   ;;  %v1542_v39 = vpop.eup %1541  ;;  %v643_v47 = vadd.f32 1.0, %v1540_v38  ;;  %v296_v17 = vld [vmem:[%s1866_s11 + $0x80] sm:$0xff] }
  0xf2   : > { %778 = vperm.xlu0 %1434, %v1538_v56   ;;  %1557 = vrcp.f32 %v627_v27 }
  0xf3   : > { %v1544_v46 = vpop.eup %1543  ;;  %1559 = vrcp.f32 %v643_v47 }
  0xf4   : > { %v1546_v50 = vpop.eup %1545 }
  0xf5   : > { %833 = vperm.xlu1 %1435, %v1542_v39   ;;  %v1548_v40 = vpop.eup %1547  ;;  %v629_v52 = vadd.f32 1.0, %v1546_v50 }
  0xf6   : > { %858 = vperm.xlu0 %1434, %v1544_v46   ;;  %v282_v46 = vld [vmem:[%s1866_s11 + $0x10] sm:$0xff] }
  0xf7   : > { %v1550_v51 = vpop.eup %1549  ;;  %1561 = vrcp.f32 %v629_v52 }
  0xf8   : > { %v1552_v53 = vpop.eup %1551 }
  0xf9   : > { %763 = vperm.xlu1 %1435, %v1548_v40   ;;  %v1554_v57 = vpop.eup %1553  ;;  %v645_v41 = vadd.f32 1.0, %v1552_v53 }
  0xfa   : > { %788 = vperm.xlu0 %1434, %v1550_v51  }
  0xfb   : > { %v1556_v58 = vpop.eup %1555  ;;  %1563 = vrcp.f32 %v645_v41 }
  0xfc   : > { %v1558_v59 = vpop.eup %1557 }
  0xfd   : > { %843 = vperm.xlu1 %1435, %v1554_v57   ;;  %v1560_v63 = vpop.eup %1559 }
  0xfe   : > { %868 = vperm.xlu0 %1434, %v1556_v58   ;;  %v298_v58 = vld [vmem:[%s1866_s11 + $0x90] sm:$0xff] }
 0x101   : > { %773 = vperm.xlu1 %1435, %v1558_v59   ;;  %v1562_v0 = vpop.eup %1561  ;;  %v299_v59 = vld [vmem:[%s1866_s11 + $0x98] sm:$0xff] }
 0x105   : > { %853 = vperm.xlu1 %1435, %v1560_v63   ;;  %v1564_v5 = vpop.eup %1563 }
 0x109   : > { %783 = vperm.xlu1 %1435, %v1562_v0   ;;  %v285_v0 = vld [vmem:[%s1866_s11 + $0x28] sm:$0xff] }
 0x10d   : > { %863 = vperm.xlu1 %1435, %v1564_v5  }
 0x140   : > { %v714_v1 = vpop.permute.xlu0 %713 }
 0x141   : > { %v871_v12 = vmul.f32 %v714_v1, %v280_v62 }
 0x143   : > { %v903_v20 = vadd.f32 %v871_v12, %v1637_v3 }
 0x144   : > { %v719_v14 = vpop.permute.xlu1 %718 }
 0x145   : > { %v872_v15 = vmul.f32 %v719_v14, %v281_v9  ;;  %v284_v9 = vld [vmem:[%s1866_s11 + $0x20] sm:$0xff]  ;;  %v301_v14 = vld [vmem:[%s1866_s11 + $0xa8] sm:$0xff] }
 0x147   : > { %v904_v21 = vadd.f32 %v872_v15, %v1649_v8  ;;  %v283_v8 = vld [vmem:[%s1866_s11 + $0x18] sm:$0xff] }
 0x148   : > { %v794_v22 = vpop.permute.xlu1 %793 }
 0x149   : > { %v935_v28 = vpack.c.bf16 %v904_v21, %v903_v20  ;;  %v887_v32 = vmul.f32 %v794_v22, %v296_v17  ;;  %v300_v17 = vld [vmem:[%s1866_s11 + $0xa0] sm:$0xff] }
 0x14b   : > { %1391 = vmatprep.mubr.msk.bf16.mxu0 %vm383_vm0, %v935_v28  ;;  %v919_v27 = vadd.f32 %v887_v32, %v1634_v2 }
 0x14c   : > { %v799_v56 = vpop.permute.xlu1 %798 }
 0x14d   : > { %v888_v33 = vmul.f32 %v799_v56, %v297_v29  ;;  %v287_v56 = vld [vmem:[%s1866_s11 + $0x38] sm:$0xff] }
 0x14f   : > { %v920_v38 = vadd.f32 %v888_v33, %v1640_v4  ;;  %v739_v39 = vpop.permute.xlu0 %738 }
 0x150   : > { %v724_v3 = vpop.permute.xlu1 %723  ;;  %v876_v12 = vmul.f32 %v739_v39, %v285_v0 }
 0x151   : > { %v943_v47 = vpack.c.bf16 %v920_v38, %v919_v27  ;;  %v873_v50 = vmul.f32 %v724_v3, %v282_v46  ;;  %v286_v38 = vld [vmem:[%s1866_s11 + $0x30] sm:$0xff] }
 0x152   : > { %v908_v28 = vadd.f32 %v876_v12, %v1680_v24  ;;  %v303_v24 = vld [vmem:[%s1866_s11 + $0xb8] sm:$0xff] }
 0x153   : > { %1407 = vmatprep.mubr.msk.bf16.mxu1 %vm383_vm0, %v943_v47  ;;  %v819_v40 = vpop.permute.xlu0 %818  ;;  %v905_v53 = vadd.f32 %v873_v50, %v1657_v11 }
 0x154   : > { %v729_v51 = vpop.permute.xlu1 %728  ;;  %v892_v29 = vmul.f32 %v819_v40, %v301_v14  ;;  %v302_v40 = vld [vmem:[%s1866_s11 + $0xb0] sm:$0xff] }
 0x155   : > { %v874_v52 = vmul.f32 %v729_v51, %v283_v8 }
 0x156   : > { %v924_v39 = vadd.f32 %v892_v29, %v1692_v30  ;;  %v289_v30 = vld [vmem:[%s1866_s11 + $0x48] sm:$0xff]  ;;  %v306_v29 = vld [vmem:[%s1866_s11 + $0xd0] sm:$0xff] }
 0x157   : > { %v906_v2 = vadd.f32 %v874_v52, %v1654_v10  ;;  %v749_v4 = vpop.permute.xlu0 %748 }
 0x158   : > { %v804_v57 = vpop.permute.xlu1 %803  ;;  %v878_v3 = vmul.f32 %v749_v4, %v287_v56 }
 0x159   : > { %v936_v41 = vpack.c.bf16 %v906_v2, %v905_v53  ;;  %v889_v63 = vmul.f32 %v804_v57, %v298_v58  ;;  %v288_v57 = vld [vmem:[%s1866_s11 + $0x40] sm:$0xff] }
 0x15a   : > { %v910_v51 = vadd.f32 %v878_v3, %v1704_v36  ;;  %v305_v36 = vld [vmem:[%s1866_s11 + $0xc8] sm:$0xff] }
 0x15b   : > { %1392 = vmatmul.mubr.msk.bf16.vlgmr.msra.gmra.mrb[0].mxu0 %vm383_vm0, %v936_v41  ;;  %v921_v11 = vadd.f32 %v889_v63, %v1671_v19 }
 0x15c   : > { %v809_v5 = vpop.permute.xlu1 %808 }
 0x15d   : > { %v890_v1 = vmul.f32 %v809_v5, %v299_v59  ;;  %v829_v62 = vpop.permute.xlu0 %828 }
 0x15e   : > { %v894_v52 = vmul.f32 %v829_v62, %v303_v24 }
 0x15f   : > { %v922_v10 = vadd.f32 %v890_v1, %v1668_v18  ;;  %v304_v1 = vld [vmem:[%s1866_s11 + $0xc0] sm:$0xff] }
 0x160   : > { %v734_v15 = vpop.permute.xlu1 %733  ;;  %v926_v58 = vadd.f32 %v894_v52, %v1716_v42  ;;  %v291_v42 = vld [vmem:[%s1866_s11 + $0x58] sm:$0xff] }
 0x161   : > { %v944_v20 = vpack.c.bf16 %v922_v10, %v921_v11  ;;  %v875_v21 = vmul.f32 %v734_v15, %v284_v9  ;;  %v759_v22 = vpop.permute.xlu0 %758  ;;  %v290_v15 = vld [vmem:[%s1866_s11 + $0x50] sm:$0xff] }
 0x162   : > { %v880_v41 = vmul.f32 %v759_v22, %v289_v30  ;;  %v294_v30 = vld [vmem:[%s1866_s11 + $0x70] sm:$0xff] }
 0x163   : > { %v907_v32 = vadd.f32 %v875_v21, %v1683_v25  ;;  %1408 = vmatmul.mubr.msk.bf16.vlgmr.msra.gmra.mrb[0].mxu1 %vm383_vm0, %v944_v20 }
 0x164   : > { %v814_v19 = vpop.permute.xlu1 %813  ;;  %v912_v62 = vadd.f32 %v880_v41, %v1728_v48  ;;  %v307_v48 = vld [vmem:[%s1866_s11 + $0xd8] sm:$0xff] }
 0x165   : > { %v937_v33 = vpack.c.bf16 %v908_v28, %v907_v32  ;;  %v891_v18 = vmul.f32 %v814_v19, %v300_v17  ;;  %v839_v27 = vpop.permute.xlu0 %838 }
 0x166   : > { %v896_v9 = vmul.f32 %v839_v27, %v305_v36 }
 0x167   : > { %v923_v46 = vadd.f32 %v891_v18, %v1695_v31  ;;  %1395 = vmatprep.mubr.msk.bf16.mxu0 %vm383_vm0, %v937_v33 }
 0x168   : > { %v744_v25 = vpop.permute.xlu1 %743  ;;  %v928_v20 = vadd.f32 %v896_v9, %v1740_v54  ;;  %v293_v54 = vld [vmem:[%s1866_s11 + $0x68] sm:$0xff] }
 0x169   : > { %v945_v47 = vpack.c.bf16 %v924_v39, %v923_v46  ;;  %v877_v8 = vmul.f32 %v744_v25, %v286_v38  ;;  %v769_v50 = vpop.permute.xlu0 %768  ;;  %v292_v38 = vld [vmem:[%s1866_s11 + $0x60] sm:$0xff] }
 0x16a   : > { %v882_v21 = vmul.f32 %v769_v50, %v291_v42 }
 0x16b   : > { %v909_v53 = vadd.f32 %v877_v8, %v1707_v37  ;;  %1411 = vmatprep.mubr.msk.bf16.mxu1 %vm383_vm0, %v945_v47  ;;  %v308_v8 = vld [vmem:[%s1866_s11 + $0xe0] sm:$0xff] }
 0x16c   : > { %v824_v31 = vpop.permute.xlu1 %823  ;;  %v914_v32 = vadd.f32 %v882_v21, %v1752_v60  ;;  %v309_v60 = vld [vmem:[%s1866_s11 + $0xe8] sm:$0xff] }
 0x16d   : > { %v938_v2 = vpack.c.bf16 %v910_v51, %v909_v53  ;;  %v893_v4 = vmul.f32 %v824_v31, %v302_v40  ;;  %v849_v63 = vpop.permute.xlu0 %848 }
 0x16e   : > { %v898_v56 = vmul.f32 %v849_v63, %v307_v48 }
 0x16f   : > { %v925_v59 = vadd.f32 %v893_v4, %v1719_v43  ;;  %1396 = vmatmul.mubr.msk.bf16.gmra.mrb[4].mxu0 %vm383_vm0, %v938_v2 }
 0x170   : > { %v754_v37 = vpop.permute.xlu1 %753  ;;  %v930_v39 = vadd.f32 %v898_v56, %v1764_v6  ;;  %v295_v6 = vld [vmem:[%s1866_s11 + $0x78] sm:$0xff] }
 0x171   : > { %v946_v0 = vpack.c.bf16 %v926_v58, %v925_v59  ;;  %v879_v5 = vmul.f32 %v754_v37, %v288_v57  ;;  %v779_v14 = vpop.permute.xlu0 %778  ;;  %v310_v59 = vld [vmem:[%s1866_s11 + $0xf0] sm:$0xff] }
 0x172   : > { %v884_v3 = vmul.f32 %v779_v14, %v293_v54 }
 0x173   : > { %v911_v12 = vadd.f32 %v879_v5, %v1731_v49  ;;  %1412 = vmatmul.mubr.msk.bf16.gmra.mrb[4].mxu1 %vm383_vm0, %v946_v0 }
 0x174   : > { %v834_v43 = vpop.permute.xlu1 %833  ;;  %v916_v50 = vadd.f32 %v884_v3, %v1773_v13  ;;  %v311_v13 = vld [vmem:[%s1866_s11 + $0xf8] sm:$0xff] }
 0x175   : > { %v939_v11 = vpack.c.bf16 %v912_v62, %v911_v12  ;;  %v895_v10 = vmul.f32 %v834_v43, %v304_v1  ;;  %v859_v33 = vpop.permute.xlu0 %858 }
 0x176   : > { %v900_v40 = vmul.f32 %v859_v33, %v309_v60 }
 0x177   : > { %v927_v22 = vadd.f32 %v895_v10, %v1743_v55  ;;  %1399 = vmatprep.mubr.msk.bf16.mxu0 %vm383_vm0, %v939_v11 }
 0x178   : > { %v764_v49 = vpop.permute.xlu1 %763  ;;  %v932_v31 = vadd.f32 %v900_v40, %v1788_v23 }
 0x179   : > { %v947_v17 = vpack.c.bf16 %v928_v20, %v927_v22  ;;  %v881_v28 = vmul.f32 %v764_v49, %v290_v15  ;;  %v789_v47 = vpop.permute.xlu0 %788 }
 0x17a   : > { %v886_v2 = vmul.f32 %v789_v47, %v295_v6 }
 0x17b   : > { %v913_v19 = vadd.f32 %v881_v28, %v1755_v61  ;;  %1415 = vmatprep.mubr.msk.bf16.mxu1 %vm383_vm0, %v947_v17 }
 0x17c   : > { %v844_v55 = vpop.permute.xlu1 %843  ;;  %v918_v36 = vadd.f32 %v886_v2, %v1800_v34  ;;  %v1951_v34 = vld [vmem:[%s2063_s5] ss:$0 sm:$0xff] }
 0x17d   : > { %v940_v18 = vpack.c.bf16 %v914_v32, %v913_v19  ;;  %v897_v27 = vmul.f32 %v844_v55, %v306_v29  ;;  %v869_v57 = vpop.permute.xlu0 %868 }
 0x17e   : > { %v902_v63 = vmul.f32 %v869_v57, %v311_v13 }
 0x17f   : > { %v929_v46 = vadd.f32 %v897_v27, %v1767_v7  ;;  %1400 = vmatmul.mubr.msk.bf16.gmra.mrb[8].mxu0 %vm383_vm0, %v940_v18 }
 0x180   : > { %v774_v61 = vpop.permute.xlu1 %773 }
 0x181   : > { %v948_v24 = vpack.c.bf16 %v930_v39, %v929_v46  ;;  %v883_v25 = vmul.f32 %v774_v61, %v292_v38 }
 0x183   : > { %v915_v51 = vadd.f32 %v883_v25, %v1779_v16  ;;  %1416 = vmatmul.mubr.msk.bf16.gmra.mrb[8].mxu1 %vm383_vm0, %v948_v24 }
 0x184   : > { %v854_v7 = vpop.permute.xlu1 %853 }
 0x185   : > { %v941_v52 = vpack.c.bf16 %v916_v50, %v915_v51  ;;  %v899_v53 = vmul.f32 %v854_v7, %v308_v8 }
 0x187   : > { %v931_v4 = vadd.f32 %v899_v53, %v1791_v26  ;;  %1403 = vmatprep.mubr.msk.bf16.mxu0 %vm383_vm0, %v941_v52  ;;  %v934_v26 = vadd.f32 %v902_v63, %v1812_v44 }
 0x188   : > { %v784_v58 = vpop.permute.xlu1 %783 }
 0x189   : > { %v949_v41 = vpack.c.bf16 %v932_v31, %v931_v4  ;;  %v885_v16 = vmul.f32 %v784_v58, %v294_v30 }
 0x18b   : > { %v917_v37 = vadd.f32 %v885_v16, %v1803_v35  ;;  %1419 = vmatprep.mubr.msk.bf16.mxu1 %vm383_vm0, %v949_v41 }
 0x18c   : > { %v864_v23 = vpop.permute.xlu1 %863 }
 0x18d   : > { %v942_v0 = vpack.c.bf16 %v918_v36, %v917_v37  ;;  %v901_v5 = vmul.f32 %v864_v23, %v310_v59 }
 0x18f   : > { %v933_v1 = vadd.f32 %v901_v5, %v1815_v45  ;;  %1404 = vmatmul.mubr.msk.bf16.gmra.mrb[12].mxu0 %vm383_vm0, %v942_v0 }
 0x191   : > { %v950_v62 = vpack.c.bf16 %v934_v26, %v933_v1 }
 0x193   : > { %1420 = vmatmul.mubr.msk.bf16.gmra.mrb[12].mxu1 %vm383_vm0, %v950_v62 }
 0x22e   : > { %v1393_v35 = vpop.f32.mrb[0].mxu0 }
 0x22f   : > { %v1057_v9 = vadd.f32 %v1393_v35, %v1951_v34  ;;  %v1048_v12 = vpop.f32.mrb[1].mxu0 }
 0x230   : > { %v1049_v44 = vadd.f32 %v1951_v34, %v1048_v12  ;;  %v1394_v45 = vpop.f32.mrb[2].mxu0 }
 0x231   : > { %v1177_v42 = vmax.f32 %v1057_v9, 0.0  ;;  %v1060_v43 = vadd.f32 %v1394_v45, %v1951_v34  ;;  %v1051_v11 = vpop.f32.mrb[3].mxu0 }
 0x232   : > { %v1175_v10 = vmax.f32 %v1049_v44, 0.0  ;;  %v1052_v14 = vadd.f32 %v1951_v34, %v1051_v11 }
 0x233   : > { %1209 = vst.msk [vmem:[%s1958_s16 + $0x10] sm:$0xff] %vm383_vm0, %v1177_v42  ;;  %v1178_v15 = vmax.f32 %v1060_v43, 0.0 }
 0x234   : > { %1207 = vst.msk [vmem:[%s1958_s16] sm:$0xff] %vm383_vm0, %v1175_v10  ;;  %v1176_v20 = vmax.f32 %v1052_v14, 0.0 }
 0x235   : > { %1210 = vst.msk [vmem:[%s1958_s16 + $0x18] sm:$0xff] %vm383_vm0, %v1178_v15 }
 0x236   : > { %1208 = vst.msk [vmem:[%s1958_s16 + $0x8] sm:$0xff] %vm383_vm0, %v1176_v20  ;;  %v1409_v21 = vpop.f32.mrb[0].mxu1 }
 0x237   : > { %v1121_v22 = vadd.f32 %v1409_v21, %v1951_v34  ;;  %v1112_v48 = vpop.f32.mrb[1].mxu1 }
 0x238   : > { %v1113_v49 = vadd.f32 %v1951_v34, %v1112_v48  ;;  %v1410_v17 = vpop.f32.mrb[2].mxu1 }
 0x239   : > { %v1193_v28 = vmax.f32 %v1121_v22, 0.0  ;;  %v1124_v29 = vadd.f32 %v1410_v17, %v1951_v34  ;;  %v1115_v32 = vpop.f32.mrb[3].mxu1 }
 0x23a   : > { %v1191_v56 = vmax.f32 %v1113_v49, 0.0  ;;  %v1116_v19 = vadd.f32 %v1951_v34, %v1115_v32 }
 0x23b   : > { %1225 = vst.msk [vmem:[%s1958_s16 + $0x90] sm:$0xff] %vm383_vm0, %v1193_v28  ;;  %v1194_v54 = vmax.f32 %v1124_v29, 0.0 }
 0x23c   : > { %1223 = vst.msk [vmem:[%s1958_s16 + $0x80] sm:$0xff] %vm383_vm0, %v1191_v56  ;;  %v1192_v33 = vmax.f32 %v1116_v19, 0.0 }
 0x23d   : > { %1226 = vst.msk [vmem:[%s1958_s16 + $0x98] sm:$0xff] %vm383_vm0, %v1194_v54 }
 0x23e   : > { %1224 = vst.msk [vmem:[%s1958_s16 + $0x88] sm:$0xff] %vm383_vm0, %v1192_v33 }
 0x242   : > { %v1397_v55 = vpop.f32.mrb[4].mxu0 }
 0x243   : > { %v1073_v18 = vadd.f32 %v1397_v55, %v1951_v34  ;;  %v1064_v27 = vpop.f32.mrb[5].mxu0 }
 0x244   : > { %v1065_v38 = vadd.f32 %v1951_v34, %v1064_v27  ;;  %v1398_v39 = vpop.f32.mrb[6].mxu0 }
 0x245   : > { %v1181_v3 = vmax.f32 %v1073_v18, 0.0  ;;  %v1076_v46 = vadd.f32 %v1398_v39, %v1951_v34  ;;  %v1067_v60 = vpop.f32.mrb[7].mxu0 }
 0x246   : > { %v1179_v61 = vmax.f32 %v1065_v38, 0.0  ;;  %v1068_v24 = vadd.f32 %v1951_v34, %v1067_v60  ;;  %v1413_v25 = vpop.f32.mrb[4].mxu1 }
 0x247   : > { %1213 = vst.msk [vmem:[%s1958_s16 + $0x30] sm:$0xff] %vm383_vm0, %v1181_v3  ;;  %v1182_v47 = vmax.f32 %v1076_v46, 0.0  ;;  %v1137_v8 = vadd.f32 %v1413_v25, %v1951_v34  ;;  %v1128_v50 = vpop.f32.mrb[5].mxu1 }
 0x248   : > { %1211 = vst.msk [vmem:[%s1958_s16 + $0x20] sm:$0xff] %vm383_vm0, %v1179_v61  ;;  %v1180_v40 = vmax.f32 %v1068_v24, 0.0  ;;  %v1129_v51 = vadd.f32 %v1951_v34, %v1128_v50  ;;  %v1414_v6 = vpop.f32.mrb[6].mxu1 }
 0x249   : > { %1214 = vst.msk [vmem:[%s1958_s16 + $0x38] sm:$0xff] %vm383_vm0, %v1182_v47  ;;  %v1197_v7 = vmax.f32 %v1137_v8, 0.0  ;;  %v1140_v52 = vadd.f32 %v1414_v6, %v1951_v34  ;;  %v1131_v53 = vpop.f32.mrb[7].mxu1 }
 0x24a   : > { %1212 = vst.msk [vmem:[%s1958_s16 + $0x28] sm:$0xff] %vm383_vm0, %v1180_v40  ;;  %v1195_v30 = vmax.f32 %v1129_v51, 0.0  ;;  %v1132_v31 = vadd.f32 %v1951_v34, %v1131_v53 }
 0x24b   : > { %1229 = vst.msk [vmem:[%s1958_s16 + $0xb0] sm:$0xff] %vm383_vm0, %v1197_v7  ;;  %v1198_v2 = vmax.f32 %v1140_v52, 0.0 }
 0x24c   : > { %1227 = vst.msk [vmem:[%s1958_s16 + $0xa0] sm:$0xff] %vm383_vm0, %v1195_v30  ;;  %v1196_v4 = vmax.f32 %v1132_v31, 0.0 }
 0x24d   : > { %1230 = vst.msk [vmem:[%s1958_s16 + $0xb8] sm:$0xff] %vm383_vm0, %v1198_v2 }
 0x24e   : > { %1228 = vst.msk [vmem:[%s1958_s16 + $0xa8] sm:$0xff] %vm383_vm0, %v1196_v4 }
 0x252   : > { %v1401_v57 = vpop.f32.mrb[8].mxu0 }
 0x253   : > { %v1089_v13 = vadd.f32 %v1401_v57, %v1951_v34  ;;  %v1080_v58 = vpop.f32.mrb[9].mxu0 }
 0x254   : > { %v1081_v41 = vadd.f32 %v1951_v34, %v1080_v58  ;;  %v1402_v16 = vpop.f32.mrb[10].mxu0 }
 0x255   : > { %v1185_v59 = vmax.f32 %v1089_v13, 0.0  ;;  %v1092_v36 = vadd.f32 %v1402_v16, %v1951_v34  ;;  %v1083_v63 = vpop.f32.mrb[11].mxu0 }
 0x256   : > { %v1183_v37 = vmax.f32 %v1081_v41, 0.0  ;;  %v1084_v23 = vadd.f32 %v1951_v34, %v1083_v63  ;;  %v1417_v0 = vpop.f32.mrb[8].mxu1 }
 0x257   : > { %1217 = vst.msk [vmem:[%s1958_s16 + $0x50] sm:$0xff] %vm383_vm0, %v1185_v59  ;;  %v1186_v5 = vmax.f32 %v1092_v36, 0.0  ;;  %v1153_v26 = vadd.f32 %v1417_v0, %v1951_v34  ;;  %v1144_v1 = vpop.f32.mrb[9].mxu1 }
 0x258   : > { %1215 = vst.msk [vmem:[%s1958_s16 + $0x40] sm:$0xff] %vm383_vm0, %v1183_v37  ;;  %v1184_v62 = vmax.f32 %v1084_v23, 0.0  ;;  %v1145_v35 = vadd.f32 %v1951_v34, %v1144_v1  ;;  %v1418_v9 = vpop.f32.mrb[10].mxu1 }
 0x259   : > { %1218 = vst.msk [vmem:[%s1958_s16 + $0x58] sm:$0xff] %vm383_vm0, %v1186_v5  ;;  %v1201_v12 = vmax.f32 %v1153_v26, 0.0  ;;  %v1156_v44 = vadd.f32 %v1418_v9, %v1951_v34  ;;  %v1147_v45 = vpop.f32.mrb[11].mxu1 }
 0x25a   : > { %1216 = vst.msk [vmem:[%s1958_s16 + $0x48] sm:$0xff] %vm383_vm0, %v1184_v62  ;;  %v1199_v42 = vmax.f32 %v1145_v35, 0.0  ;;  %v1148_v43 = vadd.f32 %v1951_v34, %v1147_v45 }
 0x25b   : > { %1233 = vst.msk [vmem:[%s1958_s16 + $0xd0] sm:$0xff] %vm383_vm0, %v1201_v12  ;;  %v1202_v11 = vmax.f32 %v1156_v44, 0.0 }
 0x25c   : > { %1231 = vst.msk [vmem:[%s1958_s16 + $0xc0] sm:$0xff] %vm383_vm0, %v1199_v42  ;;  %v1200_v10 = vmax.f32 %v1148_v43, 0.0 }
 0x25d   : > { %1234 = vst.msk [vmem:[%s1958_s16 + $0xd8] sm:$0xff] %vm383_vm0, %v1202_v11 }
 0x25e   : > { %1232 = vst.msk [vmem:[%s1958_s16 + $0xc8] sm:$0xff] %vm383_vm0, %v1200_v10 }
 0x262   : > { %v1405_v14 = vpop.f32.mrb[12].mxu0 }
 0x263   : > { %v1105_v15 = vadd.f32 %v1405_v14, %v1951_v34  ;;  %v1096_v20 = vpop.f32.mrb[13].mxu0 }
 0x264   : > { %v1097_v21 = vadd.f32 %v1951_v34, %v1096_v20  ;;  %v1406_v22 = vpop.f32.mrb[14].mxu0 }
 0x265   : > { %v1189_v48 = vmax.f32 %v1105_v15, 0.0  ;;  %v1108_v49 = vadd.f32 %v1406_v22, %v1951_v34  ;;  %v1099_v17 = vpop.f32.mrb[15].mxu0 }
 0x266   : > { %v1187_v28 = vmax.f32 %v1097_v21, 0.0  ;;  %v1100_v29 = vadd.f32 %v1951_v34, %v1099_v17  ;;  %v1421_v32 = vpop.f32.mrb[12].mxu1 }
 0x267   : > { %1221 = vst.msk [vmem:[%s1958_s16 + $0x70] sm:$0xff] %vm383_vm0, %v1189_v48  ;;  %v1190_v56 = vmax.f32 %v1108_v49, 0.0  ;;  %v1169_v19 = vadd.f32 %v1421_v32, %v1951_v34  ;;  %v1160_v54 = vpop.f32.mrb[13].mxu1 }
 0x268   : > { %1219 = vst.msk [vmem:[%s1958_s16 + $0x60] sm:$0xff] %vm383_vm0, %v1187_v28  ;;  %v1188_v33 = vmax.f32 %v1100_v29, 0.0  ;;  %v1161_v55 = vadd.f32 %v1951_v34, %v1160_v54  ;;  %v1422_v18 = vpop.f32.mrb[14].mxu1 }
 0x269   : > { %1222 = vst.msk [vmem:[%s1958_s16 + $0x78] sm:$0xff] %vm383_vm0, %v1190_v56  ;;  %v1205_v27 = vmax.f32 %v1169_v19, 0.0  ;;  %v1172_v38 = vadd.f32 %v1422_v18, %v1951_v34  ;;  %v1163_v39 = vpop.f32.mrb[15].mxu1 }
 0x26a   : > { %1220 = vst.msk [vmem:[%s1958_s16 + $0x68] sm:$0xff] %vm383_vm0, %v1188_v33  ;;  %v1203_v3 = vmax.f32 %v1161_v55, 0.0  ;;  %v1164_v46 = vadd.f32 %v1951_v34, %v1163_v39 }
 0x26b   : > { %1237 = vst.msk [vmem:[%s1958_s16 + $0xf0] sm:$0xff] %vm383_vm0, %v1205_v27  ;;  %v1206_v60 = vmax.f32 %v1172_v38, 0.0 }
 0x26c   : > { %1235 = vst.msk [vmem:[%s1958_s16 + $0xe0] sm:$0xff] %vm383_vm0, %v1203_v3  ;;  %v1204_v61 = vmax.f32 %v1164_v46, 0.0 }
 0x26d   : > { %1238 = vst.msk [vmem:[%s1958_s16 + $0xf8] sm:$0xff] %vm383_vm0, %v1206_v60 }
 0x26e   : > { %1236 = vst.msk [vmem:[%s1958_s16 + $0xe8] sm:$0xff] %vm383_vm0, %v1204_v61 }
 0x26f PF: > { %s18_s23 = sadd.s32 1, %s1571_s23  }
 0x270   : > { %p15_p4 = scmp.ge.s32.totalorder %s18_s23, 4  }
 0x272   :  { %17 = sbr.rel (!%p15_p4) target bundleno = 3 (0x3), region = 77 }

// kernel: insinet_forward.51
= control target key start
LH: loop header
LB: loop body
LE: loop exit
PB: predicated region body
PF: predicated region fallthrough
CT: control target
= control target key end

     0   :  { %s1953_s26 = smov 0   ;;  %s2722_s0 = inlined_call_operand.vmem [shape: f32[512,16], index: 0, kind: input, shape index: {}]   ;;  %s2723_s1 = inlined_call_operand.vmem [shape: f32[512,4], index: 1, kind: input, shape index: {}]   ;;  %s2724_s2 = inlined_call_operand.vmem [shape: f32[1,16], index: 2, kind: input, shape index: {}]   ;;  %s2725_s3 = inlined_call_operand.<no memory space> [shape: f32[1,1], index: 3, kind: input, shape index: {}]   ;;  %s2726_s4 = inlined_call_operand.vmem [shape: f32[1,2], index: 4, kind: input, shape index: {}]   ;;  %s2727_s5 = inlined_call_operand.vmem [shape: f32[4,2], index: 5, kind: input, shape index: {}]   ;;  %s2728_s6 = inlined_call_operand.vmem [shape: f32[1,2], index: 6, kind: input, shape index: {}]   ;;  %s2729_s7 = inlined_call_operand.vmem [shape: f32[512,2], index: 7, kind: output, shape index: {}]  }
   0x1   :  { %v12_v0 = vstv %s2725_s3 }
   0x2   :  { %13 = vst [vmem:[#allocation2] sm:$0x1] %v12_v0 }
   0x3 LB: > { %s1627_s27 = sadd.s32 4294967295, %s1907_s26   ;;  %p1631_p0 = scmp.ge.s32.totalorder %s1907_s26, 1  ;;  %s1907_s26 = sphi %s1953_s26, %s19_s26  }
   0x4   : > { %p251_p1 = scmp.lt.s32.totalorder %s1907_s26, 3 }
   0x6   : > { %p252_p2 = pnand %p1631_p0, %p251_p1 }
   0x7   : > { %s1632_s28 = sshll.u32 (!%p252_p2), %s1627_s27, 5  ;;  %v776_v1 = vld [vmem:[%s2727_s5] sm:$0xf] (!%p252_p2)  ;;  %vm874_vm0 = vcmask (!%p252_p2), 1043456   ;;  %vm377_vm1 = vcmask (!%p252_p2), 130048   ;;  %vm777_vm2 = vcmask (!%p252_p2), 31744  }
   0x8   : > { %255 = sbr.rel (%p252_p2) target bundleno = 694 (0x2b6), region = 48  ;;  %p289_p3 = scmp.lt.s32.totalorder (!%p252_p2), %s1632_s28, 63  ;;  %1710 = vmatprep.subr.msk.mxu0 (!%p252_p2), %vm874_vm0, %v776_v1  ;;  %1760 = vmatprep.subr.msk.mxu1 (!%p252_p2), %vm874_vm0, %v776_v1  ;;  %v1969_v2 = vld [vmem:[%s2724_s2] ss:$0 sm:$0xff] (!%p252_p2)  ;;  %v1909_v56 = vmov (!%p252_p2), 0   ;;  %vm1174_vm3 = vcmask (!%p252_p2), 15360  }
   0x9   : > { %1711 = vmatpush3.msk.msra.mxu0 (!%p252_p2), %vm874_vm0, %v776_v1  ;;  %1761 = vmatpush3.msk.msra.mxu1 (!%p252_p2), %vm874_vm0, %v776_v1 }
   0xa   : > { %1771 = vset.pattern.permute.xlu0 (!%p252_p2), %v1909_v56  ;;  %1772 = vset.pattern.permute.xlu1 (!%p252_p2), %v1909_v56 }
   0xf   : > { %s2731_s28 = smov (!%p289_p3, %s1632_s28), 63 }
  0x10   : > { %s1964_s3 = sshll.u32 %s2731_s28, 3 }
  0x11   : > { %s1975_s12 = scalar_lea.vmem %s2722_s0, %s1964_s3  ;;  %s1999_s15 = scalar_lea.vmem %s2723_s1, %s1964_s3 }
  0x12   : > { %v308_v3 = vld [vmem:[%s1975_s12 + $0x10] sm:$0xff]  ;;  %v306_v4 = vld [vmem:[%s1975_s12] sm:$0xff]  ;;  %v309_v5 = vld [vmem:[%s1975_s12 + $0x18] sm:$0xff]  ;;  %s2621_s22 = scalar_lea.vmem %s2729_s7, %s1964_s3 }
  0x13   : > { %v347_v6 = vmul.f32 %v1969_v2, %v308_v3  ;;  %v345_v7 = vmul.f32 %v1969_v2, %v306_v4  ;;  %v348_v8 = vmul.f32 %v1969_v2, %v309_v5  ;;  %v307_v9 = vld [vmem:[%s1975_s12 + $0x8] sm:$0xff]  ;;  %v310_v12 = vld [vmem:[%s1975_s12 + $0x20] sm:$0xff]  ;;  %v313_v19 = vld [vmem:[%s1975_s12 + $0x38] sm:$0xff] }
  0x14   : > { %v346_v10 = vmul.f32 %v1969_v2, %v307_v9  ;;  %v311_v11 = vld [vmem:[%s1975_s12 + $0x28] sm:$0xff]  ;;  %v349_v18 = vmul.f32 %v1969_v2, %v310_v12  ;;  %v312_v20 = vld [vmem:[%s1975_s12 + $0x30] sm:$0xff]  ;;  %v352_v22 = vmul.f32 %v1969_v2, %v313_v19  ;;  %v744_v25 = vld [vmem:[%s1999_s15] sm:$0xff] }
  0x15   : > { %v384_v13 = vsel %vm377_vm1, %v347_v6, 0.0  ;;  %v378_v14 = vsel %vm377_vm1, %v345_v7, 0.0  ;;  %v387_v15 = vsel %vm377_vm1, %v348_v8, 0.0  ;;  %v350_v17 = vmul.f32 %v1969_v2, %v311_v11  ;;  %v745_v26 = vld [vmem:[%s1999_s15 + $0x8] sm:$0xff]  ;;  %v314_v28 = vld [vmem:[%s1975_s12 + $0x40] sm:$0xff]  ;;  %1712 = vmatprep.mubr.msk.f32.mxu0 %vm777_vm2, %v744_v25  ;;  %v746_v29 = vld [vmem:[%s1999_s15 + $0x10] sm:$0xff] }
  0x16   : > { %385 = vadd.xlane.f32.xlu1 %v384_v13  ;;  %379 = vadd.xlane.f32.xlu0 %v378_v14  ;;  %v381_v16 = vsel %vm377_vm1, %v346_v10, 0.0  ;;  %v390_v23 = vsel %vm377_vm1, %v349_v18, 0.0  ;;  %v351_v24 = vmul.f32 %v1969_v2, %v312_v20  ;;  %v315_v27 = vld [vmem:[%s1975_s12 + $0x48] sm:$0xff]  ;;  %v747_v30 = vld [vmem:[%s1999_s15 + $0x18] sm:$0xff]  ;;  %v399_v31 = vsel %vm377_vm1, %v352_v22, 0.0  ;;  %v316_v36 = vld [vmem:[%s1975_s12 + $0x50] sm:$0xff] }
  0x17   : > { %v393_v21 = vsel %vm377_vm1, %v350_v17, 0.0  ;;  %1713 = vmatmul.mubr.msk.f32.vlgmr.msra.gmra.mrb[0].mxu0 %vm777_vm2, %v745_v26  ;;  %v354_v32 = vmul.f32 %v1969_v2, %v315_v27  ;;  %v353_v34 = vmul.f32 %v1969_v2, %v314_v28  ;;  %v317_v35 = vld [vmem:[%s1975_s12 + $0x58] sm:$0xff]  ;;  %v748_v37 = vld [vmem:[%s1999_s15 + $0x20] sm:$0xff]  ;;  %v749_v38 = vld [vmem:[%s1999_s15 + $0x28] sm:$0xff]  ;;  %v355_v45 = vmul.f32 %v1969_v2, %v316_v36 }
  0x18   : > { %v396_v33 = vsel %vm377_vm1, %v351_v24, 0.0  ;;  %1715 = vmatprep.mubr.msk.f32.mxu0 %vm777_vm2, %v746_v29  ;;  %v760_v39 = vld [vmem:[%s1999_s15 + $0x80] sm:$0xff]  ;;  %v761_v40 = vld [vmem:[%s1999_s15 + $0x88] sm:$0xff]  ;;  %v762_v41 = vld [vmem:[%s1999_s15 + $0x90] sm:$0xff]  ;;  %v356_v43 = vmul.f32 %v1969_v2, %v317_v35 }
  0x19   : > { %v405_v42 = vsel %vm377_vm1, %v354_v32, 0.0  ;;  %v402_v44 = vsel %vm377_vm1, %v353_v34, 0.0  ;;  %1736 = vmatprep.mubr.msk.f32.mxu1 %vm777_vm2, %v760_v39  ;;  %v319_v46 = vld [vmem:[%s1975_s12 + $0x68] sm:$0xff]  ;;  %v318_v47 = vld [vmem:[%s1975_s12 + $0x60] sm:$0xff]  ;;  %v750_v48 = vld [vmem:[%s1999_s15 + $0x30] sm:$0xff]  ;;  %v408_v54 = vsel %vm377_vm1, %v355_v45, 0.0 }
  0x1a   : > { %388 = vadd.xlane.f32.xlu1 %v387_v15  ;;  %382 = vadd.xlane.f32.xlu0 %v381_v16  ;;  %v763_v49 = vld [vmem:[%s1999_s15 + $0x98] sm:$0xff]  ;;  %v764_v51 = vld [vmem:[%s1999_s15 + $0xa0] sm:$0xff]  ;;  %v411_v52 = vsel %vm377_vm1, %v356_v43, 0.0  ;;  %v358_v53 = vmul.f32 %v1969_v2, %v319_v46  ;;  %v357_v55 = vmul.f32 %v1969_v2, %v318_v47  ;;  %v320_v58 = vld [vmem:[%s1975_s12 + $0x70] sm:$0xff] }
  0x1b   : > { %1716 = vmatmul.mubr.msk.f32.gmra.mrb[2].mxu0 %vm777_vm2, %v747_v30  ;;  %1737 = vmatmul.mubr.msk.f32.vlgmr.msra.gmra.mrb[0].mxu1 %vm777_vm2, %v761_v40  ;;  %v751_v50 = vld [vmem:[%s1999_s15 + $0x38] sm:$0xff]  ;;  %v752_v59 = vld [vmem:[%s1999_s15 + $0x40] sm:$0xff]  ;;  %v765_v60 = vld [vmem:[%s1999_s15 + $0xa8] sm:$0xff]  ;;  %v359_v3 = vmul.f32 %v1969_v2, %v320_v58 }
  0x1c   : > { %1718 = vmatprep.mubr.msk.f32.mxu0 %vm777_vm2, %v748_v37  ;;  %1739 = vmatprep.mubr.msk.f32.mxu1 %vm777_vm2, %v762_v41  ;;  %v321_v57 = vld [vmem:[%s1975_s12 + $0x78] sm:$0xff]  ;;  %v753_v61 = vld [vmem:[%s1999_s15 + $0x48] sm:$0xff]  ;;  %v766_v62 = vld [vmem:[%s1999_s15 + $0xb0] sm:$0xff]  ;;  %v417_v63 = vsel %vm377_vm1, %v358_v53, 0.0  ;;  %v414_v1 = vsel %vm377_vm1, %v357_v55, 0.0 }
  0x1d   : > { %v360_v0 = vmul.f32 %v1969_v2, %v321_v57  ;;  %v323_v4 = vld [vmem:[%s1975_s12 + $0x88] sm:$0xff]  ;;  %v322_v5 = vld [vmem:[%s1975_s12 + $0x80] sm:$0xff]  ;;  %v754_v6 = vld [vmem:[%s1999_s15 + $0x50] sm:$0xff]  ;;  %v420_v12 = vsel %vm377_vm1, %v359_v3, 0.0 }
  0x1e   : > { %394 = vadd.xlane.f32.xlu1 %v393_v21  ;;  %391 = vadd.xlane.f32.xlu0 %v390_v23  ;;  %v767_v7 = vld [vmem:[%s1999_s15 + $0xb8] sm:$0xff]  ;;  %v768_v9 = vld [vmem:[%s1999_s15 + $0xc0] sm:$0xff]  ;;  %v362_v11 = vmul.f32 %v1969_v2, %v323_v4  ;;  %v361_v13 = vmul.f32 %v1969_v2, %v322_v5  ;;  %v324_v15 = vld [vmem:[%s1975_s12 + $0x90] sm:$0xff] }
  0x1f   : > { %1719 = vmatmul.mubr.msk.f32.gmra.mrb[4].mxu0 %vm777_vm2, %v749_v38  ;;  %1740 = vmatmul.mubr.msk.f32.gmra.mrb[2].mxu1 %vm777_vm2, %v763_v49  ;;  %v755_v8 = vld [vmem:[%s1999_s15 + $0x58] sm:$0xff]  ;;  %v423_v10 = vsel %vm377_vm1, %v360_v0, 0.0  ;;  %v756_v16 = vld [vmem:[%s1999_s15 + $0x60] sm:$0xff]  ;;  %v769_v17 = vld [vmem:[%s1999_s15 + $0xc8] sm:$0xff]  ;;  %v363_v23 = vmul.f32 %v1969_v2, %v324_v15 }
  0x20   : > { %1721 = vmatprep.mubr.msk.f32.mxu0 %vm777_vm2, %v750_v48  ;;  %1742 = vmatprep.mubr.msk.f32.mxu1 %vm777_vm2, %v764_v51  ;;  %v325_v14 = vld [vmem:[%s1975_s12 + $0x98] sm:$0xff]  ;;  %v757_v18 = vld [vmem:[%s1999_s15 + $0x68] sm:$0xff]  ;;  %v770_v19 = vld [vmem:[%s1999_s15 + $0xd0] sm:$0xff]  ;;  %v429_v20 = vsel %vm377_vm1, %v362_v11, 0.0  ;;  %v426_v22 = vsel %vm377_vm1, %v361_v13, 0.0 }
  0x21   : > { %v364_v21 = vmul.f32 %v1969_v2, %v325_v14  ;;  %v327_v24 = vld [vmem:[%s1975_s12 + $0xa8] sm:$0xff]  ;;  %v326_v25 = vld [vmem:[%s1975_s12 + $0xa0] sm:$0xff]  ;;  %v758_v26 = vld [vmem:[%s1999_s15 + $0x70] sm:$0xff]  ;;  %v432_v32 = vsel %vm377_vm1, %v363_v23, 0.0 }
  0x22   : > { %400 = vadd.xlane.f32.xlu1 %v399_v31  ;;  %397 = vadd.xlane.f32.xlu0 %v396_v33  ;;  %v771_v27 = vld [vmem:[%s1999_s15 + $0xd8] sm:$0xff]  ;;  %v772_v29 = vld [vmem:[%s1999_s15 + $0xe0] sm:$0xff]  ;;  %v366_v31 = vmul.f32 %v1969_v2, %v327_v24  ;;  %v365_v33 = vmul.f32 %v1969_v2, %v326_v25  ;;  %v328_v35 = vld [vmem:[%s1975_s12 + $0xb0] sm:$0xff] }
  0x23   : > { %1722 = vmatmul.mubr.msk.f32.gmra.mrb[6].mxu0 %vm777_vm2, %v751_v50  ;;  %1743 = vmatmul.mubr.msk.f32.gmra.mrb[4].mxu1 %vm777_vm2, %v765_v60  ;;  %v759_v28 = vld [vmem:[%s1999_s15 + $0x78] sm:$0xff]  ;;  %v435_v30 = vsel %vm377_vm1, %v364_v21, 0.0  ;;  %v773_v36 = vld [vmem:[%s1999_s15 + $0xe8] sm:$0xff]  ;;  %v774_v37 = vld [vmem:[%s1999_s15 + $0xf0] sm:$0xff]  ;;  %v367_v41 = vmul.f32 %v1969_v2, %v328_v35 }
  0x24   : > { %1724 = vmatprep.mubr.msk.f32.mxu0 %vm777_vm2, %v752_v59  ;;  %1745 = vmatprep.mubr.msk.f32.mxu1 %vm777_vm2, %v766_v62  ;;  %v329_v34 = vld [vmem:[%s1975_s12 + $0xb8] sm:$0xff]  ;;  %v441_v38 = vsel %vm377_vm1, %v366_v31, 0.0  ;;  %v438_v40 = vsel %vm377_vm1, %v365_v33, 0.0  ;;  %v330_v43 = vld [vmem:[%s1975_s12 + $0xc0] sm:$0xff]  ;;  %v332_v50 = vld [vmem:[%s1975_s12 + $0xd0] sm:$0xff] }
  0x25   : > { %v368_v39 = vmul.f32 %v1969_v2, %v329_v34  ;;  %v444_v47 = vsel %vm377_vm1, %v367_v41, 0.0  ;;  %v369_v48 = vmul.f32 %v1969_v2, %v330_v43  ;;  %v333_v49 = vld [vmem:[%s1975_s12 + $0xd8] sm:$0xff]  ;;  %v335_v55 = vld [vmem:[%s1975_s12 + $0xe8] sm:$0xff]  ;;  %v334_v56 = vld [vmem:[%s1975_s12 + $0xe0] sm:$0xff] }
  0x26   : > { %406 = vadd.xlane.f32.xlu1 %v405_v42  ;;  %403 = vadd.xlane.f32.xlu0 %v402_v44  ;;  %v331_v42 = vld [vmem:[%s1975_s12 + $0xc8] sm:$0xff]  ;;  %v775_v44 = vld [vmem:[%s1999_s15 + $0xf8] sm:$0xff]  ;;  %v374_v58 = vmul.f32 %v1969_v2, %v335_v55  ;;  %v373_v60 = vmul.f32 %v1969_v2, %v334_v56  ;;  %v336_v62 = vld [vmem:[%s1975_s12 + $0xf0] sm:$0xff] }
  0x27   : > { %1725 = vmatmul.mubr.msk.f32.gmra.mrb[8].mxu0 %vm777_vm2, %v753_v61  ;;  %1746 = vmatmul.mubr.msk.f32.gmra.mrb[6].mxu1 %vm777_vm2, %v767_v7  ;;  %v447_v45 = vsel %vm377_vm1, %v368_v39, 0.0  ;;  %v370_v46 = vmul.f32 %v1969_v2, %v331_v42  ;;  %v450_v53 = vsel %vm377_vm1, %v369_v48, 0.0  ;;  %v337_v61 = vld [vmem:[%s1975_s12 + $0xf8] sm:$0xff]  ;;  %v375_v3 = vmul.f32 %v1969_v2, %v336_v62 }
  0x28   : > { %1727 = vmatprep.mubr.msk.f32.mxu0 %vm777_vm2, %v754_v6  ;;  %1748 = vmatprep.mubr.msk.f32.mxu1 %vm777_vm2, %v768_v9  ;;  %v376_v0 = vmul.f32 %v1969_v2, %v337_v61  ;;  %v2143_v6 = vld [vmem:[#allocation2] ss:$0 sm:$0xff] }
  0x29   : > { %v453_v51 = vsel %vm377_vm1, %v370_v46, 0.0  ;;  %v468_v5 = vsel %vm377_vm1, %v375_v3, 0.0 }
  0x2a   : > { %412 = vadd.xlane.f32.xlu1 %v411_v52  ;;  %409 = vadd.xlane.f32.xlu0 %v408_v54  ;;  %v372_v52 = vmul.f32 %v1969_v2, %v333_v49  ;;  %v371_v54 = vmul.f32 %v1969_v2, %v332_v50  ;;  %v471_v4 = vsel %vm377_vm1, %v376_v0, 0.0 }
  0x2b   : > { %1728 = vmatmul.mubr.msk.f32.gmra.mrb[10].mxu0 %vm777_vm2, %v755_v8  ;;  %1749 = vmatmul.mubr.msk.f32.gmra.mrb[8].mxu1 %vm777_vm2, %v769_v17 }
  0x2c   : > { %1730 = vmatprep.mubr.msk.f32.mxu0 %vm777_vm2, %v756_v16  ;;  %1751 = vmatprep.mubr.msk.f32.mxu1 %vm777_vm2, %v770_v19  ;;  %v459_v57 = vsel %vm377_vm1, %v372_v52, 0.0  ;;  %v456_v59 = vsel %vm377_vm1, %v371_v54, 0.0 }
  0x2e   : > { %418 = vadd.xlane.f32.xlu1 %v417_v63  ;;  %415 = vadd.xlane.f32.xlu0 %v414_v1  ;;  %v465_v63 = vsel %vm377_vm1, %v374_v58, 0.0  ;;  %v462_v1 = vsel %vm377_vm1, %v373_v60, 0.0 }
  0x2f   : > { %1731 = vmatmul.mubr.msk.f32.gmra.mrb[12].mxu0 %vm777_vm2, %v757_v18  ;;  %1752 = vmatmul.mubr.msk.f32.gmra.mrb[10].mxu1 %vm777_vm2, %v771_v27 }
  0x30   : > { %1733 = vmatprep.mubr.msk.f32.mxu0 %vm777_vm2, %v758_v26  ;;  %1754 = vmatprep.mubr.msk.f32.mxu1 %vm777_vm2, %v772_v29 }
  0x32   : > { %424 = vadd.xlane.f32.xlu1 %v423_v10  ;;  %421 = vadd.xlane.f32.xlu0 %v420_v12 }
  0x33   : > { %1734 = vmatmul.mubr.msk.f32.gmra.mrb[14].mxu0 %vm777_vm2, %v759_v28  ;;  %1755 = vmatmul.mubr.msk.f32.gmra.mrb[12].mxu1 %vm777_vm2, %v773_v36 }
  0x34   : > { %1757 = vmatprep.mubr.msk.f32.mxu1 %vm777_vm2, %v774_v37 }
  0x36   : > { %430 = vadd.xlane.f32.xlu1 %v429_v20  ;;  %427 = vadd.xlane.f32.xlu0 %v426_v22 }
  0x37   : > { %1758 = vmatmul.mubr.msk.f32.gmra.mrb[14].mxu1 %vm777_vm2, %v775_v44 }
  0x3a   : > { %436 = vadd.xlane.f32.xlu1 %v435_v30  ;;  %433 = vadd.xlane.f32.xlu0 %v432_v32 }
  0x3e   : > { %442 = vadd.xlane.f32.xlu1 %v441_v38  ;;  %439 = vadd.xlane.f32.xlu0 %v438_v40 }
  0x42   : > { %448 = vadd.xlane.f32.xlu1 %v447_v45  ;;  %445 = vadd.xlane.f32.xlu0 %v444_v47 }
  0x46   : > { %454 = vadd.xlane.f32.xlu1 %v453_v51  ;;  %451 = vadd.xlane.f32.xlu0 %v450_v53 }
  0x4a   : > { %460 = vadd.xlane.f32.xlu1 %v459_v57  ;;  %457 = vadd.xlane.f32.xlu0 %v456_v59 }
  0x4e   : > { %466 = vadd.xlane.f32.xlu1 %v465_v63  ;;  %463 = vadd.xlane.f32.xlu0 %v462_v1 }
  0x52   : > { %472 = vadd.xlane.f32.xlu1 %v471_v4  ;;  %469 = vadd.xlane.f32.xlu0 %v468_v5 }
  0xa3   : > { %v386_v7 = vpop.xlane.xlu1 %385  ;;  %v380_v8 = vpop.xlane.xlu0 %379 }
  0xa4   : > { %v481_v9 = vadd.f32 %v2143_v6, %v380_v8  ;;  %v483_v13 = vadd.f32 %v2143_v6, %v386_v7 }
  0xa6   : > { %v513_v10 = vmax.f32 %v481_v9, 0.0  ;;  %v515_v17 = vmax.f32 %v483_v13, 0.0 }
  0xa7   : > { %v389_v11 = vpop.xlane.xlu1 %388  ;;  %v383_v12 = vpop.xlane.xlu0 %382 }
  0xa8   : > { %v482_v2 = vadd.f32 %v2143_v6, %v383_v12  ;;  %548 = vperm.xlu0 %1771, %v513_v10   ;;  %v484_v18 = vadd.f32 %v2143_v6, %v389_v11 }
  0xaa   : > { %v514_v14 = vmax.f32 %v482_v2, 0.0  ;;  %v516_v21 = vmax.f32 %v484_v18, 0.0 }
  0xab   : > { %v395_v15 = vpop.xlane.xlu1 %394  ;;  %v392_v16 = vpop.xlane.xlu0 %391 }
  0xac   : > { %553 = vperm.xlu1 %1772, %v514_v14   ;;  %v485_v22 = vadd.f32 %v2143_v6, %v392_v16  ;;  %v486_v25 = vadd.f32 %v2143_v6, %v395_v15 }
  0xae   : > { %v517_v27 = vmax.f32 %v485_v22, 0.0  ;;  %v518_v31 = vmax.f32 %v486_v25, 0.0 }
  0xaf   : > { %v401_v19 = vpop.xlane.xlu1 %400  ;;  %v398_v20 = vpop.xlane.xlu0 %397 }
  0xb0   : > { %558 = vperm.xlu1 %1772, %v515_v17   ;;  %v487_v33 = vadd.f32 %v2143_v6, %v398_v20  ;;  %v488_v37 = vadd.f32 %v2143_v6, %v401_v19 }
  0xb2   : > { %v519_v39 = vmax.f32 %v487_v33, 0.0  ;;  %v520_v43 = vmax.f32 %v488_v37, 0.0 }
  0xb3   : > { %v407_v23 = vpop.xlane.xlu1 %406  ;;  %v404_v24 = vpop.xlane.xlu0 %403 }
  0xb4   : > { %v490_v26 = vadd.f32 %v2143_v6, %v407_v23  ;;  %563 = vperm.xlu1 %1772, %v516_v21   ;;  %v489_v45 = vadd.f32 %v2143_v6, %v404_v24 }
  0xb6   : > { %v522_v28 = vmax.f32 %v490_v26, 0.0  ;;  %v521_v50 = vmax.f32 %v489_v45, 0.0 }
  0xb7   : > { %v413_v29 = vpop.xlane.xlu1 %412  ;;  %v410_v30 = vpop.xlane.xlu0 %409 }
  0xb8   : > { %v492_v32 = vadd.f32 %v2143_v6, %v413_v29  ;;  %593 = vperm.xlu0 %1771, %v522_v28   ;;  %568 = vperm.xlu1 %1772, %v517_v27   ;;  %v491_v51 = vadd.f32 %v2143_v6, %v410_v30 }
  0xba   : > { %v524_v34 = vmax.f32 %v492_v32, 0.0  ;;  %v523_v56 = vmax.f32 %v491_v51, 0.0 }
  0xbb   : > { %v419_v35 = vpop.xlane.xlu1 %418  ;;  %v416_v36 = vpop.xlane.xlu0 %415 }
  0xbc   : > { %v494_v38 = vadd.f32 %v2143_v6, %v419_v35  ;;  %603 = vperm.xlu0 %1771, %v524_v34   ;;  %573 = vperm.xlu1 %1772, %v518_v31   ;;  %v493_v57 = vadd.f32 %v2143_v6, %v416_v36 }
  0xbe   : > { %v526_v40 = vmax.f32 %v494_v38, 0.0  ;;  %v525_v62 = vmax.f32 %v493_v57, 0.0 }
  0xbf   : > { %v425_v41 = vpop.xlane.xlu1 %424  ;;  %v422_v42 = vpop.xlane.xlu0 %421 }
  0xc0   : > { %v496_v44 = vadd.f32 %v2143_v6, %v425_v41  ;;  %613 = vperm.xlu0 %1771, %v526_v40   ;;  %578 = vperm.xlu1 %1772, %v519_v39   ;;  %v495_v63 = vadd.f32 %v2143_v6, %v422_v42 }
  0xc2   : > { %v528_v46 = vmax.f32 %v496_v44, 0.0  ;;  %v527_v4 = vmax.f32 %v495_v63, 0.0 }
  0xc3   : > { %v431_v47 = vpop.xlane.xlu1 %430  ;;  %v428_v48 = vpop.xlane.xlu0 %427 }
  0xc4   : > { %v498_v49 = vadd.f32 %v2143_v6, %v431_v47  ;;  %623 = vperm.xlu0 %1771, %v528_v46   ;;  %583 = vperm.xlu1 %1772, %v520_v43   ;;  %v497_v5 = vadd.f32 %v2143_v6, %v428_v48 }
  0xc6   : > { %v530_v52 = vmax.f32 %v498_v49, 0.0  ;;  %v529_v11 = vmax.f32 %v497_v5, 0.0 }
  0xc7   : > { %v437_v53 = vpop.xlane.xlu1 %436  ;;  %v434_v54 = vpop.xlane.xlu0 %433 }
  0xc8   : > { %v500_v55 = vadd.f32 %v2143_v6, %v437_v53  ;;  %633 = vperm.xlu0 %1771, %v530_v52   ;;  %588 = vperm.xlu1 %1772, %v521_v50   ;;  %v499_v12 = vadd.f32 %v2143_v6, %v434_v54 }
  0xca   : > { %v532_v58 = vmax.f32 %v500_v55, 0.0  ;;  %v531_v16 = vmax.f32 %v499_v12, 0.0 }
  0xcb   : > { %v443_v59 = vpop.xlane.xlu1 %442  ;;  %v440_v60 = vpop.xlane.xlu0 %439 }
  0xcc   : > { %v502_v61 = vadd.f32 %v2143_v6, %v443_v59  ;;  %643 = vperm.xlu0 %1771, %v532_v58   ;;  %598 = vperm.xlu1 %1772, %v523_v56   ;;  %v501_v17 = vadd.f32 %v2143_v6, %v440_v60 }
  0xce   : > { %v534_v0 = vmax.f32 %v502_v61, 0.0  ;;  %v533_v21 = vmax.f32 %v501_v17, 0.0 }
  0xcf   : > { %v449_v1 = vpop.xlane.xlu1 %448  ;;  %v446_v7 = vpop.xlane.xlu0 %445 }
  0xd0   : > { %v504_v3 = vadd.f32 %v2143_v6, %v449_v1  ;;  %653 = vperm.xlu0 %1771, %v534_v0   ;;  %608 = vperm.xlu1 %1772, %v525_v62   ;;  %v503_v22 = vadd.f32 %v2143_v6, %v446_v7 }
  0xd2   : > { %v536_v8 = vmax.f32 %v504_v3, 0.0  ;;  %v535_v27 = vmax.f32 %v503_v22, 0.0 }
  0xd3   : > { %v455_v9 = vpop.xlane.xlu1 %454  ;;  %v452_v14 = vpop.xlane.xlu0 %451 }
  0xd4   : > { %v506_v10 = vadd.f32 %v2143_v6, %v455_v9  ;;  %663 = vperm.xlu0 %1771, %v536_v8   ;;  %618 = vperm.xlu1 %1772, %v527_v4   ;;  %v505_v28 = vadd.f32 %v2143_v6, %v452_v14  ;;  %v2232_v8 = vld [vmem:[%s2726_s4] ss:$0 sm:$0xff] }
  0xd6   : > { %v538_v13 = vmax.f32 %v506_v10, 0.0  ;;  %v537_v31 = vmax.f32 %v505_v28, 0.0 }
  0xd7   : > { %v461_v2 = vpop.xlane.xlu1 %460  ;;  %v458_v23 = vpop.xlane.xlu0 %457 }
  0xd8   : > { %v508_v15 = vadd.f32 %v2143_v6, %v461_v2  ;;  %673 = vperm.xlu0 %1771, %v538_v13   ;;  %628 = vperm.xlu1 %1772, %v529_v11   ;;  %v507_v32 = vadd.f32 %v2143_v6, %v458_v23  ;;  %v2238_v11 = vld [vmem:[%s2728_s6] ss:$0 sm:$0xff] }
  0xda   : > { %v540_v18 = vmax.f32 %v508_v15, 0.0  ;;  %v539_v33 = vmax.f32 %v507_v32, 0.0 }
  0xdb   : > { %v467_v19 = vpop.xlane.xlu1 %466  ;;  %v464_v30 = vpop.xlane.xlu0 %463 }
  0xdc   : > { %v510_v20 = vadd.f32 %v2143_v6, %v467_v19  ;;  %683 = vperm.xlu0 %1771, %v540_v18   ;;  %638 = vperm.xlu1 %1772, %v531_v16   ;;  %v509_v34 = vadd.f32 %v2143_v6, %v464_v30 }
  0xde   : > { %v542_v24 = vmax.f32 %v510_v20, 0.0  ;;  %v541_v36 = vmax.f32 %v509_v34, 0.0 }
  0xdf   : > { %v473_v25 = vpop.xlane.xlu1 %472  ;;  %v470_v35 = vpop.xlane.xlu0 %469 }
  0xe0   : > { %v512_v26 = vadd.f32 %v2143_v6, %v473_v25  ;;  %693 = vperm.xlu0 %1771, %v542_v24   ;;  %648 = vperm.xlu1 %1772, %v533_v21   ;;  %v511_v37 = vadd.f32 %v2143_v6, %v470_v35 }
  0xe2   : > { %v544_v29 = vmax.f32 %v512_v26, 0.0  ;;  %v543_v38 = vmax.f32 %v511_v37, 0.0 }
  0xe4   : > { %703 = vperm.xlu0 %1771, %v544_v29   ;;  %658 = vperm.xlu1 %1772, %v535_v27  }
  0xe8   : > { %668 = vperm.xlu1 %1772, %v537_v31  }
  0xea   : > { %v1714_v39 = vpop.f32.mrb[0].mxu0 }
  0xeb   : > { %v944_v40 = vpop.f32.mrb[1].mxu0 }
  0xec   : > { %678 = vperm.xlu1 %1772, %v539_v33  }
  0xee   : > { %v1717_v41 = vpop.f32.mrb[2].mxu0  ;;  %v2177_v43 = vpop.f32.mrb[0].mxu1 }
  0xef   : > { %v954_v42 = vpop.f32.mrb[3].mxu0  ;;  %v2179_v45 = vpop.f32.mrb[1].mxu1 }
  0xf0   : > { %688 = vperm.xlu1 %1772, %v541_v36  }
  0xf2   : > { %v1720_v44 = vpop.f32.mrb[4].mxu0  ;;  %v2181_v47 = vpop.f32.mrb[2].mxu1 }
  0xf3   : > { %v964_v46 = vpop.f32.mrb[5].mxu0  ;;  %v2185_v49 = vpop.f32.mrb[3].mxu1 }
  0xf4   : > { %698 = vperm.xlu1 %1772, %v543_v38  }
  0xf6   : > { %v2183_v48 = vpop.f32.mrb[6].mxu0  ;;  %v2189_v50 = vpop.f32.mrb[4].mxu1 }
  0xf7   : > { %v2187_v6 = vpop.f32.mrb[7].mxu0  ;;  %v2193_v52 = vpop.f32.mrb[5].mxu1 }
  0xfa   : > { %v2191_v51 = vpop.f32.mrb[8].mxu0  ;;  %v2197_v54 = vpop.f32.mrb[6].mxu1 }
  0xfb   : > { %v2195_v53 = vpop.f32.mrb[9].mxu0  ;;  %v2201_v56 = vpop.f32.mrb[7].mxu1 }
  0xfe   : > { %v2199_v55 = vpop.f32.mrb[10].mxu0  ;;  %v2205_v58 = vpop.f32.mrb[8].mxu1 }
  0xff   : > { %v2203_v57 = vpop.f32.mrb[11].mxu0  ;;  %v2209_v60 = vpop.f32.mrb[9].mxu1 }
 0x102   : > { %v2207_v59 = vpop.f32.mrb[12].mxu0  ;;  %v2213_v62 = vpop.f32.mrb[10].mxu1 }
 0x103   : > { %v2211_v61 = vpop.f32.mrb[13].mxu0  ;;  %v2217_v0 = vpop.f32.mrb[11].mxu1 }
 0x106   : > { %v2215_v63 = vpop.f32.mrb[14].mxu0  ;;  %v2221_v3 = vpop.f32.mrb[12].mxu1 }
 0x107   : > { %v2219_v1 = vpop.f32.mrb[15].mxu0  ;;  %v2223_v4 = vpop.f32.mrb[13].mxu1 }
 0x10a   : > { %v2225_v5 = vpop.f32.mrb[14].mxu1 }
 0x10b   : > { %v2227_v7 = vpop.f32.mrb[15].mxu1 }
 0x127   : > { %v549_v9 = vpop.permute.xlu0 %548 }
 0x128   : > { %v712_v10 = vmul.f32 %v2232_v8, %v549_v9 }
 0x12a   : > { %v1103_v12 = vadd.f32 %v944_v40, %v712_v10 }
 0x12b   : > { %v554_v13 = vpop.permute.xlu1 %553 }
 0x12c   : > { %v713_v2 = vmul.f32 %v2232_v8, %v554_v13  ;;  %v2242_v14 = vadd.f32 %v2238_v11, %v1103_v12 }
 0x12e   : > { %v1104_v15 = vadd.f32 %v1714_v39, %v713_v2  ;;  %v1175_v16 = vsel %vm1174_vm3, %v2242_v14, -inf }
 0x12f   : > { %v559_v17 = vpop.permute.xlu1 %558  ;;  %1176 = vmax.xlane.f32.xlu1 %v1175_v16 }
 0x130   : > { %v714_v18 = vmul.f32 %v2232_v8, %v559_v17  ;;  %v2248_v19 = vadd.f32 %v2238_v11, %v1104_v15 }
 0x132   : > { %v1105_v20 = vadd.f32 %v954_v42, %v714_v18  ;;  %v1178_v21 = vsel %vm1174_vm3, %v2248_v19, -inf }
 0x133   : > { %1179 = vmax.xlane.f32.xlu0 %v1178_v21  ;;  %v564_v22 = vpop.permute.xlu1 %563 }
 0x134   : > { %v715_v23 = vmul.f32 %v2232_v8, %v564_v22  ;;  %v2254_v24 = vadd.f32 %v2238_v11, %v1105_v20 }
 0x136   : > { %v1106_v25 = vadd.f32 %v1717_v41, %v715_v23  ;;  %v1181_v26 = vsel %vm1174_vm3, %v2254_v24, -inf }
 0x137   : > { %1182 = vmax.xlane.f32.xlu0 %v1181_v26  ;;  %v569_v27 = vpop.permute.xlu1 %568  ;;  %v594_v28 = vpop.permute.xlu0 %593 }
 0x138   : > { %v716_v29 = vmul.f32 %v2232_v8, %v569_v27  ;;  %v2260_v30 = vadd.f32 %v2238_v11, %v1106_v25 }
 0x13a   : > { %v1107_v31 = vadd.f32 %v964_v46, %v716_v29  ;;  %v1184_v32 = vsel %vm1174_vm3, %v2260_v30, -inf  ;;  %v721_v46 = vmul.f32 %v2232_v8, %v594_v28 }
 0x13b   : > { %v574_v33 = vpop.permute.xlu1 %573  ;;  %1185 = vmax.xlane.f32.xlu1 %v1184_v32  ;;  %v604_v34 = vpop.permute.xlu0 %603 }
 0x13c   : > { %v717_v35 = vmul.f32 %v2232_v8, %v574_v33  ;;  %v2266_v36 = vadd.f32 %v2238_v11, %v1107_v31  ;;  %v1112_v15 = vadd.f32 %v2191_v51, %v721_v46  ;;  %v723_v16 = vmul.f32 %v2232_v8, %v604_v34 }
 0x13e   : > { %v1108_v37 = vadd.f32 %v1720_v44, %v717_v35  ;;  %v1187_v38 = vsel %vm1174_vm3, %v2266_v36, -inf  ;;  %v1114_v23 = vadd.f32 %v2199_v55, %v723_v16  ;;  %v2293_v25 = vadd.f32 %v2238_v11, %v1112_v15 }
 0x13f   : > { %1188 = vmax.xlane.f32.xlu0 %v1187_v38  ;;  %v579_v39 = vpop.permute.xlu1 %578  ;;  %v614_v40 = vpop.permute.xlu0 %613 }
 0x140   : > { %v718_v41 = vmul.f32 %v2232_v8, %v579_v39  ;;  %v2272_v42 = vadd.f32 %v2238_v11, %v1108_v37  ;;  %v725_v51 = vmul.f32 %v2232_v8, %v614_v40  ;;  %v1202_v55 = vsel %vm1174_vm3, %v2293_v25, -inf }
 0x141   : > { %v2306_v32 = vadd.f32 %v2238_v11, %v1114_v23 }
 0x142   : > { %v1109_v9 = vadd.f32 %v2187_v6, %v718_v41  ;;  %v1190_v10 = vsel %vm1174_vm3, %v2272_v42, -inf  ;;  %v1116_v33 = vadd.f32 %v2207_v59, %v725_v51 }
 0x143   : > { %v584_v12 = vpop.permute.xlu1 %583  ;;  %1191 = vmax.xlane.f32.xlu1 %v1190_v10  ;;  %v624_v44 = vpop.permute.xlu0 %623  ;;  %v1208_v59 = vsel %vm1174_vm3, %v2306_v32, -inf }
 0x144   : > { %v719_v13 = vmul.f32 %v2232_v8, %v584_v12  ;;  %v2280_v2 = vadd.f32 %v2238_v11, %v1109_v9  ;;  %v2325_v10 = vadd.f32 %v2238_v11, %v1116_v33 }
 0x146   : > { %v1110_v17 = vadd.f32 %v2183_v48, %v719_v13  ;;  %v1193_v6 = vsel %vm1174_vm3, %v2280_v2, -inf }
 0x147   : > { %1194 = vmax.xlane.f32.xlu0 %v1193_v6  ;;  %v589_v18 = vpop.permute.xlu1 %588  ;;  %v634_v20 = vpop.permute.xlu0 %633  ;;  %v1214_v6 = vsel %vm1174_vm3, %v2325_v10, -inf }
 0x148   : > { %v720_v21 = vmul.f32 %v2232_v8, %v589_v18  ;;  %v2289_v22 = vadd.f32 %v2238_v11, %v1110_v17  ;;  %v729_v41 = vmul.f32 %v2232_v8, %v634_v20 }
 0x14a   : > { %v1111_v48 = vadd.f32 %v2195_v53, %v720_v21  ;;  %v1196_v26 = vsel %vm1174_vm3, %v2289_v22, -inf  ;;  %v727_v53 = vmul.f32 %v2232_v8, %v624_v44  ;;  %v1120_v16 = vadd.f32 %v2177_v43, %v729_v41 }
 0x14b   : > { %v599_v27 = vpop.permute.xlu1 %598  ;;  %1197 = vmax.xlane.f32.xlu1 %v1196_v26  ;;  %v644_v28 = vpop.permute.xlu0 %643 }
 0x14c   : > { %v722_v29 = vmul.f32 %v2232_v8, %v599_v27  ;;  %v2301_v31 = vadd.f32 %v2238_v11, %v1111_v48  ;;  %v1118_v46 = vadd.f32 %v2215_v63, %v727_v53  ;;  %v731_v63 = vmul.f32 %v2232_v8, %v644_v28 }
 0x14d   : > { %v2347_v51 = vadd.f32 %v2238_v11, %v1120_v16 }
 0x14e   : > { %v1113_v34 = vadd.f32 %v2203_v57, %v722_v29  ;;  %v1199_v35 = vsel %vm1174_vm3, %v2301_v31, -inf  ;;  %v2339_v18 = vadd.f32 %v2238_v11, %v1118_v46  ;;  %v1122_v23 = vadd.f32 %v2181_v47, %v731_v63 }
 0x14f   : > { %1200 = vmax.xlane.f32.xlu0 %v1199_v35  ;;  %v609_v37 = vpop.permute.xlu1 %608  ;;  %1203 = vmax.xlane.f32.xlu1 %v1202_v55  ;;  %v654_v38 = vpop.permute.xlu0 %653  ;;  %v1226_v33 = vsel %vm1174_vm3, %v2347_v51, -inf }
 0x150   : > { %v724_v39 = vmul.f32 %v2232_v8, %v609_v37  ;;  %v2315_v40 = vadd.f32 %v2238_v11, %v1113_v34  ;;  %v733_v48 = vmul.f32 %v2232_v8, %v654_v38  ;;  %v1220_v28 = vsel %vm1174_vm3, %v2339_v18, -inf }
 0x151   : > { %v2362_v53 = vadd.f32 %v2238_v11, %v1122_v23 }
 0x152   : > { %v1115_v57 = vadd.f32 %v2211_v61, %v724_v39  ;;  %v1205_v9 = vsel %vm1174_vm3, %v2315_v40, -inf }
 0x153   : > { %1206 = vmax.xlane.f32.xlu0 %v1205_v9  ;;  %v619_v12 = vpop.permute.xlu1 %618  ;;  %1209 = vmax.xlane.f32.xlu1 %v1208_v59  ;;  %v664_v44 = vpop.permute.xlu0 %663 }
 0x154   : > { %v726_v13 = vmul.f32 %v2232_v8, %v619_v12  ;;  %v2329_v15 = vadd.f32 %v2238_v11, %v1115_v57  ;;  %v735_v34 = vmul.f32 %v2232_v8, %v664_v44 }
 0x156   : > { %v1117_v61 = vadd.f32 %v2219_v1, %v726_v13  ;;  %v1211_v17 = vsel %vm1174_vm3, %v2329_v15, -inf  ;;  %v1126_v57 = vadd.f32 %v2197_v54, %v735_v34 }
 0x157   : > { %1212 = vmax.xlane.f32.xlu0 %v1211_v17  ;;  %v629_v20 = vpop.permute.xlu1 %628  ;;  %1215 = vmax.xlane.f32.xlu1 %v1214_v6  ;;  %v674_v1 = vpop.permute.xlu0 %673 }
 0x158   : > { %v728_v21 = vmul.f32 %v2232_v8, %v629_v20  ;;  %v2343_v43 = vadd.f32 %v2238_v11, %v1117_v61  ;;  %v737_v46 = vmul.f32 %v2232_v8, %v674_v1  ;;  %v2395_v20 = vadd.f32 %v2238_v11, %v1126_v57 }
 0x15a   : > { %v1119_v26 = vadd.f32 %v2179_v45, %v728_v21  ;;  %v1217_v27 = vsel %vm1174_vm3, %v2343_v43, -inf  ;;  %v1124_v45 = vadd.f32 %v2189_v50, %v733_v48  ;;  %v1232_v50 = vsel %vm1174_vm3, %v2362_v53, -inf }
 0x15b   : > { %1218 = vmax.xlane.f32.xlu0 %v1217_v27  ;;  %v639_v29 = vpop.permute.xlu1 %638  ;;  %1221 = vmax.xlane.f32.xlu1 %v1220_v28  ;;  %v684_v38 = vpop.permute.xlu0 %683  ;;  %v1128_v63 = vadd.f32 %v2205_v58, %v737_v46  ;;  %v1244_v28 = vsel %vm1174_vm3, %v2395_v20, -inf }
 0x15c   : > { %v730_v55 = vmul.f32 %v2232_v8, %v639_v29  ;;  %v2357_v47 = vadd.f32 %v2238_v11, %v1119_v26  ;;  %v2381_v12 = vadd.f32 %v2238_v11, %v1124_v45  ;;  %v739_v54 = vmul.f32 %v2232_v8, %v684_v38 }
 0x15e   : > { %v1121_v35 = vadd.f32 %v2185_v49, %v730_v55  ;;  %v1223_v37 = vsel %vm1174_vm3, %v2357_v47, -inf  ;;  %v1238_v6 = vsel %vm1174_vm3, %v2381_v12, -inf  ;;  %v1130_v1 = vadd.f32 %v2213_v62, %v739_v54 }
 0x15f   : > { %1224 = vmax.xlane.f32.xlu0 %v1223_v37  ;;  %v649_v39 = vpop.permute.xlu1 %648  ;;  %1227 = vmax.xlane.f32.xlu1 %v1226_v33  ;;  %v694_v61 = vpop.permute.xlu0 %693 }
 0x160   : > { %v732_v41 = vmul.f32 %v2232_v8, %v649_v39  ;;  %v2371_v59 = vadd.f32 %v2238_v11, %v1121_v35  ;;  %v741_v48 = vmul.f32 %v2232_v8, %v694_v61 }
 0x162   : > { %v1123_v49 = vadd.f32 %v2193_v52, %v732_v41  ;;  %v1229_v9 = vsel %vm1174_vm3, %v2371_v59, -inf  ;;  %v1132_v34 = vadd.f32 %v2221_v3, %v741_v48 }
 0x163   : > { %1230 = vmax.xlane.f32.xlu0 %v1229_v9  ;;  %v659_v44 = vpop.permute.xlu1 %658  ;;  %1233 = vmax.xlane.f32.xlu1 %v1232_v50  ;;  %v704_v29 = vpop.permute.xlu0 %703 }
 0x164   : > { %v734_v13 = vmul.f32 %v2232_v8, %v659_v44  ;;  %v2385_v16 = vadd.f32 %v2238_v11, %v1123_v49  ;;  %v743_v35 = vmul.f32 %v2232_v8, %v704_v29  ;;  %v2432_v3 = vadd.f32 %v2238_v11, %v1132_v34 }
 0x166   : > { %v1125_v52 = vadd.f32 %v2201_v56, %v734_v13  ;;  %v1235_v17 = vsel %vm1174_vm3, %v2385_v16, -inf  ;;  %v2403_v56 = vadd.f32 %v2238_v11, %v1128_v63  ;;  %v1134_v57 = vadd.f32 %v2225_v5, %v743_v35 }
 0x167   : > { %1236 = vmax.xlane.f32.xlu0 %v1235_v17  ;;  %v669_v21 = vpop.permute.xlu1 %668  ;;  %1239 = vmax.xlane.f32.xlu1 %v1238_v6 }
 0x168   : > { %v736_v23 = vmul.f32 %v2232_v8, %v669_v21  ;;  %v2399_v58 = vadd.f32 %v2238_v11, %v1125_v52  ;;  %v1250_v45 = vsel %vm1174_vm3, %v2403_v56, -inf  ;;  %v2443_v63 = vadd.f32 %v2238_v11, %v1134_v57 }
 0x16a   : > { %v1127_v26 = vadd.f32 %v2209_v60, %v736_v23  ;;  %v1241_v27 = vsel %vm1174_vm3, %v2399_v58, -inf  ;;  %v2418_v60 = vadd.f32 %v2238_v11, %v1130_v1  ;;  %v1268_v52 = vsel %vm1174_vm3, %v2443_v63, -inf }
 0x16b   : > { %1242 = vmax.xlane.f32.xlu0 %v1241_v27  ;;  %v679_v55 = vpop.permute.xlu1 %678  ;;  %1245 = vmax.xlane.f32.xlu1 %v1244_v28 }
 0x16c   : > { %v738_v33 = vmul.f32 %v2232_v8, %v679_v55  ;;  %v2413_v62 = vadd.f32 %v2238_v11, %v1127_v26  ;;  %v1256_v50 = vsel %vm1174_vm3, %v2418_v60, -inf }
 0x16e   : > { %v1129_v37 = vadd.f32 %v2217_v0, %v738_v33  ;;  %v1247_v38 = vsel %vm1174_vm3, %v2413_v62, -inf }
 0x16f   : > { %1248 = vmax.xlane.f32.xlu0 %v1247_v38  ;;  %v689_v39 = vpop.permute.xlu1 %688  ;;  %1251 = vmax.xlane.f32.xlu1 %v1250_v45 }
 0x170   : > { %v740_v41 = vmul.f32 %v2232_v8, %v689_v39  ;;  %v2427_v46 = vadd.f32 %v2238_v11, %v1129_v37 }
 0x172   : > { %v1131_v0 = vadd.f32 %v2223_v4, %v740_v41  ;;  %v1253_v49 = vsel %vm1174_vm3, %v2427_v46, -inf  ;;  %v1262_v4 = vsel %vm1174_vm3, %v2432_v3, -inf }
 0x173   : > { %1254 = vmax.xlane.f32.xlu0 %v1253_v49  ;;  %v699_v9 = vpop.permute.xlu1 %698  ;;  %1257 = vmax.xlane.f32.xlu1 %v1256_v50 }
 0x174   : > { %v742_v44 = vmul.f32 %v2232_v8, %v699_v9  ;;  %v2440_v13 = vadd.f32 %v2238_v11, %v1131_v0 }
 0x176   : > { %v1133_v54 = vadd.f32 %v2227_v7, %v742_v44  ;;  %v1259_v5 = vsel %vm1174_vm3, %v2440_v13, -inf }
 0x177   : > { %1260 = vmax.xlane.f32.xlu0 %v1259_v5  ;;  %1263 = vmax.xlane.f32.xlu1 %v1262_v4 }
 0x178   : > { %v2451_v61 = vadd.f32 %v2238_v11, %v1133_v54 }
 0x17a   : > { %v1265_v8 = vsel %vm1174_vm3, %v2451_v61, -inf }
 0x17b   : > { %1266 = vmax.xlane.f32.xlu0 %v1265_v8  ;;  %1269 = vmax.xlane.f32.xlu1 %v1268_v52 }
 0x1bc   : > { %v1177_v7 = vpop.xlane.xlu1 %1176 }
 0x1bd   : > { %v1271_v17 = vsub.f32 %v2242_v14, %v1177_v7 }
 0x1bf   : > { %v1303_v6 = vmul.f32 1.442695, %v1271_v17 }
 0x1c0   : > { %v1180_v21 = vpop.xlane.xlu0 %1179 }
 0x1c1   : > { %1773 = vpow2.f32 %v1303_v6  ;;  %v1272_v23 = vsub.f32 %v2248_v19, %v1180_v21 }
 0x1c3   : > { %v1305_v1 = vmul.f32 1.442695, %v1272_v23 }
 0x1c4   : > { %v1183_v48 = vpop.xlane.xlu0 %1182 }
 0x1c5   : > { %1775 = vpow2.f32 %v1305_v1  ;;  %v1273_v11 = vsub.f32 %v2254_v24, %v1183_v48 }
 0x1c7   : > { %v1307_v26 = vmul.f32 1.442695, %v1273_v11 }
 0x1c8   : > { %v1186_v27 = vpop.xlane.xlu1 %1185 }
 0x1c9   : > { %1777 = vpow2.f32 %v1307_v26  ;;  %v1274_v28 = vsub.f32 %v2260_v30, %v1186_v27 }
 0x1cb   : > { %v2461_v29 = vpop.eup %1773  ;;  %v1309_v55 = vmul.f32 1.442695, %v1274_v28 }
 0x1cc   : > { %v1189_v33 = vpop.xlane.xlu0 %1188  ;;  %v1367_v14 = vsel %vm1174_vm3, %v2461_v29, 0.0 }
 0x1cd   : > { %1779 = vpow2.f32 %v1309_v55  ;;  %v1275_v19 = vsub.f32 %v2266_v36, %v1189_v33  ;;  %1368 = vadd.xlane.f32.xlu0 %v1367_v14 }
 0x1cf   : > { %v2466_v45 = vpop.eup %1775  ;;  %v1311_v34 = vmul.f32 1.442695, %v1275_v19 }
 0x1d0   : > { %v1192_v24 = vpop.xlane.xlu1 %1191  ;;  %v1370_v35 = vsel %vm1174_vm3, %v2466_v45, 0.0 }
 0x1d1   : > { %1781 = vpow2.f32 %v1311_v34  ;;  %v1276_v30 = vsub.f32 %v2272_v42, %v1192_v24  ;;  %1371 = vadd.xlane.f32.xlu1 %v1370_v35 }
 0x1d3   : > { %v2471_v37 = vpop.eup %1777  ;;  %v1313_v38 = vmul.f32 1.442695, %v1276_v30 }
 0x1d4   : > { %v1195_v39 = vpop.xlane.xlu0 %1194  ;;  %v1373_v41 = vsel %vm1174_vm3, %v2471_v37, 0.0 }
 0x1d5   : > { %1783 = vpow2.f32 %v1313_v38  ;;  %v1277_v36 = vsub.f32 %v2280_v2, %v1195_v39  ;;  %1374 = vadd.xlane.f32.xlu0 %v1373_v41 }
 0x1d7   : > { %v2476_v50 = vpop.eup %1779  ;;  %v1315_v57 = vmul.f32 1.442695, %v1277_v36 }
 0x1d8   : > { %v1198_v0 = vpop.xlane.xlu1 %1197  ;;  %v1376_v49 = vsel %vm1174_vm3, %v2476_v50, 0.0 }
 0x1d9   : > { %1785 = vpow2.f32 %v1315_v57  ;;  %v1278_v42 = vsub.f32 %v2289_v22, %v1198_v0  ;;  %1377 = vadd.xlane.f32.xlu1 %v1376_v49 }
 0x1db   : > { %v2481_v9 = vpop.eup %1781  ;;  %v1317_v44 = vmul.f32 1.442695, %v1278_v42 }
 0x1dc   : > { %v1204_v54 = vpop.xlane.xlu1 %1203  ;;  %v1201_v5 = vpop.xlane.xlu0 %1200  ;;  %v1379_v2 = vsel %vm1174_vm3, %v2481_v9, 0.0 }
 0x1dd   : > { %1787 = vpow2.f32 %v1317_v44  ;;  %v1280_v4 = vsub.f32 %v2293_v25, %v1204_v54  ;;  %v1279_v8 = vsub.f32 %v2301_v31, %v1201_v5  ;;  %1380 = vadd.xlane.f32.xlu0 %v1379_v2 }
 0x1df   : > { %v2487_v52 = vpop.eup %1783  ;;  %v1321_v7 = vmul.f32 1.442695, %v1280_v4  ;;  %v1319_v17 = vmul.f32 1.442695, %v1279_v8 }
 0x1e0   : > { %v1210_v22 = vpop.xlane.xlu1 %1209  ;;  %v1207_v6 = vpop.xlane.xlu0 %1206  ;;  %v1382_v21 = vsel %vm1174_vm3, %v2487_v52, 0.0 }
 0x1e1   : > { %1789 = vpow2.f32 %v1321_v7  ;;  %v1282_v23 = vsub.f32 %v2306_v32, %v1210_v22  ;;  %v1281_v1 = vsub.f32 %v2315_v40, %v1207_v6  ;;  %1383 = vadd.xlane.f32.xlu1 %v1382_v21 }
 0x1e2   : > { %1791 = vpow2.f32 %v1319_v17 }
 0x1e3   : > { %v2493_v25 = vpop.eup %1785  ;;  %v1325_v31 = vmul.f32 1.442695, %v1282_v23  ;;  %v1323_v48 = vmul.f32 1.442695, %v1281_v1 }
 0x1e4   : > { %v1216_v11 = vpop.xlane.xlu1 %1215  ;;  %v1213_v26 = vpop.xlane.xlu0 %1212  ;;  %v1385_v27 = vsel %vm1174_vm3, %v2493_v25, 0.0 }
 0x1e5   : > { %1793 = vpow2.f32 %v1325_v31  ;;  %v1284_v28 = vsub.f32 %v2325_v10, %v1216_v11  ;;  %v1283_v55 = vsub.f32 %v2329_v15, %v1213_v26  ;;  %1386 = vadd.xlane.f32.xlu0 %v1385_v27 }
 0x1e6   : > { %1795 = vpow2.f32 %v1323_v48 }
 0x1e7   : > { %v2499_v32 = vpop.eup %1787  ;;  %v1329_v40 = vmul.f32 1.442695, %v1284_v28  ;;  %v1327_v33 = vmul.f32 1.442695, %v1283_v55 }
 0x1e8   : > { %v1222_v14 = vpop.xlane.xlu1 %1221  ;;  %v1219_v19 = vpop.xlane.xlu0 %1218  ;;  %v1388_v34 = vsel %vm1174_vm3, %v2499_v32, 0.0 }
 0x1e9   : > { %1797 = vpow2.f32 %v1329_v40  ;;  %v1286_v24 = vsub.f32 %v2339_v18, %v1222_v14  ;;  %v1285_v35 = vsub.f32 %v2343_v43, %v1219_v19  ;;  %1389 = vadd.xlane.f32.xlu1 %v1388_v34 }
 0x1ea   : > { %1799 = vpow2.f32 %v1327_v33 }
 0x1eb   : > { %v2505_v10 = vpop.eup %1789  ;;  %v1333_v15 = vmul.f32 1.442695, %v1286_v24  ;;  %v1331_v30 = vmul.f32 1.442695, %v1285_v35 }
 0x1ec   : > { %v2507_v38 = vpop.eup %1791  ;;  %v1228_v39 = vpop.xlane.xlu1 %1227  ;;  %v1394_v36 = vsel %vm1174_vm3, %v2505_v10, 0.0 }
 0x1ed   : > { %v1225_v41 = vpop.xlane.xlu0 %1224  ;;  %1801 = vpow2.f32 %v1333_v15  ;;  %v1288_v57 = vsub.f32 %v2347_v51, %v1228_v39  ;;  %1395 = vadd.xlane.f32.xlu1 %v1394_v36  ;;  %v1391_v43 = vsel %vm1174_vm3, %v2507_v38, 0.0 }
 0x1ee   : > { %v1287_v18 = vsub.f32 %v2357_v47, %v1225_v41  ;;  %1803 = vpow2.f32 %v1331_v30  ;;  %1392 = vadd.xlane.f32.xlu0 %v1391_v43 }
 0x1ef   : > { %v2515_v0 = vpop.eup %1793  ;;  %v1337_v49 = vmul.f32 1.442695, %v1288_v57 }
 0x1f0   : > { %v1335_v42 = vmul.f32 1.442695, %v1287_v18  ;;  %v2517_v44 = vpop.eup %1795  ;;  %v1234_v54 = vpop.xlane.xlu1 %1233  ;;  %v1400_v2 = vsel %vm1174_vm3, %v2515_v0, 0.0 }
 0x1f1   : > { %v1231_v5 = vpop.xlane.xlu0 %1230  ;;  %1805 = vpow2.f32 %v1337_v49  ;;  %v1290_v51 = vsub.f32 %v2362_v53, %v1234_v54  ;;  %1401 = vadd.xlane.f32.xlu1 %v1400_v2  ;;  %v1397_v4 = vsel %vm1174_vm3, %v2517_v44, 0.0 }
 0x1f2   : > { %v1289_v47 = vsub.f32 %v2371_v59, %v1231_v5  ;;  %1807 = vpow2.f32 %v1335_v42  ;;  %1398 = vadd.xlane.f32.xlu0 %v1397_v4 }
 0x1f3   : > { %v2525_v8 = vpop.eup %1797  ;;  %v1341_v7 = vmul.f32 1.442695, %v1290_v51 }
 0x1f4   : > { %v1339_v17 = vmul.f32 1.442695, %v1289_v47  ;;  %v2527_v22 = vpop.eup %1799  ;;  %v1240_v6 = vpop.xlane.xlu1 %1239  ;;  %v1406_v23 = vsel %vm1174_vm3, %v2525_v8, 0.0 }
 0x1f5   : > { %v1237_v21 = vpop.xlane.xlu0 %1236  ;;  %1809 = vpow2.f32 %v1341_v7  ;;  %v1292_v53 = vsub.f32 %v2381_v12, %v1240_v6  ;;  %1407 = vadd.xlane.f32.xlu1 %v1406_v23  ;;  %v1403_v1 = vsel %vm1174_vm3, %v2527_v22, 0.0 }
 0x1f6   : > { %v1291_v59 = vsub.f32 %v2385_v16, %v1237_v21  ;;  %1811 = vpow2.f32 %v1339_v17  ;;  %1404 = vadd.xlane.f32.xlu0 %v1403_v1 }
 0x1f7   : > { %v2535_v31 = vpop.eup %1801  ;;  %v1345_v48 = vmul.f32 1.442695, %v1292_v53 }
 0x1f8   : > { %v1343_v11 = vmul.f32 1.442695, %v1291_v59  ;;  %v2537_v26 = vpop.eup %1803  ;;  %v1246_v27 = vpop.xlane.xlu1 %1245  ;;  %v1412_v55 = vsel %vm1174_vm3, %v2535_v31, 0.0 }
 0x1f9   : > { %v1243_v28 = vpop.xlane.xlu0 %1242  ;;  %1813 = vpow2.f32 %v1345_v48  ;;  %v1294_v12 = vsub.f32 %v2395_v20, %v1246_v27  ;;  %1413 = vadd.xlane.f32.xlu1 %v1412_v55  ;;  %v1409_v40 = vsel %vm1174_vm3, %v2537_v26, 0.0 }
 0x1fa   : > { %v1293_v16 = vsub.f32 %v2399_v58, %v1243_v28  ;;  %1815 = vpow2.f32 %v1343_v11  ;;  %1410 = vadd.xlane.f32.xlu0 %v1409_v40 }
 0x1fb   : > { %v2545_v33 = vpop.eup %1805  ;;  %v1349_v14 = vmul.f32 1.442695, %v1294_v12 }
 0x1fc   : > { %v1347_v19 = vmul.f32 1.442695, %v1293_v16  ;;  %v2547_v34 = vpop.eup %1807  ;;  %v1252_v24 = vpop.xlane.xlu1 %1251  ;;  %v1418_v15 = vsel %vm1174_vm3, %v2545_v33, 0.0 }
 0x1fd   : > { %v1249_v35 = vpop.xlane.xlu0 %1248  ;;  %1817 = vpow2.f32 %v1349_v14  ;;  %v1296_v20 = vsub.f32 %v2403_v56, %v1252_v24  ;;  %1419 = vadd.xlane.f32.xlu1 %v1418_v15  ;;  %v1415_v30 = vsel %vm1174_vm3, %v2547_v34, 0.0 }
 0x1fe   : > { %v1295_v58 = vsub.f32 %v2413_v62, %v1249_v35  ;;  %1819 = vpow2.f32 %v1347_v19  ;;  %1416 = vadd.xlane.f32.xlu0 %v1415_v30 }
 0x1ff   : > { %v2555_v39 = vpop.eup %1809  ;;  %v1353_v41 = vmul.f32 1.442695, %v1296_v20 }
 0x200   : > { %v1351_v36 = vmul.f32 1.442695, %v1295_v58  ;;  %v2557_v57 = vpop.eup %1811  ;;  %v1258_v18 = vpop.xlane.xlu1 %1257  ;;  %v1424_v49 = vsel %vm1174_vm3, %v2555_v39, 0.0 }
 0x201   : > { %v1255_v43 = vpop.xlane.xlu0 %1254  ;;  %1821 = vpow2.f32 %v1353_v41  ;;  %v1298_v56 = vsub.f32 %v2418_v60, %v1258_v18  ;;  %1425 = vadd.xlane.f32.xlu1 %v1424_v49  ;;  %v1421_v42 = vsel %vm1174_vm3, %v2557_v57, 0.0 }
 0x202   : > { %v1297_v62 = vsub.f32 %v2427_v46, %v1255_v43  ;;  %1823 = vpow2.f32 %v1351_v36  ;;  %1422 = vadd.xlane.f32.xlu0 %v1421_v42 }
 0x203   : > { %v2565_v54 = vpop.eup %1813  ;;  %v1357_v5 = vmul.f32 1.442695, %v1298_v56 }
 0x204   : > { %v1355_v2 = vmul.f32 1.442695, %v1297_v62  ;;  %v2567_v51 = vpop.eup %1815  ;;  %v1264_v47 = vpop.xlane.xlu1 %1263  ;;  %v1430_v7 = vsel %vm1174_vm3, %v2565_v54, 0.0 }
 0x205   : > { %v1261_v4 = vpop.xlane.xlu0 %1260  ;;  %1825 = vpow2.f32 %v1357_v5  ;;  %v1300_v60 = vsub.f32 %v2432_v3, %v1264_v47  ;;  %1431 = vadd.xlane.f32.xlu1 %v1430_v7  ;;  %v1427_v17 = vsel %vm1174_vm3, %v2567_v51, 0.0 }
 0x206   : > { %v1299_v46 = vsub.f32 %v2440_v13, %v1261_v4  ;;  %1827 = vpow2.f32 %v1355_v2  ;;  %1428 = vadd.xlane.f32.xlu0 %v1427_v17 }
 0x207   : > { %v2575_v6 = vpop.eup %1817  ;;  %v1361_v21 = vmul.f32 1.442695, %v1300_v60 }
 0x208   : > { %v1359_v23 = vmul.f32 1.442695, %v1299_v46  ;;  %v2577_v53 = vpop.eup %1819  ;;  %v1270_v59 = vpop.xlane.xlu1 %1269  ;;  %v1436_v48 = vsel %vm1174_vm3, %v2575_v6, 0.0 }
 0x209   : > { %v1267_v1 = vpop.xlane.xlu0 %1266  ;;  %1829 = vpow2.f32 %v1361_v21  ;;  %v1302_v3 = vsub.f32 %v2443_v63, %v1270_v59  ;;  %1437 = vadd.xlane.f32.xlu1 %v1436_v48  ;;  %v1433_v11 = vsel %vm1174_vm3, %v2577_v53, 0.0 }
 0x20a   : > { %v1301_v13 = vsub.f32 %v2451_v61, %v1267_v1  ;;  %1831 = vpow2.f32 %v1359_v23  ;;  %1434 = vadd.xlane.f32.xlu0 %v1433_v11 }
 0x20b   : > { %v2585_v27 = vpop.eup %1821  ;;  %v1365_v28 = vmul.f32 1.442695, %v1302_v3 }
 0x20c   : > { %v1363_v55 = vmul.f32 1.442695, %v1301_v13  ;;  %v2587_v12 = vpop.eup %1823  ;;  %v1442_v16 = vsel %vm1174_vm3, %v2585_v27, 0.0 }
 0x20d   : > { %1833 = vpow2.f32 %v1365_v28  ;;  %1443 = vadd.xlane.f32.xlu1 %v1442_v16  ;;  %v1439_v63 = vsel %vm1174_vm3, %v2587_v12, 0.0 }
 0x20e   : > { %1835 = vpow2.f32 %v1363_v55  ;;  %1440 = vadd.xlane.f32.xlu0 %v1439_v63 }
 0x20f   : > { %v2593_v61 = vpop.eup %1825 }
 0x210   : > { %v2595_v40 = vpop.eup %1827  ;;  %v1448_v14 = vsel %vm1174_vm3, %v2593_v61, 0.0 }
 0x211   : > { %1449 = vadd.xlane.f32.xlu1 %v1448_v14  ;;  %v1445_v19 = vsel %vm1174_vm3, %v2595_v40, 0.0 }
 0x212   : > { %1446 = vadd.xlane.f32.xlu0 %v1445_v19 }
 0x213   : > { %v2601_v24 = vpop.eup %1829 }
 0x214   : > { %v2603_v35 = vpop.eup %1831  ;;  %v1454_v15 = vsel %vm1174_vm3, %v2601_v24, 0.0 }
 0x215   : > { %1455 = vadd.xlane.f32.xlu1 %v1454_v15  ;;  %v1451_v20 = vsel %vm1174_vm3, %v2603_v35, 0.0 }
 0x216   : > { %1452 = vadd.xlane.f32.xlu0 %v1451_v20 }
 0x217   : > { %v2609_v58 = vpop.eup %1833 }
 0x218   : > { %v2611_v30 = vpop.eup %1835  ;;  %v1460_v41 = vsel %vm1174_vm3, %v2609_v58, 0.0 }
 0x219   : > { %1461 = vadd.xlane.f32.xlu1 %v1460_v41  ;;  %v1457_v36 = vsel %vm1174_vm3, %v2611_v30, 0.0 }
 0x21a   : > { %1458 = vadd.xlane.f32.xlu0 %v1457_v36 }
 0x25a   : > { %v1369_v18 = vpop.xlane.xlu0 %1368 }
 0x25b   : > { %1837 = vrcp.f32 %v1369_v18 }
 0x25e   : > { %v1372_v43 = vpop.xlane.xlu1 %1371 }
 0x25f   : > { %1839 = vrcp.f32 %v1372_v43 }
 0x262   : > { %v1375_v49 = vpop.xlane.xlu0 %1374 }
 0x263   : > { %1841 = vrcp.f32 %v1375_v49 }
 0x265   : > { %v1838_v56 = vpop.eup %1837 }
 0x266   : > { %v1464_v62 = vmul.f32 %v1838_v56, %v2461_v29  ;;  %v1378_v42 = vpop.xlane.xlu1 %1377 }
 0x267   : > { %1843 = vrcp.f32 %v1378_v42 }
 0x268   : > { %1527 = vst.msk [vmem:[%s2621_s22] sm:$0xff] %vm1174_vm3, %v1464_v62 }
 0x269   : > { %v1840_v5 = vpop.eup %1839 }
 0x26a   : > { %v1466_v2 = vmul.f32 %v1840_v5, %v2466_v45  ;;  %v1381_v47 = vpop.xlane.xlu0 %1380 }
 0x26b   : > { %1845 = vrcp.f32 %v1381_v47 }
 0x26c   : > { %1528 = vst.msk [vmem:[%s2621_s22 + $0x8] sm:$0xff] %vm1174_vm3, %v1466_v2 }
 0x26d   : > { %v1842_v4 = vpop.eup %1841 }
 0x26e   : > { %v1468_v7 = vmul.f32 %v1842_v4, %v2471_v37  ;;  %v1384_v60 = vpop.xlane.xlu1 %1383 }
 0x26f   : > { %1847 = vrcp.f32 %v1384_v60 }
 0x270   : > { %1529 = vst.msk [vmem:[%s2621_s22 + $0x10] sm:$0xff] %vm1174_vm3, %v1468_v7 }
 0x271   : > { %v1844_v29 = vpop.eup %1843 }
 0x272   : > { %v1470_v46 = vmul.f32 %v1844_v29, %v2476_v50  ;;  %v1387_v17 = vpop.xlane.xlu0 %1386 }
 0x273   : > { %1849 = vrcp.f32 %v1387_v17 }
 0x274   : > { %1530 = vst.msk [vmem:[%s2621_s22 + $0x18] sm:$0xff] %vm1174_vm3, %v1470_v46 }
 0x275   : > { %v1846_v45 = vpop.eup %1845 }
 0x276   : > { %v1472_v21 = vmul.f32 %v1846_v45, %v2481_v9  ;;  %v1390_v23 = vpop.xlane.xlu1 %1389 }
 0x277   : > { %1851 = vrcp.f32 %v1390_v23 }
 0x278   : > { %1531 = vst.msk [vmem:[%s2621_s22 + $0x20] sm:$0xff] %vm1174_vm3, %v1472_v21 }
 0x279   : > { %v1848_v37 = vpop.eup %1847 }
 0x27a   : > { %v1474_v59 = vmul.f32 %v1848_v37, %v2487_v52  ;;  %v1396_v1 = vpop.xlane.xlu1 %1395 }
 0x27b   : > { %1853 = vrcp.f32 %v1396_v1  ;;  %v1393_v48 = vpop.xlane.xlu0 %1392 }
 0x27c   : > { %1532 = vst.msk [vmem:[%s2621_s22 + $0x28] sm:$0xff] %vm1174_vm3, %v1474_v59  ;;  %1855 = vrcp.f32 %v1393_v48 }
 0x27d   : > { %v1850_v50 = vpop.eup %1849 }
 0x27e   : > { %v1476_v3 = vmul.f32 %v1850_v50, %v2493_v25  ;;  %v1402_v13 = vpop.xlane.xlu1 %1401 }
 0x27f   : > { %1857 = vrcp.f32 %v1402_v13  ;;  %v1399_v9 = vpop.xlane.xlu0 %1398 }
 0x280   : > { %1533 = vst.msk [vmem:[%s2621_s22 + $0x30] sm:$0xff] %vm1174_vm3, %v1476_v3  ;;  %1859 = vrcp.f32 %v1399_v9 }
 0x281   : > { %v1852_v11 = vpop.eup %1851 }
 0x282   : > { %v1478_v52 = vmul.f32 %v1852_v11, %v2499_v32  ;;  %v1408_v28 = vpop.xlane.xlu1 %1407 }
 0x283   : > { %1861 = vrcp.f32 %v1408_v28  ;;  %v1405_v55 = vpop.xlane.xlu0 %1404 }
 0x284   : > { %1534 = vst.msk [vmem:[%s2621_s22 + $0x38] sm:$0xff] %vm1174_vm3, %v1478_v52  ;;  %1863 = vrcp.f32 %v1405_v55 }
 0x285   : > { %v1854_v16 = vpop.eup %1853 }
 0x286   : > { %v1856_v63 = vpop.eup %1855  ;;  %v1482_v25 = vmul.f32 %v1854_v16, %v2505_v10  ;;  %v1414_v14 = vpop.xlane.xlu1 %1413 }
 0x287   : > { %v1480_v19 = vmul.f32 %v1856_v63, %v2507_v38  ;;  %1865 = vrcp.f32 %v1414_v14  ;;  %v1411_v15 = vpop.xlane.xlu0 %1410 }
 0x288   : > { %1536 = vst.msk [vmem:[%s2621_s22 + $0x48] sm:$0xff] %vm1174_vm3, %v1482_v25  ;;  %1867 = vrcp.f32 %v1411_v15 }
 0x289   : > { %v1858_v32 = vpop.eup %1857  ;;  %1535 = vst.msk [vmem:[%s2621_s22 + $0x40] sm:$0xff] %vm1174_vm3, %v1480_v19 }
 0x28a   : > { %v1860_v20 = vpop.eup %1859  ;;  %v1486_v41 = vmul.f32 %v1858_v32, %v2515_v0  ;;  %v1420_v36 = vpop.xlane.xlu1 %1419 }
 0x28b   : > { %v1484_v18 = vmul.f32 %v1860_v20, %v2517_v44  ;;  %1869 = vrcp.f32 %v1420_v36  ;;  %v1417_v10 = vpop.xlane.xlu0 %1416 }
 0x28c   : > { %1538 = vst.msk [vmem:[%s2621_s22 + $0x58] sm:$0xff] %vm1174_vm3, %v1486_v41  ;;  %1871 = vrcp.f32 %v1417_v10 }
 0x28d   : > { %v1862_v38 = vpop.eup %1861  ;;  %1537 = vst.msk [vmem:[%s2621_s22 + $0x50] sm:$0xff] %vm1174_vm3, %v1484_v18 }
 0x28e   : > { %v1864_v43 = vpop.eup %1863  ;;  %v1490_v49 = vmul.f32 %v1862_v38, %v2525_v8  ;;  %v1426_v56 = vpop.xlane.xlu1 %1425 }
 0x28f   : > { %v1488_v62 = vmul.f32 %v1864_v43, %v2527_v22  ;;  %1873 = vrcp.f32 %v1426_v56  ;;  %v1423_v0 = vpop.xlane.xlu0 %1422 }
 0x290   : > { %1540 = vst.msk [vmem:[%s2621_s22 + $0x68] sm:$0xff] %vm1174_vm3, %v1490_v49  ;;  %1875 = vrcp.f32 %v1423_v0 }
 0x291   : > { %v1866_v44 = vpop.eup %1865  ;;  %1539 = vst.msk [vmem:[%s2621_s22 + $0x60] sm:$0xff] %vm1174_vm3, %v1488_v62 }
 0x292   : > { %v1868_v42 = vpop.eup %1867  ;;  %v1494_v5 = vmul.f32 %v1866_v44, %v2535_v31  ;;  %v1432_v2 = vpop.xlane.xlu1 %1431 }
 0x293   : > { %v1492_v47 = vmul.f32 %v1868_v42, %v2537_v26  ;;  %1877 = vrcp.f32 %v1432_v2  ;;  %v1429_v8 = vpop.xlane.xlu0 %1428 }
 0x294   : > { %1542 = vst.msk [vmem:[%s2621_s22 + $0x78] sm:$0xff] %vm1174_vm3, %v1494_v5  ;;  %1879 = vrcp.f32 %v1429_v8 }
 0x295   : > { %v1870_v22 = vpop.eup %1869  ;;  %1541 = vst.msk [vmem:[%s2621_s22 + $0x70] sm:$0xff] %vm1174_vm3, %v1492_v47 }
 0x296   : > { %v1872_v4 = vpop.eup %1871  ;;  %v1498_v7 = vmul.f32 %v1870_v22, %v2545_v33  ;;  %v1438_v60 = vpop.xlane.xlu1 %1437 }
 0x297   : > { %v1496_v29 = vmul.f32 %v1872_v4, %v2547_v34  ;;  %1881 = vrcp.f32 %v1438_v60  ;;  %v1435_v31 = vpop.xlane.xlu0 %1434 }
 0x298   : > { %1544 = vst.msk [vmem:[%s2621_s22 + $0x88] sm:$0xff] %vm1174_vm3, %v1498_v7  ;;  %1883 = vrcp.f32 %v1435_v31 }
 0x299   : > { %v1874_v26 = vpop.eup %1873  ;;  %1543 = vst.msk [vmem:[%s2621_s22 + $0x80] sm:$0xff] %vm1174_vm3, %v1496_v29 }
 0x29a   : > { %v1876_v46 = vpop.eup %1875  ;;  %v1502_v17 = vmul.f32 %v1874_v26, %v2555_v39  ;;  %v1444_v45 = vpop.xlane.xlu1 %1443 }
 0x29b   : > { %v1500_v21 = vmul.f32 %v1876_v46, %v2557_v57  ;;  %1885 = vrcp.f32 %v1444_v45  ;;  %v1441_v33 = vpop.xlane.xlu0 %1440 }
 0x29c   : > { %1546 = vst.msk [vmem:[%s2621_s22 + $0x98] sm:$0xff] %vm1174_vm3, %v1502_v17  ;;  %1887 = vrcp.f32 %v1441_v33 }
 0x29d   : > { %v1878_v34 = vpop.eup %1877  ;;  %1545 = vst.msk [vmem:[%s2621_s22 + $0x90] sm:$0xff] %vm1174_vm3, %v1500_v21 }
 0x29e   : > { %v1880_v23 = vpop.eup %1879  ;;  %v1506_v37 = vmul.f32 %v1878_v34, %v2565_v54  ;;  %v1450_v59 = vpop.xlane.xlu1 %1449 }
 0x29f   : > { %v1504_v1 = vmul.f32 %v1880_v23, %v2567_v51  ;;  %1889 = vrcp.f32 %v1450_v59  ;;  %v1447_v39 = vpop.xlane.xlu0 %1446 }
 0x2a0   : > { %1548 = vst.msk [vmem:[%s2621_s22 + $0xa8] sm:$0xff] %vm1174_vm3, %v1506_v37  ;;  %1891 = vrcp.f32 %v1447_v39 }
 0x2a1   : > { %v1882_v57 = vpop.eup %1881  ;;  %1547 = vst.msk [vmem:[%s2621_s22 + $0xa0] sm:$0xff] %vm1174_vm3, %v1504_v1 }
 0x2a2   : > { %v1884_v48 = vpop.eup %1883  ;;  %v1510_v50 = vmul.f32 %v1882_v57, %v2575_v6  ;;  %v1456_v3 = vpop.xlane.xlu1 %1455 }
 0x2a3   : > { %v1508_v13 = vmul.f32 %v1884_v48, %v2577_v53  ;;  %1893 = vrcp.f32 %v1456_v3  ;;  %v1453_v54 = vpop.xlane.xlu0 %1452 }
 0x2a4   : > { %1550 = vst.msk [vmem:[%s2621_s22 + $0xb8] sm:$0xff] %vm1174_vm3, %v1510_v50  ;;  %1895 = vrcp.f32 %v1453_v54 }
 0x2a5   : > { %v1886_v51 = vpop.eup %1885  ;;  %1549 = vst.msk [vmem:[%s2621_s22 + $0xb0] sm:$0xff] %vm1174_vm3, %v1508_v13 }
 0x2a6   : > { %v1888_v9 = vpop.eup %1887  ;;  %v1514_v11 = vmul.f32 %v1886_v51, %v2585_v27  ;;  %v1462_v52 = vpop.xlane.xlu1 %1461 }
 0x2a7   : > { %v1512_v6 = vmul.f32 %v1888_v9, %v2587_v12  ;;  %1897 = vrcp.f32 %v1462_v52  ;;  %v1459_v53 = vpop.xlane.xlu0 %1458 }
 0x2a8   : > { %1552 = vst.msk [vmem:[%s2621_s22 + $0xc8] sm:$0xff] %vm1174_vm3, %v1514_v11  ;;  %1899 = vrcp.f32 %v1459_v53 }
 0x2a9   : > { %v1890_v28 = vpop.eup %1889  ;;  %1551 = vst.msk [vmem:[%s2621_s22 + $0xc0] sm:$0xff] %vm1174_vm3, %v1512_v6 }
 0x2aa   : > { %v1892_v55 = vpop.eup %1891  ;;  %v1518_v16 = vmul.f32 %v1890_v28, %v2593_v61 }
 0x2ab   : > { %v1516_v27 = vmul.f32 %v1892_v55, %v2595_v40 }
 0x2ac   : > { %1554 = vst.msk [vmem:[%s2621_s22 + $0xd8] sm:$0xff] %vm1174_vm3, %v1518_v16 }
 0x2ad   : > { %v1894_v12 = vpop.eup %1893  ;;  %1553 = vst.msk [vmem:[%s2621_s22 + $0xd0] sm:$0xff] %vm1174_vm3, %v1516_v27 }
 0x2ae   : > { %v1896_v63 = vpop.eup %1895  ;;  %v1522_v25 = vmul.f32 %v1894_v12, %v2601_v24 }
 0x2af   : > { %v1520_v14 = vmul.f32 %v1896_v63, %v2603_v35 }
 0x2b0   : > { %1556 = vst.msk [vmem:[%s2621_s22 + $0xe8] sm:$0xff] %vm1174_vm3, %v1522_v25 }
 0x2b1   : > { %v1898_v19 = vpop.eup %1897  ;;  %1555 = vst.msk [vmem:[%s2621_s22 + $0xe0] sm:$0xff] %vm1174_vm3, %v1520_v14 }
 0x2b2   : > { %v1900_v15 = vpop.eup %1899  ;;  %v1526_v61 = vmul.f32 %v1898_v19, %v2609_v58 }
 0x2b3   : > { %v1524_v40 = vmul.f32 %v1900_v15, %v2611_v30 }
 0x2b4   : > { %1558 = vst.msk [vmem:[%s2621_s22 + $0xf8] sm:$0xff] %vm1174_vm3, %v1526_v61 }
 0x2b5   : > { %1557 = vst.msk [vmem:[%s2621_s22 + $0xf0] sm:$0xff] %vm1174_vm3, %v1524_v40 }
 0x2b6 PF: > { %s19_s26 = sadd.s32 1, %s1907_s26  }
 0x2b7   : > { %p16_p4 = scmp.ge.s32.totalorder %s19_s26, 4  }
 0x2b9   :  { %18 = sbr.rel (!%p16_p4) target bundleno = 3 (0x3), region = 81 }

</bundles_post_ra>
